<compile_context>
chip_gen: v5e
topology: v5e:2x2
jax: 0.10.0
libtpu: 0.0.40
codegen_flags: <defaults>
</compile_context>

<pallas_src>
import functools

import numpy as np
import jax
import jax.numpy as jnp
from jax.experimental import pallas as pl
from jax.experimental.pallas import tpu as pltpu


_VMEM = pltpu.MemorySpace.VMEM
GROUPS = 8


# ----------------------------------------------------------------------------
# In-kernel helpers (operate on values / refs already resident in VMEM)
# ----------------------------------------------------------------------------
def _gn_relu(x, gamma, beta, pmat, groups=GROUPS, eps=1e-5, relu=True):
    """GroupNorm(+ReLU) on a per-sample (C, H*W) tile.

    gamma/beta: (C, 1).  pmat: (C, C) 0/1 block-diagonal group indicator used to
    broadcast per-group statistics back to per-channel rows with one tiny matmul.
    gamma is folded into the per-channel scale so the full tile sees a single
    multiply-add instead of two multiplies + add.
    """
    c, hw = x.shape
    inv_cnt = 1.0 / float((c // groups) * hw)
    s1 = jnp.sum(x, axis=1, keepdims=True)                                   # (C, 1)
    mean = jnp.dot(pmat, s1, preferred_element_type=jnp.float32) * inv_cnt   # (C, 1)
    d = x - mean
    s2 = jnp.sum(d * d, axis=1, keepdims=True)
    var = jnp.dot(pmat, s2, preferred_element_type=jnp.float32) * inv_cnt
    scale = jax.lax.rsqrt(var + eps) * gamma                                 # (C, 1)
    y = d * scale + beta
    if relu:
        y = jnp.maximum(y, 0.0)
    return y


def _lane_roll(x, shift, hw):
    """Roll along the lane (pixel) axis.  Uses the XLU rotate when the lane extent is
    vreg-aligned; falls back to jnp.roll (slice+concat) on tiny unaligned tiles."""
    shift = shift % hw
    if shift == 0:
        return x
    if hw % 128 == 0:
        return pltpu.roll(x, shift, axis=1)
    return jnp.roll(x, shift, axis=1)


def _conv3x3(x, w_ref, mask_ref, W):
    """3x3 conv (padding=1) on a per-sample (Cin, H*W) tile as ONE stacked-K matmul.

    w_ref: (Cout, 9*Cin) bf16 (tap-major K ordering); mask_ref: (9, 1, H*W) f32 masks.
    The 9 shifted/masked taps are stacked along K (f32, sublane-aligned), cast to bf16
    once, and contracted in a single big-K MXU matmul (f32 accumulation).
    """
    cin, hw = x.shape
    taps = []
    for kh in range(3):
        for kw in range(3):
            t = kh * 3 + kw
            delta = (kh - 1) * W + (kw - 1)
            if delta == 0:
                taps.append(x)
            else:
                taps.append(_lane_roll(x, -delta, hw) * mask_ref[t])
    stacked = jnp.concatenate(taps, axis=0).astype(jnp.bfloat16)             # (9*Cin, HW)
    return jnp.dot(w_ref[...], stacked, preferred_element_type=jnp.float32)  # (Cout, HW)


def _conv1x1(x, w, b=None):
    """1x1 conv on a (Cin, M) tile: (Cout, M) = W @ X (lane-dense output, bf16 MXU)."""
    y = jnp.dot(w, x.astype(w.dtype), preferred_element_type=jnp.float32)
    if b is not None:
        y = y + b
    return y


def _bilinear_up(y, u_ref):
    """x2 bilinear upsample as a single (C, HWin) @ (HWin, 4*HWin) bf16 matmul."""
    return jnp.dot(y.astype(jnp.bfloat16), u_ref[...],
                   preferred_element_type=jnp.float32)


# ----------------------------------------------------------------------------
# Fused Pallas kernels
# ----------------------------------------------------------------------------
def _down_sample_kernel(x_ref, pin_ref, g1_ref, b1_ref, w_ref, bias_ref, mask_ref,
                        pemb_ref, g2_ref, b2_ref, o_ref, *, W):
    x = _gn_relu(x_ref[...], g1_ref[...], b1_ref[...], pin_ref[...])
    y = _conv3x3(x, w_ref, mask_ref, W) + bias_ref[...]
    o_ref[...] = _gn_relu(y, g2_ref[...], b2_ref[...], pemb_ref[...])


def _bottleneck_kernel(x_ref, noise_ref, wm_ref, bm_ref, ws_ref, bs_ref,
                       wg_ref, bg_ref, z_ref, reg_ref):
    x = x_ref[...]
    mean = jnp.dot(x, wm_ref[...], preferred_element_type=jnp.float32) + bm_ref[...]
    s = jnp.dot(x, ws_ref[...], preferred_element_type=jnp.float32) + bs_ref[...]
    # numerically stable softplus
    std = jnp.maximum(s, 0.0) + jnp.log1p(jnp.exp(-jnp.abs(s)))
    e = mean * mean + std * std - jnp.log(1e-08 + std * std) - 1.0
    reg_ref[...] = 0.5 * jnp.sum(jnp.sum(e, axis=1, keepdims=True),
                                 axis=0, keepdims=True) / float(e.size)
    z = mean + std * noise_ref[...]
    z_ref[...] = jnp.maximum(
        jnp.dot(z, wg_ref[...], preferred_element_type=jnp.float32) + bg_ref[...], 0.0)


def _prefix_kernel(z_ref, w_ref, bias_ref, u_ref, pm_ref, g_ref, b_ref, o_ref):
    y = _conv1x1(z_ref[...], w_ref[...], bias_ref[...])                      # (Cout, HWin)
    up = _bilinear_up(y, u_ref)                                              # (Cout, HWout)
    o_ref[...] = _gn_relu(up, g_ref[...], b_ref[...], pm_ref[...])


def _upres_kernel(z_ref, wup_ref, u_ref, pm_ref, g1_ref, b1_ref, w1_ref,
                  g2_ref, b2_ref, w2_ref, mask_ref, o_ref, *, W2):
    zu = _conv1x1(z_ref[...], wup_ref[...])                                  # 1x1, no bias
    zu = _bilinear_up(zu, u_ref)                                             # bilinear x2
    h = _gn_relu(zu, g1_ref[...], b1_ref[...], pm_ref[...])
    h = _conv3x3(h, w1_ref, mask_ref, W2)
    h = _gn_relu(h, g2_ref[...], b2_ref[...], pm_ref[...])
    h = _conv3x3(h, w2_ref, mask_ref, W2)
    o_ref[...] = zu + h                                                      # residual add


def _head_kernel(z_ref, raw_ref, pm_ref, g_ref, b_ref, w_ref, bias_ref, o_ref):
    h = _gn_relu(z_ref[...], g_ref[...], b_ref[...], pm_ref[...])
    pseudo = _conv1x1(h, w_ref[...], bias_ref[...])                          # (Craw, HW)
    d = raw_ref[...] - pseudo
    o_ref[...] = jnp.sum(jnp.sum(d * d, axis=1, keepdims=True), axis=0, keepdims=True)


# ----------------------------------------------------------------------------
# Host-side constant builders (numpy, trace-time, tiny)
# ----------------------------------------------------------------------------
def _np_group_mat(c, groups=GROUPS):
    cg = c // groups
    return np.kron(np.eye(groups, dtype=np.float32), np.ones((cg, cg), np.float32))


def _np_upsample_1d(n_in):
    """Bilinear x2, align_corners=True (matches nn.UpsamplingBilinear2d)."""
    n_out = 2 * n_in
    if n_in == 1:
        return np.ones((n_out, n_in), np.float32)
    src = np.arange(n_out, dtype=np.float64) * (n_in - 1) / (n_out - 1)
    x0 = np.floor(src).astype(np.int64)
    x1 = np.minimum(x0 + 1, n_in - 1)
    w1 = (src - x0).astype(np.float32)
    a = np.zeros((n_out, n_in), np.float32)
    a[np.arange(n_out), x0] += 1.0 - w1
    a[np.arange(n_out), x1] += w1
    return a


def _np_upsample_2d(h, w):
    """(H*W, 2H*2W) matrix so that out_flat = in_flat @ U does the full 2-D bilinear x2."""
    ah = _np_upsample_1d(h)            # (2h, h)
    aw = _np_upsample_1d(w)            # (2w, w)
    return np.einsum("pi,qj->ijpq", ah, aw).reshape(h * w, 4 * h * w).astype(np.float32)


def _np_conv3x3_masks(h, w):
    """(9, 1, H*W) validity masks for the 9 taps of a padding=1 3x3 conv."""
    hh, ww = np.meshgrid(np.arange(h), np.arange(w), indexing="ij")
    hh = hh.reshape(-1)
    ww = ww.reshape(-1)
    m = np.zeros((9, 1, h * w), np.float32)
    for kh in range(3):
        for kw in range(3):
            dh, dw = kh - 1, kw - 1
            valid = (hh + dh >= 0) & (hh + dh < h) & (ww + dw >= 0) & (ww + dw < w)
            m[kh * 3 + kw, 0] = valid.astype(np.float32)
    return m


def _conv_w9(w_oihw):
    """PyTorch (Cout, Cin, 3, 3) -> (Cout, 9*Cin) bf16, tap-major K ordering
    (matches the stacking order of _conv3x3)."""
    cout, cin = w_oihw.shape[0], w_oihw.shape[1]
    return jnp.transpose(w_oihw, (0, 2, 3, 1)).reshape(cout, 9 * cin).astype(jnp.bfloat16)


def _const_index_map(ndim):
    def _im(n):
        return (0,) * ndim
    return _im


def _full_spec(a):
    return pl.BlockSpec(a.shape, _const_index_map(a.ndim))


def _sample_spec(c, hw):
    return pl.BlockSpec((None, c, hw), lambda n: (n, 0, 0))


def _stage_params(*arrays, out_bytes=0):
    """Per-stage compiler params: parallel batch grid + explicit scoped-VMEM limit
    sized from the operands (clamped to v7x's 64 MiB physical ceiling)."""
    nbytes = out_bytes + sum(int(np.prod(a.shape)) * a.dtype.itemsize for a in arrays)
    limit = int(min(max(3 * nbytes + (8 << 20), 16 << 20), 64 << 20))
    return pltpu.CompilerParams(dimension_semantics=("parallel",),
                                vmem_limit_bytes=limit)


# ----------------------------------------------------------------------------
# Stage wrappers (one pallas_call each)
# ----------------------------------------------------------------------------
def _down_sample(x, p, H, W):
    n, c, hw = x.shape
    ce = p["ds_conv_w"].shape[0]
    pin = jnp.asarray(_np_group_mat(c))
    pemb = jnp.asarray(_np_group_mat(ce))
    g1 = p["ds_gn1_g"].reshape(c, 1).astype(jnp.float32)
    b1 = p["ds_gn1_b"].reshape(c, 1).astype(jnp.float32)
    w9 = _conv_w9(p["ds_conv_w"])
    bias = p["ds_conv_b"].reshape(ce, 1).astype(jnp.float32)
    mask = jnp.asarray(_np_conv3x3_masks(H, W))
    g2 = p["ds_gn2_g"].reshape(ce, 1).astype(jnp.float32)
    b2 = p["ds_gn2_b"].reshape(ce, 1).astype(jnp.float32)
    args = (x, pin, g1, b1, w9, bias, mask, pemb, g2, b2)
    return pl.pallas_call(
        functools.partial(_down_sample_kernel, W=W),
        grid=(n,),
        in_specs=[_sample_spec(c, hw)] + [_full_spec(a) for a in args[1:]],
        out_specs=_sample_spec(ce, hw),
        out_shape=jax.ShapeDtypeStruct((n, ce, hw), jnp.float32),
        compiler_params=_stage_params(*args, out_bytes=n * ce * hw * 4),
    )(*args)


def _bottleneck(flat_x, noise, p):
    n, e = flat_x.shape
    l = p["mean_w"].shape[0]
    wm = jnp.transpose(p["mean_w"]).astype(jnp.float32)   # (E, L)
    bm = p["mean_b"].reshape(1, l).astype(jnp.float32)
    ws = jnp.transpose(p["std_w"]).astype(jnp.float32)
    bs = p["std_b"].reshape(1, l).astype(jnp.float32)
    wg = jnp.transpose(p["gen_w"]).astype(jnp.float32)    # (L, E)
    bg = p["gen_b"].reshape(1, e).astype(jnp.float32)
    args = (flat_x, noise, wm, bm, ws, bs, wg, bg)
    nbytes = sum(int(np.prod(a.shape)) * a.dtype.itemsize for a in args)
    return pl.pallas_call(
        _bottleneck_kernel,
        out_shape=(jax.ShapeDtypeStruct((n, e), jnp.float32),
                   jax.ShapeDtypeStruct((1, 1), jnp.float32)),
        in_specs=[pl.BlockSpec(memory_space=_VMEM)] * 8,
        out_specs=(pl.BlockSpec(memory_space=_VMEM),
                   pl.BlockSpec(memory_space=_VMEM)),
        compiler_params=pltpu.CompilerParams(
            vmem_limit_bytes=int(min(max(3 * nbytes + (8 << 20), 16 << 20), 64 << 20))),
    )(*args)


def _prefix_up_sample(z, p, H, W):
    n, c, hw = z.shape
    cout = p["pre_conv_w"].shape[0]
    w = p["pre_conv_w"].reshape(cout, c).astype(jnp.bfloat16)
    bias = p["pre_conv_b"].reshape(cout, 1).astype(jnp.float32)
    u = jnp.asarray(_np_upsample_2d(H, W)).astype(jnp.bfloat16)      # bf16 MXU operand
    pm = jnp.asarray(_np_group_mat(cout))
    g = p["pre_gn_g"].reshape(cout, 1).astype(jnp.float32)
    b = p["pre_gn_b"].reshape(cout, 1).astype(jnp.float32)
    hw2 = 4 * hw
    args = (z, w, bias, u, pm, g, b)
    return pl.pallas_call(
        _prefix_kernel,
        grid=(n,),
        in_specs=[_sample_spec(c, hw)] + [_full_spec(a) for a in args[1:]],
        out_specs=_sample_spec(cout, hw2),
        out_shape=jax.ShapeDtypeStruct((n, cout, hw2), jnp.float32),
        compiler_params=_stage_params(*args, out_bytes=n * cout * hw2 * 4),
    )(*args)


def _up_res_block(z, blk, H, W):
    n, cin, hw = z.shape
    cout = blk["up_w"].shape[0]
    wup = blk["up_w"].reshape(cout, cin).astype(jnp.bfloat16)
    u = jnp.asarray(_np_upsample_2d(H, W)).astype(jnp.bfloat16)      # bf16 MXU operand
    pm = jnp.asarray(_np_group_mat(cout))
    g1 = blk["gn1_g"].reshape(cout, 1).astype(jnp.float32)
    b1 = blk["gn1_b"].reshape(cout, 1).astype(jnp.float32)
    w1 = _conv_w9(blk["c1_w"])
    g2 = blk["gn2_g"].reshape(cout, 1).astype(jnp.float32)
    b2 = blk["gn2_b"].reshape(cout, 1).astype(jnp.float32)
    w2 = _conv_w9(blk["c2_w"])
    H2, W2 = 2 * H, 2 * W
    mask = jnp.asarray(_np_conv3x3_masks(H2, W2))
    hw2 = H2 * W2
    args = (z, wup, u, pm, g1, b1, w1, g2, b2, w2, mask)
    return pl.pallas_call(
        functools.partial(_upres_kernel, W2=W2),
        grid=(n,),
        in_specs=[_sample_spec(cin, hw)] + [_full_spec(a) for a in args[1:]],
        out_specs=_sample_spec(cout, hw2),
        out_shape=jax.ShapeDtypeStruct((n, cout, hw2), jnp.float32),
        compiler_params=_stage_params(*args, out_bytes=n * cout * hw2 * 4),
    )(*args)


def _channel_align_mse(z, raw, p):
    n, c, hw = z.shape
    craw = p["ca_conv_w"].shape[0]
    hw_raw = raw.shape[2]
    assert hw_raw == hw, "decoder output resolution must match the raw image"
    pm = jnp.asarray(_np_group_mat(c))
    g = p["ca_gn_g"].reshape(c, 1).astype(jnp.float32)
    b = p["ca_gn_b"].reshape(c, 1).astype(jnp.float32)
    w = p["ca_conv_w"].reshape(craw, c).astype(jnp.bfloat16)
    bias = p["ca_conv_b"].reshape(craw, 1).astype(jnp.float32)
    args = (z, raw, pm, g, b, w, bias)
    sse = pl.pallas_call(
        _head_kernel,
        grid=(n,),
        in_specs=[_sample_spec(c, hw), _sample_spec(craw, hw)]
                 + [_full_spec(a) for a in args[2:]],
        out_specs=pl.BlockSpec((None, 1, 1), lambda i: (i, 0, 0)),
        out_shape=jax.ShapeDtypeStruct((n, 1, 1), jnp.float32),
        compiler_params=_stage_params(*args, out_bytes=n * 4),
    )(*args)
    return jnp.sum(sse) / float(n * craw * hw)


# ----------------------------------------------------------------------------
# VAEDecoder forward (semantics of the PyTorch module, estimate_std=True)
# ----------------------------------------------------------------------------
def vae_decoder_forward(params, encoded_x_nchw, raw_image_nchw, noise):
    p = params
    n, cin, he, we = encoded_x_nchw.shape
    _, craw, hr, wr = raw_image_nchw.shape

    # activations are carried as (N, C, H*W) -> all inter-kernel reshapes are contiguous
    x = encoded_x_nchw.reshape(n, cin, he * we).astype(jnp.float32)

    # down_sample: GN(8)+ReLU + Conv3x3(+bias) + GN(8)+ReLU  (one fused kernel)
    x = _down_sample(x, p, he, we)                       # (N, Cemb, He*We)
    ce = x.shape[1]

    # bottleneck: mean/std Linear + softplus + reg_loss + reparam + gen Linear + ReLU
    flat_x = x.reshape(n, ce * he * we)                  # (C, H, W)-order flatten (torch .view)
    flat_z, reg = _bottleneck(flat_x, noise.astype(jnp.float32), p)
    z = flat_z.reshape(n, ce, he * we)

    # prefix_up_sample: Conv1x1 + bilinear x2 + GN(8) + ReLU  (one fused kernel)
    h, w = he, we
    z = _prefix_up_sample(z, p, h, w)
    h, w = 2 * h, 2 * w

    # decoder_layer: 3 UpResBlocks, each one fused kernel
    for blk in p["blocks"]:
        z = _up_res_block(z, blk, h, w)
        h, w = 2 * h, 2 * w

    # channel_aligner (GN+ReLU+Conv1x1) + MSE, fused
    raw = raw_image_nchw.reshape(n, craw, hr * wr).astype(jnp.float32)
    img = _channel_align_mse(z, raw, p)

    return reg[0, 0] + img


# ----------------------------------------------------------------------------
# Deterministic parameter init (shapes follow the PyTorch module __init__)
# ----------------------------------------------------------------------------
def init_params(key, in_channels, raw_c, latent_dim, embryo_tot):
    emb_c = in_channels // 4
    keys = iter(jax.random.split(key, 64))

    def nrm(shape, scale=0.05):
        return scale * jax.random.normal(next(keys), shape, jnp.float32)

    def gn(c):
        return 1.0 + nrm((c,)), nrm((c,))

    p = {}
    p["ds_gn1_g"], p["ds_gn1_b"] = gn(in_channels)
    p["ds_conv_w"] = nrm((emb_c, in_channels, 3, 3))
    p["ds_conv_b"] = nrm((emb_c,))
    p["ds_gn2_g"], p["ds_gn2_b"] = gn(emb_c)

    p["mean_w"] = nrm((latent_dim, embryo_tot))          # torch Linear weight (out, in)
    p["mean_b"] = nrm((latent_dim,))
    p["std_w"] = nrm((latent_dim, embryo_tot))
    p["std_b"] = nrm((latent_dim,))
    p["gen_w"] = nrm((embryo_tot, latent_dim))
    p["gen_b"] = nrm((embryo_tot,))

    p["pre_conv_w"] = nrm((in_channels, emb_c, 1, 1))
    p["pre_conv_b"] = nrm((in_channels,))
    p["pre_gn_g"], p["pre_gn_b"] = gn(in_channels)

    blocks = []
    for i in range(3):
        cin = in_channels // (2 ** i)
        cout = cin // 2
        blk = {}
        blk["up_w"] = nrm((cout, cin, 1, 1))
        blk["gn1_g"], blk["gn1_b"] = gn(cout)
        blk["c1_w"] = nrm((cout, cout, 3, 3))
        blk["gn2_g"], blk["gn2_b"] = gn(cout)
        blk["c2_w"] = nrm((cout, cout, 3, 3))
        blocks.append(blk)
    p["blocks"] = blocks

    p["ca_gn_g"], p["ca_gn_b"] = gn(in_channels // 8)
    p["ca_conv_w"] = nrm((raw_c, in_channels // 8, 1, 1))
    p["ca_conv_b"] = nrm((raw_c,))
    return p


# ----------------------------------------------------------------------------
if __name__ == "__main__":
    # Small config: in_channels=64, raw image (1, 32, 32), latent_dim=32, batch=2.
    # -> embryo_channels=16, image_embryo_hw=[4,4], embryo_tot_element=64,
    #    encoded_x spatial = (H/16, W/16) = (2, 2) so the flatten matches.
    in_channels = 64
    raw_image_shape = (1, 32, 32)
    latent_dim = 32
    batch = 2
    embryo_tot = (raw_image_shape[1] // 8) * (raw_image_shape[2] // 8) // 4 * (in_channels // 4)

    key = jax.random.PRNGKey(0)
    k_par, k_enc, k_img, k_noise = jax.random.split(key, 4)

    params = init_params(k_par, in_channels, raw_image_shape[0], latent_dim, embryo_tot)
    encoded_x = jax.random.normal(
        k_enc, (batch, in_channels, raw_image_shape[1] // 16, raw_image_shape[2] // 16),
        jnp.float32)
    raw_image = jax.random.normal(k_img, (batch,) + raw_image_shape, jnp.float32)
    noise = jax.random.normal(k_noise, (batch, latent_dim), jnp.float32)

    fwd = jax.jit(vae_decoder_forward)
    loss = fwd(params, encoded_x, raw_image, noise)
    jax.block_until_ready(loss)
    assert loss.shape == () and jnp.isfinite(loss)
    print("KERNEL_OK")
</pallas_src>

<mosaic_0001>
module attributes {stable_mosaic.version = 11 : i64} {
  func.func @_down_sample_kernel(%arg0: i32, %arg1: memref<1x64x4xf32, #tpu.memory_space<vmem>>, %arg2: memref<64x64xf32, #tpu.memory_space<vmem>>, %arg3: memref<64x1xf32, #tpu.memory_space<vmem>>, %arg4: memref<64x1xf32, #tpu.memory_space<vmem>>, %arg5: memref<16x576xbf16, #tpu.memory_space<vmem>>, %arg6: memref<16x1xf32, #tpu.memory_space<vmem>>, %arg7: memref<9x1x4xf32, #tpu.memory_space<vmem>>, %arg8: memref<16x16xf32, #tpu.memory_space<vmem>>, %arg9: memref<16x1xf32, #tpu.memory_space<vmem>>, %arg10: memref<16x1xf32, #tpu.memory_space<vmem>>, %arg11: memref<1x16x4xf32, #tpu.memory_space<vmem>>) attributes {dimension_semantics = [#tpu.dimension_semantics<parallel>], iteration_bounds = array<i64: 2>, scalar_prefetch = 0 : i64, scratch_operands = 0 : i64, tpu.core_type = #tpu.core_type<tc>, window_params = [{transform_indices = @transform_0, window_bounds = array<i64: 1, 64, 4>}, {pipeline_mode = #tpu.pipeline_mode<synchronous>, transform_indices = @transform_1, window_bounds = array<i64: 64, 64>}, {pipeline_mode = #tpu.pipeline_mode<synchronous>, transform_indices = @transform_2, window_bounds = array<i64: 64, 1>}, {pipeline_mode = #tpu.pipeline_mode<synchronous>, transform_indices = @transform_3, window_bounds = array<i64: 64, 1>}, {pipeline_mode = #tpu.pipeline_mode<synchronous>, transform_indices = @transform_4, window_bounds = array<i64: 16, 576>}, {pipeline_mode = #tpu.pipeline_mode<synchronous>, transform_indices = @transform_5, window_bounds = array<i64: 16, 1>}, {pipeline_mode = #tpu.pipeline_mode<synchronous>, transform_indices = @transform_6, window_bounds = array<i64: 9, 1, 4>}, {pipeline_mode = #tpu.pipeline_mode<synchronous>, transform_indices = @transform_7, window_bounds = array<i64: 16, 16>}, {pipeline_mode = #tpu.pipeline_mode<synchronous>, transform_indices = @transform_8, window_bounds = array<i64: 16, 1>}, {pipeline_mode = #tpu.pipeline_mode<synchronous>, transform_indices = @transform_9, window_bounds = array<i64: 16, 1>}, {transform_indices = @transform_10, window_bounds = array<i64: 1, 16, 4>}]} {
    %c0 = arith.constant 0 : index
    %c0_0 = arith.constant 0 : index
    %c0_1 = arith.constant 0 : index
    %0 = vector.load %arg1[%c0, %c0_0, %c0_1] : memref<1x64x4xf32, #tpu.memory_space<vmem>>, vector<1x64x4xf32>
    %1 = vector.shape_cast %0 : vector<1x64x4xf32> to vector<64x4xf32>
    %c0_2 = arith.constant 0 : index
    %c0_3 = arith.constant 0 : index
    %2 = vector.load %arg3[%c0_2, %c0_3] : memref<64x1xf32, #tpu.memory_space<vmem>>, vector<64x1xf32>
    %c0_4 = arith.constant 0 : index
    %c0_5 = arith.constant 0 : index
    %3 = vector.load %arg4[%c0_4, %c0_5] : memref<64x1xf32, #tpu.memory_space<vmem>>, vector<64x1xf32>
    %c0_6 = arith.constant 0 : index
    %c0_7 = arith.constant 0 : index
    %4 = vector.load %arg2[%c0_6, %c0_7] : memref<64x64xf32, #tpu.memory_space<vmem>>, vector<64x64xf32>
    %cst = arith.constant dense<0.000000e+00> : vector<64xf32>
    %5 = vector.multi_reduction <add>, %1, %cst [1] : vector<64x4xf32> to vector<64xf32>
    %6 = vector.shape_cast %5 : vector<64xf32> to vector<64x1xf32>
    %cst_8 = arith.constant dense<0.000000e+00> : vector<64x1xf32>
    %7 = tpu.matmul %4, %6, %cst_8 {dimension_numbers = #tpu.dot_dimension_numbers<[1], [0], [0], [1], [0, 0, 1, 1], [], []>} : vector<64x64xf32>, vector<64x1xf32>, vector<64x1xf32> -> vector<64x1xf32>
    %cst_9 = arith.constant 3.125000e-02 : f32
    %8 = vector.broadcast %cst_9 : f32 to vector<64x1xf32>
    %9 = arith.mulf %7, %8 : vector<64x1xf32>
    %10 = vector.broadcast %9 : vector<64x1xf32> to vector<64x4xf32>
    %11 = arith.subf %1, %10 : vector<64x4xf32>
    %12 = arith.mulf %11, %11 : vector<64x4xf32>
    %cst_10 = arith.constant dense<0.000000e+00> : vector<64xf32>
    %13 = vector.multi_reduction <add>, %12, %cst_10 [1] : vector<64x4xf32> to vector<64xf32>
    %14 = vector.shape_cast %13 : vector<64xf32> to vector<64x1xf32>
    %cst_11 = arith.constant dense<0.000000e+00> : vector<64x1xf32>
    %15 = tpu.matmul %4, %14, %cst_11 {dimension_numbers = #tpu.dot_dimension_numbers<[1], [0], [0], [1], [0, 0, 1, 1], [], []>} : vector<64x64xf32>, vector<64x1xf32>, vector<64x1xf32> -> vector<64x1xf32>
    %cst_12 = arith.constant 3.125000e-02 : f32
    %16 = vector.broadcast %cst_12 : f32 to vector<64x1xf32>
    %17 = arith.mulf %15, %16 : vector<64x1xf32>
    %cst_13 = arith.constant 9.99999974E-6 : f32
    %18 = vector.broadcast %cst_13 : f32 to vector<64x1xf32>
    %19 = arith.addf %17, %18 : vector<64x1xf32>
    %20 = math.rsqrt %19 : vector<64x1xf32>
    %21 = arith.mulf %20, %2 : vector<64x1xf32>
    %22 = vector.broadcast %21 : vector<64x1xf32> to vector<64x4xf32>
    %23 = arith.mulf %11, %22 : vector<64x4xf32>
    %24 = vector.broadcast %3 : vector<64x1xf32> to vector<64x4xf32>
    %25 = arith.addf %23, %24 : vector<64x4xf32>
    %cst_14 = arith.constant 0.000000e+00 : f32
    %26 = vector.broadcast %cst_14 : f32 to vector<64x4xf32>
    %27 = arith.maximumf %25, %26 : vector<64x4xf32>
    %28 = vector.extract_strided_slice %27 {offsets = [0, 1], sizes = [64, 3], strides = [1, 1]} : vector<64x4xf32> to vector<64x3xf32>
    %29 = vector.extract_strided_slice %27 {offsets = [0, 0], sizes = [64, 1], strides = [1, 1]} : vector<64x4xf32> to vector<64x1xf32>
    %30 = tpu.concatenate %28, %29 in 1 : vector<64x3xf32>, vector<64x1xf32> -> vector<64x4xf32>
    %c0_15 = arith.constant 0 : index
    %c0_16 = arith.constant 0 : index
    %c0_17 = arith.constant 0 : index
    %31 = vector.load %arg7[%c0_15, %c0_16, %c0_17] : memref<9x1x4xf32, #tpu.memory_space<vmem>>, vector<1x1x4xf32>
    %32 = vector.shape_cast %31 : vector<1x1x4xf32> to vector<1x4xf32>
    %33 = vector.broadcast %32 : vector<1x4xf32> to vector<64x4xf32>
    %34 = arith.mulf %30, %33 : vector<64x4xf32>
    %35 = vector.extract_strided_slice %27 {offsets = [0, 2], sizes = [64, 2], strides = [1, 1]} : vector<64x4xf32> to vector<64x2xf32>
    %36 = vector.extract_strided_slice %27 {offsets = [0, 0], sizes = [64, 2], strides = [1, 1]} : vector<64x4xf32> to vector<64x2xf32>
    %37 = tpu.concatenate %35, %36 in 1 : vector<64x2xf32>, vector<64x2xf32> -> vector<64x4xf32>
    %c1 = arith.constant 1 : index
    %c0_18 = arith.constant 0 : index
    %c0_19 = arith.constant 0 : index
    %38 = vector.load %arg7[%c1, %c0_18, %c0_19] : memref<9x1x4xf32, #tpu.memory_space<vmem>>, vector<1x1x4xf32>
    %39 = vector.shape_cast %38 : vector<1x1x4xf32> to vector<1x4xf32>
    %40 = vector.broadcast %39 : vector<1x4xf32> to vector<64x4xf32>
    %41 = arith.mulf %37, %40 : vector<64x4xf32>
    %42 = vector.extract_strided_slice %27 {offsets = [0, 3], sizes = [64, 1], strides = [1, 1]} : vector<64x4xf32> to vector<64x1xf32>
    %43 = vector.extract_strided_slice %27 {offsets = [0, 0], sizes = [64, 3], strides = [1, 1]} : vector<64x4xf32> to vector<64x3xf32>
    %44 = tpu.concatenate %42, %43 in 1 : vector<64x1xf32>, vector<64x3xf32> -> vector<64x4xf32>
    %c2 = arith.constant 2 : index
    %c0_20 = arith.constant 0 : index
    %c0_21 = arith.constant 0 : index
    %45 = vector.load %arg7[%c2, %c0_20, %c0_21] : memref<9x1x4xf32, #tpu.memory_space<vmem>>, vector<1x1x4xf32>
    %46 = vector.shape_cast %45 : vector<1x1x4xf32> to vector<1x4xf32>
    %47 = vector.broadcast %46 : vector<1x4xf32> to vector<64x4xf32>
    %48 = arith.mulf %44, %47 : vector<64x4xf32>
    %49 = vector.extract_strided_slice %27 {offsets = [0, 3], sizes = [64, 1], strides = [1, 1]} : vector<64x4xf32> to vector<64x1xf32>
    %50 = vector.extract_strided_slice %27 {offsets = [0, 0], sizes = [64, 3], strides = [1, 1]} : vector<64x4xf32> to vector<64x3xf32>
    %51 = tpu.concatenate %49, %50 in 1 : vector<64x1xf32>, vector<64x3xf32> -> vector<64x4xf32>
    %c3 = arith.constant 3 : index
    %c0_22 = arith.constant 0 : index
    %c0_23 = arith.constant 0 : index
    %52 = vector.load %arg7[%c3, %c0_22, %c0_23] : memref<9x1x4xf32, #tpu.memory_space<vmem>>, vector<1x1x4xf32>
    %53 = vector.shape_cast %52 : vector<1x1x4xf32> to vector<1x4xf32>
    %54 = vector.broadcast %53 : vector<1x4xf32> to vector<64x4xf32>
    %55 = arith.mulf %51, %54 : vector<64x4xf32>
    %56 = vector.extract_strided_slice %27 {offsets = [0, 1], sizes = [64, 3], strides = [1, 1]} : vector<64x4xf32> to vector<64x3xf32>
    %57 = vector.extract_strided_slice %27 {offsets = [0, 0], sizes = [64, 1], strides = [1, 1]} : vector<64x4xf32> to vector<64x1xf32>
    %58 = tpu.concatenate %56, %57 in 1 : vector<64x3xf32>, vector<64x1xf32> -> vector<64x4xf32>
    %c5 = arith.constant 5 : index
    %c0_24 = arith.constant 0 : index
    %c0_25 = arith.constant 0 : index
    %59 = vector.load %arg7[%c5, %c0_24, %c0_25] : memref<9x1x4xf32, #tpu.memory_space<vmem>>, vector<1x1x4xf32>
    %60 = vector.shape_cast %59 : vector<1x1x4xf32> to vector<1x4xf32>
    %61 = vector.broadcast %60 : vector<1x4xf32> to vector<64x4xf32>
    %62 = arith.mulf %58, %61 : vector<64x4xf32>
    %63 = vector.extract_strided_slice %27 {offsets = [0, 1], sizes = [64, 3], strides = [1, 1]} : vector<64x4xf32> to vector<64x3xf32>
    %64 = vector.extract_strided_slice %27 {offsets = [0, 0], sizes = [64, 1], strides = [1, 1]} : vector<64x4xf32> to vector<64x1xf32>
    %65 = tpu.concatenate %63, %64 in 1 : vector<64x3xf32>, vector<64x1xf32> -> vector<64x4xf32>
    %c6 = arith.constant 6 : index
    %c0_26 = arith.constant 0 : index
    %c0_27 = arith.constant 0 : index
    %66 = vector.load %arg7[%c6, %c0_26, %c0_27] : memref<9x1x4xf32, #tpu.memory_space<vmem>>, vector<1x1x4xf32>
    %67 = vector.shape_cast %66 : vector<1x1x4xf32> to vector<1x4xf32>
    %68 = vector.broadcast %67 : vector<1x4xf32> to vector<64x4xf32>
    %69 = arith.mulf %65, %68 : vector<64x4xf32>
    %70 = vector.extract_strided_slice %27 {offsets = [0, 2], sizes = [64, 2], strides = [1, 1]} : vector<64x4xf32> to vector<64x2xf32>
    %71 = vector.extract_strided_slice %27 {offsets = [0, 0], sizes = [64, 2], strides = [1, 1]} : vector<64x4xf32> to vector<64x2xf32>
    %72 = tpu.concatenate %70, %71 in 1 : vector<64x2xf32>, vector<64x2xf32> -> vector<64x4xf32>
    %c7 = arith.constant 7 : index
    %c0_28 = arith.constant 0 : index
    %c0_29 = arith.constant 0 : index
    %73 = vector.load %arg7[%c7, %c0_28, %c0_29] : memref<9x1x4xf32, #tpu.memory_space<vmem>>, vector<1x1x4xf32>
    %74 = vector.shape_cast %73 : vector<1x1x4xf32> to vector<1x4xf32>
    %75 = vector.broadcast %74 : vector<1x4xf32> to vector<64x4xf32>
    %76 = arith.mulf %72, %75 : vector<64x4xf32>
    %77 = vector.extract_strided_slice %27 {offsets = [0, 3], sizes = [64, 1], strides = [1, 1]} : vector<64x4xf32> to vector<64x1xf32>
    %78 = vector.extract_strided_slice %27 {offsets = [0, 0], sizes = [64, 3], strides = [1, 1]} : vector<64x4xf32> to vector<64x3xf32>
    %79 = tpu.concatenate %77, %78 in 1 : vector<64x1xf32>, vector<64x3xf32> -> vector<64x4xf32>
    %c8 = arith.constant 8 : index
    %c0_30 = arith.constant 0 : index
    %c0_31 = arith.constant 0 : index
    %80 = vector.load %arg7[%c8, %c0_30, %c0_31] : memref<9x1x4xf32, #tpu.memory_space<vmem>>, vector<1x1x4xf32>
    %81 = vector.shape_cast %80 : vector<1x1x4xf32> to vector<1x4xf32>
    %82 = vector.broadcast %81 : vector<1x4xf32> to vector<64x4xf32>
    %83 = arith.mulf %79, %82 : vector<64x4xf32>
    %84 = tpu.concatenate %34, %41, %48, %55, %27, %62, %69, %76, %83 in 0 : vector<64x4xf32>, vector<64x4xf32>, vector<64x4xf32>, vector<64x4xf32>, vector<64x4xf32>, vector<64x4xf32>, vector<64x4xf32>, vector<64x4xf32>, vector<64x4xf32> -> vector<576x4xf32>
    %85 = arith.truncf %84 : vector<576x4xf32> to vector<576x4xbf16>
    %c0_32 = arith.constant 0 : index
    %c0_33 = arith.constant 0 : index
    %86 = vector.load %arg5[%c0_32, %c0_33] : memref<16x576xbf16, #tpu.memory_space<vmem>>, vector<16x576xbf16>
    %cst_34 = arith.constant dense<0.000000e+00> : vector<16x4xf32>
    %87 = tpu.matmul %86, %85, %cst_34 {dimension_numbers = #tpu.dot_dimension_numbers<[1], [0], [0], [1], [0, 0, 1, 1], [], []>} : vector<16x576xbf16>, vector<576x4xbf16>, vector<16x4xf32> -> vector<16x4xf32>
    %c0_35 = arith.constant 0 : index
    %c0_36 = arith.constant 0 : index
    %88 = vector.load %arg6[%c0_35, %c0_36] : memref<16x1xf32, #tpu.memory_space<vmem>>, vector<16x1xf32>
    %89 = vector.broadcast %88 : vector<16x1xf32> to vector<16x4xf32>
    %90 = arith.addf %87, %89 : vector<16x4xf32>
    %c0_37 = arith.constant 0 : index
    %c0_38 = arith.constant 0 : index
    %91 = vector.load %arg9[%c0_37, %c0_38] : memref<16x1xf32, #tpu.memory_space<vmem>>, vector<16x1xf32>
    %c0_39 = arith.constant 0 : index
    %c0_40 = arith.constant 0 : index
    %92 = vector.load %arg10[%c0_39, %c0_40] : memref<16x1xf32, #tpu.memory_space<vmem>>, vector<16x1xf32>
    %c0_41 = arith.constant 0 : index
    %c0_42 = arith.constant 0 : index
    %93 = vector.load %arg8[%c0_41, %c0_42] : memref<16x16xf32, #tpu.memory_space<vmem>>, vector<16x16xf32>
    %cst_43 = arith.constant dense<0.000000e+00> : vector<16xf32>
    %94 = vector.multi_reduction <add>, %90, %cst_43 [1] : vector<16x4xf32> to vector<16xf32>
    %95 = vector.shape_cast %94 : vector<16xf32> to vector<16x1xf32>
    %cst_44 = arith.constant dense<0.000000e+00> : vector<16x1xf32>
    %96 = tpu.matmul %93, %95, %cst_44 {dimension_numbers = #tpu.dot_dimension_numbers<[1], [0], [0], [1], [0, 0, 1, 1], [], []>} : vector<16x16xf32>, vector<16x1xf32>, vector<16x1xf32> -> vector<16x1xf32>
    %cst_45 = arith.constant 1.250000e-01 : f32
    %97 = vector.broadcast %cst_45 : f32 to vector<16x1xf32>
    %98 = arith.mulf %96, %97 : vector<16x1xf32>
    %99 = vector.broadcast %98 : vector<16x1xf32> to vector<16x4xf32>
    %100 = arith.subf %90, %99 : vector<16x4xf32>
    %101 = arith.mulf %100, %100 : vector<16x4xf32>
    %cst_46 = arith.constant dense<0.000000e+00> : vector<16xf32>
    %102 = vector.multi_reduction <add>, %101, %cst_46 [1] : vector<16x4xf32> to vector<16xf32>
    %103 = vector.shape_cast %102 : vector<16xf32> to vector<16x1xf32>
    %cst_47 = arith.constant dense<0.000000e+00> : vector<16x1xf32>
    %104 = tpu.matmul %93, %103, %cst_47 {dimension_numbers = #tpu.dot_dimension_numbers<[1], [0], [0], [1], [0, 0, 1, 1], [], []>} : vector<16x16xf32>, vector<16x1xf32>, vector<16x1xf32> -> vector<16x1xf32>
    %cst_48 = arith.constant 1.250000e-01 : f32
    %105 = vector.broadcast %cst_48 : f32 to vector<16x1xf32>
    %106 = arith.mulf %104, %105 : vector<16x1xf32>
    %cst_49 = arith.constant 9.99999974E-6 : f32
    %107 = vector.broadcast %cst_49 : f32 to vector<16x1xf32>
    %108 = arith.addf %106, %107 : vector<16x1xf32>
    %109 = math.rsqrt %108 : vector<16x1xf32>
    %110 = arith.mulf %109, %91 : vector<16x1xf32>
    %111 = vector.broadcast %110 : vector<16x1xf32> to vector<16x4xf32>
    %112 = arith.mulf %100, %111 : vector<16x4xf32>
    %113 = vector.broadcast %92 : vector<16x1xf32> to vector<16x4xf32>
    %114 = arith.addf %112, %113 : vector<16x4xf32>
    %cst_50 = arith.constant 0.000000e+00 : f32
    %115 = vector.broadcast %cst_50 : f32 to vector<16x4xf32>
    %116 = arith.maximumf %114, %115 : vector<16x4xf32>
    %c0_51 = arith.constant 0 : index
    %c0_52 = arith.constant 0 : index
    %c0_53 = arith.constant 0 : index
    %117 = vector.load %arg11[%c0_51, %c0_52, %c0_53] : memref<1x16x4xf32, #tpu.memory_space<vmem>>, vector<1x16x4xf32>
    %118 = vector.shape_cast %117 : vector<1x16x4xf32> to vector<16x4xf32>
    %119 = vector.shape_cast %116 : vector<16x4xf32> to vector<1x16x4xf32>
    tpu.vector_store %arg11[%c0_51, %c0_52, %c0_53], %119 {strides = array<i32>} : memref<1x16x4xf32, #tpu.memory_space<vmem>>, vector<1x16x4xf32>,
    return
  }
  func.func @transform_0(%arg0: i32) -> (i32, i32, i32) {
    %c0_i32 = arith.constant 0 : i32
    %c0_i32_0 = arith.constant 0 : i32
    %c0_i32_1 = arith.constant 0 : i32
    return %arg0, %c0_i32, %c0_i32_0 : i32, i32, i32
  }
  func.func @transform_1(%arg0: i32) -> (i32, i32) {
    %c0_i32 = arith.constant 0 : i32
    %c0_i32_0 = arith.constant 0 : i32
    %c0_i32_1 = arith.constant 0 : i32
    return %c0_i32, %c0_i32_0 : i32, i32
  }
  func.func @transform_2(%arg0: i32) -> (i32, i32) {
    %c0_i32 = arith.constant 0 : i32
    %c0_i32_0 = arith.constant 0 : i32
    %c0_i32_1 = arith.constant 0 : i32
    return %c0_i32, %c0_i32_0 : i32, i32
  }
  func.func @transform_3(%arg0: i32) -> (i32, i32) {
    %c0_i32 = arith.constant 0 : i32
    %c0_i32_0 = arith.constant 0 : i32
    %c0_i32_1 = arith.constant 0 : i32
    return %c0_i32, %c0_i32_0 : i32, i32
  }
  func.func @transform_4(%arg0: i32) -> (i32, i32) {
    %c0_i32 = arith.constant 0 : i32
    %c0_i32_0 = arith.constant 0 : i32
    %c0_i32_1 = arith.constant 0 : i32
    return %c0_i32, %c0_i32_0 : i32, i32
  }
  func.func @transform_5(%arg0: i32) -> (i32, i32) {
    %c0_i32 = arith.constant 0 : i32
    %c0_i32_0 = arith.constant 0 : i32
    %c0_i32_1 = arith.constant 0 : i32
    return %c0_i32, %c0_i32_0 : i32, i32
  }
  func.func @transform_6(%arg0: i32) -> (i32, i32, i32) {
    %c0_i32 = arith.constant 0 : i32
    %c0_i32_0 = arith.constant 0 : i32
    %c0_i32_1 = arith.constant 0 : i32
    %c0_i32_2 = arith.constant 0 : i32
    return %c0_i32, %c0_i32_0, %c0_i32_1 : i32, i32, i32
  }
  func.func @transform_7(%arg0: i32) -> (i32, i32) {
    %c0_i32 = arith.constant 0 : i32
    %c0_i32_0 = arith.constant 0 : i32
    %c0_i32_1 = arith.constant 0 : i32
    return %c0_i32, %c0_i32_0 : i32, i32
  }
  func.func @transform_8(%arg0: i32) -> (i32, i32) {
    %c0_i32 = arith.constant 0 : i32
    %c0_i32_0 = arith.constant 0 : i32
    %c0_i32_1 = arith.constant 0 : i32
    return %c0_i32, %c0_i32_0 : i32, i32
  }
  func.func @transform_9(%arg0: i32) -> (i32, i32) {
    %c0_i32 = arith.constant 0 : i32
    %c0_i32_0 = arith.constant 0 : i32
    %c0_i32_1 = arith.constant 0 : i32
    return %c0_i32, %c0_i32_0 : i32, i32
  }
  func.func @transform_10(%arg0: i32) -> (i32, i32, i32) {
    %c0_i32 = arith.constant 0 : i32
    %c0_i32_0 = arith.constant 0 : i32
    %c0_i32_1 = arith.constant 0 : i32
    return %arg0, %c0_i32, %c0_i32_0 : i32, i32, i32
  }
}

module attributes {stable_mosaic.version = 11 : i64} {
  func.func @_bottleneck_kernel(%arg0: memref<2x64xf32, #tpu.memory_space<vmem>>, %arg1: memref<2x32xf32, #tpu.memory_space<vmem>>, %arg2: memref<64x32xf32, #tpu.memory_space<vmem>>, %arg3: memref<1x32xf32, #tpu.memory_space<vmem>>, %arg4: memref<64x32xf32, #tpu.memory_space<vmem>>, %arg5: memref<1x32xf32, #tpu.memory_space<vmem>>, %arg6: memref<32x64xf32, #tpu.memory_space<vmem>>, %arg7: memref<1x64xf32, #tpu.memory_space<vmem>>, %arg8: memref<2x64xf32, #tpu.memory_space<vmem>>, %arg9: memref<1x1xf32, #tpu.memory_space<vmem>>) attributes {dimension_semantics = [], scalar_prefetch = 0 : i64, scratch_operands = 0 : i64, tpu.core_type = #tpu.core_type<tc>} {
    %c0 = arith.constant 0 : index
    %c0_0 = arith.constant 0 : index
    %0 = vector.load %arg0[%c0, %c0_0] : memref<2x64xf32, #tpu.memory_space<vmem>>, vector<2x64xf32>
    %c0_1 = arith.constant 0 : index
    %c0_2 = arith.constant 0 : index
    %1 = vector.load %arg2[%c0_1, %c0_2] : memref<64x32xf32, #tpu.memory_space<vmem>>, vector<64x32xf32>
    %cst = arith.constant dense<0.000000e+00> : vector<2x32xf32>
    %2 = tpu.matmul %0, %1, %cst {dimension_numbers = #tpu.dot_dimension_numbers<[1], [0], [0], [1], [0, 0, 1, 1], [], []>} : vector<2x64xf32>, vector<64x32xf32>, vector<2x32xf32> -> vector<2x32xf32>
    %c0_3 = arith.constant 0 : index
    %c0_4 = arith.constant 0 : index
    %3 = vector.load %arg3[%c0_3, %c0_4] : memref<1x32xf32, #tpu.memory_space<vmem>>, vector<1x32xf32>
    %4 = vector.broadcast %3 : vector<1x32xf32> to vector<2x32xf32>
    %5 = arith.addf %2, %4 : vector<2x32xf32>
    %c0_5 = arith.constant 0 : index
    %c0_6 = arith.constant 0 : index
    %6 = vector.load %arg4[%c0_5, %c0_6] : memref<64x32xf32, #tpu.memory_space<vmem>>, vector<64x32xf32>
    %cst_7 = arith.constant dense<0.000000e+00> : vector<2x32xf32>
    %7 = tpu.matmul %0, %6, %cst_7 {dimension_numbers = #tpu.dot_dimension_numbers<[1], [0], [0], [1], [0, 0, 1, 1], [], []>} : vector<2x64xf32>, vector<64x32xf32>, vector<2x32xf32> -> vector<2x32xf32>
    %c0_8 = arith.constant 0 : index
    %c0_9 = arith.constant 0 : index
    %8 = vector.load %arg5[%c0_8, %c0_9] : memref<1x32xf32, #tpu.memory_space<vmem>>, vector<1x32xf32>
    %9 = vector.broadcast %8 : vector<1x32xf32> to vector<2x32xf32>
    %10 = arith.addf %7, %9 : vector<2x32xf32>
    %cst_10 = arith.constant 0.000000e+00 : f32
    %11 = vector.broadcast %cst_10 : f32 to vector<2x32xf32>
    %12 = arith.maximumf %10, %11 : vector<2x32xf32>
    %13 = math.absf %10 : vector<2x32xf32>
    %cst_11 = arith.constant 0.000000e+00 : f32
    %14 = vector.broadcast %cst_11 : f32 to vector<2x32xf32>
    %15 = arith.subf %14, %13 : vector<2x32xf32>
    %16 = math.exp %15 : vector<2x32xf32>
    %17 = math.log1p %16 : vector<2x32xf32>
    %18 = arith.addf %12, %17 : vector<2x32xf32>
    %19 = arith.mulf %5, %5 : vector<2x32xf32>
    %20 = arith.mulf %18, %18 : vector<2x32xf32>
    %21 = arith.addf %19, %20 : vector<2x32xf32>
    %22 = arith.mulf %18, %18 : vector<2x32xf32>
    %cst_12 = arith.constant 9.99999993E-9 : f32
    %23 = vector.broadcast %cst_12 : f32 to vector<2x32xf32>
    %24 = arith.addf %23, %22 : vector<2x32xf32>
    %25 = math.log %24 : vector<2x32xf32>
    %26 = arith.subf %21, %25 : vector<2x32xf32>
    %cst_13 = arith.constant 1.000000e+00 : f32
    %27 = vector.broadcast %cst_13 : f32 to vector<2x32xf32>
    %28 = arith.subf %26, %27 : vector<2x32xf32>
    %cst_14 = arith.constant dense<0.000000e+00> : vector<2xf32>
    %29 = vector.multi_reduction <add>, %28, %cst_14 [1] : vector<2x32xf32> to vector<2xf32>
    %30 = vector.shape_cast %29 : vector<2xf32> to vector<2x1xf32>
    %cst_15 = arith.constant dense<0.000000e+00> : vector<1xf32>
    %31 = vector.multi_reduction <add>, %30, %cst_15 [0] : vector<2x1xf32> to vector<1xf32>
    %32 = vector.shape_cast %31 : vector<1xf32> to vector<1x1xf32>
    %cst_16 = arith.constant 5.000000e-01 : f32
    %33 = vector.broadcast %cst_16 : f32 to vector<1x1xf32>
    %34 = arith.mulf %33, %32 : vector<1x1xf32>
    %cst_17 = arith.constant 6.400000e+01 : f32
    %35 = vector.broadcast %cst_17 : f32 to vector<1x1xf32>
    %36 = arith.divf %34, %35 : vector<1x1xf32>
    %c0_18 = arith.constant 0 : index
    %c0_19 = arith.constant 0 : index
    %37 = vector.load %arg9[%c0_18, %c0_19] : memref<1x1xf32, #tpu.memory_space<vmem>>, vector<1x1xf32>
    tpu.vector_store %arg9[%c0_18, %c0_19], %36 {strides = array<i32>} : memref<1x1xf32, #tpu.memory_space<vmem>>, vector<1x1xf32>,
    %c0_20 = arith.constant 0 : index
    %c0_21 = arith.constant 0 : index
    %38 = vector.load %arg1[%c0_20, %c0_21] : memref<2x32xf32, #tpu.memory_space<vmem>>, vector<2x32xf32>
    %39 = arith.mulf %18, %38 : vector<2x32xf32>
    %40 = arith.addf %5, %39 : vector<2x32xf32>
    %c0_22 = arith.constant 0 : index
    %c0_23 = arith.constant 0 : index
    %41 = vector.load %arg6[%c0_22, %c0_23] : memref<32x64xf32, #tpu.memory_space<vmem>>, vector<32x64xf32>
    %cst_24 = arith.constant dense<0.000000e+00> : vector<2x64xf32>
    %42 = tpu.matmul %40, %41, %cst_24 {dimension_numbers = #tpu.dot_dimension_numbers<[1], [0], [0], [1], [0, 0, 1, 1], [], []>} : vector<2x32xf32>, vector<32x64xf32>, vector<2x64xf32> -> vector<2x64xf32>
    %c0_25 = arith.constant 0 : index
    %c0_26 = arith.constant 0 : index
    %43 = vector.load %arg7[%c0_25, %c0_26] : memref<1x64xf32, #tpu.memory_space<vmem>>, vector<1x64xf32>
    %44 = vector.broadcast %43 : vector<1x64xf32> to vector<2x64xf32>
    %45 = arith.addf %42, %44 : vector<2x64xf32>
    %cst_27 = arith.constant 0.000000e+00 : f32
    %46 = vector.broadcast %cst_27 : f32 to vector<2x64xf32>
    %47 = arith.maximumf %45, %46 : vector<2x64xf32>
    %c0_28 = arith.constant 0 : index
    %c0_29 = arith.constant 0 : index
    %48 = vector.load %arg8[%c0_28, %c0_29] : memref<2x64xf32, #tpu.memory_space<vmem>>, vector<2x64xf32>
    tpu.vector_store %arg8[%c0_28, %c0_29], %47 {strides = array<i32>} : memref<2x64xf32, #tpu.memory_space<vmem>>, vector<2x64xf32>,
    return
  }
}

module attributes {stable_mosaic.version = 11 : i64} {
  func.func @_prefix_kernel(%arg0: i32, %arg1: memref<1x16x4xf32, #tpu.memory_space<vmem>>, %arg2: memref<64x16xbf16, #tpu.memory_space<vmem>>, %arg3: memref<64x1xf32, #tpu.memory_space<vmem>>, %arg4: memref<4x16xbf16, #tpu.memory_space<vmem>>, %arg5: memref<64x64xf32, #tpu.memory_space<vmem>>, %arg6: memref<64x1xf32, #tpu.memory_space<vmem>>, %arg7: memref<64x1xf32, #tpu.memory_space<vmem>>, %arg8: memref<1x64x16xf32, #tpu.memory_space<vmem>>) attributes {dimension_semantics = [#tpu.dimension_semantics<parallel>], iteration_bounds = array<i64: 2>, scalar_prefetch = 0 : i64, scratch_operands = 0 : i64, tpu.core_type = #tpu.core_type<tc>, window_params = [{transform_indices = @transform_0, window_bounds = array<i64: 1, 16, 4>}, {pipeline_mode = #tpu.pipeline_mode<synchronous>, transform_indices = @transform_1, window_bounds = array<i64: 64, 16>}, {pipeline_mode = #tpu.pipeline_mode<synchronous>, transform_indices = @transform_2, window_bounds = array<i64: 64, 1>}, {pipeline_mode = #tpu.pipeline_mode<synchronous>, transform_indices = @transform_3, window_bounds = array<i64: 4, 16>}, {pipeline_mode = #tpu.pipeline_mode<synchronous>, transform_indices = @transform_4, window_bounds = array<i64: 64, 64>}, {pipeline_mode = #tpu.pipeline_mode<synchronous>, transform_indices = @transform_5, window_bounds = array<i64: 64, 1>}, {pipeline_mode = #tpu.pipeline_mode<synchronous>, transform_indices = @transform_6, window_bounds = array<i64: 64, 1>}, {transform_indices = @transform_7, window_bounds = array<i64: 1, 64, 16>}]} {
    %c0 = arith.constant 0 : index
    %c0_0 = arith.constant 0 : index
    %c0_1 = arith.constant 0 : index
    %0 = vector.load %arg1[%c0, %c0_0, %c0_1] : memref<1x16x4xf32, #tpu.memory_space<vmem>>, vector<1x16x4xf32>
    %1 = vector.shape_cast %0 : vector<1x16x4xf32> to vector<16x4xf32>
    %c0_2 = arith.constant 0 : index
    %c0_3 = arith.constant 0 : index
    %2 = vector.load %arg2[%c0_2, %c0_3] : memref<64x16xbf16, #tpu.memory_space<vmem>>, vector<64x16xbf16>
    %c0_4 = arith.constant 0 : index
    %c0_5 = arith.constant 0 : index
    %3 = vector.load %arg3[%c0_4, %c0_5] : memref<64x1xf32, #tpu.memory_space<vmem>>, vector<64x1xf32>
    %4 = arith.truncf %1 : vector<16x4xf32> to vector<16x4xbf16>
    %cst = arith.constant dense<0.000000e+00> : vector<64x4xf32>
    %5 = tpu.matmul %2, %4, %cst {dimension_numbers = #tpu.dot_dimension_numbers<[1], [0], [0], [1], [0, 0, 1, 1], [], []>} : vector<64x16xbf16>, vector<16x4xbf16>, vector<64x4xf32> -> vector<64x4xf32>
    %6 = vector.broadcast %3 : vector<64x1xf32> to vector<64x4xf32>
    %7 = arith.addf %5, %6 : vector<64x4xf32>
    %8 = arith.truncf %7 : vector<64x4xf32> to vector<64x4xbf16>
    %c0_6 = arith.constant 0 : index
    %c0_7 = arith.constant 0 : index
    %9 = vector.load %arg4[%c0_6, %c0_7] : memref<4x16xbf16, #tpu.memory_space<vmem>>, vector<4x16xbf16>
    %cst_8 = arith.constant dense<0.000000e+00> : vector<64x16xf32>
    %10 = tpu.matmul %8, %9, %cst_8 {dimension_numbers = #tpu.dot_dimension_numbers<[1], [0], [0], [1], [0, 0, 1, 1], [], []>} : vector<64x4xbf16>, vector<4x16xbf16>, vector<64x16xf32> -> vector<64x16xf32>
    %c0_9 = arith.constant 0 : index
    %c0_10 = arith.constant 0 : index
    %11 = vector.load %arg6[%c0_9, %c0_10] : memref<64x1xf32, #tpu.memory_space<vmem>>, vector<64x1xf32>
    %c0_11 = arith.constant 0 : index
    %c0_12 = arith.constant 0 : index
    %12 = vector.load %arg7[%c0_11, %c0_12] : memref<64x1xf32, #tpu.memory_space<vmem>>, vector<64x1xf32>
    %c0_13 = arith.constant 0 : index
    %c0_14 = arith.constant 0 : index
    %13 = vector.load %arg5[%c0_13, %c0_14] : memref<64x64xf32, #tpu.memory_space<vmem>>, vector<64x64xf32>
    %cst_15 = arith.constant dense<0.000000e+00> : vector<64xf32>
    %14 = vector.multi_reduction <add>, %10, %cst_15 [1] : vector<64x16xf32> to vector<64xf32>
    %15 = vector.shape_cast %14 : vector<64xf32> to vector<64x1xf32>
    %cst_16 = arith.constant dense<0.000000e+00> : vector<64x1xf32>
    %16 = tpu.matmul %13, %15, %cst_16 {dimension_numbers = #tpu.dot_dimension_numbers<[1], [0], [0], [1], [0, 0, 1, 1], [], []>} : vector<64x64xf32>, vector<64x1xf32>, vector<64x1xf32> -> vector<64x1xf32>
    %cst_17 = arith.constant 7.812500e-03 : f32
    %17 = vector.broadcast %cst_17 : f32 to vector<64x1xf32>
    %18 = arith.mulf %16, %17 : vector<64x1xf32>
    %19 = vector.broadcast %18 : vector<64x1xf32> to vector<64x16xf32>
    %20 = arith.subf %10, %19 : vector<64x16xf32>
    %21 = arith.mulf %20, %20 : vector<64x16xf32>
    %cst_18 = arith.constant dense<0.000000e+00> : vector<64xf32>
    %22 = vector.multi_reduction <add>, %21, %cst_18 [1] : vector<64x16xf32> to vector<64xf32>
    %23 = vector.shape_cast %22 : vector<64xf32> to vector<64x1xf32>
    %cst_19 = arith.constant dense<0.000000e+00> : vector<64x1xf32>
    %24 = tpu.matmul %13, %23, %cst_19 {dimension_numbers = #tpu.dot_dimension_numbers<[1], [0], [0], [1], [0, 0, 1, 1], [], []>} : vector<64x64xf32>, vector<64x1xf32>, vector<64x1xf32> -> vector<64x1xf32>
    %cst_20 = arith.constant 7.812500e-03 : f32
    %25 = vector.broadcast %cst_20 : f32 to vector<64x1xf32>
    %26 = arith.mulf %24, %25 : vector<64x1xf32>
    %cst_21 = arith.constant 9.99999974E-6 : f32
    %27 = vector.broadcast %cst_21 : f32 to vector<64x1xf32>
    %28 = arith.addf %26, %27 : vector<64x1xf32>
    %29 = math.rsqrt %28 : vector<64x1xf32>
    %30 = arith.mulf %29, %11 : vector<64x1xf32>
    %31 = vector.broadcast %30 : vector<64x1xf32> to vector<64x16xf32>
    %32 = arith.mulf %20, %31 : vector<64x16xf32>
    %33 = vector.broadcast %12 : vector<64x1xf32> to vector<64x16xf32>
    %34 = arith.addf %32, %33 : vector<64x16xf32>
    %cst_22 = arith.constant 0.000000e+00 : f32
    %35 = vector.broadcast %cst_22 : f32 to vector<64x16xf32>
    %36 = arith.maximumf %34, %35 : vector<64x16xf32>
    %c0_23 = arith.constant 0 : index
    %c0_24 = arith.constant 0 : index
    %c0_25 = arith.constant 0 : index
    %37 = vector.load %arg8[%c0_23, %c0_24, %c0_25] : memref<1x64x16xf32, #tpu.memory_space<vmem>>, vector<1x64x16xf32>
    %38 = vector.shape_cast %37 : vector<1x64x16xf32> to vector<64x16xf32>
    %39 = vector.shape_cast %36 : vector<64x16xf32> to vector<1x64x16xf32>
    tpu.vector_store %arg8[%c0_23, %c0_24, %c0_25], %39 {strides = array<i32>} : memref<1x64x16xf32, #tpu.memory_space<vmem>>, vector<1x64x16xf32>,
    return
  }
  func.func @transform_0(%arg0: i32) -> (i32, i32, i32) {
    %c0_i32 = arith.constant 0 : i32
    %c0_i32_0 = arith.constant 0 : i32
    %c0_i32_1 = arith.constant 0 : i32
    return %arg0, %c0_i32, %c0_i32_0 : i32, i32, i32
  }
  func.func @transform_1(%arg0: i32) -> (i32, i32) {
    %c0_i32 = arith.constant 0 : i32
    %c0_i32_0 = arith.constant 0 : i32
    %c0_i32_1 = arith.constant 0 : i32
    return %c0_i32, %c0_i32_0 : i32, i32
  }
  func.func @transform_2(%arg0: i32) -> (i32, i32) {
    %c0_i32 = arith.constant 0 : i32
    %c0_i32_0 = arith.constant 0 : i32
    %c0_i32_1 = arith.constant 0 : i32
    return %c0_i32, %c0_i32_0 : i32, i32
  }
  func.func @transform_3(%arg0: i32) -> (i32, i32) {
    %c0_i32 = arith.constant 0 : i32
    %c0_i32_0 = arith.constant 0 : i32
    %c0_i32_1 = arith.constant 0 : i32
    return %c0_i32, %c0_i32_0 : i32, i32
  }
  func.func @transform_4(%arg0: i32) -> (i32, i32) {
    %c0_i32 = arith.constant 0 : i32
    %c0_i32_0 = arith.constant 0 : i32
    %c0_i32_1 = arith.constant 0 : i32
    return %c0_i32, %c0_i32_0 : i32, i32
  }
  func.func @transform_5(%arg0: i32) -> (i32, i32) {
    %c0_i32 = arith.constant 0 : i32
    %c0_i32_0 = arith.constant 0 : i32
    %c0_i32_1 = arith.constant 0 : i32
    return %c0_i32, %c0_i32_0 : i32, i32
  }
  func.func @transform_6(%arg0: i32) -> (i32, i32) {
    %c0_i32 = arith.constant 0 : i32
    %c0_i32_0 = arith.constant 0 : i32
    %c0_i32_1 = arith.constant 0 : i32
    return %c0_i32, %c0_i32_0 : i32, i32
  }
  func.func @transform_7(%arg0: i32) -> (i32, i32, i32) {
    %c0_i32 = arith.constant 0 : i32
    %c0_i32_0 = arith.constant 0 : i32
    %c0_i32_1 = arith.constant 0 : i32
    return %arg0, %c0_i32, %c0_i32_0 : i32, i32, i32
  }
}

module attributes {stable_mosaic.version = 11 : i64} {
  func.func @_upres_kernel(%arg0: i32, %arg1: memref<1x64x16xf32, #tpu.memory_space<vmem>>, %arg2: memref<32x64xbf16, #tpu.memory_space<vmem>>, %arg3: memref<16x64xbf16, #tpu.memory_space<vmem>>, %arg4: memref<32x32xf32, #tpu.memory_space<vmem>>, %arg5: memref<32x1xf32, #tpu.memory_space<vmem>>, %arg6: memref<32x1xf32, #tpu.memory_space<vmem>>, %arg7: memref<32x288xbf16, #tpu.memory_space<vmem>>, %arg8: memref<32x1xf32, #tpu.memory_space<vmem>>, %arg9: memref<32x1xf32, #tpu.memory_space<vmem>>, %arg10: memref<32x288xbf16, #tpu.memory_space<vmem>>, %arg11: memref<9x1x64xf32, #tpu.memory_space<vmem>>, %arg12: memref<1x32x64xf32, #tpu.memory_space<vmem>>) attributes {dimension_semantics = [#tpu.dimension_semantics<parallel>], iteration_bounds = array<i64: 2>, scalar_prefetch = 0 : i64, scratch_operands = 0 : i64, tpu.core_type = #tpu.core_type<tc>, window_params = [{transform_indices = @transform_0, window_bounds = array<i64: 1, 64, 16>}, {pipeline_mode = #tpu.pipeline_mode<synchronous>, transform_indices = @transform_1, window_bounds = array<i64: 32, 64>}, {pipeline_mode = #tpu.pipeline_mode<synchronous>, transform_indices = @transform_2, window_bounds = array<i64: 16, 64>}, {pipeline_mode = #tpu.pipeline_mode<synchronous>, transform_indices = @transform_3, window_bounds = array<i64: 32, 32>}, {pipeline_mode = #tpu.pipeline_mode<synchronous>, transform_indices = @transform_4, window_bounds = array<i64: 32, 1>}, {pipeline_mode = #tpu.pipeline_mode<synchronous>, transform_indices = @transform_5, window_bounds = array<i64: 32, 1>}, {pipeline_mode = #tpu.pipeline_mode<synchronous>, transform_indices = @transform_6, window_bounds = array<i64: 32, 288>}, {pipeline_mode = #tpu.pipeline_mode<synchronous>, transform_indices = @transform_7, window_bounds = array<i64: 32, 1>}, {pipeline_mode = #tpu.pipeline_mode<synchronous>, transform_indices = @transform_8, window_bounds = array<i64: 32, 1>}, {pipeline_mode = #tpu.pipeline_mode<synchronous>, transform_indices = @transform_9, window_bounds = array<i64: 32, 288>}, {pipeline_mode = #tpu.pipeline_mode<synchronous>, transform_indices = @transform_10, window_bounds = array<i64: 9, 1, 64>}, {transform_indices = @transform_11, window_bounds = array<i64: 1, 32, 64>}]} {
    %c0 = arith.constant 0 : index
    %c0_0 = arith.constant 0 : index
    %c0_1 = arith.constant 0 : index
    %0 = vector.load %arg1[%c0, %c0_0, %c0_1] : memref<1x64x16xf32, #tpu.memory_space<vmem>>, vector<1x64x16xf32>
    %1 = vector.shape_cast %0 : vector<1x64x16xf32> to vector<64x16xf32>
    %c0_2 = arith.constant 0 : index
    %c0_3 = arith.constant 0 : index
    %2 = vector.load %arg2[%c0_2, %c0_3] : memref<32x64xbf16, #tpu.memory_space<vmem>>, vector<32x64xbf16>
    %3 = arith.truncf %1 : vector<64x16xf32> to vector<64x16xbf16>
    %cst = arith.constant dense<0.000000e+00> : vector<32x16xf32>
    %4 = tpu.matmul %2, %3, %cst {dimension_numbers = #tpu.dot_dimension_numbers<[1], [0], [0], [1], [0, 0, 1, 1], [], []>} : vector<32x64xbf16>, vector<64x16xbf16>, vector<32x16xf32> -> vector<32x16xf32>
    %5 = arith.truncf %4 : vector<32x16xf32> to vector<32x16xbf16>
    %c0_4 = arith.constant 0 : index
    %c0_5 = arith.constant 0 : index
    %6 = vector.load %arg3[%c0_4, %c0_5] : memref<16x64xbf16, #tpu.memory_space<vmem>>, vector<16x64xbf16>
    %cst_6 = arith.constant dense<0.000000e+00> : vector<32x64xf32>
    %7 = tpu.matmul %5, %6, %cst_6 {dimension_numbers = #tpu.dot_dimension_numbers<[1], [0], [0], [1], [0, 0, 1, 1], [], []>} : vector<32x16xbf16>, vector<16x64xbf16>, vector<32x64xf32> -> vector<32x64xf32>
    %c0_7 = arith.constant 0 : index
    %c0_8 = arith.constant 0 : index
    %8 = vector.load %arg5[%c0_7, %c0_8] : memref<32x1xf32, #tpu.memory_space<vmem>>, vector<32x1xf32>
    %c0_9 = arith.constant 0 : index
    %c0_10 = arith.constant 0 : index
    %9 = vector.load %arg6[%c0_9, %c0_10] : memref<32x1xf32, #tpu.memory_space<vmem>>, vector<32x1xf32>
    %c0_11 = arith.constant 0 : index
    %c0_12 = arith.constant 0 : index
    %10 = vector.load %arg4[%c0_11, %c0_12] : memref<32x32xf32, #tpu.memory_space<vmem>>, vector<32x32xf32>
    %cst_13 = arith.constant dense<0.000000e+00> : vector<32xf32>
    %11 = vector.multi_reduction <add>, %7, %cst_13 [1] : vector<32x64xf32> to vector<32xf32>
    %12 = vector.shape_cast %11 : vector<32xf32> to vector<32x1xf32>
    %cst_14 = arith.constant dense<0.000000e+00> : vector<32x1xf32>
    %13 = tpu.matmul %10, %12, %cst_14 {dimension_numbers = #tpu.dot_dimension_numbers<[1], [0], [0], [1], [0, 0, 1, 1], [], []>} : vector<32x32xf32>, vector<32x1xf32>, vector<32x1xf32> -> vector<32x1xf32>
    %cst_15 = arith.constant 3.906250e-03 : f32
    %14 = vector.broadcast %cst_15 : f32 to vector<32x1xf32>
    %15 = arith.mulf %13, %14 : vector<32x1xf32>
    %16 = vector.broadcast %15 : vector<32x1xf32> to vector<32x64xf32>
    %17 = arith.subf %7, %16 : vector<32x64xf32>
    %18 = arith.mulf %17, %17 : vector<32x64xf32>
    %cst_16 = arith.constant dense<0.000000e+00> : vector<32xf32>
    %19 = vector.multi_reduction <add>, %18, %cst_16 [1] : vector<32x64xf32> to vector<32xf32>
    %20 = vector.shape_cast %19 : vector<32xf32> to vector<32x1xf32>
    %cst_17 = arith.constant dense<0.000000e+00> : vector<32x1xf32>
    %21 = tpu.matmul %10, %20, %cst_17 {dimension_numbers = #tpu.dot_dimension_numbers<[1], [0], [0], [1], [0, 0, 1, 1], [], []>} : vector<32x32xf32>, vector<32x1xf32>, vector<32x1xf32> -> vector<32x1xf32>
    %cst_18 = arith.constant 3.906250e-03 : f32
    %22 = vector.broadcast %cst_18 : f32 to vector<32x1xf32>
    %23 = arith.mulf %21, %22 : vector<32x1xf32>
    %cst_19 = arith.constant 9.99999974E-6 : f32
    %24 = vector.broadcast %cst_19 : f32 to vector<32x1xf32>
    %25 = arith.addf %23, %24 : vector<32x1xf32>
    %26 = math.rsqrt %25 : vector<32x1xf32>
    %27 = arith.mulf %26, %8 : vector<32x1xf32>
    %28 = vector.broadcast %27 : vector<32x1xf32> to vector<32x64xf32>
    %29 = arith.mulf %17, %28 : vector<32x64xf32>
    %30 = vector.broadcast %9 : vector<32x1xf32> to vector<32x64xf32>
    %31 = arith.addf %29, %30 : vector<32x64xf32>
    %cst_20 = arith.constant 0.000000e+00 : f32
    %32 = vector.broadcast %cst_20 : f32 to vector<32x64xf32>
    %33 = arith.maximumf %31, %32 : vector<32x64xf32>
    %34 = vector.extract_strided_slice %33 {offsets = [0, 55], sizes = [32, 9], strides = [1, 1]} : vector<32x64xf32> to vector<32x9xf32>
    %35 = vector.extract_strided_slice %33 {offsets = [0, 0], sizes = [32, 55], strides = [1, 1]} : vector<32x64xf32> to vector<32x55xf32>
    %36 = tpu.concatenate %34, %35 in 1 : vector<32x9xf32>, vector<32x55xf32> -> vector<32x64xf32>
    %c0_21 = arith.constant 0 : index
    %c0_22 = arith.constant 0 : index
    %c0_23 = arith.constant 0 : index
    %37 = vector.load %arg11[%c0_21, %c0_22, %c0_23] : memref<9x1x64xf32, #tpu.memory_space<vmem>>, vector<1x1x64xf32>
    %38 = vector.shape_cast %37 : vector<1x1x64xf32> to vector<1x64xf32>
    %39 = vector.broadcast %38 : vector<1x64xf32> to vector<32x64xf32>
    %40 = arith.mulf %36, %39 : vector<32x64xf32>
    %41 = vector.extract_strided_slice %33 {offsets = [0, 56], sizes = [32, 8], strides = [1, 1]} : vector<32x64xf32> to vector<32x8xf32>
    %42 = vector.extract_strided_slice %33 {offsets = [0, 0], sizes = [32, 56], strides = [1, 1]} : vector<32x64xf32> to vector<32x56xf32>
    %43 = tpu.concatenate %41, %42 in 1 : vector<32x8xf32>, vector<32x56xf32> -> vector<32x64xf32>
    %c1 = arith.constant 1 : index
    %c0_24 = arith.constant 0 : index
    %c0_25 = arith.constant 0 : index
    %44 = vector.load %arg11[%c1, %c0_24, %c0_25] : memref<9x1x64xf32, #tpu.memory_space<vmem>>, vector<1x1x64xf32>
    %45 = vector.shape_cast %44 : vector<1x1x64xf32> to vector<1x64xf32>
    %46 = vector.broadcast %45 : vector<1x64xf32> to vector<32x64xf32>
    %47 = arith.mulf %43, %46 : vector<32x64xf32>
    %48 = vector.extract_strided_slice %33 {offsets = [0, 57], sizes = [32, 7], strides = [1, 1]} : vector<32x64xf32> to vector<32x7xf32>
    %49 = vector.extract_strided_slice %33 {offsets = [0, 0], sizes = [32, 57], strides = [1, 1]} : vector<32x64xf32> to vector<32x57xf32>
    %50 = tpu.concatenate %48, %49 in 1 : vector<32x7xf32>, vector<32x57xf32> -> vector<32x64xf32>
    %c2 = arith.constant 2 : index
    %c0_26 = arith.constant 0 : index
    %c0_27 = arith.constant 0 : index
    %51 = vector.load %arg11[%c2, %c0_26, %c0_27] : memref<9x1x64xf32, #tpu.memory_space<vmem>>, vector<1x1x64xf32>
    %52 = vector.shape_cast %51 : vector<1x1x64xf32> to vector<1x64xf32>
    %53 = vector.broadcast %52 : vector<1x64xf32> to vector<32x64xf32>
    %54 = arith.mulf %50, %53 : vector<32x64xf32>
    %55 = vector.extract_strided_slice %33 {offsets = [0, 63], sizes = [32, 1], strides = [1, 1]} : vector<32x64xf32> to vector<32x1xf32>
    %56 = vector.extract_strided_slice %33 {offsets = [0, 0], sizes = [32, 63], strides = [1, 1]} : vector<32x64xf32> to vector<32x63xf32>
    %57 = tpu.concatenate %55, %56 in 1 : vector<32x1xf32>, vector<32x63xf32> -> vector<32x64xf32>
    %c3 = arith.constant 3 : index
    %c0_28 = arith.constant 0 : index
    %c0_29 = arith.constant 0 : index
    %58 = vector.load %arg11[%c3, %c0_28, %c0_29] : memref<9x1x64xf32, #tpu.memory_space<vmem>>, vector<1x1x64xf32>
    %59 = vector.shape_cast %58 : vector<1x1x64xf32> to vector<1x64xf32>
    %60 = vector.broadcast %59 : vector<1x64xf32> to vector<32x64xf32>
    %61 = arith.mulf %57, %60 : vector<32x64xf32>
    %62 = vector.extract_strided_slice %33 {offsets = [0, 1], sizes = [32, 63], strides = [1, 1]} : vector<32x64xf32> to vector<32x63xf32>
    %63 = vector.extract_strided_slice %33 {offsets = [0, 0], sizes = [32, 1], strides = [1, 1]} : vector<32x64xf32> to vector<32x1xf32>
    %64 = tpu.concatenate %62, %63 in 1 : vector<32x63xf32>, vector<32x1xf32> -> vector<32x64xf32>
    %c5 = arith.constant 5 : index
    %c0_30 = arith.constant 0 : index
    %c0_31 = arith.constant 0 : index
    %65 = vector.load %arg11[%c5, %c0_30, %c0_31] : memref<9x1x64xf32, #tpu.memory_space<vmem>>, vector<1x1x64xf32>
    %66 = vector.shape_cast %65 : vector<1x1x64xf32> to vector<1x64xf32>
    %67 = vector.broadcast %66 : vector<1x64xf32> to vector<32x64xf32>
    %68 = arith.mulf %64, %67 : vector<32x64xf32>
    %69 = vector.extract_strided_slice %33 {offsets = [0, 7], sizes = [32, 57], strides = [1, 1]} : vector<32x64xf32> to vector<32x57xf32>
    %70 = vector.extract_strided_slice %33 {offsets = [0, 0], sizes = [32, 7], strides = [1, 1]} : vector<32x64xf32> to vector<32x7xf32>
    %71 = tpu.concatenate %69, %70 in 1 : vector<32x57xf32>, vector<32x7xf32> -> vector<32x64xf32>
    %c6 = arith.constant 6 : index
    %c0_32 = arith.constant 0 : index
    %c0_33 = arith.constant 0 : index
    %72 = vector.load %arg11[%c6, %c0_32, %c0_33] : memref<9x1x64xf32, #tpu.memory_space<vmem>>, vector<1x1x64xf32>
    %73 = vector.shape_cast %72 : vector<1x1x64xf32> to vector<1x64xf32>
    %74 = vector.broadcast %73 : vector<1x64xf32> to vector<32x64xf32>
    %75 = arith.mulf %71, %74 : vector<32x64xf32>
    %76 = vector.extract_strided_slice %33 {offsets = [0, 8], sizes = [32, 56], strides = [1, 1]} : vector<32x64xf32> to vector<32x56xf32>
    %77 = vector.extract_strided_slice %33 {offsets = [0, 0], sizes = [32, 8], strides = [1, 1]} : vector<32x64xf32> to vector<32x8xf32>
    %78 = tpu.concatenate %76, %77 in 1 : vector<32x56xf32>, vector<32x8xf32> -> vector<32x64xf32>
    %c7 = arith.constant 7 : index
    %c0_34 = arith.constant 0 : index
    %c0_35 = arith.constant 0 : index
    %79 = vector.load %arg11[%c7, %c0_34, %c0_35] : memref<9x1x64xf32, #tpu.memory_space<vmem>>, vector<1x1x64xf32>
    %80 = vector.shape_cast %79 : vector<1x1x64xf32> to vector<1x64xf32>
    %81 = vector.broadcast %80 : vector<1x64xf32> to vector<32x64xf32>
    %82 = arith.mulf %78, %81 : vector<32x64xf32>
    %83 = vector.extract_strided_slice %33 {offsets = [0, 9], sizes = [32, 55], strides = [1, 1]} : vector<32x64xf32> to vector<32x55xf32>
    %84 = vector.extract_strided_slice %33 {offsets = [0, 0], sizes = [32, 9], strides = [1, 1]} : vector<32x64xf32> to vector<32x9xf32>
    %85 = tpu.concatenate %83, %84 in 1 : vector<32x55xf32>, vector<32x9xf32> -> vector<32x64xf32>
    %c8 = arith.constant 8 : index
    %c0_36 = arith.constant 0 : index
    %c0_37 = arith.constant 0 : index
    %86 = vector.load %arg11[%c8, %c0_36, %c0_37] : memref<9x1x64xf32, #tpu.memory_space<vmem>>, vector<1x1x64xf32>
    %87 = vector.shape_cast %86 : vector<1x1x64xf32> to vector<1x64xf32>
    %88 = vector.broadcast %87 : vector<1x64xf32> to vector<32x64xf32>
    %89 = arith.mulf %85, %88 : vector<32x64xf32>
    %90 = tpu.concatenate %40, %47, %54, %61, %33, %68, %75, %82, %89 in 0 : vector<32x64xf32>, vector<32x64xf32>, vector<32x64xf32>, vector<32x64xf32>, vector<32x64xf32>, vector<32x64xf32>, vector<32x64xf32>, vector<32x64xf32>, vector<32x64xf32> -> vector<288x64xf32>
    %91 = arith.truncf %90 : vector<288x64xf32> to vector<288x64xbf16>
    %c0_38 = arith.constant 0 : index
    %c0_39 = arith.constant 0 : index
    %92 = vector.load %arg7[%c0_38, %c0_39] : memref<32x288xbf16, #tpu.memory_space<vmem>>, vector<32x288xbf16>
    %cst_40 = arith.constant dense<0.000000e+00> : vector<32x64xf32>
    %93 = tpu.matmul %92, %91, %cst_40 {dimension_numbers = #tpu.dot_dimension_numbers<[1], [0], [0], [1], [0, 0, 1, 1], [], []>} : vector<32x288xbf16>, vector<288x64xbf16>, vector<32x64xf32> -> vector<32x64xf32>
    %c0_41 = arith.constant 0 : index
    %c0_42 = arith.constant 0 : index
    %94 = vector.load %arg8[%c0_41, %c0_42] : memref<32x1xf32, #tpu.memory_space<vmem>>, vector<32x1xf32>
    %c0_43 = arith.constant 0 : index
    %c0_44 = arith.constant 0 : index
    %95 = vector.load %arg9[%c0_43, %c0_44] : memref<32x1xf32, #tpu.memory_space<vmem>>, vector<32x1xf32>
    %c0_45 = arith.constant 0 : index
    %c0_46 = arith.constant 0 : index
    %96 = vector.load %arg4[%c0_45, %c0_46] : memref<32x32xf32, #tpu.memory_space<vmem>>, vector<32x32xf32>
    %cst_47 = arith.constant dense<0.000000e+00> : vector<32xf32>
    %97 = vector.multi_reduction <add>, %93, %cst_47 [1] : vector<32x64xf32> to vector<32xf32>
    %98 = vector.shape_cast %97 : vector<32xf32> to vector<32x1xf32>
    %cst_48 = arith.constant dense<0.000000e+00> : vector<32x1xf32>
    %99 = tpu.matmul %96, %98, %cst_48 {dimension_numbers = #tpu.dot_dimension_numbers<[1], [0], [0], [1], [0, 0, 1, 1], [], []>} : vector<32x32xf32>, vector<32x1xf32>, vector<32x1xf32> -> vector<32x1xf32>
    %cst_49 = arith.constant 3.906250e-03 : f32
    %100 = vector.broadcast %cst_49 : f32 to vector<32x1xf32>
    %101 = arith.mulf %99, %100 : vector<32x1xf32>
    %102 = vector.broadcast %101 : vector<32x1xf32> to vector<32x64xf32>
    %103 = arith.subf %93, %102 : vector<32x64xf32>
    %104 = arith.mulf %103, %103 : vector<32x64xf32>
    %cst_50 = arith.constant dense<0.000000e+00> : vector<32xf32>
    %105 = vector.multi_reduction <add>, %104, %cst_50 [1] : vector<32x64xf32> to vector<32xf32>
    %106 = vector.shape_cast %105 : vector<32xf32> to vector<32x1xf32>
    %cst_51 = arith.constant dense<0.000000e+00> : vector<32x1xf32>
    %107 = tpu.matmul %96, %106, %cst_51 {dimension_numbers = #tpu.dot_dimension_numbers<[1], [0], [0], [1], [0, 0, 1, 1], [], []>} : vector<32x32xf32>, vector<32x1xf32>, vector<32x1xf32> -> vector<32x1xf32>
    %cst_52 = arith.constant 3.906250e-03 : f32
    %108 = vector.broadcast %cst_52 : f32 to vector<32x1xf32>
    %109 = arith.mulf %107, %108 : vector<32x1xf32>
    %cst_53 = arith.constant 9.99999974E-6 : f32
    %110 = vector.broadcast %cst_53 : f32 to vector<32x1xf32>
    %111 = arith.addf %109, %110 : vector<32x1xf32>
    %112 = math.rsqrt %111 : vector<32x1xf32>
    %113 = arith.mulf %112, %94 : vector<32x1xf32>
    %114 = vector.broadcast %113 : vector<32x1xf32> to vector<32x64xf32>
    %115 = arith.mulf %103, %114 : vector<32x64xf32>
    %116 = vector.broadcast %95 : vector<32x1xf32> to vector<32x64xf32>
    %117 = arith.addf %115, %116 : vector<32x64xf32>
    %cst_54 = arith.constant 0.000000e+00 : f32
    %118 = vector.broadcast %cst_54 : f32 to vector<32x64xf32>
    %119 = arith.maximumf %117, %118 : vector<32x64xf32>
    %120 = vector.extract_strided_slice %119 {offsets = [0, 55], sizes = [32, 9], strides = [1, 1]} : vector<32x64xf32> to vector<32x9xf32>
    %121 = vector.extract_strided_slice %119 {offsets = [0, 0], sizes = [32, 55], strides = [1, 1]} : vector<32x64xf32> to vector<32x55xf32>
    %122 = tpu.concatenate %120, %121 in 1 : vector<32x9xf32>, vector<32x55xf32> -> vector<32x64xf32>
    %c0_55 = arith.constant 0 : index
    %c0_56 = arith.constant 0 : index
    %c0_57 = arith.constant 0 : index
    %123 = vector.load %arg11[%c0_55, %c0_56, %c0_57] : memref<9x1x64xf32, #tpu.memory_space<vmem>>, vector<1x1x64xf32>
    %124 = vector.shape_cast %123 : vector<1x1x64xf32> to vector<1x64xf32>
    %125 = vector.broadcast %124 : vector<1x64xf32> to vector<32x64xf32>
    %126 = arith.mulf %122, %125 : vector<32x64xf32>
    %127 = vector.extract_strided_slice %119 {offsets = [0, 56], sizes = [32, 8], strides = [1, 1]} : vector<32x64xf32> to vector<32x8xf32>
    %128 = vector.extract_strided_slice %119 {offsets = [0, 0], sizes = [32, 56], strides = [1, 1]} : vector<32x64xf32> to vector<32x56xf32>
    %129 = tpu.concatenate %127, %128 in 1 : vector<32x8xf32>, vector<32x56xf32> -> vector<32x64xf32>
    %c1_58 = arith.constant 1 : index
    %c0_59 = arith.constant 0 : index
    %c0_60 = arith.constant 0 : index
    %130 = vector.load %arg11[%c1_58, %c0_59, %c0_60] : memref<9x1x64xf32, #tpu.memory_space<vmem>>, vector<1x1x64xf32>
    %131 = vector.shape_cast %130 : vector<1x1x64xf32> to vector<1x64xf32>
    %132 = vector.broadcast %131 : vector<1x64xf32> to vector<32x64xf32>
    %133 = arith.mulf %129, %132 : vector<32x64xf32>
    %134 = vector.extract_strided_slice %119 {offsets = [0, 57], sizes = [32, 7], strides = [1, 1]} : vector<32x64xf32> to vector<32x7xf32>
    %135 = vector.extract_strided_slice %119 {offsets = [0, 0], sizes = [32, 57], strides = [1, 1]} : vector<32x64xf32> to vector<32x57xf32>
    %136 = tpu.concatenate %134, %135 in 1 : vector<32x7xf32>, vector<32x57xf32> -> vector<32x64xf32>
    %c2_61 = arith.constant 2 : index
    %c0_62 = arith.constant 0 : index
    %c0_63 = arith.constant 0 : index
    %137 = vector.load %arg11[%c2_61, %c0_62, %c0_63] : memref<9x1x64xf32, #tpu.memory_space<vmem>>, vector<1x1x64xf32>
    %138 = vector.shape_cast %137 : vector<1x1x64xf32> to vector<1x64xf32>
    %139 = vector.broadcast %138 : vector<1x64xf32> to vector<32x64xf32>
    %140 = arith.mulf %136, %139 : vector<32x64xf32>
    %141 = vector.extract_strided_slice %119 {offsets = [0, 63], sizes = [32, 1], strides = [1, 1]} : vector<32x64xf32> to vector<32x1xf32>
    %142 = vector.extract_strided_slice %119 {offsets = [0, 0], sizes = [32, 63], strides = [1, 1]} : vector<32x64xf32> to vector<32x63xf32>
    %143 = tpu.concatenate %141, %142 in 1 : vector<32x1xf32>, vector<32x63xf32> -> vector<32x64xf32>
    %c3_64 = arith.constant 3 : index
    %c0_65 = arith.constant 0 : index
    %c0_66 = arith.constant 0 : index
    %144 = vector.load %arg11[%c3_64, %c0_65, %c0_66] : memref<9x1x64xf32, #tpu.memory_space<vmem>>, vector<1x1x64xf32>
    %145 = vector.shape_cast %144 : vector<1x1x64xf32> to vector<1x64xf32>
    %146 = vector.broadcast %145 : vector<1x64xf32> to vector<32x64xf32>
    %147 = arith.mulf %143, %146 : vector<32x64xf32>
    %148 = vector.extract_strided_slice %119 {offsets = [0, 1], sizes = [32, 63], strides = [1, 1]} : vector<32x64xf32> to vector<32x63xf32>
    %149 = vector.extract_strided_slice %119 {offsets = [0, 0], sizes = [32, 1], strides = [1, 1]} : vector<32x64xf32> to vector<32x1xf32>
    %150 = tpu.concatenate %148, %149 in 1 : vector<32x63xf32>, vector<32x1xf32> -> vector<32x64xf32>
    %c5_67 = arith.constant 5 : index
    %c0_68 = arith.constant 0 : index
    %c0_69 = arith.constant 0 : index
    %151 = vector.load %arg11[%c5_67, %c0_68, %c0_69] : memref<9x1x64xf32, #tpu.memory_space<vmem>>, vector<1x1x64xf32>
    %152 = vector.shape_cast %151 : vector<1x1x64xf32> to vector<1x64xf32>
    %153 = vector.broadcast %152 : vector<1x64xf32> to vector<32x64xf32>
    %154 = arith.mulf %150, %153 : vector<32x64xf32>
    %155 = vector.extract_strided_slice %119 {offsets = [0, 7], sizes = [32, 57], strides = [1, 1]} : vector<32x64xf32> to vector<32x57xf32>
    %156 = vector.extract_strided_slice %119 {offsets = [0, 0], sizes = [32, 7], strides = [1, 1]} : vector<32x64xf32> to vector<32x7xf32>
    %157 = tpu.concatenate %155, %156 in 1 : vector<32x57xf32>, vector<32x7xf32> -> vector<32x64xf32>
    %c6_70 = arith.constant 6 : index
    %c0_71 = arith.constant 0 : index
    %c0_72 = arith.constant 0 : index
    %158 = vector.load %arg11[%c6_70, %c0_71, %c0_72] : memref<9x1x64xf32, #tpu.memory_space<vmem>>, vector<1x1x64xf32>
    %159 = vector.shape_cast %158 : vector<1x1x64xf32> to vector<1x64xf32>
    %160 = vector.broadcast %159 : vector<1x64xf32> to vector<32x64xf32>
    %161 = arith.mulf %157, %160 : vector<32x64xf32>
    %162 = vector.extract_strided_slice %119 {offsets = [0, 8], sizes = [32, 56], strides = [1, 1]} : vector<32x64xf32> to vector<32x56xf32>
    %163 = vector.extract_strided_slice %119 {offsets = [0, 0], sizes = [32, 8], strides = [1, 1]} : vector<32x64xf32> to vector<32x8xf32>
    %164 = tpu.concatenate %162, %163 in 1 : vector<32x56xf32>, vector<32x8xf32> -> vector<32x64xf32>
    %c7_73 = arith.constant 7 : index
    %c0_74 = arith.constant 0 : index
    %c0_75 = arith.constant 0 : index
    %165 = vector.load %arg11[%c7_73, %c0_74, %c0_75] : memref<9x1x64xf32, #tpu.memory_space<vmem>>, vector<1x1x64xf32>
    %166 = vector.shape_cast %165 : vector<1x1x64xf32> to vector<1x64xf32>
    %167 = vector.broadcast %166 : vector<1x64xf32> to vector<32x64xf32>
    %168 = arith.mulf %164, %167 : vector<32x64xf32>
    %169 = vector.extract_strided_slice %119 {offsets = [0, 9], sizes = [32, 55], strides = [1, 1]} : vector<32x64xf32> to vector<32x55xf32>
    %170 = vector.extract_strided_slice %119 {offsets = [0, 0], sizes = [32, 9], strides = [1, 1]} : vector<32x64xf32> to vector<32x9xf32>
    %171 = tpu.concatenate %169, %170 in 1 : vector<32x55xf32>, vector<32x9xf32> -> vector<32x64xf32>
    %c8_76 = arith.constant 8 : index
    %c0_77 = arith.constant 0 : index
    %c0_78 = arith.constant 0 : index
    %172 = vector.load %arg11[%c8_76, %c0_77, %c0_78] : memref<9x1x64xf32, #tpu.memory_space<vmem>>, vector<1x1x64xf32>
    %173 = vector.shape_cast %172 : vector<1x1x64xf32> to vector<1x64xf32>
    %174 = vector.broadcast %173 : vector<1x64xf32> to vector<32x64xf32>
    %175 = arith.mulf %171, %174 : vector<32x64xf32>
    %176 = tpu.concatenate %126, %133, %140, %147, %119, %154, %161, %168, %175 in 0 : vector<32x64xf32>, vector<32x64xf32>, vector<32x64xf32>, vector<32x64xf32>, vector<32x64xf32>, vector<32x64xf32>, vector<32x64xf32>, vector<32x64xf32>, vector<32x64xf32> -> vector<288x64xf32>
    %177 = arith.truncf %176 : vector<288x64xf32> to vector<288x64xbf16>
    %c0_79 = arith.constant 0 : index
    %c0_80 = arith.constant 0 : index
    %178 = vector.load %arg10[%c0_79, %c0_80] : memref<32x288xbf16, #tpu.memory_space<vmem>>, vector<32x288xbf16>
    %cst_81 = arith.constant dense<0.000000e+00> : vector<32x64xf32>
    %179 = tpu.matmul %178, %177, %cst_81 {dimension_numbers = #tpu.dot_dimension_numbers<[1], [0], [0], [1], [0, 0, 1, 1], [], []>} : vector<32x288xbf16>, vector<288x64xbf16>, vector<32x64xf32> -> vector<32x64xf32>
    %180 = arith.addf %7, %179 : vector<32x64xf32>
    %c0_82 = arith.constant 0 : index
    %c0_83 = arith.constant 0 : index
    %c0_84 = arith.constant 0 : index
    %181 = vector.load %arg12[%c0_82, %c0_83, %c0_84] : memref<1x32x64xf32, #tpu.memory_space<vmem>>, vector<1x32x64xf32>
    %182 = vector.shape_cast %181 : vector<1x32x64xf32> to vector<32x64xf32>
    %183 = vector.shape_cast %180 : vector<32x64xf32> to vector<1x32x64xf32>
    tpu.vector_store %arg12[%c0_82, %c0_83, %c0_84], %183 {strides = array<i32>} : memref<1x32x64xf32, #tpu.memory_space<vmem>>, vector<1x32x64xf32>,
    return
  }
  func.func @transform_0(%arg0: i32) -> (i32, i32, i32) {
    %c0_i32 = arith.constant 0 : i32
    %c0_i32_0 = arith.constant 0 : i32
    %c0_i32_1 = arith.constant 0 : i32
    return %arg0, %c0_i32, %c0_i32_0 : i32, i32, i32
  }
  func.func @transform_1(%arg0: i32) -> (i32, i32) {
    %c0_i32 = arith.constant 0 : i32
    %c0_i32_0 = arith.constant 0 : i32
    %c0_i32_1 = arith.constant 0 : i32
    return %c0_i32, %c0_i32_0 : i32, i32
  }
  func.func @transform_2(%arg0: i32) -> (i32, i32) {
    %c0_i32 = arith.constant 0 : i32
    %c0_i32_0 = arith.constant 0 : i32
    %c0_i32_1 = arith.constant 0 : i32
    return %c0_i32, %c0_i32_0 : i32, i32
  }
  func.func @transform_3(%arg0: i32) -> (i32, i32) {
    %c0_i32 = arith.constant 0 : i32
    %c0_i32_0 = arith.constant 0 : i32
    %c0_i32_1 = arith.constant 0 : i32
    return %c0_i32, %c0_i32_0 : i32, i32
  }
  func.func @transform_4(%arg0: i32) -> (i32, i32) {
    %c0_i32 = arith.constant 0 : i32
    %c0_i32_0 = arith.constant 0 : i32
    %c0_i32_1 = arith.constant 0 : i32
    return %c0_i32, %c0_i32_0 : i32, i32
  }
  func.func @transform_5(%arg0: i32) -> (i32, i32) {
    %c0_i32 = arith.constant 0 : i32
    %c0_i32_0 = arith.constant 0 : i32
    %c0_i32_1 = arith.constant 0 : i32
    return %c0_i32, %c0_i32_0 : i32, i32
  }
  func.func @transform_6(%arg0: i32) -> (i32, i32) {
    %c0_i32 = arith.constant 0 : i32
    %c0_i32_0 = arith.constant 0 : i32
    %c0_i32_1 = arith.constant 0 : i32
    return %c0_i32, %c0_i32_0 : i32, i32
  }
  func.func @transform_7(%arg0: i32) -> (i32, i32) {
    %c0_i32 = arith.constant 0 : i32
    %c0_i32_0 = arith.constant 0 : i32
    %c0_i32_1 = arith.constant 0 : i32
    return %c0_i32, %c0_i32_0 : i32, i32
  }
  func.func @transform_8(%arg0: i32) -> (i32, i32) {
    %c0_i32 = arith.constant 0 : i32
    %c0_i32_0 = arith.constant 0 : i32
    %c0_i32_1 = arith.constant 0 : i32
    return %c0_i32, %c0_i32_0 : i32, i32
  }
  func.func @transform_9(%arg0: i32) -> (i32, i32) {
    %c0_i32 = arith.constant 0 : i32
    %c0_i32_0 = arith.constant 0 : i32
    %c0_i32_1 = arith.constant 0 : i32
    return %c0_i32, %c0_i32_0 : i32, i32
  }
  func.func @transform_10(%arg0: i32) -> (i32, i32, i32) {
    %c0_i32 = arith.constant 0 : i32
    %c0_i32_0 = arith.constant 0 : i32
    %c0_i32_1 = arith.constant 0 : i32
    %c0_i32_2 = arith.constant 0 : i32
    return %c0_i32, %c0_i32_0, %c0_i32_1 : i32, i32, i32
  }
  func.func @transform_11(%arg0: i32) -> (i32, i32, i32) {
    %c0_i32 = arith.constant 0 : i32
    %c0_i32_0 = arith.constant 0 : i32
    %c0_i32_1 = arith.constant 0 : i32
    return %arg0, %c0_i32, %c0_i32_0 : i32, i32, i32
  }
}

module attributes {stable_mosaic.version = 11 : i64} {
  func.func @_upres_kernel(%arg0: i32, %arg1: memref<1x32x64xf32, #tpu.memory_space<vmem>>, %arg2: memref<16x32xbf16, #tpu.memory_space<vmem>>, %arg3: memref<64x256xbf16, #tpu.memory_space<vmem>>, %arg4: memref<16x16xf32, #tpu.memory_space<vmem>>, %arg5: memref<16x1xf32, #tpu.memory_space<vmem>>, %arg6: memref<16x1xf32, #tpu.memory_space<vmem>>, %arg7: memref<16x144xbf16, #tpu.memory_space<vmem>>, %arg8: memref<16x1xf32, #tpu.memory_space<vmem>>, %arg9: memref<16x1xf32, #tpu.memory_space<vmem>>, %arg10: memref<16x144xbf16, #tpu.memory_space<vmem>>, %arg11: memref<9x1x256xf32, #tpu.memory_space<vmem>>, %arg12: memref<1x16x256xf32, #tpu.memory_space<vmem>>) attributes {dimension_semantics = [#tpu.dimension_semantics<parallel>], iteration_bounds = array<i64: 2>, scalar_prefetch = 0 : i64, scratch_operands = 0 : i64, tpu.core_type = #tpu.core_type<tc>, window_params = [{transform_indices = @transform_0, window_bounds = array<i64: 1, 32, 64>}, {pipeline_mode = #tpu.pipeline_mode<synchronous>, transform_indices = @transform_1, window_bounds = array<i64: 16, 32>}, {pipeline_mode = #tpu.pipeline_mode<synchronous>, transform_indices = @transform_2, window_bounds = array<i64: 64, 256>}, {pipeline_mode = #tpu.pipeline_mode<synchronous>, transform_indices = @transform_3, window_bounds = array<i64: 16, 16>}, {pipeline_mode = #tpu.pipeline_mode<synchronous>, transform_indices = @transform_4, window_bounds = array<i64: 16, 1>}, {pipeline_mode = #tpu.pipeline_mode<synchronous>, transform_indices = @transform_5, window_bounds = array<i64: 16, 1>}, {pipeline_mode = #tpu.pipeline_mode<synchronous>, transform_indices = @transform_6, window_bounds = array<i64: 16, 144>}, {pipeline_mode = #tpu.pipeline_mode<synchronous>, transform_indices = @transform_7, window_bounds = array<i64: 16, 1>}, {pipeline_mode = #tpu.pipeline_mode<synchronous>, transform_indices = @transform_8, window_bounds = array<i64: 16, 1>}, {pipeline_mode = #tpu.pipeline_mode<synchronous>, transform_indices = @transform_9, window_bounds = array<i64: 16, 144>}, {pipeline_mode = #tpu.pipeline_mode<synchronous>, transform_indices = @transform_10, window_bounds = array<i64: 9, 1, 256>}, {transform_indices = @transform_11, window_bounds = array<i64: 1, 16, 256>}]} {
    %c0 = arith.constant 0 : index
    %c0_0 = arith.constant 0 : index
    %c0_1 = arith.constant 0 : index
    %0 = vector.load %arg1[%c0, %c0_0, %c0_1] : memref<1x32x64xf32, #tpu.memory_space<vmem>>, vector<1x32x64xf32>
    %1 = vector.shape_cast %0 : vector<1x32x64xf32> to vector<32x64xf32>
    %c0_2 = arith.constant 0 : index
    %c0_3 = arith.constant 0 : index
    %2 = vector.load %arg2[%c0_2, %c0_3] : memref<16x32xbf16, #tpu.memory_space<vmem>>, vector<16x32xbf16>
    %3 = arith.truncf %1 : vector<32x64xf32> to vector<32x64xbf16>
    %cst = arith.constant dense<0.000000e+00> : vector<16x64xf32>
    %4 = tpu.matmul %2, %3, %cst {dimension_numbers = #tpu.dot_dimension_numbers<[1], [0], [0], [1], [0, 0, 1, 1], [], []>} : vector<16x32xbf16>, vector<32x64xbf16>, vector<16x64xf32> -> vector<16x64xf32>
    %5 = arith.truncf %4 : vector<16x64xf32> to vector<16x64xbf16>
    %c0_4 = arith.constant 0 : index
    %c0_5 = arith.constant 0 : index
    %6 = vector.load %arg3[%c0_4, %c0_5] : memref<64x256xbf16, #tpu.memory_space<vmem>>, vector<64x256xbf16>
    %cst_6 = arith.constant dense<0.000000e+00> : vector<16x256xf32>
    %7 = tpu.matmul %5, %6, %cst_6 {dimension_numbers = #tpu.dot_dimension_numbers<[1], [0], [0], [1], [0, 0, 1, 1], [], []>} : vector<16x64xbf16>, vector<64x256xbf16>, vector<16x256xf32> -> vector<16x256xf32>
    %c0_7 = arith.constant 0 : index
    %c0_8 = arith.constant 0 : index
    %8 = vector.load %arg5[%c0_7, %c0_8] : memref<16x1xf32, #tpu.memory_space<vmem>>, vector<16x1xf32>
    %c0_9 = arith.constant 0 : index
    %c0_10 = arith.constant 0 : index
    %9 = vector.load %arg6[%c0_9, %c0_10] : memref<16x1xf32, #tpu.memory_space<vmem>>, vector<16x1xf32>
    %c0_11 = arith.constant 0 : index
    %c0_12 = arith.constant 0 : index
    %10 = vector.load %arg4[%c0_11, %c0_12] : memref<16x16xf32, #tpu.memory_space<vmem>>, vector<16x16xf32>
    %cst_13 = arith.constant dense<0.000000e+00> : vector<16xf32>
    %11 = vector.multi_reduction <add>, %7, %cst_13 [1] : vector<16x256xf32> to vector<16xf32>
    %12 = vector.shape_cast %11 : vector<16xf32> to vector<16x1xf32>
    %cst_14 = arith.constant dense<0.000000e+00> : vector<16x1xf32>
    %13 = tpu.matmul %10, %12, %cst_14 {dimension_numbers = #tpu.dot_dimension_numbers<[1], [0], [0], [1], [0, 0, 1, 1], [], []>} : vector<16x16xf32>, vector<16x1xf32>, vector<16x1xf32> -> vector<16x1xf32>
    %cst_15 = arith.constant 0.001953125 : f32
    %14 = vector.broadcast %cst_15 : f32 to vector<16x1xf32>
    %15 = arith.mulf %13, %14 : vector<16x1xf32>
    %16 = vector.broadcast %15 : vector<16x1xf32> to vector<16x256xf32>
    %17 = arith.subf %7, %16 : vector<16x256xf32>
    %18 = arith.mulf %17, %17 : vector<16x256xf32>
    %cst_16 = arith.constant dense<0.000000e+00> : vector<16xf32>
    %19 = vector.multi_reduction <add>, %18, %cst_16 [1] : vector<16x256xf32> to vector<16xf32>
    %20 = vector.shape_cast %19 : vector<16xf32> to vector<16x1xf32>
    %cst_17 = arith.constant dense<0.000000e+00> : vector<16x1xf32>
    %21 = tpu.matmul %10, %20, %cst_17 {dimension_numbers = #tpu.dot_dimension_numbers<[1], [0], [0], [1], [0, 0, 1, 1], [], []>} : vector<16x16xf32>, vector<16x1xf32>, vector<16x1xf32> -> vector<16x1xf32>
    %cst_18 = arith.constant 0.001953125 : f32
    %22 = vector.broadcast %cst_18 : f32 to vector<16x1xf32>
    %23 = arith.mulf %21, %22 : vector<16x1xf32>
    %cst_19 = arith.constant 9.99999974E-6 : f32
    %24 = vector.broadcast %cst_19 : f32 to vector<16x1xf32>
    %25 = arith.addf %23, %24 : vector<16x1xf32>
    %26 = math.rsqrt %25 : vector<16x1xf32>
    %27 = arith.mulf %26, %8 : vector<16x1xf32>
    %28 = vector.broadcast %27 : vector<16x1xf32> to vector<16x256xf32>
    %29 = arith.mulf %17, %28 : vector<16x256xf32>
    %30 = vector.broadcast %9 : vector<16x1xf32> to vector<16x256xf32>
    %31 = arith.addf %29, %30 : vector<16x256xf32>
    %cst_20 = arith.constant 0.000000e+00 : f32
    %32 = vector.broadcast %cst_20 : f32 to vector<16x256xf32>
    %33 = arith.maximumf %31, %32 : vector<16x256xf32>
    %c17_i32 = arith.constant 17 : i32
    %34 = tpu.dynamic_rotate %33 by %c17_i32 dim 1 : vector<16x256xf32>, i32 -> vector<16x256xf32>
    %c0_21 = arith.constant 0 : index
    %c0_22 = arith.constant 0 : index
    %c0_23 = arith.constant 0 : index
    %35 = vector.load %arg11[%c0_21, %c0_22, %c0_23] : memref<9x1x256xf32, #tpu.memory_space<vmem>>, vector<1x1x256xf32>
    %36 = vector.shape_cast %35 : vector<1x1x256xf32> to vector<1x256xf32>
    %37 = vector.broadcast %36 : vector<1x256xf32> to vector<16x256xf32>
    %38 = arith.mulf %34, %37 : vector<16x256xf32>
    %c16_i32 = arith.constant 16 : i32
    %39 = tpu.dynamic_rotate %33 by %c16_i32 dim 1 : vector<16x256xf32>, i32 -> vector<16x256xf32>
    %c1 = arith.constant 1 : index
    %c0_24 = arith.constant 0 : index
    %c0_25 = arith.constant 0 : index
    %40 = vector.load %arg11[%c1, %c0_24, %c0_25] : memref<9x1x256xf32, #tpu.memory_space<vmem>>, vector<1x1x256xf32>
    %41 = vector.shape_cast %40 : vector<1x1x256xf32> to vector<1x256xf32>
    %42 = vector.broadcast %41 : vector<1x256xf32> to vector<16x256xf32>
    %43 = arith.mulf %39, %42 : vector<16x256xf32>
    %c15_i32 = arith.constant 15 : i32
    %44 = tpu.dynamic_rotate %33 by %c15_i32 dim 1 : vector<16x256xf32>, i32 -> vector<16x256xf32>
    %c2 = arith.constant 2 : index
    %c0_26 = arith.constant 0 : index
    %c0_27 = arith.constant 0 : index
    %45 = vector.load %arg11[%c2, %c0_26, %c0_27] : memref<9x1x256xf32, #tpu.memory_space<vmem>>, vector<1x1x256xf32>
    %46 = vector.shape_cast %45 : vector<1x1x256xf32> to vector<1x256xf32>
    %47 = vector.broadcast %46 : vector<1x256xf32> to vector<16x256xf32>
    %48 = arith.mulf %44, %47 : vector<16x256xf32>
    %c1_i32 = arith.constant 1 : i32
    %49 = tpu.dynamic_rotate %33 by %c1_i32 dim 1 : vector<16x256xf32>, i32 -> vector<16x256xf32>
    %c3 = arith.constant 3 : index
    %c0_28 = arith.constant 0 : index
    %c0_29 = arith.constant 0 : index
    %50 = vector.load %arg11[%c3, %c0_28, %c0_29] : memref<9x1x256xf32, #tpu.memory_space<vmem>>, vector<1x1x256xf32>
    %51 = vector.shape_cast %50 : vector<1x1x256xf32> to vector<1x256xf32>
    %52 = vector.broadcast %51 : vector<1x256xf32> to vector<16x256xf32>
    %53 = arith.mulf %49, %52 : vector<16x256xf32>
    %c255_i32 = arith.constant 255 : i32
    %54 = tpu.dynamic_rotate %33 by %c255_i32 dim 1 : vector<16x256xf32>, i32 -> vector<16x256xf32>
    %c5 = arith.constant 5 : index
    %c0_30 = arith.constant 0 : index
    %c0_31 = arith.constant 0 : index
    %55 = vector.load %arg11[%c5, %c0_30, %c0_31] : memref<9x1x256xf32, #tpu.memory_space<vmem>>, vector<1x1x256xf32>
    %56 = vector.shape_cast %55 : vector<1x1x256xf32> to vector<1x256xf32>
    %57 = vector.broadcast %56 : vector<1x256xf32> to vector<16x256xf32>
    %58 = arith.mulf %54, %57 : vector<16x256xf32>
    %c241_i32 = arith.constant 241 : i32
    %59 = tpu.dynamic_rotate %33 by %c241_i32 dim 1 : vector<16x256xf32>, i32 -> vector<16x256xf32>
    %c6 = arith.constant 6 : index
    %c0_32 = arith.constant 0 : index
    %c0_33 = arith.constant 0 : index
    %60 = vector.load %arg11[%c6, %c0_32, %c0_33] : memref<9x1x256xf32, #tpu.memory_space<vmem>>, vector<1x1x256xf32>
    %61 = vector.shape_cast %60 : vector<1x1x256xf32> to vector<1x256xf32>
    %62 = vector.broadcast %61 : vector<1x256xf32> to vector<16x256xf32>
    %63 = arith.mulf %59, %62 : vector<16x256xf32>
    %c240_i32 = arith.constant 240 : i32
    %64 = tpu.dynamic_rotate %33 by %c240_i32 dim 1 : vector<16x256xf32>, i32 -> vector<16x256xf32>
    %c7 = arith.constant 7 : index
    %c0_34 = arith.constant 0 : index
    %c0_35 = arith.constant 0 : index
    %65 = vector.load %arg11[%c7, %c0_34, %c0_35] : memref<9x1x256xf32, #tpu.memory_space<vmem>>, vector<1x1x256xf32>
    %66 = vector.shape_cast %65 : vector<1x1x256xf32> to vector<1x256xf32>
    %67 = vector.broadcast %66 : vector<1x256xf32> to vector<16x256xf32>
    %68 = arith.mulf %64, %67 : vector<16x256xf32>
    %c239_i32 = arith.constant 239 : i32
    %69 = tpu.dynamic_rotate %33 by %c239_i32 dim 1 : vector<16x256xf32>, i32 -> vector<16x256xf32>
    %c8 = arith.constant 8 : index
    %c0_36 = arith.constant 0 : index
    %c0_37 = arith.constant 0 : index
    %70 = vector.load %arg11[%c8, %c0_36, %c0_37] : memref<9x1x256xf32, #tpu.memory_space<vmem>>, vector<1x1x256xf32>
    %71 = vector.shape_cast %70 : vector<1x1x256xf32> to vector<1x256xf32>
    %72 = vector.broadcast %71 : vector<1x256xf32> to vector<16x256xf32>
    %73 = arith.mulf %69, %72 : vector<16x256xf32>
    %74 = tpu.concatenate %38, %43, %48, %53, %33, %58, %63, %68, %73 in 0 : vector<16x256xf32>, vector<16x256xf32>, vector<16x256xf32>, vector<16x256xf32>, vector<16x256xf32>, vector<16x256xf32>, vector<16x256xf32>, vector<16x256xf32>, vector<16x256xf32> -> vector<144x256xf32>
    %75 = arith.truncf %74 : vector<144x256xf32> to vector<144x256xbf16>
    %c0_38 = arith.constant 0 : index
    %c0_39 = arith.constant 0 : index
    %76 = vector.load %arg7[%c0_38, %c0_39] : memref<16x144xbf16, #tpu.memory_space<vmem>>, vector<16x144xbf16>
    %cst_40 = arith.constant dense<0.000000e+00> : vector<16x256xf32>
    %77 = tpu.matmul %76, %75, %cst_40 {dimension_numbers = #tpu.dot_dimension_numbers<[1], [0], [0], [1], [0, 0, 1, 1], [], []>} : vector<16x144xbf16>, vector<144x256xbf16>, vector<16x256xf32> -> vector<16x256xf32>
    %c0_41 = arith.constant 0 : index
    %c0_42 = arith.constant 0 : index
    %78 = vector.load %arg8[%c0_41, %c0_42] : memref<16x1xf32, #tpu.memory_space<vmem>>, vector<16x1xf32>
    %c0_43 = arith.constant 0 : index
    %c0_44 = arith.constant 0 : index
    %79 = vector.load %arg9[%c0_43, %c0_44] : memref<16x1xf32, #tpu.memory_space<vmem>>, vector<16x1xf32>
    %c0_45 = arith.constant 0 : index
    %c0_46 = arith.constant 0 : index
    %80 = vector.load %arg4[%c0_45, %c0_46] : memref<16x16xf32, #tpu.memory_space<vmem>>, vector<16x16xf32>
    %cst_47 = arith.constant dense<0.000000e+00> : vector<16xf32>
    %81 = vector.multi_reduction <add>, %77, %cst_47 [1] : vector<16x256xf32> to vector<16xf32>
    %82 = vector.shape_cast %81 : vector<16xf32> to vector<16x1xf32>
    %cst_48 = arith.constant dense<0.000000e+00> : vector<16x1xf32>
    %83 = tpu.matmul %80, %82, %cst_48 {dimension_numbers = #tpu.dot_dimension_numbers<[1], [0], [0], [1], [0, 0, 1, 1], [], []>} : vector<16x16xf32>, vector<16x1xf32>, vector<16x1xf32> -> vector<16x1xf32>
    %cst_49 = arith.constant 0.001953125 : f32
    %84 = vector.broadcast %cst_49 : f32 to vector<16x1xf32>
    %85 = arith.mulf %83, %84 : vector<16x1xf32>
    %86 = vector.broadcast %85 : vector<16x1xf32> to vector<16x256xf32>
    %87 = arith.subf %77, %86 : vector<16x256xf32>
    %88 = arith.mulf %87, %87 : vector<16x256xf32>
    %cst_50 = arith.constant dense<0.000000e+00> : vector<16xf32>
    %89 = vector.multi_reduction <add>, %88, %cst_50 [1] : vector<16x256xf32> to vector<16xf32>
    %90 = vector.shape_cast %89 : vector<16xf32> to vector<16x1xf32>
    %cst_51 = arith.constant dense<0.000000e+00> : vector<16x1xf32>
    %91 = tpu.matmul %80, %90, %cst_51 {dimension_numbers = #tpu.dot_dimension_numbers<[1], [0], [0], [1], [0, 0, 1, 1], [], []>} : vector<16x16xf32>, vector<16x1xf32>, vector<16x1xf32> -> vector<16x1xf32>
    %cst_52 = arith.constant 0.001953125 : f32
    %92 = vector.broadcast %cst_52 : f32 to vector<16x1xf32>
    %93 = arith.mulf %91, %92 : vector<16x1xf32>
    %cst_53 = arith.constant 9.99999974E-6 : f32
    %94 = vector.broadcast %cst_53 : f32 to vector<16x1xf32>
    %95 = arith.addf %93, %94 : vector<16x1xf32>
    %96 = math.rsqrt %95 : vector<16x1xf32>
    %97 = arith.mulf %96, %78 : vector<16x1xf32>
    %98 = vector.broadcast %97 : vector<16x1xf32> to vector<16x256xf32>
    %99 = arith.mulf %87, %98 : vector<16x256xf32>
    %100 = vector.broadcast %79 : vector<16x1xf32> to vector<16x256xf32>
    %101 = arith.addf %99, %100 : vector<16x256xf32>
    %cst_54 = arith.constant 0.000000e+00 : f32
    %102 = vector.broadcast %cst_54 : f32 to vector<16x256xf32>
    %103 = arith.maximumf %101, %102 : vector<16x256xf32>
    %c17_i32_55 = arith.constant 17 : i32
    %104 = tpu.dynamic_rotate %103 by %c17_i32_55 dim 1 : vector<16x256xf32>, i32 -> vector<16x256xf32>
    %c0_56 = arith.constant 0 : index
    %c0_57 = arith.constant 0 : index
    %c0_58 = arith.constant 0 : index
    %105 = vector.load %arg11[%c0_56, %c0_57, %c0_58] : memref<9x1x256xf32, #tpu.memory_space<vmem>>, vector<1x1x256xf32>
    %106 = vector.shape_cast %105 : vector<1x1x256xf32> to vector<1x256xf32>
    %107 = vector.broadcast %106 : vector<1x256xf32> to vector<16x256xf32>
    %108 = arith.mulf %104, %107 : vector<16x256xf32>
    %c16_i32_59 = arith.constant 16 : i32
    %109 = tpu.dynamic_rotate %103 by %c16_i32_59 dim 1 : vector<16x256xf32>, i32 -> vector<16x256xf32>
    %c1_60 = arith.constant 1 : index
    %c0_61 = arith.constant 0 : index
    %c0_62 = arith.constant 0 : index
    %110 = vector.load %arg11[%c1_60, %c0_61, %c0_62] : memref<9x1x256xf32, #tpu.memory_space<vmem>>, vector<1x1x256xf32>
    %111 = vector.shape_cast %110 : vector<1x1x256xf32> to vector<1x256xf32>
    %112 = vector.broadcast %111 : vector<1x256xf32> to vector<16x256xf32>
    %113 = arith.mulf %109, %112 : vector<16x256xf32>
    %c15_i32_63 = arith.constant 15 : i32
    %114 = tpu.dynamic_rotate %103 by %c15_i32_63 dim 1 : vector<16x256xf32>, i32 -> vector<16x256xf32>
    %c2_64 = arith.constant 2 : index
    %c0_65 = arith.constant 0 : index
    %c0_66 = arith.constant 0 : index
    %115 = vector.load %arg11[%c2_64, %c0_65, %c0_66] : memref<9x1x256xf32, #tpu.memory_space<vmem>>, vector<1x1x256xf32>
    %116 = vector.shape_cast %115 : vector<1x1x256xf32> to vector<1x256xf32>
    %117 = vector.broadcast %116 : vector<1x256xf32> to vector<16x256xf32>
    %118 = arith.mulf %114, %117 : vector<16x256xf32>
    %c1_i32_67 = arith.constant 1 : i32
    %119 = tpu.dynamic_rotate %103 by %c1_i32_67 dim 1 : vector<16x256xf32>, i32 -> vector<16x256xf32>
    %c3_68 = arith.constant 3 : index
    %c0_69 = arith.constant 0 : index
    %c0_70 = arith.constant 0 : index
    %120 = vector.load %arg11[%c3_68, %c0_69, %c0_70] : memref<9x1x256xf32, #tpu.memory_space<vmem>>, vector<1x1x256xf32>
    %121 = vector.shape_cast %120 : vector<1x1x256xf32> to vector<1x256xf32>
    %122 = vector.broadcast %121 : vector<1x256xf32> to vector<16x256xf32>
    %123 = arith.mulf %119, %122 : vector<16x256xf32>
    %c255_i32_71 = arith.constant 255 : i32
    %124 = tpu.dynamic_rotate %103 by %c255_i32_71 dim 1 : vector<16x256xf32>, i32 -> vector<16x256xf32>
    %c5_72 = arith.constant 5 : index
    %c0_73 = arith.constant 0 : index
    %c0_74 = arith.constant 0 : index
    %125 = vector.load %arg11[%c5_72, %c0_73, %c0_74] : memref<9x1x256xf32, #tpu.memory_space<vmem>>, vector<1x1x256xf32>
    %126 = vector.shape_cast %125 : vector<1x1x256xf32> to vector<1x256xf32>
    %127 = vector.broadcast %126 : vector<1x256xf32> to vector<16x256xf32>
    %128 = arith.mulf %124, %127 : vector<16x256xf32>
    %c241_i32_75 = arith.constant 241 : i32
    %129 = tpu.dynamic_rotate %103 by %c241_i32_75 dim 1 : vector<16x256xf32>, i32 -> vector<16x256xf32>
    %c6_76 = arith.constant 6 : index
    %c0_77 = arith.constant 0 : index
    %c0_78 = arith.constant 0 : index
    %130 = vector.load %arg11[%c6_76, %c0_77, %c0_78] : memref<9x1x256xf32, #tpu.memory_space<vmem>>, vector<1x1x256xf32>
    %131 = vector.shape_cast %130 : vector<1x1x256xf32> to vector<1x256xf32>
    %132 = vector.broadcast %131 : vector<1x256xf32> to vector<16x256xf32>
    %133 = arith.mulf %129, %132 : vector<16x256xf32>
    %c240_i32_79 = arith.constant 240 : i32
    %134 = tpu.dynamic_rotate %103 by %c240_i32_79 dim 1 : vector<16x256xf32>, i32 -> vector<16x256xf32>
    %c7_80 = arith.constant 7 : index
    %c0_81 = arith.constant 0 : index
    %c0_82 = arith.constant 0 : index
    %135 = vector.load %arg11[%c7_80, %c0_81, %c0_82] : memref<9x1x256xf32, #tpu.memory_space<vmem>>, vector<1x1x256xf32>
    %136 = vector.shape_cast %135 : vector<1x1x256xf32> to vector<1x256xf32>
    %137 = vector.broadcast %136 : vector<1x256xf32> to vector<16x256xf32>
    %138 = arith.mulf %134, %137 : vector<16x256xf32>
    %c239_i32_83 = arith.constant 239 : i32
    %139 = tpu.dynamic_rotate %103 by %c239_i32_83 dim 1 : vector<16x256xf32>, i32 -> vector<16x256xf32>
    %c8_84 = arith.constant 8 : index
    %c0_85 = arith.constant 0 : index
    %c0_86 = arith.constant 0 : index
    %140 = vector.load %arg11[%c8_84, %c0_85, %c0_86] : memref<9x1x256xf32, #tpu.memory_space<vmem>>, vector<1x1x256xf32>
    %141 = vector.shape_cast %140 : vector<1x1x256xf32> to vector<1x256xf32>
    %142 = vector.broadcast %141 : vector<1x256xf32> to vector<16x256xf32>
    %143 = arith.mulf %139, %142 : vector<16x256xf32>
    %144 = tpu.concatenate %108, %113, %118, %123, %103, %128, %133, %138, %143 in 0 : vector<16x256xf32>, vector<16x256xf32>, vector<16x256xf32>, vector<16x256xf32>, vector<16x256xf32>, vector<16x256xf32>, vector<16x256xf32>, vector<16x256xf32>, vector<16x256xf32> -> vector<144x256xf32>
    %145 = arith.truncf %144 : vector<144x256xf32> to vector<144x256xbf16>
    %c0_87 = arith.constant 0 : index
    %c0_88 = arith.constant 0 : index
    %146 = vector.load %arg10[%c0_87, %c0_88] : memref<16x144xbf16, #tpu.memory_space<vmem>>, vector<16x144xbf16>
    %cst_89 = arith.constant dense<0.000000e+00> : vector<16x256xf32>
    %147 = tpu.matmul %146, %145, %cst_89 {dimension_numbers = #tpu.dot_dimension_numbers<[1], [0], [0], [1], [0, 0, 1, 1], [], []>} : vector<16x144xbf16>, vector<144x256xbf16>, vector<16x256xf32> -> vector<16x256xf32>
    %148 = arith.addf %7, %147 : vector<16x256xf32>
    %c0_90 = arith.constant 0 : index
    %c0_91 = arith.constant 0 : index
    %c0_92 = arith.constant 0 : index
    %149 = vector.load %arg12[%c0_90, %c0_91, %c0_92] : memref<1x16x256xf32, #tpu.memory_space<vmem>>, vector<1x16x256xf32>
    %150 = vector.shape_cast %149 : vector<1x16x256xf32> to vector<16x256xf32>
    %151 = vector.shape_cast %148 : vector<16x256xf32> to vector<1x16x256xf32>
    tpu.vector_store %arg12[%c0_90, %c0_91, %c0_92], %151 {strides = array<i32>} : memref<1x16x256xf32, #tpu.memory_space<vmem>>, vector<1x16x256xf32>,
    return
  }
  func.func @transform_0(%arg0: i32) -> (i32, i32, i32) {
    %c0_i32 = arith.constant 0 : i32
    %c0_i32_0 = arith.constant 0 : i32
    %c0_i32_1 = arith.constant 0 : i32
    return %arg0, %c0_i32, %c0_i32_0 : i32, i32, i32
  }
  func.func @transform_1(%arg0: i32) -> (i32, i32) {
    %c0_i32 = arith.constant 0 : i32
    %c0_i32_0 = arith.constant 0 : i32
    %c0_i32_1 = arith.constant 0 : i32
    return %c0_i32, %c0_i32_0 : i32, i32
  }
  func.func @transform_2(%arg0: i32) -> (i32, i32) {
    %c0_i32 = arith.constant 0 : i32
    %c0_i32_0 = arith.constant 0 : i32
    %c0_i32_1 = arith.constant 0 : i32
    return %c0_i32, %c0_i32_0 : i32, i32
  }
  func.func @transform_3(%arg0: i32) -> (i32, i32) {
    %c0_i32 = arith.constant 0 : i32
    %c0_i32_0 = arith.constant 0 : i32
    %c0_i32_1 = arith.constant 0 : i32
    return %c0_i32, %c0_i32_0 : i32, i32
  }
  func.func @transform_4(%arg0: i32) -> (i32, i32) {
    %c0_i32 = arith.constant 0 : i32
    %c0_i32_0 = arith.constant 0 : i32
    %c0_i32_1 = arith.constant 0 : i32
    return %c0_i32, %c0_i32_0 : i32, i32
  }
  func.func @transform_5(%arg0: i32) -> (i32, i32) {
    %c0_i32 = arith.constant 0 : i32
    %c0_i32_0 = arith.constant 0 : i32
    %c0_i32_1 = arith.constant 0 : i32
    return %c0_i32, %c0_i32_0 : i32, i32
  }
  func.func @transform_6(%arg0: i32) -> (i32, i32) {
    %c0_i32 = arith.constant 0 : i32
    %c0_i32_0 = arith.constant 0 : i32
    %c0_i32_1 = arith.constant 0 : i32
    return %c0_i32, %c0_i32_0 : i32, i32
  }
  func.func @transform_7(%arg0: i32) -> (i32, i32) {
    %c0_i32 = arith.constant 0 : i32
    %c0_i32_0 = arith.constant 0 : i32
    %c0_i32_1 = arith.constant 0 : i32
    return %c0_i32, %c0_i32_0 : i32, i32
  }
  func.func @transform_8(%arg0: i32) -> (i32, i32) {
    %c0_i32 = arith.constant 0 : i32
    %c0_i32_0 = arith.constant 0 : i32
    %c0_i32_1 = arith.constant 0 : i32
    return %c0_i32, %c0_i32_0 : i32, i32
  }
  func.func @transform_9(%arg0: i32) -> (i32, i32) {
    %c0_i32 = arith.constant 0 : i32
    %c0_i32_0 = arith.constant 0 : i32
    %c0_i32_1 = arith.constant 0 : i32
    return %c0_i32, %c0_i32_0 : i32, i32
  }
  func.func @transform_10(%arg0: i32) -> (i32, i32, i32) {
    %c0_i32 = arith.constant 0 : i32
    %c0_i32_0 = arith.constant 0 : i32
    %c0_i32_1 = arith.constant 0 : i32
    %c0_i32_2 = arith.constant 0 : i32
    return %c0_i32, %c0_i32_0, %c0_i32_1 : i32, i32, i32
  }
  func.func @transform_11(%arg0: i32) -> (i32, i32, i32) {
    %c0_i32 = arith.constant 0 : i32
    %c0_i32_0 = arith.constant 0 : i32
    %c0_i32_1 = arith.constant 0 : i32
    return %arg0, %c0_i32, %c0_i32_0 : i32, i32, i32
  }
}

module attributes {stable_mosaic.version = 11 : i64} {
  func.func @_head_kernel(%arg0: i32, %arg1: memref<1x8x1024xf32, #tpu.memory_space<vmem>>, %arg2: memref<1x1x1024xf32, #tpu.memory_space<vmem>>, %arg3: memref<8x8xf32, #tpu.memory_space<vmem>>, %arg4: memref<8x1xf32, #tpu.memory_space<vmem>>, %arg5: memref<8x1xf32, #tpu.memory_space<vmem>>, %arg6: memref<1x8xbf16, #tpu.memory_space<vmem>>, %arg7: memref<1x1xf32, #tpu.memory_space<vmem>>, %arg8: memref<1x1x1xf32, #tpu.memory_space<vmem>>) attributes {dimension_semantics = [#tpu.dimension_semantics<parallel>], iteration_bounds = array<i64: 2>, scalar_prefetch = 0 : i64, scratch_operands = 0 : i64, tpu.core_type = #tpu.core_type<tc>, window_params = [{transform_indices = @transform_0, window_bounds = array<i64: 1, 8, 1024>}, {transform_indices = @transform_1, window_bounds = array<i64: 1, 1, 1024>}, {pipeline_mode = #tpu.pipeline_mode<synchronous>, transform_indices = @transform_2, window_bounds = array<i64: 8, 8>}, {pipeline_mode = #tpu.pipeline_mode<synchronous>, transform_indices = @transform_3, window_bounds = array<i64: 8, 1>}, {pipeline_mode = #tpu.pipeline_mode<synchronous>, transform_indices = @transform_4, window_bounds = array<i64: 8, 1>}, {pipeline_mode = #tpu.pipeline_mode<synchronous>, transform_indices = @transform_5, window_bounds = array<i64: 1, 8>}, {pipeline_mode = #tpu.pipeline_mode<synchronous>, transform_indices = @transform_6, window_bounds = array<i64: 1, 1>}, {transform_indices = @transform_7, window_bounds = array<i64: 1, 1, 1>}]} {
    %c0 = arith.constant 0 : index
    %c0_0 = arith.constant 0 : index
    %c0_1 = arith.constant 0 : index
    %0 = vector.load %arg1[%c0, %c0_0, %c0_1] : memref<1x8x1024xf32, #tpu.memory_space<vmem>>, vector<1x8x1024xf32>
    %1 = vector.shape_cast %0 : vector<1x8x1024xf32> to vector<8x1024xf32>
    %c0_2 = arith.constant 0 : index
    %c0_3 = arith.constant 0 : index
    %2 = vector.load %arg4[%c0_2, %c0_3] : memref<8x1xf32, #tpu.memory_space<vmem>>, vector<8x1xf32>
    %c0_4 = arith.constant 0 : index
    %c0_5 = arith.constant 0 : index
    %3 = vector.load %arg5[%c0_4, %c0_5] : memref<8x1xf32, #tpu.memory_space<vmem>>, vector<8x1xf32>
    %c0_6 = arith.constant 0 : index
    %c0_7 = arith.constant 0 : index
    %4 = vector.load %arg3[%c0_6, %c0_7] : memref<8x8xf32, #tpu.memory_space<vmem>>, vector<8x8xf32>
    %cst = arith.constant dense<0.000000e+00> : vector<8xf32>
    %5 = vector.multi_reduction <add>, %1, %cst [1] : vector<8x1024xf32> to vector<8xf32>
    %6 = vector.shape_cast %5 : vector<8xf32> to vector<8x1xf32>
    %cst_8 = arith.constant dense<0.000000e+00> : vector<8x1xf32>
    %7 = tpu.matmul %4, %6, %cst_8 {dimension_numbers = #tpu.dot_dimension_numbers<[1], [0], [0], [1], [0, 0, 1, 1], [], []>} : vector<8x8xf32>, vector<8x1xf32>, vector<8x1xf32> -> vector<8x1xf32>
    %cst_9 = arith.constant 9.765625E-4 : f32
    %8 = vector.broadcast %cst_9 : f32 to vector<8x1xf32>
    %9 = arith.mulf %7, %8 : vector<8x1xf32>
    %10 = vector.broadcast %9 : vector<8x1xf32> to vector<8x1024xf32>
    %11 = arith.subf %1, %10 : vector<8x1024xf32>
    %12 = arith.mulf %11, %11 : vector<8x1024xf32>
    %cst_10 = arith.constant dense<0.000000e+00> : vector<8xf32>
    %13 = vector.multi_reduction <add>, %12, %cst_10 [1] : vector<8x1024xf32> to vector<8xf32>
    %14 = vector.shape_cast %13 : vector<8xf32> to vector<8x1xf32>
    %cst_11 = arith.constant dense<0.000000e+00> : vector<8x1xf32>
    %15 = tpu.matmul %4, %14, %cst_11 {dimension_numbers = #tpu.dot_dimension_numbers<[1], [0], [0], [1], [0, 0, 1, 1], [], []>} : vector<8x8xf32>, vector<8x1xf32>, vector<8x1xf32> -> vector<8x1xf32>
    %cst_12 = arith.constant 9.765625E-4 : f32
    %16 = vector.broadcast %cst_12 : f32 to vector<8x1xf32>
    %17 = arith.mulf %15, %16 : vector<8x1xf32>
    %cst_13 = arith.constant 9.99999974E-6 : f32
    %18 = vector.broadcast %cst_13 : f32 to vector<8x1xf32>
    %19 = arith.addf %17, %18 : vector<8x1xf32>
    %20 = math.rsqrt %19 : vector<8x1xf32>
    %21 = arith.mulf %20, %2 : vector<8x1xf32>
    %22 = vector.broadcast %21 : vector<8x1xf32> to vector<8x1024xf32>
    %23 = arith.mulf %11, %22 : vector<8x1024xf32>
    %24 = vector.broadcast %3 : vector<8x1xf32> to vector<8x1024xf32>
    %25 = arith.addf %23, %24 : vector<8x1024xf32>
    %cst_14 = arith.constant 0.000000e+00 : f32
    %26 = vector.broadcast %cst_14 : f32 to vector<8x1024xf32>
    %27 = arith.maximumf %25, %26 : vector<8x1024xf32>
    %c0_15 = arith.constant 0 : index
    %c0_16 = arith.constant 0 : index
    %28 = vector.load %arg6[%c0_15, %c0_16] : memref<1x8xbf16, #tpu.memory_space<vmem>>, vector<1x8xbf16>
    %c0_17 = arith.constant 0 : index
    %c0_18 = arith.constant 0 : index
    %29 = vector.load %arg7[%c0_17, %c0_18] : memref<1x1xf32, #tpu.memory_space<vmem>>, vector<1x1xf32>
    %30 = arith.truncf %27 : vector<8x1024xf32> to vector<8x1024xbf16>
    %cst_19 = arith.constant dense<0.000000e+00> : vector<1x1024xf32>
    %31 = tpu.matmul %28, %30, %cst_19 {dimension_numbers = #tpu.dot_dimension_numbers<[1], [0], [0], [1], [0, 0, 1, 1], [], []>} : vector<1x8xbf16>, vector<8x1024xbf16>, vector<1x1024xf32> -> vector<1x1024xf32>
    %32 = vector.broadcast %29 : vector<1x1xf32> to vector<1x1024xf32>
    %33 = arith.addf %31, %32 : vector<1x1024xf32>
    %c0_20 = arith.constant 0 : index
    %c0_21 = arith.constant 0 : index
    %c0_22 = arith.constant 0 : index
    %34 = vector.load %arg2[%c0_20, %c0_21, %c0_22] : memref<1x1x1024xf32, #tpu.memory_space<vmem>>, vector<1x1x1024xf32>
    %35 = vector.shape_cast %34 : vector<1x1x1024xf32> to vector<1x1024xf32>
    %36 = arith.subf %35, %33 : vector<1x1024xf32>
    %37 = arith.mulf %36, %36 : vector<1x1024xf32>
    %cst_23 = arith.constant dense<0.000000e+00> : vector<1xf32>
    %38 = vector.multi_reduction <add>, %37, %cst_23 [1] : vector<1x1024xf32> to vector<1xf32>
    %39 = vector.shape_cast %38 : vector<1xf32> to vector<1x1xf32>
    %cst_24 = arith.constant dense<0.000000e+00> : vector<1xf32>
    %40 = vector.multi_reduction <add>, %39, %cst_24 [0] : vector<1x1xf32> to vector<1xf32>
    %41 = vector.shape_cast %40 : vector<1xf32> to vector<1x1xf32>
    %c0_25 = arith.constant 0 : index
    %c0_26 = arith.constant 0 : index
    %c0_27 = arith.constant 0 : index
    %42 = vector.load %arg8[%c0_25, %c0_26, %c0_27] : memref<1x1x1xf32, #tpu.memory_space<vmem>>, vector<1x1x1xf32>
    %43 = vector.shape_cast %42 : vector<1x1x1xf32> to vector<1x1xf32>
    %44 = vector.shape_cast %41 : vector<1x1xf32> to vector<1x1x1xf32>
    tpu.vector_store %arg8[%c0_25, %c0_26, %c0_27], %44 {strides = array<i32>} : memref<1x1x1xf32, #tpu.memory_space<vmem>>, vector<1x1x1xf32>,
    return
  }
  func.func @transform_0(%arg0: i32) -> (i32, i32, i32) {
    %c0_i32 = arith.constant 0 : i32
    %c0_i32_0 = arith.constant 0 : i32
    %c0_i32_1 = arith.constant 0 : i32
    return %arg0, %c0_i32, %c0_i32_0 : i32, i32, i32
  }
  func.func @transform_1(%arg0: i32) -> (i32, i32, i32) {
    %c0_i32 = arith.constant 0 : i32
    %c0_i32_0 = arith.constant 0 : i32
    %c0_i32_1 = arith.constant 0 : i32
    return %arg0, %c0_i32, %c0_i32_0 : i32, i32, i32
  }
  func.func @transform_2(%arg0: i32) -> (i32, i32) {
    %c0_i32 = arith.constant 0 : i32
    %c0_i32_0 = arith.constant 0 : i32
    %c0_i32_1 = arith.constant 0 : i32
    return %c0_i32, %c0_i32_0 : i32, i32
  }
  func.func @transform_3(%arg0: i32) -> (i32, i32) {
    %c0_i32 = arith.constant 0 : i32
    %c0_i32_0 = arith.constant 0 : i32
    %c0_i32_1 = arith.constant 0 : i32
    return %c0_i32, %c0_i32_0 : i32, i32
  }
  func.func @transform_4(%arg0: i32) -> (i32, i32) {
    %c0_i32 = arith.constant 0 : i32
    %c0_i32_0 = arith.constant 0 : i32
    %c0_i32_1 = arith.constant 0 : i32
    return %c0_i32, %c0_i32_0 : i32, i32
  }
  func.func @transform_5(%arg0: i32) -> (i32, i32) {
    %c0_i32 = arith.constant 0 : i32
    %c0_i32_0 = arith.constant 0 : i32
    %c0_i32_1 = arith.constant 0 : i32
    return %c0_i32, %c0_i32_0 : i32, i32
  }
  func.func @transform_6(%arg0: i32) -> (i32, i32) {
    %c0_i32 = arith.constant 0 : i32
    %c0_i32_0 = arith.constant 0 : i32
    %c0_i32_1 = arith.constant 0 : i32
    return %c0_i32, %c0_i32_0 : i32, i32
  }
  func.func @transform_7(%arg0: i32) -> (i32, i32, i32) {
    %c0_i32 = arith.constant 0 : i32
    %c0_i32_0 = arith.constant 0 : i32
    %c0_i32_1 = arith.constant 0 : i32
    return %arg0, %c0_i32, %c0_i32_0 : i32, i32, i32
  }
}

module attributes {stable_mosaic.version = 11 : i64} {
  func.func @_upres_kernel(%arg0: i32, %arg1: memref<1x16x256xf32, #tpu.memory_space<vmem>>, %arg2: memref<8x16xbf16, #tpu.memory_space<vmem>>, %arg3: memref<256x1024xbf16, #tpu.memory_space<vmem>>, %arg4: memref<8x8xf32, #tpu.memory_space<vmem>>, %arg5: memref<8x1xf32, #tpu.memory_space<vmem>>, %arg6: memref<8x1xf32, #tpu.memory_space<vmem>>, %arg7: memref<8x72xbf16, #tpu.memory_space<vmem>>, %arg8: memref<8x1xf32, #tpu.memory_space<vmem>>, %arg9: memref<8x1xf32, #tpu.memory_space<vmem>>, %arg10: memref<8x72xbf16, #tpu.memory_space<vmem>>, %arg11: memref<9x1x1024xf32, #tpu.memory_space<vmem>>, %arg12: memref<1x8x1024xf32, #tpu.memory_space<vmem>>) attributes {dimension_semantics = [#tpu.dimension_semantics<parallel>], iteration_bounds = array<i64: 2>, scalar_prefetch = 0 : i64, scratch_operands = 0 : i64, tpu.core_type = #tpu.core_type<tc>, window_params = [{transform_indices = @transform_0, window_bounds = array<i64: 1, 16, 256>}, {pipeline_mode = #tpu.pipeline_mode<synchronous>, transform_indices = @transform_1, window_bounds = array<i64: 8, 16>}, {pipeline_mode = #tpu.pipeline_mode<synchronous>, transform_indices = @transform_2, window_bounds = array<i64: 256, 1024>}, {pipeline_mode = #tpu.pipeline_mode<synchronous>, transform_indices = @transform_3, window_bounds = array<i64: 8, 8>}, {pipeline_mode = #tpu.pipeline_mode<synchronous>, transform_indices = @transform_4, window_bounds = array<i64: 8, 1>}, {pipeline_mode = #tpu.pipeline_mode<synchronous>, transform_indices = @transform_5, window_bounds = array<i64: 8, 1>}, {pipeline_mode = #tpu.pipeline_mode<synchronous>, transform_indices = @transform_6, window_bounds = array<i64: 8, 72>}, {pipeline_mode = #tpu.pipeline_mode<synchronous>, transform_indices = @transform_7, window_bounds = array<i64: 8, 1>}, {pipeline_mode = #tpu.pipeline_mode<synchronous>, transform_indices = @transform_8, window_bounds = array<i64: 8, 1>}, {pipeline_mode = #tpu.pipeline_mode<synchronous>, transform_indices = @transform_9, window_bounds = array<i64: 8, 72>}, {pipeline_mode = #tpu.pipeline_mode<synchronous>, transform_indices = @transform_10, window_bounds = array<i64: 9, 1, 1024>}, {transform_indices = @transform_11, window_bounds = array<i64: 1, 8, 1024>}]} {
    %c0 = arith.constant 0 : index
    %c0_0 = arith.constant 0 : index
    %c0_1 = arith.constant 0 : index
    %0 = vector.load %arg1[%c0, %c0_0, %c0_1] : memref<1x16x256xf32, #tpu.memory_space<vmem>>, vector<1x16x256xf32>
    %1 = vector.shape_cast %0 : vector<1x16x256xf32> to vector<16x256xf32>
    %c0_2 = arith.constant 0 : index
    %c0_3 = arith.constant 0 : index
    %2 = vector.load %arg2[%c0_2, %c0_3] : memref<8x16xbf16, #tpu.memory_space<vmem>>, vector<8x16xbf16>
    %3 = arith.truncf %1 : vector<16x256xf32> to vector<16x256xbf16>
    %cst = arith.constant dense<0.000000e+00> : vector<8x256xf32>
    %4 = tpu.matmul %2, %3, %cst {dimension_numbers = #tpu.dot_dimension_numbers<[1], [0], [0], [1], [0, 0, 1, 1], [], []>} : vector<8x16xbf16>, vector<16x256xbf16>, vector<8x256xf32> -> vector<8x256xf32>
    %5 = arith.truncf %4 : vector<8x256xf32> to vector<8x256xbf16>
    %c0_4 = arith.constant 0 : index
    %c0_5 = arith.constant 0 : index
    %6 = vector.load %arg3[%c0_4, %c0_5] : memref<256x1024xbf16, #tpu.memory_space<vmem>>, vector<256x1024xbf16>
    %cst_6 = arith.constant dense<0.000000e+00> : vector<8x1024xf32>
    %7 = tpu.matmul %5, %6, %cst_6 {dimension_numbers = #tpu.dot_dimension_numbers<[1], [0], [0], [1], [0, 0, 1, 1], [], []>} : vector<8x256xbf16>, vector<256x1024xbf16>, vector<8x1024xf32> -> vector<8x1024xf32>
    %c0_7 = arith.constant 0 : index
    %c0_8 = arith.constant 0 : index
    %8 = vector.load %arg5[%c0_7, %c0_8] : memref<8x1xf32, #tpu.memory_space<vmem>>, vector<8x1xf32>
    %c0_9 = arith.constant 0 : index
    %c0_10 = arith.constant 0 : index
    %9 = vector.load %arg6[%c0_9, %c0_10] : memref<8x1xf32, #tpu.memory_space<vmem>>, vector<8x1xf32>
    %c0_11 = arith.constant 0 : index
    %c0_12 = arith.constant 0 : index
    %10 = vector.load %arg4[%c0_11, %c0_12] : memref<8x8xf32, #tpu.memory_space<vmem>>, vector<8x8xf32>
    %cst_13 = arith.constant dense<0.000000e+00> : vector<8xf32>
    %11 = vector.multi_reduction <add>, %7, %cst_13 [1] : vector<8x1024xf32> to vector<8xf32>
    %12 = vector.shape_cast %11 : vector<8xf32> to vector<8x1xf32>
    %cst_14 = arith.constant dense<0.000000e+00> : vector<8x1xf32>
    %13 = tpu.matmul %10, %12, %cst_14 {dimension_numbers = #tpu.dot_dimension_numbers<[1], [0], [0], [1], [0, 0, 1, 1], [], []>} : vector<8x8xf32>, vector<8x1xf32>, vector<8x1xf32> -> vector<8x1xf32>
    %cst_15 = arith.constant 9.765625E-4 : f32
    %14 = vector.broadcast %cst_15 : f32 to vector<8x1xf32>
    %15 = arith.mulf %13, %14 : vector<8x1xf32>
    %16 = vector.broadcast %15 : vector<8x1xf32> to vector<8x1024xf32>
    %17 = arith.subf %7, %16 : vector<8x1024xf32>
    %18 = arith.mulf %17, %17 : vector<8x1024xf32>
    %cst_16 = arith.constant dense<0.000000e+00> : vector<8xf32>
    %19 = vector.multi_reduction <add>, %18, %cst_16 [1] : vector<8x1024xf32> to vector<8xf32>
    %20 = vector.shape_cast %19 : vector<8xf32> to vector<8x1xf32>
    %cst_17 = arith.constant dense<0.000000e+00> : vector<8x1xf32>
    %21 = tpu.matmul %10, %20, %cst_17 {dimension_numbers = #tpu.dot_dimension_numbers<[1], [0], [0], [1], [0, 0, 1, 1], [], []>} : vector<8x8xf32>, vector<8x1xf32>, vector<8x1xf32> -> vector<8x1xf32>
    %cst_18 = arith.constant 9.765625E-4 : f32
    %22 = vector.broadcast %cst_18 : f32 to vector<8x1xf32>
    %23 = arith.mulf %21, %22 : vector<8x1xf32>
    %cst_19 = arith.constant 9.99999974E-6 : f32
    %24 = vector.broadcast %cst_19 : f32 to vector<8x1xf32>
    %25 = arith.addf %23, %24 : vector<8x1xf32>
    %26 = math.rsqrt %25 : vector<8x1xf32>
    %27 = arith.mulf %26, %8 : vector<8x1xf32>
    %28 = vector.broadcast %27 : vector<8x1xf32> to vector<8x1024xf32>
    %29 = arith.mulf %17, %28 : vector<8x1024xf32>
    %30 = vector.broadcast %9 : vector<8x1xf32> to vector<8x1024xf32>
    %31 = arith.addf %29, %30 : vector<8x1024xf32>
    %cst_20 = arith.constant 0.000000e+00 : f32
    %32 = vector.broadcast %cst_20 : f32 to vector<8x1024xf32>
    %33 = arith.maximumf %31, %32 : vector<8x1024xf32>
    %c33_i32 = arith.constant 33 : i32
    %34 = tpu.dynamic_rotate %33 by %c33_i32 dim 1 : vector<8x1024xf32>, i32 -> vector<8x1024xf32>
    %c0_21 = arith.constant 0 : index
    %c0_22 = arith.constant 0 : index
    %c0_23 = arith.constant 0 : index
    %35 = vector.load %arg11[%c0_21, %c0_22, %c0_23] : memref<9x1x1024xf32, #tpu.memory_space<vmem>>, vector<1x1x1024xf32>
    %36 = vector.shape_cast %35 : vector<1x1x1024xf32> to vector<1x1024xf32>
    %37 = vector.broadcast %36 : vector<1x1024xf32> to vector<8x1024xf32>
    %38 = arith.mulf %34, %37 : vector<8x1024xf32>
    %c32_i32 = arith.constant 32 : i32
    %39 = tpu.dynamic_rotate %33 by %c32_i32 dim 1 : vector<8x1024xf32>, i32 -> vector<8x1024xf32>
    %c1 = arith.constant 1 : index
    %c0_24 = arith.constant 0 : index
    %c0_25 = arith.constant 0 : index
    %40 = vector.load %arg11[%c1, %c0_24, %c0_25] : memref<9x1x1024xf32, #tpu.memory_space<vmem>>, vector<1x1x1024xf32>
    %41 = vector.shape_cast %40 : vector<1x1x1024xf32> to vector<1x1024xf32>
    %42 = vector.broadcast %41 : vector<1x1024xf32> to vector<8x1024xf32>
    %43 = arith.mulf %39, %42 : vector<8x1024xf32>
    %c31_i32 = arith.constant 31 : i32
    %44 = tpu.dynamic_rotate %33 by %c31_i32 dim 1 : vector<8x1024xf32>, i32 -> vector<8x1024xf32>
    %c2 = arith.constant 2 : index
    %c0_26 = arith.constant 0 : index
    %c0_27 = arith.constant 0 : index
    %45 = vector.load %arg11[%c2, %c0_26, %c0_27] : memref<9x1x1024xf32, #tpu.memory_space<vmem>>, vector<1x1x1024xf32>
    %46 = vector.shape_cast %45 : vector<1x1x1024xf32> to vector<1x1024xf32>
    %47 = vector.broadcast %46 : vector<1x1024xf32> to vector<8x1024xf32>
    %48 = arith.mulf %44, %47 : vector<8x1024xf32>
    %c1_i32 = arith.constant 1 : i32
    %49 = tpu.dynamic_rotate %33 by %c1_i32 dim 1 : vector<8x1024xf32>, i32 -> vector<8x1024xf32>
    %c3 = arith.constant 3 : index
    %c0_28 = arith.constant 0 : index
    %c0_29 = arith.constant 0 : index
    %50 = vector.load %arg11[%c3, %c0_28, %c0_29] : memref<9x1x1024xf32, #tpu.memory_space<vmem>>, vector<1x1x1024xf32>
    %51 = vector.shape_cast %50 : vector<1x1x1024xf32> to vector<1x1024xf32>
    %52 = vector.broadcast %51 : vector<1x1024xf32> to vector<8x1024xf32>
    %53 = arith.mulf %49, %52 : vector<8x1024xf32>
    %c1023_i32 = arith.constant 1023 : i32
    %54 = tpu.dynamic_rotate %33 by %c1023_i32 dim 1 : vector<8x1024xf32>, i32 -> vector<8x1024xf32>
    %c5 = arith.constant 5 : index
    %c0_30 = arith.constant 0 : index
    %c0_31 = arith.constant 0 : index
    %55 = vector.load %arg11[%c5, %c0_30, %c0_31] : memref<9x1x1024xf32, #tpu.memory_space<vmem>>, vector<1x1x1024xf32>
    %56 = vector.shape_cast %55 : vector<1x1x1024xf32> to vector<1x1024xf32>
    %57 = vector.broadcast %56 : vector<1x1024xf32> to vector<8x1024xf32>
    %58 = arith.mulf %54, %57 : vector<8x1024xf32>
    %c993_i32 = arith.constant 993 : i32
    %59 = tpu.dynamic_rotate %33 by %c993_i32 dim 1 : vector<8x1024xf32>, i32 -> vector<8x1024xf32>
    %c6 = arith.constant 6 : index
    %c0_32 = arith.constant 0 : index
    %c0_33 = arith.constant 0 : index
    %60 = vector.load %arg11[%c6, %c0_32, %c0_33] : memref<9x1x1024xf32, #tpu.memory_space<vmem>>, vector<1x1x1024xf32>
    %61 = vector.shape_cast %60 : vector<1x1x1024xf32> to vector<1x1024xf32>
    %62 = vector.broadcast %61 : vector<1x1024xf32> to vector<8x1024xf32>
    %63 = arith.mulf %59, %62 : vector<8x1024xf32>
    %c992_i32 = arith.constant 992 : i32
    %64 = tpu.dynamic_rotate %33 by %c992_i32 dim 1 : vector<8x1024xf32>, i32 -> vector<8x1024xf32>
    %c7 = arith.constant 7 : index
    %c0_34 = arith.constant 0 : index
    %c0_35 = arith.constant 0 : index
    %65 = vector.load %arg11[%c7, %c0_34, %c0_35] : memref<9x1x1024xf32, #tpu.memory_space<vmem>>, vector<1x1x1024xf32>
    %66 = vector.shape_cast %65 : vector<1x1x1024xf32> to vector<1x1024xf32>
    %67 = vector.broadcast %66 : vector<1x1024xf32> to vector<8x1024xf32>
    %68 = arith.mulf %64, %67 : vector<8x1024xf32>
    %c991_i32 = arith.constant 991 : i32
    %69 = tpu.dynamic_rotate %33 by %c991_i32 dim 1 : vector<8x1024xf32>, i32 -> vector<8x1024xf32>
    %c8 = arith.constant 8 : index
    %c0_36 = arith.constant 0 : index
    %c0_37 = arith.constant 0 : index
    %70 = vector.load %arg11[%c8, %c0_36, %c0_37] : memref<9x1x1024xf32, #tpu.memory_space<vmem>>, vector<1x1x1024xf32>
    %71 = vector.shape_cast %70 : vector<1x1x1024xf32> to vector<1x1024xf32>
    %72 = vector.broadcast %71 : vector<1x1024xf32> to vector<8x1024xf32>
    %73 = arith.mulf %69, %72 : vector<8x1024xf32>
    %74 = tpu.concatenate %38, %43, %48, %53, %33, %58, %63, %68, %73 in 0 : vector<8x1024xf32>, vector<8x1024xf32>, vector<8x1024xf32>, vector<8x1024xf32>, vector<8x1024xf32>, vector<8x1024xf32>, vector<8x1024xf32>, vector<8x1024xf32>, vector<8x1024xf32> -> vector<72x1024xf32>
    %75 = arith.truncf %74 : vector<72x1024xf32> to vector<72x1024xbf16>
    %c0_38 = arith.constant 0 : index
    %c0_39 = arith.constant 0 : index
    %76 = vector.load %arg7[%c0_38, %c0_39] : memref<8x72xbf16, #tpu.memory_space<vmem>>, vector<8x72xbf16>
    %cst_40 = arith.constant dense<0.000000e+00> : vector<8x1024xf32>
    %77 = tpu.matmul %76, %75, %cst_40 {dimension_numbers = #tpu.dot_dimension_numbers<[1], [0], [0], [1], [0, 0, 1, 1], [], []>} : vector<8x72xbf16>, vector<72x1024xbf16>, vector<8x1024xf32> -> vector<8x1024xf32>
    %c0_41 = arith.constant 0 : index
    %c0_42 = arith.constant 0 : index
    %78 = vector.load %arg8[%c0_41, %c0_42] : memref<8x1xf32, #tpu.memory_space<vmem>>, vector<8x1xf32>
    %c0_43 = arith.constant 0 : index
    %c0_44 = arith.constant 0 : index
    %79 = vector.load %arg9[%c0_43, %c0_44] : memref<8x1xf32, #tpu.memory_space<vmem>>, vector<8x1xf32>
    %c0_45 = arith.constant 0 : index
    %c0_46 = arith.constant 0 : index
    %80 = vector.load %arg4[%c0_45, %c0_46] : memref<8x8xf32, #tpu.memory_space<vmem>>, vector<8x8xf32>
    %cst_47 = arith.constant dense<0.000000e+00> : vector<8xf32>
    %81 = vector.multi_reduction <add>, %77, %cst_47 [1] : vector<8x1024xf32> to vector<8xf32>
    %82 = vector.shape_cast %81 : vector<8xf32> to vector<8x1xf32>
    %cst_48 = arith.constant dense<0.000000e+00> : vector<8x1xf32>
    %83 = tpu.matmul %80, %82, %cst_48 {dimension_numbers = #tpu.dot_dimension_numbers<[1], [0], [0], [1], [0, 0, 1, 1], [], []>} : vector<8x8xf32>, vector<8x1xf32>, vector<8x1xf32> -> vector<8x1xf32>
    %cst_49 = arith.constant 9.765625E-4 : f32
    %84 = vector.broadcast %cst_49 : f32 to vector<8x1xf32>
    %85 = arith.mulf %83, %84 : vector<8x1xf32>
    %86 = vector.broadcast %85 : vector<8x1xf32> to vector<8x1024xf32>
    %87 = arith.subf %77, %86 : vector<8x1024xf32>
    %88 = arith.mulf %87, %87 : vector<8x1024xf32>
    %cst_50 = arith.constant dense<0.000000e+00> : vector<8xf32>
    %89 = vector.multi_reduction <add>, %88, %cst_50 [1] : vector<8x1024xf32> to vector<8xf32>
    %90 = vector.shape_cast %89 : vector<8xf32> to vector<8x1xf32>
    %cst_51 = arith.constant dense<0.000000e+00> : vector<8x1xf32>
    %91 = tpu.matmul %80, %90, %cst_51 {dimension_numbers = #tpu.dot_dimension_numbers<[1], [0], [0], [1], [0, 0, 1, 1], [], []>} : vector<8x8xf32>, vector<8x1xf32>, vector<8x1xf32> -> vector<8x1xf32>
    %cst_52 = arith.constant 9.765625E-4 : f32
    %92 = vector.broadcast %cst_52 : f32 to vector<8x1xf32>
    %93 = arith.mulf %91, %92 : vector<8x1xf32>
    %cst_53 = arith.constant 9.99999974E-6 : f32
    %94 = vector.broadcast %cst_53 : f32 to vector<8x1xf32>
    %95 = arith.addf %93, %94 : vector<8x1xf32>
    %96 = math.rsqrt %95 : vector<8x1xf32>
    %97 = arith.mulf %96, %78 : vector<8x1xf32>
    %98 = vector.broadcast %97 : vector<8x1xf32> to vector<8x1024xf32>
    %99 = arith.mulf %87, %98 : vector<8x1024xf32>
    %100 = vector.broadcast %79 : vector<8x1xf32> to vector<8x1024xf32>
    %101 = arith.addf %99, %100 : vector<8x1024xf32>
    %cst_54 = arith.constant 0.000000e+00 : f32
    %102 = vector.broadcast %cst_54 : f32 to vector<8x1024xf32>
    %103 = arith.maximumf %101, %102 : vector<8x1024xf32>
    %c33_i32_55 = arith.constant 33 : i32
    %104 = tpu.dynamic_rotate %103 by %c33_i32_55 dim 1 : vector<8x1024xf32>, i32 -> vector<8x1024xf32>
    %c0_56 = arith.constant 0 : index
    %c0_57 = arith.constant 0 : index
    %c0_58 = arith.constant 0 : index
    %105 = vector.load %arg11[%c0_56, %c0_57, %c0_58] : memref<9x1x1024xf32, #tpu.memory_space<vmem>>, vector<1x1x1024xf32>
    %106 = vector.shape_cast %105 : vector<1x1x1024xf32> to vector<1x1024xf32>
    %107 = vector.broadcast %106 : vector<1x1024xf32> to vector<8x1024xf32>
    %108 = arith.mulf %104, %107 : vector<8x1024xf32>
    %c32_i32_59 = arith.constant 32 : i32
    %109 = tpu.dynamic_rotate %103 by %c32_i32_59 dim 1 : vector<8x1024xf32>, i32 -> vector<8x1024xf32>
    %c1_60 = arith.constant 1 : index
    %c0_61 = arith.constant 0 : index
    %c0_62 = arith.constant 0 : index
    %110 = vector.load %arg11[%c1_60, %c0_61, %c0_62] : memref<9x1x1024xf32, #tpu.memory_space<vmem>>, vector<1x1x1024xf32>
    %111 = vector.shape_cast %110 : vector<1x1x1024xf32> to vector<1x1024xf32>
    %112 = vector.broadcast %111 : vector<1x1024xf32> to vector<8x1024xf32>
    %113 = arith.mulf %109, %112 : vector<8x1024xf32>
    %c31_i32_63 = arith.constant 31 : i32
    %114 = tpu.dynamic_rotate %103 by %c31_i32_63 dim 1 : vector<8x1024xf32>, i32 -> vector<8x1024xf32>
    %c2_64 = arith.constant 2 : index
    %c0_65 = arith.constant 0 : index
    %c0_66 = arith.constant 0 : index
    %115 = vector.load %arg11[%c2_64, %c0_65, %c0_66] : memref<9x1x1024xf32, #tpu.memory_space<vmem>>, vector<1x1x1024xf32>
    %116 = vector.shape_cast %115 : vector<1x1x1024xf32> to vector<1x1024xf32>
    %117 = vector.broadcast %116 : vector<1x1024xf32> to vector<8x1024xf32>
    %118 = arith.mulf %114, %117 : vector<8x1024xf32>
    %c1_i32_67 = arith.constant 1 : i32
    %119 = tpu.dynamic_rotate %103 by %c1_i32_67 dim 1 : vector<8x1024xf32>, i32 -> vector<8x1024xf32>
    %c3_68 = arith.constant 3 : index
    %c0_69 = arith.constant 0 : index
    %c0_70 = arith.constant 0 : index
    %120 = vector.load %arg11[%c3_68, %c0_69, %c0_70] : memref<9x1x1024xf32, #tpu.memory_space<vmem>>, vector<1x1x1024xf32>
    %121 = vector.shape_cast %120 : vector<1x1x1024xf32> to vector<1x1024xf32>
    %122 = vector.broadcast %121 : vector<1x1024xf32> to vector<8x1024xf32>
    %123 = arith.mulf %119, %122 : vector<8x1024xf32>
    %c1023_i32_71 = arith.constant 1023 : i32
    %124 = tpu.dynamic_rotate %103 by %c1023_i32_71 dim 1 : vector<8x1024xf32>, i32 -> vector<8x1024xf32>
    %c5_72 = arith.constant 5 : index
    %c0_73 = arith.constant 0 : index
    %c0_74 = arith.constant 0 : index
    %125 = vector.load %arg11[%c5_72, %c0_73, %c0_74] : memref<9x1x1024xf32, #tpu.memory_space<vmem>>, vector<1x1x1024xf32>
    %126 = vector.shape_cast %125 : vector<1x1x1024xf32> to vector<1x1024xf32>
    %127 = vector.broadcast %126 : vector<1x1024xf32> to vector<8x1024xf32>
    %128 = arith.mulf %124, %127 : vector<8x1024xf32>
    %c993_i32_75 = arith.constant 993 : i32
    %129 = tpu.dynamic_rotate %103 by %c993_i32_75 dim 1 : vector<8x1024xf32>, i32 -> vector<8x1024xf32>
    %c6_76 = arith.constant 6 : index
    %c0_77 = arith.constant 0 : index
    %c0_78 = arith.constant 0 : index
    %130 = vector.load %arg11[%c6_76, %c0_77, %c0_78] : memref<9x1x1024xf32, #tpu.memory_space<vmem>>, vector<1x1x1024xf32>
    %131 = vector.shape_cast %130 : vector<1x1x1024xf32> to vector<1x1024xf32>
    %132 = vector.broadcast %131 : vector<1x1024xf32> to vector<8x1024xf32>
    %133 = arith.mulf %129, %132 : vector<8x1024xf32>
    %c992_i32_79 = arith.constant 992 : i32
    %134 = tpu.dynamic_rotate %103 by %c992_i32_79 dim 1 : vector<8x1024xf32>, i32 -> vector<8x1024xf32>
    %c7_80 = arith.constant 7 : index
    %c0_81 = arith.constant 0 : index
    %c0_82 = arith.constant 0 : index
    %135 = vector.load %arg11[%c7_80, %c0_81, %c0_82] : memref<9x1x1024xf32, #tpu.memory_space<vmem>>, vector<1x1x1024xf32>
    %136 = vector.shape_cast %135 : vector<1x1x1024xf32> to vector<1x1024xf32>
    %137 = vector.broadcast %136 : vector<1x1024xf32> to vector<8x1024xf32>
    %138 = arith.mulf %134, %137 : vector<8x1024xf32>
    %c991_i32_83 = arith.constant 991 : i32
    %139 = tpu.dynamic_rotate %103 by %c991_i32_83 dim 1 : vector<8x1024xf32>, i32 -> vector<8x1024xf32>
    %c8_84 = arith.constant 8 : index
    %c0_85 = arith.constant 0 : index
    %c0_86 = arith.constant 0 : index
    %140 = vector.load %arg11[%c8_84, %c0_85, %c0_86] : memref<9x1x1024xf32, #tpu.memory_space<vmem>>, vector<1x1x1024xf32>
    %141 = vector.shape_cast %140 : vector<1x1x1024xf32> to vector<1x1024xf32>
    %142 = vector.broadcast %141 : vector<1x1024xf32> to vector<8x1024xf32>
    %143 = arith.mulf %139, %142 : vector<8x1024xf32>
    %144 = tpu.concatenate %108, %113, %118, %123, %103, %128, %133, %138, %143 in 0 : vector<8x1024xf32>, vector<8x1024xf32>, vector<8x1024xf32>, vector<8x1024xf32>, vector<8x1024xf32>, vector<8x1024xf32>, vector<8x1024xf32>, vector<8x1024xf32>, vector<8x1024xf32> -> vector<72x1024xf32>
    %145 = arith.truncf %144 : vector<72x1024xf32> to vector<72x1024xbf16>
    %c0_87 = arith.constant 0 : index
    %c0_88 = arith.constant 0 : index
    %146 = vector.load %arg10[%c0_87, %c0_88] : memref<8x72xbf16, #tpu.memory_space<vmem>>, vector<8x72xbf16>
    %cst_89 = arith.constant dense<0.000000e+00> : vector<8x1024xf32>
    %147 = tpu.matmul %146, %145, %cst_89 {dimension_numbers = #tpu.dot_dimension_numbers<[1], [0], [0], [1], [0, 0, 1, 1], [], []>} : vector<8x72xbf16>, vector<72x1024xbf16>, vector<8x1024xf32> -> vector<8x1024xf32>
    %148 = arith.addf %7, %147 : vector<8x1024xf32>
    %c0_90 = arith.constant 0 : index
    %c0_91 = arith.constant 0 : index
    %c0_92 = arith.constant 0 : index
    %149 = vector.load %arg12[%c0_90, %c0_91, %c0_92] : memref<1x8x1024xf32, #tpu.memory_space<vmem>>, vector<1x8x1024xf32>
    %150 = vector.shape_cast %149 : vector<1x8x1024xf32> to vector<8x1024xf32>
    %151 = vector.shape_cast %148 : vector<8x1024xf32> to vector<1x8x1024xf32>
    tpu.vector_store %arg12[%c0_90, %c0_91, %c0_92], %151 {strides = array<i32>} : memref<1x8x1024xf32, #tpu.memory_space<vmem>>, vector<1x8x1024xf32>,
    return
  }
  func.func @transform_0(%arg0: i32) -> (i32, i32, i32) {
    %c0_i32 = arith.constant 0 : i32
    %c0_i32_0 = arith.constant 0 : i32
    %c0_i32_1 = arith.constant 0 : i32
    return %arg0, %c0_i32, %c0_i32_0 : i32, i32, i32
  }
  func.func @transform_1(%arg0: i32) -> (i32, i32) {
    %c0_i32 = arith.constant 0 : i32
    %c0_i32_0 = arith.constant 0 : i32
    %c0_i32_1 = arith.constant 0 : i32
    return %c0_i32, %c0_i32_0 : i32, i32
  }
  func.func @transform_2(%arg0: i32) -> (i32, i32) {
    %c0_i32 = arith.constant 0 : i32
    %c0_i32_0 = arith.constant 0 : i32
    %c0_i32_1 = arith.constant 0 : i32
    return %c0_i32, %c0_i32_0 : i32, i32
  }
  func.func @transform_3(%arg0: i32) -> (i32, i32) {
    %c0_i32 = arith.constant 0 : i32
    %c0_i32_0 = arith.constant 0 : i32
    %c0_i32_1 = arith.constant 0 : i32
    return %c0_i32, %c0_i32_0 : i32, i32
  }
  func.func @transform_4(%arg0: i32) -> (i32, i32) {
    %c0_i32 = arith.constant 0 : i32
    %c0_i32_0 = arith.constant 0 : i32
    %c0_i32_1 = arith.constant 0 : i32
    return %c0_i32, %c0_i32_0 : i32, i32
  }
  func.func @transform_5(%arg0: i32) -> (i32, i32) {
    %c0_i32 = arith.constant 0 : i32
    %c0_i32_0 = arith.constant 0 : i32
    %c0_i32_1 = arith.constant 0 : i32
    return %c0_i32, %c0_i32_0 : i32, i32
  }
  func.func @transform_6(%arg0: i32) -> (i32, i32) {
    %c0_i32 = arith.constant 0 : i32
    %c0_i32_0 = arith.constant 0 : i32
    %c0_i32_1 = arith.constant 0 : i32
    return %c0_i32, %c0_i32_0 : i32, i32
  }
  func.func @transform_7(%arg0: i32) -> (i32, i32) {
    %c0_i32 = arith.constant 0 : i32
    %c0_i32_0 = arith.constant 0 : i32
    %c0_i32_1 = arith.constant 0 : i32
    return %c0_i32, %c0_i32_0 : i32, i32
  }
  func.func @transform_8(%arg0: i32) -> (i32, i32) {
    %c0_i32 = arith.constant 0 : i32
    %c0_i32_0 = arith.constant 0 : i32
    %c0_i32_1 = arith.constant 0 : i32
    return %c0_i32, %c0_i32_0 : i32, i32
  }
  func.func @transform_9(%arg0: i32) -> (i32, i32) {
    %c0_i32 = arith.constant 0 : i32
    %c0_i32_0 = arith.constant 0 : i32
    %c0_i32_1 = arith.constant 0 : i32
    return %c0_i32, %c0_i32_0 : i32, i32
  }
  func.func @transform_10(%arg0: i32) -> (i32, i32, i32) {
    %c0_i32 = arith.constant 0 : i32
    %c0_i32_0 = arith.constant 0 : i32
    %c0_i32_1 = arith.constant 0 : i32
    %c0_i32_2 = arith.constant 0 : i32
    return %c0_i32, %c0_i32_0, %c0_i32_1 : i32, i32, i32
  }
  func.func @transform_11(%arg0: i32) -> (i32, i32, i32) {
    %c0_i32 = arith.constant 0 : i32
    %c0_i32_0 = arith.constant 0 : i32
    %c0_i32_1 = arith.constant 0 : i32
    return %arg0, %c0_i32, %c0_i32_0 : i32, i32, i32
  }
}

</mosaic_0001>

<bundles_post_ra>
// kernel: vae_decoder_forward.8
= control target key start
LH: loop header
LB: loop body
LE: loop exit
PB: predicated region body
PF: predicated region fallthrough
CT: control target
= control target key end

     0   :  { %s381_s0 = inlined_call_operand.vmem [shape: f32[2,64], index: 0, kind: input, shape index: {}]   ;;  %s382_s1 = inlined_call_operand.vmem [shape: f32[2,32], index: 1, kind: input, shape index: {}]   ;;  %s383_s2 = inlined_call_operand.vmem [shape: f32[64,32], index: 2, kind: input, shape index: {}]   ;;  %s384_s3 = inlined_call_operand.vmem [shape: f32[1,32], index: 3, kind: input, shape index: {}]   ;;  %s385_s4 = inlined_call_operand.vmem [shape: f32[64,32], index: 4, kind: input, shape index: {}]   ;;  %s386_s5 = inlined_call_operand.vmem [shape: f32[1,32], index: 5, kind: input, shape index: {}]   ;;  %s387_s6 = inlined_call_operand.vmem [shape: f32[32,64], index: 6, kind: input, shape index: {}]   ;;  %s388_s7 = inlined_call_operand.vmem [shape: f32[1,64], index: 7, kind: input, shape index: {}]   ;;  %s389_s8 = inlined_call_operand.vmem [shape: f32[2,64], index: 8, kind: output, shape index: {0}]   ;;  %s390_s9 = inlined_call_operand.hbm [shape: f32[1,1], index: 9, kind: output, shape index: {1}]  }
   0x1   :  { %v76_v0 = vld [vmem:[%s385_s4 + $0x38] sm:$0xff]  ;;  %v75_v1 = vld [vmem:[%s385_s4 + $0x30] sm:$0xff]  ;;  %v74_v2 = vld [vmem:[%s385_s4 + $0x28] sm:$0xff] }
   0x2   :  { %89 = vmatpush.msra.mxu1 %v76_v0  ;;  %v40_v3 = vld [vmem:[%s383_s2 + $0x38] sm:$0xff]  ;;  %v39_v4 = vld [vmem:[%s383_s2 + $0x30] sm:$0xff]  ;;  %v73_v5 = vld [vmem:[%s385_s4 + $0x20] sm:$0xff] }
   0x3   :  { %57 = vmatpush.msra.mxu0 %v40_v3  ;;  %v38_v6 = vld [vmem:[%s383_s2 + $0x28] sm:$0xff]  ;;  %v72_v7 = vld [vmem:[%s385_s4 + $0x18] sm:$0xff]  ;;  %v37_v8 = vld [vmem:[%s383_s2 + $0x20] sm:$0xff] }
   0x4   :  { %90 = vmatpush.msra.mxu1 %v75_v1 }
   0x5   :  { %58 = vmatpush.msra.mxu0 %v39_v4 }
   0x6   :  { %91 = vmatpush.msra.mxu1 %v74_v2 }
   0x8   :  { %92 = vmatpush.msra.mxu1 %v73_v5 }
   0x9   :  { %15 = vsyncpa [#allocation3], 0  ;;  %v71_v9 = vld [vmem:[%s385_s4 + $0x10] sm:$0xff]  ;;  %59 = vmatpush.msra.mxu0 %v38_v6  ;;  %v36_v10 = vld [vmem:[%s383_s2 + $0x18] sm:$0xff]  ;;  %vm45_vm0 = vcmask 523264   ;;  %vm158_vm2 = vcmask 261120  }
   0xa   :  { %93 = vmatpush.msra.mxu1 %v72_v7  ;;  %v70_v11 = vld [vmem:[%s385_s4 + $0x8] sm:$0xff]  ;;  %v35_v12 = vld [vmem:[%s383_s2 + $0x10] sm:$0xff]  ;;  %v69_v13 = vld [vmem:[%s385_s4] sm:$0xff]  ;;  %vm124_vm3 = vcmask 254976   ;;  %v248_v53 = vmov 64.0   ;;  %vm128_vm4 = vcmask 1041408  }
   0xb   :  { %60 = vmatpush.msra.mxu0 %v37_v8  ;;  %v32_v14 = vld [vmem:[%s381_s0] sm:$0x3]  ;;  %v34_v15 = vld [vmem:[%s383_s2 + $0x8] sm:$0xff]  ;;  %v153_v17 = vld [vmem:[%s387_s6 + $0x18] sm:$0xff]  ;;  %vm183_vm5 = vcmask 517120   ;;  %s194_s15 = sshll.u32 %s390_s9, 4  ;;  %s195_s15 = int_to_ptr.hbm [resolvable:$true] %s194_s15 }
   0xc   :  { %94 = vmatpush.msra.mxu1 %v71_v9  ;;  %v33_v16 = vld [vmem:[%s383_s2] sm:$0xff]  ;;  %174 = vmatpush.msra.mxu2 %v153_v17  ;;  %v152_v18 = vld [vmem:[%s387_s6 + $0x10] sm:$0xff]  ;;  %v151_v20 = vld [vmem:[%s387_s6 + $0x8] sm:$0xff]  ;;  %vm145_vm7 = vcmask 0  }
   0xd   :  { %61 = vmatpush.msra.mxu0 %v36_v10  ;;  %v211_v19 = vld [vmem:[%s386_s5] ss:$0 sm:$0xff] }
   0xe   :  { %95 = vmatpush.msra.mxu1 %v70_v11  ;;  %175 = vmatpush.msra.mxu2 %v152_v18  ;;  %v150_v22 = vld [vmem:[%s387_s6] sm:$0xff] }
   0xf   :  { %62 = vmatpush.msra.mxu0 %v35_v12  ;;  %v212_v36 = vld [vmem:[%s384_s3] ss:$0 sm:$0xff] }
  0x10   :  { %96 = vmatpush.msra.mxu1 %v69_v13  ;;  %176 = vmatpush.msra.mxu2 %v151_v20  ;;  %v147_v39 = vld [vmem:[%s382_s1] sm:$0x3] }
  0x11   :  { %206 = vmatmul.msk.f32.vlgmr.msra.gmra.mxu1 %vm45_vm0, %v32_v14  ;;  %63 = vmatpush.msra.mxu0 %v34_v15  ;;  %v213_v56 = vld [vmem:[%s388_s7] ss:$0 sm:$0xff]  ;;  %s249_s7 = smov [#allocation2]  }
  0x12   :  { %177 = vmatpush.msra.mxu2 %v150_v22  ;;  %s192_s12 = sshll.u32 %s249_s7, 4  ;;  %s193_s12 = int_to_ptr.vmem [resolvable:$true] %s192_s12 }
  0x13   :  { %64 = vmatpush.msra.mxu0 %v33_v16 }
  0x14   :  { %205 = vmatmul.msk.f32.vlgmr.msra.gmra.mxu0 %vm45_vm0, %v32_v14 }
  0x8e   :  { %v98_v21 = vpop.f32.mrf.mxu1 }
  0x8f   :  { %v99_v23 = vadd.f32 %v211_v19, %v98_v21 }
  0x91   :  { %v102_v24 = vand.u32 2147483647, %v99_v23  ;;  %v101_v35 = vmax.f32 %v99_v23, 0.0  ;;  %v66_v38 = vpop.f32.mrf.mxu0 }
  0x92   :  { %v67_v41 = vadd.f32 %v212_v36, %v66_v38 }
  0x93   :  { %v103_v25 = vsub.f32 0.0, %v102_v24 }
  0x94   :  { %v116_v46 = vmul.f32 %v67_v41, %v67_v41 }
  0x95   :  { %v104_v26 = vmul.f32 1.442695, %v103_v25 }
  0x97   :  { %214 = vpow2.f32 %v104_v26 }
  0x9d   :  { %v215_v27 = vpop.eup %214 }
  0x9e   :  { %v106_v28 = vadd.f32 1.0, %v215_v27  ;;  %v109_v29 = vmul.f32 -0.5, %v215_v27  ;;  %v112_v31 = vand.u32 2147483647, %v215_v27 }
  0xa0   :  { %216 = vlog2.f32 %v106_v28  ;;  %v110_v30 = vadd.f32 1.0, %v109_v29  ;;  %vm113_vm1 = vcmp.lt.f32.partialorder %v112_v31, 0.0004427343 }
  0xa2   :  { %v111_v34 = vmul.f32 %v215_v27, %v110_v30 }
  0xa6   :  { %v217_v32 = vpop.eup %216 }
  0xa7   :  { %v108_v33 = vmul.f32 0.6931472, %v217_v32 }
  0xa9   :  { %v114_v37 = vsel %vm113_vm1, %v111_v34, %v108_v33 }
  0xaa   :  { %v115_v40 = vadd.f32 %v114_v37, %v101_v35 }
  0xac   :  { %v148_v42 = vmul.f32 %v147_v39, %v115_v40  ;;  %v117_v43 = vmul.f32 %v115_v40, %v115_v40 }
  0xae   :  { %v149_v44 = vadd.f32 %v148_v42, %v67_v41  ;;  %v119_v45 = vadd.f32 1e-08, %v117_v43  ;;  %v118_v48 = vadd.f32 %v117_v43, %v116_v46 }
  0xb0   :  { %208 = vmatmul.msk.f32.vlgmr.msra.gmra.mxu2 %vm158_vm2, %v149_v44  ;;  %218 = vlog2.f32 %v119_v45 }
  0xb1   :  { %220 = vrcp.f32 %v248_v53 }
  0xb6   :  { %v219_v47 = vpop.eup %218 }
  0xb7   :  { %v121_v49 = vmul.f32 0.6931472, %v219_v47  ;;  %v221_v54 = vpop.eup %220 }
  0xb8   :  { %v138_v55 = vmul.f32 64.0, %v221_v54  ;;  %vm142_vm6 = vweird.f32 %v221_v54 }
  0xb9   :  { %v122_v50 = vsub.f32 %v118_v48, %v121_v49 }
  0xba   :  { %v139_v59 = vsub.f32 1.0, %v138_v55 }
  0xbb   :  { %v207_v51 = vadd.f32 -1.0, %v122_v50 }
  0xbc   :  { %v140_v1 = vmul.f32 %v221_v54, %v139_v59 }
  0xbd   :  { %v125_v52 = vsel %vm124_vm3, %v207_v51, 0.0 }
  0xbe   :  { %126 = vadd.xlane.f32.xlu0 %v125_v52  ;;  %v141_v4 = vadd.f32 %v221_v54, %v140_v1 }
  0xc0   :  { %v143_v7 = vsel %vm142_vm6, %v221_v54, %v141_v4 }
 0x131   :  { %v127_v57 = vpop.xlane.xlu0 %126 }
 0x132   :  { %v129_v58 = vsel %vm128_vm4, %v127_v57, 0.0 }
 0x133   :  { %v130_v60 = vrot.slane %v129_v58, 4  ;;  %v179_v61 = vpop.f32.mrf.mxu2 }
 0x134   :  { %v180_v62 = vadd.f32 %v213_v56, %v179_v61 }
 0x135   :  { %v131_v63 = vadd.f32 %v130_v60, %v129_v58 }
 0x136   :  { %v182_v0 = vmax.f32 %v180_v62, 0.0 }
 0x137   :  { %v132_v2 = vrot.slane %v131_v63, 2 }
 0x138   :  { %184 = vst.msk [vmem:[%s389_s8] sm:$0x3] %vm183_vm5, %v182_v0 }
 0x139   :  { %v133_v3 = vadd.f32 %v132_v2, %v131_v63 }
 0x13b   :  { %v134_v5 = vrot.slane %v133_v3, 1 }
 0x13d   :  { %v135_v6 = vadd.f32 %v134_v5, %v133_v3 }
 0x13f   :  { %v136_v8 = vmul.f32 0.5, %v135_v6 }
 0x141   :  { %v144_v9 = vmul.f32 %v143_v7, %v136_v8 }
 0x143   :  { %146 = vst.msk [vmem:[#allocation2] sm:$0x1] %vm145_vm7, %v144_v9 }
 0x144   :  { %197 = dma.vmem_to_hbm [thread:$0]  %s193_s12, 16, %s195_s15, [#allocation3]  }
 0x145   :  { %246 = dma.done.wait [#allocation3], 16  }
 0x146   :  { %247 = vsyncadd [#allocation3], 4294967280 }
 0x147   :  { %204 = vsyncpa [#allocation3], 1 }

// kernel: vae_decoder_forward.9
= control target key start
LH: loop header
LB: loop body
LE: loop exit
PB: predicated region body
PF: predicated region fallthrough
CT: control target
= control target key end

     0   :  { %s1100_s24 = smov 0   ;;  %s1394_s0 = inlined_call_operand.vmem [shape: f32[2,16,4], index: 0, kind: input, shape index: {}]   ;;  %s1395_s1 = inlined_call_operand.vmem [shape: bf16[64,16], index: 1, kind: input, shape index: {}]   ;;  %s1396_s2 = inlined_call_operand.vmem [shape: f32[64,1], index: 2, kind: input, shape index: {}]   ;;  %s1397_s3 = inlined_call_operand.vmem [shape: bf16[4,16], index: 3, kind: input, shape index: {}]   ;;  %s1398_s4 = inlined_call_operand.vmem [shape: f32[64,64], index: 4, kind: input, shape index: {}]   ;;  %s1399_s5 = inlined_call_operand.vmem [shape: f32[64,1], index: 5, kind: input, shape index: {}]   ;;  %s1400_s6 = inlined_call_operand.vmem [shape: f32[64,1], index: 6, kind: input, shape index: {}]   ;;  %s1401_s7 = inlined_call_operand.vmem [shape: f32[2,64,16], index: 7, kind: output, shape index: {}]  }
   0x1 LB: > { %s966_s25 = sadd.s32 4294967295, %s1057_s24   ;;  %p970_p0 = scmp.ge.s32.totalorder %s1057_s24, 1  ;;  %s1057_s24 = sphi %s1100_s24, %s17_s24  }
   0x2   : > { %p237_p1 = scmp.lt.s32.totalorder %s1057_s24, 3 }
   0x4   : > { %p238_p2 = pnand %p970_p0, %p237_p1 }
   0x5   : > { %p269_p3 = scmp.lt.s32.totalorder (!%p238_p2), %s966_s25, 1 }
   0x6   : > { %241 = sbr.rel (%p238_p2) target bundleno = 1261 (0x4ed), region = 48 }
   0xb   : > { %v290_v0 = vld [vmem:[%s1396_s2] sm:$0xff]  ;;  %v1059_v1 = vmov 0   ;;  %v292_v2 = vld [vmem:[%s1396_s2 + $0x10] sm:$0xff]  ;;  %s1403_s25 = smov (!%p269_p3, %s966_s25), 1  ;;  %v291_v6 = vld [vmem:[%s1396_s2 + $0x8] sm:$0xff]  ;;  %vm359_vm0 = vcmask 130048  }
   0xc   : > { %1032 = vset.pattern.permute.xlu0 %v1059_v1  ;;  %1033 = vset.pattern.permute.xlu1 %v1059_v1  ;;  %s1017_s30 = sshll.u32 %s1403_s25, 4  ;;  %v293_v7 = vld [vmem:[%s1396_s2 + $0x18] sm:$0xff]  ;;  %v1019_v8 = vld [vmem:[%s1395_s1] sm:$0xff]  ;;  %v296_v9 = vld [vmem:[%s1396_s2 + $0x30] sm:$0xff]  ;;  %vm419_vm1 = vcmask 1041408   ;;  %vm406_vm2 = vcmask 31744  }
   0xd   : > { %301 = vperm.xlu0 %1032, %v290_v0   ;;  %311 = vperm.xlu1 %1033, %v292_v2   ;;  %s273_s10 = scalar_lea.vmem %s1394_s0, %s1017_s30  ;;  %v297_v10 = vld [vmem:[%s1396_s2 + $0x38] sm:$0xff]  ;;  %v1020_v11 = vld [vmem:[%s1395_s1 + $0x8] sm:$0xff]  ;;  %v294_v12 = vld [vmem:[%s1396_s2 + $0x20] sm:$0xff]  ;;  %vm500_vm3 = vcmask 523264   ;;  %s1018_s18 = sshll.u32 %s1403_s25, 6 }
   0xe   : > { %1034 = vset.pattern.permute.xlu2 %v1059_v1  ;;  %v280_v3 = vld [vmem:[%s273_s10] sm:$0xff]  ;;  %v281_v4 = vld [vmem:[%s273_s10 + $0x8] sm:$0xff]  ;;  %v1021_v14 = vld [vmem:[%s1395_s1 + $0x10] sm:$0xff]  ;;  %s1366_s21 = scalar_lea.vmem %s1401_s7, %s1018_s18 }
   0xf   : > { %v298_v5 = vpack.c.bf16 %v281_v4, %v280_v3  ;;  %321 = vperm.xlu2 %1034, %v294_v12   ;;  %v295_v13 = vld [vmem:[%s1396_s2 + $0x28] sm:$0xff]  ;;  %v1022_v15 = vld [vmem:[%s1395_s1 + $0x18] sm:$0xff]  ;;  %v405_v16 = vld [vmem:[%s1397_s3] sm:$0x3] }
  0x10   : > { %v421_v17 = vsel %vm419_vm1, %v405_v16, 0  ;;  %v1238_v12 = vld [vmem:[%s1398_s4 + $0x30] sm:$0xff] }
  0x11   : > { %379 = vmatpush.bf16.msra.mxu0 %v298_v5  ;;  %430 = vmatpush.bf16.msra.mxu1 %v421_v17  ;;  %v1196_v5 = vld [vmem:[%s1398_s4] sm:$0xff] }
  0x14   : > { %991 = vmatmul.msk.bf16.vlgmr.msra.gmra.mxu0 %vm359_vm0, %v1019_v8  ;;  %v1210_v8 = vld [vmem:[%s1398_s4 + $0x10] sm:$0xff] }
  0x15   : > { %306 = vperm.xlu0 %1032, %v291_v6   ;;  %316 = vperm.xlu1 %1033, %v293_v7   ;;  %v1203_v7 = vld [vmem:[%s1398_s4 + $0x8] sm:$0xff] }
  0x17   : > { %326 = vperm.xlu2 %1034, %v295_v13   ;;  %v1245_v13 = vld [vmem:[%s1398_s4 + $0x38] sm:$0xff] }
  0x1d   : > { %331 = vperm.xlu0 %1032, %v296_v9   ;;  %336 = vperm.xlu1 %1033, %v297_v10   ;;  %v1217_v9 = vld [vmem:[%s1398_s4 + $0x18] sm:$0xff]  ;;  %v1224_v10 = vld [vmem:[%s1398_s4 + $0x20] sm:$0xff] }
  0x24   : > { %992 = vmatmul.msk.bf16.gmra.mxu0 %vm359_vm0, %v1020_v11  ;;  %v1231_v11 = vld [vmem:[%s1398_s4 + $0x28] sm:$0xff] }
  0x34   : > { %993 = vmatmul.msk.bf16.gmra.mxu0 %vm359_vm0, %v1021_v14 }
  0x44   : > { %994 = vmatmul.msk.bf16.gmra.mxu0 %vm359_vm0, %v1022_v15 }
  0x69   : > { %v322_v32 = vpop.permute.xlu2 %321 }
  0x71   : > { %v327_v34 = vpop.permute.xlu2 %326 }
  0x7f   : > { %v302_v18 = vpop.permute.xlu0 %301  ;;  %v312_v25 = vpop.permute.xlu1 %311 }
  0x87   : > { %v307_v20 = vpop.permute.xlu0 %306  ;;  %v317_v27 = vpop.permute.xlu1 %316 }
  0x8f   : > { %v332_v40 = vpop.permute.xlu0 %331  ;;  %v337_v41 = vpop.permute.xlu1 %336 }
  0x91   : > { %v381_v19 = vpop.f32.mrf.mxu0 }
  0x92   : > { %v382_v22 = vadd.f32 %v381_v19, %v302_v18 }
  0x99   : > { %v383_v21 = vpop.f32.mrf.mxu0 }
  0x9a   : > { %v384_v23 = vadd.f32 %v383_v21, %v307_v20 }
  0x9c   : > { %v401_v24 = vpack.c.bf16 %v384_v23, %v382_v22 }
  0x9e   : > { %995 = vmatmul.msk.bf16.vlgmr.msra.gmra.mxu1 %vm406_vm2, %v401_v24 }
  0xa1   : > { %v386_v26 = vpop.f32.mrf.mxu0 }
  0xa2   : > { %v387_v29 = vadd.f32 %v386_v26, %v312_v25 }
  0xa9   : > { %v388_v28 = vpop.f32.mrf.mxu0 }
  0xaa   : > { %v389_v30 = vadd.f32 %v388_v28, %v317_v27 }
  0xac   : > { %v402_v31 = vpack.c.bf16 %v389_v30, %v387_v29 }
  0xae   : > { %996 = vmatmul.msk.bf16.gmra.mxu1 %vm406_vm2, %v402_v31 }
  0xb1   : > { %v391_v33 = vpop.f32.mrf.mxu0 }
  0xb2   : > { %v392_v36 = vadd.f32 %v391_v33, %v322_v32 }
  0xb9   : > { %v393_v35 = vpop.f32.mrf.mxu0 }
  0xba   : > { %v394_v37 = vadd.f32 %v393_v35, %v327_v34 }
  0xbc   : > { %v403_v38 = vpack.c.bf16 %v394_v37, %v392_v36 }
  0xbe   : > { %997 = vmatmul.msk.bf16.gmra.mxu1 %vm406_vm2, %v403_v38 }
  0xc1   : > { %v396_v39 = vpop.f32.mrf.mxu0 }
  0xc2   : > { %v397_v43 = vadd.f32 %v396_v39, %v332_v40 }
  0xc9   : > { %v398_v42 = vpop.f32.mrf.mxu0 }
  0xca   : > { %v399_v44 = vadd.f32 %v398_v42, %v337_v41 }
  0xcc   : > { %v404_v45 = vpack.c.bf16 %v399_v44, %v397_v43 }
  0xce   : > { %998 = vmatmul.msk.bf16.gmra.mxu1 %vm406_vm2, %v404_v45 }
 0x11b   : > { %v1161_v46 = vpop.f32.mrf.mxu1 }
 0x11c   : > { %v476_v61 = vsel %vm359_vm0, %v1161_v46, 0.0 }
 0x123   : > { %v1163_v47 = vpop.f32.mrf.mxu1 }
 0x124   : > { %v479_v55 = vsel %vm359_vm0, %v1163_v47, 0.0 }
 0x12b   : > { %v1165_v48 = vpop.f32.mrf.mxu1 }
 0x12c   : > { %v482_v58 = vsel %vm359_vm0, %v1165_v48, 0.0 }
 0x133   : > { %v1167_v49 = vpop.f32.mrf.mxu1 }
 0x134   : > { %v485_v60 = vsel %vm359_vm0, %v1167_v49, 0.0 }
 0x13b   : > { %v1169_v50 = vpop.f32.mrf.mxu1 }
 0x13c   : > { %v488_v51 = vsel %vm359_vm0, %v1169_v50, 0.0 }
 0x13d   : > { %489 = vadd.xlane.f32.xlu2 %v488_v51 }
 0x143   : > { %v1173_v52 = vpop.f32.mrf.mxu1 }
 0x144   : > { %v491_v53 = vsel %vm359_vm0, %v1173_v52, 0.0 }
 0x145   : > { %492 = vadd.xlane.f32.xlu1 %v491_v53 }
 0x14b   : > { %v1177_v54 = vpop.f32.mrf.mxu1 }
 0x14c   : > { %v494_v56 = vsel %vm359_vm0, %v1177_v54, 0.0 }
 0x14d   : > { %480 = vadd.xlane.f32.xlu1 %v479_v55  ;;  %495 = vadd.xlane.f32.xlu0 %v494_v56 }
 0x153   : > { %v1183_v57 = vpop.f32.mrf.mxu1 }
 0x154   : > { %v497_v59 = vsel %vm359_vm0, %v1183_v57, 0.0 }
 0x155   : > { %483 = vadd.xlane.f32.xlu0 %v482_v58  ;;  %498 = vadd.xlane.f32.xlu2 %v497_v59 }
 0x15d   : > { %486 = vadd.xlane.f32.xlu2 %v485_v60 }
 0x165   : > { %477 = vadd.xlane.f32.xlu2 %v476_v61 }
 0x1b0   : > { %v490_v62 = vpop.xlane.xlu2 %489 }
 0x1b8   : > { %v493_v1 = vpop.xlane.xlu1 %492 }
 0x1c0   : > { %v496_v63 = vpop.xlane.xlu0 %495  ;;  %v481_v4 = vpop.xlane.xlu1 %480 }
 0x1c8   : > { %v499_v0 = vpop.xlane.xlu2 %498  ;;  %v484_v3 = vpop.xlane.xlu0 %483 }
 0x1c9   : > { %533 = vmatpush.msra.mxu2 %v499_v0  ;;  %v463_v0 = vld [vmem:[%s1400_s6 + $0x18] sm:$0xff] }
 0x1cb   : > { %534 = vmatpush.msra.mxu2 %v496_v63  ;;  %v460_v63 = vld [vmem:[%s1400_s6] sm:$0xff] }
 0x1cd   : > { %535 = vmatpush.msra.mxu2 %v493_v1  ;;  %v462_v1 = vld [vmem:[%s1400_s6 + $0x10] sm:$0xff] }
 0x1cf   : > { %536 = vmatpush.msra.mxu2 %v490_v62 }
 0x1d0   : > { %v487_v2 = vpop.xlane.xlu2 %486 }
 0x1d1   : > { %537 = vmatpush.msra.mxu2 %v487_v2  ;;  %v464_v2 = vld [vmem:[%s1400_s6 + $0x20] sm:$0xff] }
 0x1d3   : > { %538 = vmatpush.msra.mxu2 %v484_v3 }
 0x1d5   : > { %539 = vmatpush.msra.mxu2 %v481_v4 }
 0x1d8   : > { %v478_v6 = vpop.xlane.xlu2 %477 }
 0x1d9   : > { %540 = vmatpush.msra.mxu2 %v478_v6 }
 0x1da   : > { %999 = vmatmul.msk.f32.vlgmr.msra.gmra.mxu2 %vm500_vm3, %v1196_v5 }
 0x1e2   : > { %1000 = vmatmul.msk.f32.gmra.mxu2 %vm500_vm3, %v1203_v7 }
 0x1ea   : > { %1001 = vmatmul.msk.f32.gmra.mxu2 %vm500_vm3, %v1210_v8 }
 0x1f2   : > { %1002 = vmatmul.msk.f32.gmra.mxu2 %vm500_vm3, %v1217_v9 }
 0x1fa   : > { %1003 = vmatmul.msk.f32.gmra.mxu2 %vm500_vm3, %v1224_v10 }
 0x202   : > { %1004 = vmatmul.msk.f32.gmra.mxu2 %vm500_vm3, %v1231_v11 }
 0x20a   : > { %1005 = vmatmul.msk.f32.gmra.mxu2 %vm500_vm3, %v1238_v12 }
 0x212   : > { %1006 = vmatmul.msk.f32.gmra.mxu2 %vm500_vm3, %v1245_v13 }
 0x25d   : > { %v542_v14 = vpop.f32.mrf.mxu2 }
 0x25e   : > { %v566_v27 = vmul.f32 0.0078125, %v542_v14 }
 0x265   : > { %v545_v15 = vpop.f32.mrf.mxu2 }
 0x266   : > { %v567_v22 = vmul.f32 0.0078125, %v545_v15 }
 0x26d   : > { %v548_v16 = vpop.f32.mrf.mxu2 }
 0x26e   : > { %v568_v29 = vmul.f32 0.0078125, %v548_v16 }
 0x275   : > { %v551_v17 = vpop.f32.mrf.mxu2 }
 0x276   : > { %v569_v25 = vmul.f32 0.0078125, %v551_v17 }
 0x27d   : > { %v554_v18 = vpop.f32.mrf.mxu2 }
 0x27e   : > { %v570_v28 = vmul.f32 0.0078125, %v554_v18 }
 0x285   : > { %v557_v19 = vpop.f32.mrf.mxu2 }
 0x286   : > { %v571_v20 = vmul.f32 0.0078125, %v557_v19 }
 0x288   : > { %601 = vperm.xlu2 %1034, %v571_v20  }
 0x28d   : > { %v560_v21 = vpop.f32.mrf.mxu2 }
 0x28e   : > { %v572_v23 = vmul.f32 0.0078125, %v560_v21 }
 0x290   : > { %581 = vperm.xlu2 %1034, %v567_v22   ;;  %606 = vperm.xlu1 %1033, %v572_v23  }
 0x295   : > { %v563_v24 = vpop.f32.mrf.mxu2 }
 0x296   : > { %v573_v26 = vmul.f32 0.0078125, %v563_v24 }
 0x298   : > { %591 = vperm.xlu1 %1033, %v569_v25   ;;  %611 = vperm.xlu0 %1032, %v573_v26  }
 0x2a0   : > { %576 = vperm.xlu1 %1033, %v566_v27   ;;  %596 = vperm.xlu0 %1032, %v570_v28   ;;  %v452_v27 = vld [vmem:[%s1399_s5] sm:$0xff] }
 0x2a8   : > { %586 = vperm.xlu0 %1032, %v568_v29  }
 0x2e2   : > { %v602_v30 = vpop.permute.xlu2 %601 }
 0x2e3   : > { %v1250_v31 = vsub.f32 %v1173_v52, %v602_v30 }
 0x2e5   : > { %v627_v32 = vmul.f32 %v1250_v31, %v1250_v31 }
 0x2e7   : > { %v645_v33 = vsel %vm359_vm0, %v627_v32, 0.0 }
 0x2e8   : > { %646 = vadd.xlane.f32.xlu1 %v645_v33 }
 0x302   : > { %v607_v34 = vpop.permute.xlu1 %606 }
 0x303   : > { %v1256_v35 = vsub.f32 %v1177_v54, %v607_v34  ;;  %v582_v54 = vpop.permute.xlu2 %581 }
 0x305   : > { %v628_v36 = vmul.f32 %v1256_v35, %v1256_v35 }
 0x307   : > { %v648_v37 = vsel %vm359_vm0, %v628_v36, 0.0 }
 0x308   : > { %649 = vadd.xlane.f32.xlu2 %v648_v37 }
 0x30a   : > { %v592_v38 = vpop.permute.xlu1 %591  ;;  %v612_v39 = vpop.permute.xlu0 %611 }
 0x30b   : > { %v1262_v40 = vsub.f32 %v1167_v49, %v592_v38  ;;  %v1265_v41 = vsub.f32 %v1183_v57, %v612_v39  ;;  %v1284_v57 = vsub.f32 %v1163_v47, %v582_v54 }
 0x30d   : > { %v625_v42 = vmul.f32 %v1262_v40, %v1262_v40  ;;  %v629_v43 = vmul.f32 %v1265_v41, %v1265_v41  ;;  %v623_v60 = vmul.f32 %v1284_v57, %v1284_v57 }
 0x30f   : > { %v639_v44 = vsel %vm359_vm0, %v625_v42, 0.0  ;;  %v651_v45 = vsel %vm359_vm0, %v629_v43, 0.0  ;;  %v633_v62 = vsel %vm359_vm0, %v623_v60, 0.0  ;;  %v453_v43 = vld [vmem:[%s1399_s5 + $0x8] sm:$0xff] }
 0x310   : > { %640 = vadd.xlane.f32.xlu2 %v639_v44  ;;  %652 = vadd.xlane.f32.xlu0 %v651_v45 }
 0x312   : > { %v577_v51 = vpop.permute.xlu1 %576  ;;  %v597_v52 = vpop.permute.xlu0 %596 }
 0x313   : > { %v1274_v49 = vsub.f32 %v1161_v46, %v577_v51  ;;  %v1277_v53 = vsub.f32 %v1169_v50, %v597_v52 }
 0x315   : > { %v622_v55 = vmul.f32 %v1274_v49, %v1274_v49  ;;  %v626_v56 = vmul.f32 %v1277_v53, %v1277_v53 }
 0x317   : > { %v630_v58 = vsel %vm359_vm0, %v622_v55, 0.0  ;;  %v642_v59 = vsel %vm359_vm0, %v626_v56, 0.0 }
 0x318   : > { %631 = vadd.xlane.f32.xlu2 %v630_v58  ;;  %643 = vadd.xlane.f32.xlu0 %v642_v59 }
 0x31a   : > { %v587_v46 = vpop.permute.xlu0 %586 }
 0x31b   : > { %v1289_v50 = vsub.f32 %v1165_v48, %v587_v46  ;;  %v461_v48 = vld [vmem:[%s1400_s6 + $0x8] sm:$0xff] }
 0x31d   : > { %v624_v61 = vmul.f32 %v1289_v50, %v1289_v50 }
 0x31f   : > { %v636_v47 = vsel %vm359_vm0, %v624_v61, 0.0  ;;  %v454_v61 = vld [vmem:[%s1399_s5 + $0x10] sm:$0xff] }
 0x320   : > { %634 = vadd.xlane.f32.xlu0 %v633_v62  ;;  %637 = vadd.xlane.f32.xlu1 %v636_v47 }
 0x330   : > { %849 = vperm.xlu2 %1034, %v460_v63  }
 0x334   : > { %854 = vperm.xlu0 %1032, %v461_v48  }
 0x338   : > { %864 = vperm.xlu2 %1034, %v463_v0  }
 0x339   : > { %859 = vperm.xlu1 %1033, %v462_v1  }
 0x33c   : > { %869 = vperm.xlu0 %1032, %v464_v2  }
 0x35b   : > { %v647_v6 = vpop.xlane.xlu1 %646 }
 0x37b   : > { %v650_v3 = vpop.xlane.xlu2 %649 }
 0x383   : > { %v653_v4 = vpop.xlane.xlu0 %652  ;;  %v641_v15 = vpop.xlane.xlu2 %640 }
 0x384   : > { %662 = vmatpush.msra.mxu3 %v653_v4 }
 0x386   : > { %663 = vmatpush.msra.mxu3 %v650_v3 }
 0x388   : > { %664 = vmatpush.msra.mxu3 %v647_v6 }
 0x38b   : > { %v644_v14 = vpop.xlane.xlu0 %643  ;;  %v632_v18 = vpop.xlane.xlu2 %631 }
 0x38c   : > { %665 = vmatpush.msra.mxu3 %v644_v14 }
 0x38e   : > { %666 = vmatpush.msra.mxu3 %v641_v15  ;;  %v455_v15 = vld [vmem:[%s1399_s5 + $0x18] sm:$0xff] }
 0x393   : > { %v638_v16 = vpop.xlane.xlu1 %637  ;;  %v635_v17 = vpop.xlane.xlu0 %634 }
 0x394   : > { %667 = vmatpush.msra.mxu3 %v638_v16 }
 0x396   : > { %668 = vmatpush.msra.mxu3 %v635_v17 }
 0x398   : > { %669 = vmatpush.msra.mxu3 %v632_v18 }
 0x399   : > { %1007 = vmatmul.msk.f32.vlgmr.msra.gmra.mxu3 %vm500_vm3, %v1196_v5 }
 0x3a1   : > { %1008 = vmatmul.msk.f32.gmra.mxu3 %vm500_vm3, %v1203_v7 }
 0x3a9   : > { %1009 = vmatmul.msk.f32.gmra.mxu3 %vm500_vm3, %v1210_v8 }
 0x3b1   : > { %1010 = vmatmul.msk.f32.gmra.mxu3 %vm500_vm3, %v1217_v9 }
 0x3b9   : > { %1011 = vmatmul.msk.f32.gmra.mxu3 %vm500_vm3, %v1224_v10 }
 0x3c1   : > { %1012 = vmatmul.msk.f32.gmra.mxu3 %vm500_vm3, %v1231_v11 }
 0x3c9   : > { %1013 = vmatmul.msk.f32.gmra.mxu3 %vm500_vm3, %v1238_v12 }
 0x3d1   : > { %1014 = vmatmul.msk.f32.gmra.mxu3 %vm500_vm3, %v1245_v13 }
 0x41c   : > { %v671_v5 = vpop.f32.mrf.mxu3 }
 0x41d   : > { %v695_v7 = vmul.f32 0.0078125, %v671_v5 }
 0x41f   : > { %v703_v19 = vadd.f32 1e-05, %v695_v7 }
 0x421   : > { %1035 = vrsqrt.f32 %v703_v19  ;;  %vm717_vm5 = vweird.f32 %v703_v19 }
 0x424   : > { %v674_v8 = vpop.f32.mrf.mxu3 }
 0x425   : > { %v696_v20 = vmul.f32 0.0078125, %v674_v8 }
 0x427   : > { %v1036_v21 = vpop.eup %1035  ;;  %v704_v9 = vadd.f32 1e-05, %v696_v20 }
 0x428   : > { %v712_v22 = vmul.f32 %v1036_v21, %v703_v19  ;;  %vm718_vm4 = vweird.f32 %v1036_v21 }
 0x429   : > { %1037 = vrsqrt.f32 %v704_v9  ;;  %vm719_vm6 = vmor %vm717_vm5, %vm718_vm4  ;;  %vm727_vm8 = vweird.f32 %v704_v9 }
 0x42a   : > { %v713_v10 = vmul.f32 %v1036_v21, %v712_v22 }
 0x42c   : > { %v714_v23 = vmul.f32 0.5, %v713_v10  ;;  %v677_v24 = vpop.f32.mrf.mxu3  ;;  %v456_v10 = vld [vmem:[%s1399_s5 + $0x20] sm:$0xff] }
 0x42d   : > { %v697_v11 = vmul.f32 0.0078125, %v677_v24 }
 0x42e   : > { %v715_v25 = vsub.f32 1.5, %v714_v23 }
 0x42f   : > { %v1038_v12 = vpop.eup %1037  ;;  %v705_v26 = vadd.f32 1e-05, %v697_v11 }
 0x430   : > { %v722_v13 = vmul.f32 %v1038_v12, %v704_v9  ;;  %v716_v28 = vmul.f32 %v1036_v21, %v715_v25  ;;  %vm728_vm7 = vweird.f32 %v1038_v12 }
 0x431   : > { %1039 = vrsqrt.f32 %v705_v26  ;;  %vm729_vm9 = vmor %vm727_vm8, %vm728_vm7  ;;  %vm737_vm11 = vweird.f32 %v705_v26 }
 0x432   : > { %v723_v29 = vmul.f32 %v1038_v12, %v722_v13  ;;  %v720_v30 = vsel %vm719_vm6, %v1036_v21, %v716_v28 }
 0x433   : > { %v791_v32 = vmul.f32 %v720_v30, %v452_v27 }
 0x434   : > { %v724_v33 = vmul.f32 0.5, %v723_v29  ;;  %v680_v34 = vpop.f32.mrf.mxu3 }
 0x435   : > { %v698_v36 = vmul.f32 0.0078125, %v680_v34  ;;  %801 = vperm.xlu1 %1033, %v791_v32   ;;  %v457_v32 = vld [vmem:[%s1399_s5 + $0x28] sm:$0xff] }
 0x436   : > { %v725_v37 = vsub.f32 1.5, %v724_v33 }
 0x437   : > { %v1040_v38 = vpop.eup %1039  ;;  %v706_v39 = vadd.f32 1e-05, %v698_v36 }
 0x438   : > { %v732_v42 = vmul.f32 %v1040_v38, %v705_v26  ;;  %v726_v44 = vmul.f32 %v1038_v12, %v725_v37  ;;  %vm738_vm10 = vweird.f32 %v1040_v38 }
 0x439   : > { %1041 = vrsqrt.f32 %v706_v39  ;;  %vm739_vm12 = vmor %vm737_vm11, %vm738_vm10  ;;  %vm747_vm14 = vweird.f32 %v706_v39 }
 0x43a   : > { %v733_v45 = vmul.f32 %v1040_v38, %v732_v42  ;;  %v730_v51 = vsel %vm729_vm9, %v1038_v12, %v726_v44  ;;  %v458_v44 = vld [vmem:[%s1399_s5 + $0x30] sm:$0xff] }
 0x43b   : > { %v792_v52 = vmul.f32 %v730_v51, %v453_v43 }
 0x43c   : > { %v734_v54 = vmul.f32 0.5, %v733_v45  ;;  %v683_v55 = vpop.f32.mrf.mxu3 }
 0x43d   : > { %v699_v56 = vmul.f32 0.0078125, %v683_v55  ;;  %806 = vperm.xlu0 %1032, %v792_v52   ;;  %v466_v52 = vld [vmem:[%s1400_s6 + $0x30] sm:$0xff] }
 0x43e   : > { %v735_v58 = vsub.f32 1.5, %v734_v54 }
 0x43f   : > { %v1042_v59 = vpop.eup %1041  ;;  %v707_v46 = vadd.f32 1e-05, %v699_v56 }
 0x440   : > { %v742_v60 = vmul.f32 %v1042_v59, %v706_v39  ;;  %v736_v62 = vmul.f32 %v1040_v38, %v735_v58  ;;  %vm748_vm13 = vweird.f32 %v1042_v59 }
 0x441   : > { %1043 = vrsqrt.f32 %v707_v46  ;;  %vm749_vm15 = vmor %vm747_vm14, %vm748_vm13  ;;  %vm757_vm2 = vweird.f32 %v707_v46 }
 0x442   : > { %v743_v47 = vmul.f32 %v1042_v59, %v742_v60  ;;  %v740_v63 = vsel %vm739_vm12, %v1040_v38, %v736_v62  ;;  %v467_v60 = vld [vmem:[%s1400_s6 + $0x38] sm:$0xff] }
 0x443   : > { %v793_v48 = vmul.f32 %v740_v63, %v454_v61  ;;  %v850_v63 = vpop.permute.xlu2 %849 }
 0x444   : > { %v744_v0 = vmul.f32 0.5, %v743_v47  ;;  %v686_v1 = vpop.f32.mrf.mxu3  ;;  %v465_v47 = vld [vmem:[%s1400_s6 + $0x28] sm:$0xff] }
 0x445   : > { %v700_v2 = vmul.f32 0.0078125, %v686_v1  ;;  %811 = vperm.xlu2 %1034, %v793_v48   ;;  %v860_v1 = vpop.permute.xlu1 %859 }
 0x446   : > { %v745_v3 = vsub.f32 1.5, %v744_v0  ;;  %v855_v0 = vpop.permute.xlu0 %854 }
 0x447   : > { %v1044_v4 = vpop.eup %1043  ;;  %v708_v6 = vadd.f32 1e-05, %v700_v2 }
 0x448   : > { %v752_v14 = vmul.f32 %v1044_v4, %v707_v46  ;;  %v746_v16 = vmul.f32 %v1042_v59, %v745_v3  ;;  %vm758_vm1 = vweird.f32 %v1044_v4 }
 0x449   : > { %1045 = vrsqrt.f32 %v708_v6  ;;  %vm759_vm3 = vmor %vm757_vm2, %vm758_vm1  ;;  %vm767_vm5 = vweird.f32 %v708_v6 }
 0x44a   : > { %v753_v17 = vmul.f32 %v1044_v4, %v752_v14  ;;  %v750_v18 = vsel %vm749_vm15, %v1042_v59, %v746_v16  ;;  %v459_v59 = vld [vmem:[%s1399_s5 + $0x38] sm:$0xff] }
 0x44b   : > { %v794_v5 = vmul.f32 %v750_v18, %v455_v15  ;;  %v865_v48 = vpop.permute.xlu2 %864 }
 0x44c   : > { %v754_v7 = vmul.f32 0.5, %v753_v17  ;;  %v689_v19 = vpop.f32.mrf.mxu3 }
 0x44d   : > { %v701_v8 = vmul.f32 0.0078125, %v689_v19  ;;  %816 = vperm.xlu0 %1032, %v794_v5  }
 0x44e   : > { %v755_v20 = vsub.f32 1.5, %v754_v7  ;;  %v870_v14 = vpop.permute.xlu0 %869 }
 0x44f   : > { %v1046_v21 = vpop.eup %1045  ;;  %v709_v9 = vadd.f32 1e-05, %v701_v8 }
 0x450   : > { %v762_v22 = vmul.f32 %v1046_v21, %v708_v6  ;;  %v756_v23 = vmul.f32 %v1044_v4, %v755_v20  ;;  %vm768_vm4 = vweird.f32 %v1046_v21 }
 0x451   : > { %1047 = vrsqrt.f32 %v709_v9  ;;  %vm769_vm6 = vmor %vm767_vm5, %vm768_vm4  ;;  %vm777_vm8 = vweird.f32 %v709_v9 }
 0x452   : > { %v763_v24 = vmul.f32 %v1046_v21, %v762_v22  ;;  %v760_v11 = vsel %vm759_vm3, %v1044_v4, %v756_v23 }
 0x453   : > { %v795_v25 = vmul.f32 %v760_v11, %v456_v10 }
 0x454   : > { %v764_v12 = vmul.f32 0.5, %v763_v24  ;;  %v692_v26 = vpop.f32.mrf.mxu3 }
 0x455   : > { %v702_v13 = vmul.f32 0.0078125, %v692_v26  ;;  %821 = vperm.xlu1 %1033, %v795_v25  }
 0x456   : > { %v765_v27 = vsub.f32 1.5, %v764_v12 }
 0x457   : > { %v1048_v28 = vpop.eup %1047  ;;  %v710_v29 = vadd.f32 1e-05, %v702_v13 }
 0x458   : > { %v772_v30 = vmul.f32 %v1048_v28, %v709_v9  ;;  %v766_v33 = vmul.f32 %v1046_v21, %v765_v27  ;;  %vm778_vm7 = vweird.f32 %v1048_v28 }
 0x459   : > { %1049 = vrsqrt.f32 %v710_v29  ;;  %vm779_vm9 = vmor %vm777_vm8, %vm778_vm7  ;;  %vm787_vm11 = vweird.f32 %v710_v29 }
 0x45a   : > { %v773_v34 = vmul.f32 %v1048_v28, %v772_v30  ;;  %v770_v36 = vsel %vm769_vm6, %v1046_v21, %v766_v33 }
 0x45b   : > { %v796_v37 = vmul.f32 %v770_v36, %v457_v32 }
 0x45c   : > { %v774_v38 = vmul.f32 0.5, %v773_v34 }
 0x45d   : > { %826 = vperm.xlu2 %1034, %v796_v37  }
 0x45e   : > { %v775_v39 = vsub.f32 1.5, %v774_v38 }
 0x45f   : > { %v1050_v42 = vpop.eup %1049 }
 0x460   : > { %v782_v43 = vmul.f32 %v1050_v42, %v710_v29  ;;  %v776_v45 = vmul.f32 %v1048_v28, %v775_v39  ;;  %vm788_vm10 = vweird.f32 %v1050_v42 }
 0x461   : > { %vm789_vm12 = vmor %vm787_vm11, %vm788_vm10 }
 0x462   : > { %v783_v51 = vmul.f32 %v1050_v42, %v782_v43  ;;  %v780_v54 = vsel %vm779_vm9, %v1048_v28, %v776_v45 }
 0x463   : > { %v797_v55 = vmul.f32 %v780_v54, %v458_v44 }
 0x464   : > { %v784_v56 = vmul.f32 0.5, %v783_v51 }
 0x465   : > { %879 = vperm.xlu2 %1034, %v466_v52   ;;  %831 = vperm.xlu0 %1032, %v797_v55  }
 0x466   : > { %v785_v58 = vsub.f32 1.5, %v784_v56 }
 0x468   : > { %v786_v46 = vmul.f32 %v1050_v42, %v785_v58 }
 0x46a   : > { %v790_v61 = vsel %vm789_vm12, %v1050_v42, %v786_v46 }
 0x46b   : > { %v798_v62 = vmul.f32 %v790_v61, %v459_v59 }
 0x46d   : > { %884 = vperm.xlu0 %1032, %v467_v60   ;;  %836 = vperm.xlu1 %1033, %v798_v62  }
 0x475   : > { %874 = vperm.xlu1 %1033, %v465_v47  }
 0x49f   : > { %v812_v2 = vpop.permute.xlu2 %811 }
 0x4a0   : > { %v841_v3 = vmul.f32 %v812_v2, %v1289_v50 }
 0x4a2   : > { %v889_v4 = vadd.f32 %v860_v1, %v841_v3 }
 0x4a4   : > { %v897_v6 = vmax.f32 %v889_v4, 0.0 }
 0x4a6   : > { %905 = vst.msk [vmem:[%s1366_s21 + $0x10] sm:$0xff] %vm359_vm0, %v897_v6 }
 0x4a7   : > { %v802_v15 = vpop.permute.xlu1 %801 }
 0x4a8   : > { %v839_v16 = vmul.f32 %v802_v15, %v1274_v49 }
 0x4aa   : > { %v887_v17 = vadd.f32 %v850_v63, %v839_v16 }
 0x4ac   : > { %v895_v18 = vmax.f32 %v887_v17, 0.0 }
 0x4ae   : > { %903 = vst.msk [vmem:[%s1366_s21] sm:$0xff] %vm359_vm0, %v895_v18 }
 0x4af   : > { %v807_v50 = vpop.permute.xlu0 %806 }
 0x4b0   : > { %v840_v5 = vmul.f32 %v807_v50, %v1284_v57 }
 0x4b2   : > { %v888_v7 = vadd.f32 %v855_v0, %v840_v5 }
 0x4b4   : > { %v896_v19 = vmax.f32 %v888_v7, 0.0 }
 0x4b6   : > { %904 = vst.msk [vmem:[%s1366_s21 + $0x8] sm:$0xff] %vm359_vm0, %v896_v19 }
 0x4b7   : > { %v827_v57 = vpop.permute.xlu2 %826 }
 0x4b8   : > { %v844_v29 = vmul.f32 %v827_v57, %v1250_v31 }
 0x4bf   : > { %v817_v8 = vpop.permute.xlu0 %816  ;;  %v880_v25 = vpop.permute.xlu2 %879 }
 0x4c0   : > { %v842_v20 = vmul.f32 %v817_v8, %v1262_v40 }
 0x4c2   : > { %v890_v21 = vadd.f32 %v865_v48, %v842_v20 }
 0x4c4   : > { %v898_v9 = vmax.f32 %v890_v21, 0.0 }
 0x4c6   : > { %906 = vst.msk [vmem:[%s1366_s21 + $0x18] sm:$0xff] %vm359_vm0, %v898_v9 }
 0x4c7   : > { %v822_v49 = vpop.permute.xlu1 %821 }
 0x4c8   : > { %v843_v22 = vmul.f32 %v822_v49, %v1277_v53 }
 0x4ca   : > { %v891_v10 = vadd.f32 %v870_v14, %v843_v22 }
 0x4cc   : > { %v899_v23 = vmax.f32 %v891_v10, 0.0 }
 0x4ce   : > { %907 = vst.msk [vmem:[%s1366_s21 + $0x20] sm:$0xff] %vm359_vm0, %v899_v23 }
 0x4d7   : > { %v832_v24 = vpop.permute.xlu0 %831 }
 0x4d8   : > { %v845_v11 = vmul.f32 %v832_v24, %v1256_v35 }
 0x4da   : > { %v893_v12 = vadd.f32 %v880_v25, %v845_v11 }
 0x4dc   : > { %v901_v40 = vmax.f32 %v893_v12, 0.0 }
 0x4de   : > { %909 = vst.msk [vmem:[%s1366_s21 + $0x30] sm:$0xff] %vm359_vm0, %v901_v40 }
 0x4df   : > { %v837_v26 = vpop.permute.xlu1 %836  ;;  %v885_v27 = vpop.permute.xlu0 %884 }
 0x4e0   : > { %v846_v13 = vmul.f32 %v837_v26, %v1265_v41 }
 0x4e2   : > { %v894_v53 = vadd.f32 %v885_v27, %v846_v13 }
 0x4e4   : > { %v902_v28 = vmax.f32 %v894_v53, 0.0 }
 0x4e6   : > { %910 = vst.msk [vmem:[%s1366_s21 + $0x38] sm:$0xff] %vm359_vm0, %v902_v28 }
 0x4e7   : > { %v875_v30 = vpop.permute.xlu1 %874 }
 0x4e8   : > { %v892_v32 = vadd.f32 %v875_v30, %v844_v29 }
 0x4ea   : > { %v900_v33 = vmax.f32 %v892_v32, 0.0 }
 0x4ec   : > { %908 = vst.msk [vmem:[%s1366_s21 + $0x28] sm:$0xff] %vm359_vm0, %v900_v33 }
 0x4ed PF: > { %s17_s24 = sadd.s32 1, %s1057_s24  }
 0x4ee   : > { %p14_p4 = scmp.ge.s32.totalorder %s17_s24, 4  }
 0x4f0   :  { %16 = sbr.rel (!%p14_p4) target bundleno = 1 (0x1), region = 78 }

// kernel: vae_decoder_forward.7
= control target key start
LH: loop header
LB: loop body
LE: loop exit
PB: predicated region body
PF: predicated region fallthrough
CT: control target
= control target key end

     0   :  { %s1633_s13 = smov 0   ;;  %s2241_s0 = inlined_call_operand.vmem [shape: f32[2,64,4], index: 0, kind: input, shape index: {}]   ;;  %s2242_s1 = inlined_call_operand.vmem [shape: f32[64,64], index: 1, kind: input, shape index: {}]   ;;  %s2243_s2 = inlined_call_operand.vmem [shape: f32[64,1], index: 2, kind: input, shape index: {}]   ;;  %s2244_s3 = inlined_call_operand.vmem [shape: f32[64,1], index: 3, kind: input, shape index: {}]   ;;  %s2245_s4 = inlined_call_operand.vmem [shape: bf16[16,576], index: 4, kind: input, shape index: {}]   ;;  %s2246_s5 = inlined_call_operand.vmem [shape: f32[16,1], index: 5, kind: input, shape index: {}]   ;;  %s2247_s6 = inlined_call_operand.vmem [shape: f32[9,1,4], index: 6, kind: input, shape index: {}]   ;;  %s2248_s7 = inlined_call_operand.vmem [shape: f32[16,16], index: 7, kind: input, shape index: {}]   ;;  %s2249_s8 = inlined_call_operand.vmem [shape: f32[16,1], index: 8, kind: input, shape index: {}]   ;;  %s2250_s9 = inlined_call_operand.vmem [shape: f32[16,1], index: 9, kind: input, shape index: {}]   ;;  %s2251_s10 = inlined_call_operand.vmem [shape: f32[2,16,4], index: 10, kind: output, shape index: {}]  }
   0x1 LB: > { %s1451_s14 = sadd.s32 4294967295, %s1569_s13   ;;  %p1455_p0 = scmp.ge.s32.totalorder %s1569_s13, 1  ;;  %s1569_s13 = sphi %s1633_s13, %s20_s13  }
   0x2   : > { %p312_p1 = scmp.lt.s32.totalorder %s1569_s13, 3 }
   0x4   : > { %p313_p2 = pnand %p1455_p0, %p312_p1 }
   0x5   : > { %p350_p3 = scmp.lt.s32.totalorder (!%p313_p2), %s1451_s14, 1  ;;  %s1572_s11 = smov (!%p313_p2), 125  }
   0x6   : > { %316 = sbr.rel (%p313_p2) target bundleno = 2040 (0x7f8), region = 60  ;;  %s1573_s12 = smov (!%p313_p2), 2  }
   0x7   : > { %s1575_s16 = smov (!%p313_p2), 1   ;;  %s1576_s17 = smov (!%p313_p2), 127  }
   0xb   : > { %s2257_s14 = smov (!%p350_p3, %s1451_s14), 1  ;;  %vm393_vm0 = vcmask 31744   ;;  %v1682_v24 = vld [vmem:[%s2242_s1] sm:$0xff]  ;;  %vm418_vm1 = vcmask 523264   ;;  %v1689_v25 = vld [vmem:[%s2242_s1 + $0x8] sm:$0xff]  ;;  %v1696_v26 = vld [vmem:[%s2242_s1 + $0x10] sm:$0xff] }
   0xc   : > { %s1510_s15 = sshll.u32 %s2257_s14, 6  ;;  %v1703_v27 = vld [vmem:[%s2242_s1 + $0x18] sm:$0xff]  ;;  %v1710_v28 = vld [vmem:[%s2242_s1 + $0x20] sm:$0xff]  ;;  %v1717_v29 = vld [vmem:[%s2242_s1 + $0x28] sm:$0xff]  ;;  %v1571_v33 = vmov 0  }
   0xd   : > { %s354_s18 = scalar_lea.vmem %s2241_s0, %s1510_s15  ;;  %v1724_v30 = vld [vmem:[%s2242_s1 + $0x30] sm:$0xff]  ;;  %v1731_v31 = vld [vmem:[%s2242_s1 + $0x38] sm:$0xff]  ;;  %1534 = vset.pattern.permute.xlu2 %v1571_v33  ;;  %1533 = vset.pattern.permute.xlu1 %v1571_v33  ;;  %s1574_s15 = smov 126  }
   0xe   : > { %v1647_v0 = vld [vmem:[%s354_s18 + $0x38] sm:$0xff]  ;;  %v1649_v1 = vld [vmem:[%s354_s18 + $0x28] sm:$0xff]  ;;  %v1659_v6 = vld [vmem:[%s354_s18 + $0x30] sm:$0xff]  ;;  %1532 = vset.pattern.permute.xlu0 %v1571_v33 }
   0xf   : > { %v415_v2 = vsel %vm393_vm0, %v1647_v0, 0.0  ;;  %v409_v3 = vsel %vm393_vm0, %v1649_v1, 0.0  ;;  %v1655_v4 = vld [vmem:[%s354_s18 + $0x18] sm:$0xff]  ;;  %v1661_v7 = vld [vmem:[%s354_s18 + $0x20] sm:$0xff]  ;;  %v1663_v8 = vld [vmem:[%s354_s18 + $0x10] sm:$0xff]  ;;  %v412_v9 = vsel %vm393_vm0, %v1659_v6, 0.0 }
  0x10   : > { %416 = vadd.xlane.f32.xlu0 %v415_v2  ;;  %410 = vadd.xlane.f32.xlu1 %v409_v3  ;;  %v403_v5 = vsel %vm393_vm0, %v1655_v4, 0.0  ;;  %v406_v10 = vsel %vm393_vm0, %v1661_v7, 0.0  ;;  %v400_v11 = vsel %vm393_vm0, %v1663_v8, 0.0  ;;  %v1671_v12 = vld [vmem:[%s354_s18 + $0x8] sm:$0xff]  ;;  %v1673_v13 = vld [vmem:[%s354_s18] sm:$0xff]  ;;  %s1577_s18 = smov 3  }
  0x11   : > { %404 = vadd.xlane.f32.xlu2 %v403_v5  ;;  %v397_v14 = vsel %vm393_vm0, %v1671_v12, 0.0  ;;  %v394_v15 = vsel %vm393_vm0, %v1673_v13, 0.0 }
  0x18   : > { %413 = vadd.xlane.f32.xlu0 %v412_v9  ;;  %407 = vadd.xlane.f32.xlu1 %v406_v10 }
  0x19   : > { %401 = vadd.xlane.f32.xlu2 %v400_v11 }
  0x20   : > { %398 = vadd.xlane.f32.xlu0 %v397_v14  ;;  %395 = vadd.xlane.f32.xlu1 %v394_v15 }
  0x83   : > { %v417_v16 = vpop.xlane.xlu0 %416  ;;  %v411_v17 = vpop.xlane.xlu1 %410 }
  0x84   : > { %451 = vmatpush.msra.mxu0 %v417_v16  ;;  %v405_v18 = vpop.xlane.xlu2 %404 }
  0x8b   : > { %v414_v19 = vpop.xlane.xlu0 %413  ;;  %v408_v20 = vpop.xlane.xlu1 %407 }
  0x8c   : > { %452 = vmatpush.msra.mxu0 %v414_v19  ;;  %v402_v21 = vpop.xlane.xlu2 %401  ;;  %v381_v19 = vld [vmem:[%s2244_s3 + $0x20] sm:$0xff] }
  0x8e   : > { %453 = vmatpush.msra.mxu0 %v411_v17 }
  0x90   : > { %454 = vmatpush.msra.mxu0 %v408_v20  ;;  %v382_v20 = vld [vmem:[%s2244_s3 + $0x28] sm:$0xff] }
  0x92   : > { %455 = vmatpush.msra.mxu0 %v405_v18  ;;  %v384_v18 = vld [vmem:[%s2244_s3 + $0x38] sm:$0xff] }
  0x93   : > { %v399_v22 = vpop.xlane.xlu0 %398  ;;  %v396_v23 = vpop.xlane.xlu1 %395 }
  0x94   : > { %456 = vmatpush.msra.mxu0 %v402_v21  ;;  %v380_v21 = vld [vmem:[%s2244_s3 + $0x18] sm:$0xff] }
  0x96   : > { %457 = vmatpush.msra.mxu0 %v399_v22  ;;  %v378_v22 = vld [vmem:[%s2244_s3 + $0x8] sm:$0xff] }
  0x98   : > { %458 = vmatpush.msra.mxu0 %v396_v23  ;;  %v379_v23 = vld [vmem:[%s2244_s3 + $0x10] sm:$0xff] }
  0x99   : > { %1460 = vmatmul.msk.f32.vlgmr.msra.gmra.mxu0 %vm418_vm1, %v1682_v24 }
  0xa1   : > { %1461 = vmatmul.msk.f32.gmra.mxu0 %vm418_vm1, %v1689_v25 }
  0xa9   : > { %1462 = vmatmul.msk.f32.gmra.mxu0 %vm418_vm1, %v1696_v26 }
  0xb1   : > { %1463 = vmatmul.msk.f32.gmra.mxu0 %vm418_vm1, %v1703_v27 }
  0xb9   : > { %1464 = vmatmul.msk.f32.gmra.mxu0 %vm418_vm1, %v1710_v28 }
  0xc1   : > { %1465 = vmatmul.msk.f32.gmra.mxu0 %vm418_vm1, %v1717_v29 }
  0xc9   : > { %1466 = vmatmul.msk.f32.gmra.mxu0 %vm418_vm1, %v1724_v30 }
  0xd1   : > { %1467 = vmatmul.msk.f32.gmra.mxu0 %vm418_vm1, %v1731_v31 }
 0x116   : > { %v460_v32 = vpop.f32.mrf.mxu0 }
 0x117   : > { %v484_v45 = vmul.f32 0.03125, %v460_v32  ;;  %v377_v32 = vld [vmem:[%s2244_s3] sm:$0xff] }
 0x11e   : > { %v463_v34 = vpop.f32.mrf.mxu0 }
 0x11f   : > { %v485_v48 = vmul.f32 0.03125, %v463_v34 }
 0x126   : > { %v466_v35 = vpop.f32.mrf.mxu0 }
 0x127   : > { %v486_v42 = vmul.f32 0.03125, %v466_v35 }
 0x12e   : > { %v469_v36 = vpop.f32.mrf.mxu0 }
 0x12f   : > { %v487_v47 = vmul.f32 0.03125, %v469_v36 }
 0x136   : > { %v472_v37 = vpop.f32.mrf.mxu0 }
 0x137   : > { %v488_v38 = vmul.f32 0.03125, %v472_v37 }
 0x139   : > { %514 = vperm.xlu2 %1534, %v488_v38  }
 0x13e   : > { %v475_v39 = vpop.f32.mrf.mxu0 }
 0x13f   : > { %v489_v40 = vmul.f32 0.03125, %v475_v39 }
 0x141   : > { %519 = vperm.xlu1 %1533, %v489_v40  }
 0x146   : > { %v478_v41 = vpop.f32.mrf.mxu0 }
 0x147   : > { %v490_v43 = vmul.f32 0.03125, %v478_v41 }
 0x149   : > { %504 = vperm.xlu1 %1533, %v486_v42   ;;  %524 = vperm.xlu0 %1532, %v490_v43  }
 0x14e   : > { %v481_v44 = vpop.f32.mrf.mxu0 }
 0x14f   : > { %v491_v46 = vmul.f32 0.03125, %v481_v44 }
 0x151   : > { %494 = vperm.xlu1 %1533, %v484_v45   ;;  %529 = vperm.xlu2 %1534, %v491_v46  }
 0x159   : > { %509 = vperm.xlu2 %1534, %v487_v47  }
 0x161   : > { %499 = vperm.xlu2 %1534, %v485_v48  }
 0x193   : > { %v515_v49 = vpop.permute.xlu2 %514 }
 0x1ab   : > { %v530_v50 = vpop.permute.xlu2 %529 }
 0x1ac   : > { %v1736_v51 = vsub.f32 %v1647_v0, %v530_v50 }
 0x1ae   : > { %v547_v52 = vmul.f32 %v1736_v51, %v1736_v51 }
 0x1b0   : > { %v569_v53 = vsel %vm393_vm0, %v547_v52, 0.0 }
 0x1b1   : > { %570 = vadd.xlane.f32.xlu0 %v569_v53 }
 0x1b3   : > { %v520_v54 = vpop.permute.xlu1 %519  ;;  %v510_v55 = vpop.permute.xlu2 %509 }
 0x1b4   : > { %v1742_v56 = vsub.f32 %v1649_v1, %v520_v54  ;;  %v1745_v57 = vsub.f32 %v1655_v4, %v510_v55  ;;  %v1764_v4 = vsub.f32 %v1661_v7, %v515_v49  ;;  %v369_v49 = vld [vmem:[%s2243_s2] sm:$0xff] }
 0x1b6   : > { %v545_v58 = vmul.f32 %v1742_v56, %v1742_v56  ;;  %v543_v59 = vmul.f32 %v1745_v57, %v1745_v57 }
 0x1b8   : > { %v563_v60 = vsel %vm393_vm0, %v545_v58, 0.0  ;;  %v557_v61 = vsel %vm393_vm0, %v543_v59, 0.0 }
 0x1b9   : > { %564 = vadd.xlane.f32.xlu1 %v563_v60  ;;  %558 = vadd.xlane.f32.xlu0 %v557_v61 }
 0x1bb   : > { %v505_v62 = vpop.permute.xlu1 %504  ;;  %v525_v63 = vpop.permute.xlu0 %524 }
 0x1bc   : > { %v1754_v0 = vsub.f32 %v1663_v8, %v505_v62  ;;  %v1757_v1 = vsub.f32 %v1659_v6, %v525_v63  ;;  %v544_v6 = vmul.f32 %v1764_v4, %v1764_v4  ;;  %v500_v11 = vpop.permute.xlu2 %499 }
 0x1bd   : > { %v1776_v7 = vsub.f32 %v1671_v12, %v500_v11  ;;  %v383_v12 = vld [vmem:[%s2244_s3 + $0x30] sm:$0xff] }
 0x1be   : > { %v542_v2 = vmul.f32 %v1754_v0, %v1754_v0  ;;  %v546_v3 = vmul.f32 %v1757_v1, %v1757_v1  ;;  %v560_v15 = vsel %vm393_vm0, %v544_v6, 0.0 }
 0x1c0   : > { %v554_v5 = vsel %vm393_vm0, %v542_v2, 0.0  ;;  %v566_v9 = vsel %vm393_vm0, %v546_v3, 0.0  ;;  %v370_v2 = vld [vmem:[%s2243_s2 + $0x8] sm:$0xff] }
 0x1c1   : > { %555 = vadd.xlane.f32.xlu1 %v554_v5  ;;  %567 = vadd.xlane.f32.xlu2 %v566_v9 }
 0x1c3   : > { %v495_v8 = vpop.permute.xlu1 %494 }
 0x1c4   : > { %v1769_v10 = vsub.f32 %v1673_v13, %v495_v8  ;;  %v541_v13 = vmul.f32 %v1776_v7, %v1776_v7 }
 0x1c6   : > { %v540_v14 = vmul.f32 %v1769_v10, %v1769_v10  ;;  %v551_v17 = vsel %vm393_vm0, %v541_v13, 0.0 }
 0x1c8   : > { %v548_v16 = vsel %vm393_vm0, %v540_v14, 0.0 }
 0x1c9   : > { %561 = vadd.xlane.f32.xlu2 %v560_v15  ;;  %549 = vadd.xlane.f32.xlu0 %v548_v16 }
 0x1d1   : > { %552 = vadd.xlane.f32.xlu2 %v551_v17 }
 0x1da   : > { %802 = vperm.xlu1 %1533, %v384_v18   ;;  %v371_v18 = vld [vmem:[%s2243_s2 + $0x10] sm:$0xff] }
 0x1dd   : > { %797 = vperm.xlu0 %1532, %v383_v12  }
 0x1e2   : > { %787 = vperm.xlu1 %1533, %v381_v19  }
 0x1e5   : > { %792 = vperm.xlu0 %1532, %v382_v20  }
 0x1e9   : > { %782 = vperm.xlu2 %1534, %v380_v21  }
 0x1ea   : > { %772 = vperm.xlu1 %1533, %v378_v22  }
 0x1ed   : > { %777 = vperm.xlu0 %1532, %v379_v23  }
 0x1f1   : > { %767 = vperm.xlu2 %1534, %v377_v32  }
 0x224   : > { %v571_v33 = vpop.xlane.xlu0 %570 }
 0x225   : > { %580 = vmatpush.msra.mxu1 %v571_v33 }
 0x22c   : > { %v565_v35 = vpop.xlane.xlu1 %564  ;;  %v559_v37 = vpop.xlane.xlu0 %558 }
 0x234   : > { %v568_v34 = vpop.xlane.xlu2 %567  ;;  %v556_v38 = vpop.xlane.xlu1 %555 }
 0x235   : > { %581 = vmatpush.msra.mxu1 %v568_v34 }
 0x237   : > { %582 = vmatpush.msra.mxu1 %v565_v35 }
 0x23c   : > { %v562_v36 = vpop.xlane.xlu2 %561  ;;  %v550_v40 = vpop.xlane.xlu0 %549 }
 0x23d   : > { %583 = vmatpush.msra.mxu1 %v562_v36 }
 0x23f   : > { %584 = vmatpush.msra.mxu1 %v559_v37  ;;  %v372_v37 = vld [vmem:[%s2243_s2 + $0x18] sm:$0xff] }
 0x241   : > { %585 = vmatpush.msra.mxu1 %v556_v38 }
 0x244   : > { %v553_v39 = vpop.xlane.xlu2 %552 }
 0x245   : > { %586 = vmatpush.msra.mxu1 %v553_v39 }
 0x247   : > { %587 = vmatpush.msra.mxu1 %v550_v40 }
 0x248   : > { %1468 = vmatmul.msk.f32.vlgmr.msra.gmra.mxu1 %vm418_vm1, %v1682_v24 }
 0x250   : > { %1469 = vmatmul.msk.f32.gmra.mxu1 %vm418_vm1, %v1689_v25 }
 0x258   : > { %1470 = vmatmul.msk.f32.gmra.mxu1 %vm418_vm1, %v1696_v26 }
 0x260   : > { %1471 = vmatmul.msk.f32.gmra.mxu1 %vm418_vm1, %v1703_v27 }
 0x268   : > { %1472 = vmatmul.msk.f32.gmra.mxu1 %vm418_vm1, %v1710_v28 }
 0x270   : > { %1473 = vmatmul.msk.f32.gmra.mxu1 %vm418_vm1, %v1717_v29 }
 0x278   : > { %1474 = vmatmul.msk.f32.gmra.mxu1 %vm418_vm1, %v1724_v30 }
 0x280   : > { %1475 = vmatmul.msk.f32.gmra.mxu1 %vm418_vm1, %v1731_v31 }
 0x2c5   : > { %v589_v24 = vpop.f32.mrf.mxu1 }
 0x2c6   : > { %v613_v25 = vmul.f32 0.03125, %v589_v24 }
 0x2c8   : > { %v621_v41 = vadd.f32 1e-05, %v613_v25 }
 0x2ca   : > { %1543 = vrsqrt.f32 %v621_v41  ;;  %vm635_vm3 = vweird.f32 %v621_v41 }
 0x2cd   : > { %v592_v26 = vpop.f32.mrf.mxu1 }
 0x2ce   : > { %v614_v42 = vmul.f32 0.03125, %v592_v26 }
 0x2d0   : > { %v1544_v43 = vpop.eup %1543  ;;  %v622_v27 = vadd.f32 1e-05, %v614_v42 }
 0x2d1   : > { %v630_v44 = vmul.f32 %v1544_v43, %v621_v41  ;;  %vm636_vm2 = vweird.f32 %v1544_v43 }
 0x2d2   : > { %1545 = vrsqrt.f32 %v622_v27  ;;  %vm637_vm4 = vmor %vm635_vm3, %vm636_vm2  ;;  %vm645_vm6 = vweird.f32 %v622_v27 }
 0x2d3   : > { %v631_v28 = vmul.f32 %v1544_v43, %v630_v44 }
 0x2d5   : > { %v632_v45 = vmul.f32 0.5, %v631_v28  ;;  %v595_v46 = vpop.f32.mrf.mxu1  ;;  %v373_v28 = vld [vmem:[%s2243_s2 + $0x20] sm:$0xff] }
 0x2d6   : > { %v615_v29 = vmul.f32 0.03125, %v595_v46 }
 0x2d7   : > { %v633_v47 = vsub.f32 1.5, %v632_v45 }
 0x2d8   : > { %v1546_v30 = vpop.eup %1545  ;;  %v623_v48 = vadd.f32 1e-05, %v615_v29 }
 0x2d9   : > { %v640_v31 = vmul.f32 %v1546_v30, %v622_v27  ;;  %v634_v50 = vmul.f32 %v1544_v43, %v633_v47  ;;  %vm646_vm5 = vweird.f32 %v1546_v30 }
 0x2da   : > { %1547 = vrsqrt.f32 %v623_v48  ;;  %vm647_vm7 = vmor %vm645_vm6, %vm646_vm5  ;;  %vm655_vm9 = vweird.f32 %v623_v48 }
 0x2db   : > { %v641_v52 = vmul.f32 %v1546_v30, %v640_v31  ;;  %v638_v53 = vsel %vm637_vm4, %v1544_v43, %v634_v50 }
 0x2dc   : > { %v709_v54 = vmul.f32 %v638_v53, %v369_v49 }
 0x2dd   : > { %v642_v55 = vmul.f32 0.5, %v641_v52  ;;  %v598_v58 = vpop.f32.mrf.mxu1 }
 0x2de   : > { %v616_v59 = vmul.f32 0.03125, %v598_v58  ;;  %719 = vperm.xlu1 %1533, %v709_v54   ;;  %v374_v54 = vld [vmem:[%s2243_s2 + $0x28] sm:$0xff] }
 0x2df   : > { %v643_v60 = vsub.f32 1.5, %v642_v55 }
 0x2e0   : > { %v1548_v61 = vpop.eup %1547  ;;  %v624_v62 = vadd.f32 1e-05, %v616_v59 }
 0x2e1   : > { %v650_v63 = vmul.f32 %v1548_v61, %v623_v48  ;;  %v644_v3 = vmul.f32 %v1546_v30, %v643_v60  ;;  %vm656_vm8 = vweird.f32 %v1548_v61 }
 0x2e2   : > { %1549 = vrsqrt.f32 %v624_v62  ;;  %vm657_vm10 = vmor %vm655_vm9, %vm656_vm8  ;;  %vm665_vm12 = vweird.f32 %v624_v62 }
 0x2e3   : > { %v651_v5 = vmul.f32 %v1548_v61, %v650_v63  ;;  %v648_v9 = vsel %vm647_vm7, %v1546_v30, %v644_v3  ;;  %v375_v3 = vld [vmem:[%s2243_s2 + $0x30] sm:$0xff] }
 0x2e4   : > { %v710_v8 = vmul.f32 %v648_v9, %v370_v2 }
 0x2e5   : > { %v652_v6 = vmul.f32 0.5, %v651_v5  ;;  %v601_v11 = vpop.f32.mrf.mxu1 }
 0x2e6   : > { %v617_v14 = vmul.f32 0.03125, %v601_v11  ;;  %724 = vperm.xlu0 %1532, %v710_v8  }
 0x2e7   : > { %v653_v15 = vsub.f32 1.5, %v652_v6 }
 0x2e8   : > { %v1550_v16 = vpop.eup %1549  ;;  %v625_v13 = vadd.f32 1e-05, %v617_v14 }
 0x2e9   : > { %v660_v17 = vmul.f32 %v1550_v16, %v624_v62  ;;  %v654_v12 = vmul.f32 %v1548_v61, %v653_v15  ;;  %vm666_vm11 = vweird.f32 %v1550_v16  ;;  %v376_v15 = vld [vmem:[%s2243_s2 + $0x38] sm:$0xff] }
 0x2ea   : > { %1551 = vrsqrt.f32 %v625_v13  ;;  %vm667_vm13 = vmor %vm665_vm12, %vm666_vm11  ;;  %vm675_vm14 = vweird.f32 %v625_v13  ;;  %vm946_vm12 = vcmask 15360  }
 0x2eb   : > { %v661_v19 = vmul.f32 %v1550_v16, %v660_v17  ;;  %v658_v20 = vsel %vm657_vm10, %v1548_v61, %v654_v12  ;;  %v798_v12 = vpop.permute.xlu0 %797 }
 0x2ec   : > { %v711_v21 = vmul.f32 %v658_v20, %v371_v18  ;;  %v803_v18 = vpop.permute.xlu1 %802 }
 0x2ed   : > { %v662_v22 = vmul.f32 0.5, %v661_v19  ;;  %v604_v23 = vpop.f32.mrf.mxu1 }
 0x2ee   : > { %v618_v32 = vmul.f32 0.03125, %v604_v23  ;;  %729 = vperm.xlu2 %1534, %v711_v21   ;;  %v783_v21 = vpop.permute.xlu2 %782 }
 0x2ef   : > { %v663_v33 = vsub.f32 1.5, %v662_v22 }
 0x2f0   : > { %v1552_v34 = vpop.eup %1551  ;;  %v626_v35 = vadd.f32 1e-05, %v618_v32 }
 0x2f1   : > { %v670_v36 = vmul.f32 %v1552_v34, %v625_v13  ;;  %v664_v38 = vmul.f32 %v1550_v16, %v663_v33  ;;  %vm676_vm15 = vweird.f32 %v1552_v34 }
 0x2f2   : > { %1553 = vrsqrt.f32 %v626_v35  ;;  %vm677_vm2 = vmor %vm675_vm14, %vm676_vm15  ;;  %vm685_vm3 = vweird.f32 %v626_v35  ;;  %vm877_vm14 = vcmask 23552  }
 0x2f3   : > { %v671_v39 = vmul.f32 %v1552_v34, %v670_v36  ;;  %v668_v40 = vsel %vm667_vm13, %v1550_v16, %v664_v38  ;;  %v793_v20 = vpop.permute.xlu0 %792  ;;  %vm1016_vm13 = vcmask 7168  }
 0x2f4   : > { %v712_v24 = vmul.f32 %v668_v40, %v372_v37  ;;  %v788_v19 = vpop.permute.xlu1 %787 }
 0x2f5   : > { %v672_v25 = vmul.f32 0.5, %v671_v39  ;;  %v607_v41 = vpop.f32.mrf.mxu1 }
 0x2f6   : > { %v619_v26 = vmul.f32 0.03125, %v607_v41  ;;  %734 = vperm.xlu1 %1533, %v712_v24  }
 0x2f7   : > { %v673_v42 = vsub.f32 1.5, %v672_v25 }
 0x2f8   : > { %v1554_v43 = vpop.eup %1553  ;;  %v627_v27 = vadd.f32 1e-05, %v619_v26 }
 0x2f9   : > { %v680_v44 = vmul.f32 %v1554_v43, %v626_v35  ;;  %v674_v45 = vmul.f32 %v1552_v34, %v673_v42  ;;  %vm686_vm4 = vweird.f32 %v1554_v43 }
 0x2fa   : > { %1555 = vrsqrt.f32 %v627_v27  ;;  %vm687_vm5 = vmor %vm685_vm3, %vm686_vm4  ;;  %vm695_vm6 = vweird.f32 %v627_v27 }
 0x2fb   : > { %v681_v46 = vmul.f32 %v1554_v43, %v680_v44  ;;  %v678_v29 = vsel %vm677_vm2, %v1552_v34, %v674_v45  ;;  %v778_v23 = vpop.permute.xlu0 %777  ;;  %v768_v34 = vpop.permute.xlu2 %767 }
 0x2fc   : > { %v713_v47 = vmul.f32 %v678_v29, %v373_v28  ;;  %v773_v22 = vpop.permute.xlu1 %772 }
 0x2fd   : > { %v682_v30 = vmul.f32 0.5, %v681_v46  ;;  %v610_v48 = vpop.f32.mrf.mxu1 }
 0x2fe   : > { %v620_v31 = vmul.f32 0.03125, %v610_v48  ;;  %739 = vperm.xlu0 %1532, %v713_v47  }
 0x2ff   : > { %v683_v49 = vsub.f32 1.5, %v682_v30 }
 0x300   : > { %v1556_v50 = vpop.eup %1555  ;;  %v628_v52 = vadd.f32 1e-05, %v620_v31 }
 0x301   : > { %v690_v53 = vmul.f32 %v1556_v50, %v627_v27  ;;  %v684_v55 = vmul.f32 %v1554_v43, %v683_v49  ;;  %vm696_vm7 = vweird.f32 %v1556_v50 }
 0x302   : > { %1557 = vrsqrt.f32 %v628_v52  ;;  %vm697_vm8 = vmor %vm695_vm6, %vm696_vm7  ;;  %vm705_vm9 = vweird.f32 %v628_v52 }
 0x303   : > { %v691_v58 = vmul.f32 %v1556_v50, %v690_v53  ;;  %v688_v59 = vsel %vm687_vm5, %v1554_v43, %v684_v55 }
 0x304   : > { %v714_v60 = vmul.f32 %v688_v59, %v374_v54 }
 0x305   : > { %v692_v61 = vmul.f32 0.5, %v691_v58 }
 0x306   : > { %744 = vperm.xlu2 %1534, %v714_v60   ;;  %v1961_v60 = vld [vmem:[%s2247_s6 + $0x3] ss:$0 sm:$0xff] }
 0x307   : > { %v693_v62 = vsub.f32 1.5, %v692_v61  ;;  %v1968_v61 = vld [vmem:[%s2247_s6 + $0x8] ss:$0 sm:$0xff] }
 0x308   : > { %v1558_v63 = vpop.eup %1557 }
 0x309   : > { %v700_v2 = vmul.f32 %v1558_v63, %v628_v52  ;;  %v694_v5 = vmul.f32 %v1556_v50, %v693_v62  ;;  %vm706_vm10 = vweird.f32 %v1558_v63  ;;  %v1973_v62 = vld [vmem:[%s2247_s6 + $0x2] ss:$0 sm:$0xff] }
 0x30a   : > { %vm707_vm11 = vmor %vm705_vm9, %vm706_vm10 }
 0x30b   : > { %v701_v9 = vmul.f32 %v1558_v63, %v700_v2  ;;  %v698_v8 = vsel %vm697_vm8, %v1556_v50, %v694_v5 }
 0x30c   : > { %v715_v6 = vmul.f32 %v698_v8, %v375_v3 }
 0x30d   : > { %v702_v11 = vmul.f32 0.5, %v701_v9 }
 0x30e   : > { %749 = vperm.xlu1 %1533, %v715_v6  }
 0x30f   : > { %v703_v14 = vsub.f32 1.5, %v702_v11 }
 0x311   : > { %v704_v16 = vmul.f32 %v1558_v63, %v703_v14  ;;  %v1145_v14 = vld [vmem:[%s2246_s5] sm:$0xff] }
 0x313   : > { %v708_v13 = vsel %vm707_vm11, %v1558_v63, %v704_v16 }
 0x314   : > { %v716_v17 = vmul.f32 %v708_v13, %v376_v15 }
 0x316   : > { %754 = vperm.xlu2 %1534, %v716_v17   ;;  %v1146_v17 = vld [vmem:[%s2246_s5 + $0x8] sm:$0xff] }
 0x350   : > { %v720_v32 = vpop.permute.xlu1 %719 }
 0x351   : > { %v757_v33 = vmul.f32 %v720_v32, %v1769_v10  ;;  %v730_v10 = vpop.permute.xlu2 %729 }
 0x352   : > { %v759_v40 = vmul.f32 %v730_v10, %v1754_v0 }
 0x353   : > { %v805_v35 = vadd.f32 %v768_v34, %v757_v33 }
 0x354   : > { %v807_v25 = vadd.f32 %v778_v23, %v759_v40 }
 0x355   : > { %v1848_v36 = vmax.f32 %v805_v35, 0.0 }
 0x356   : > { %v1866_v41 = vmax.f32 %v807_v25, 0.0 }
 0x357   : > { %968 = vrot.lane.b32.xlu2 %v1848_v36, %s1572_s11  ;;  %922 = vrot.lane.b32.xlu1 %v1848_v36, %s1573_s12 }
 0x358   : > { %898 = vrot.lane.b32.xlu0 %v1848_v36, %s1574_s15  ;;  %v725_v37 = vpop.permute.xlu0 %724 }
 0x359   : > { %v758_v38 = vmul.f32 %v725_v37, %v1776_v7 }
 0x35b   : > { %v806_v39 = vadd.f32 %v773_v22, %v758_v38 }
 0x35d   : > { %v1858_v24 = vmax.f32 %v806_v39, 0.0 }
 0x35f   : > { %900 = vrot.lane.b32.xlu2 %v1858_v24, %s1574_s15  ;;  %970 = vrot.lane.b32.xlu1 %v1858_v24, %s1572_s11 }
 0x360   : > { %992 = vrot.lane.b32.xlu0 %v1848_v36, %s1575_s16  ;;  %v745_v43 = vpop.permute.xlu2 %744 }
 0x361   : > { %v762_v48 = vmul.f32 %v745_v43, %v1742_v56 }
 0x367   : > { %994 = vrot.lane.b32.xlu2 %v1858_v24, %s1575_s16  ;;  %972 = vrot.lane.b32.xlu1 %v1866_v41, %s1572_s11 }
 0x368   : > { %924 = vrot.lane.b32.xlu0 %v1858_v24, %s1573_s12  ;;  %v735_v0 = vpop.permute.xlu1 %734 }
 0x369   : > { %v760_v7 = vmul.f32 %v735_v0, %v1745_v57 }
 0x36b   : > { %v808_v26 = vadd.f32 %v783_v21, %v760_v7  ;;  %v2017_v21 = vld [vmem:[%s2247_s6 + $0x7] ss:$0 sm:$0xff] }
 0x36d   : > { %v1875_v42 = vmax.f32 %v808_v26, 0.0 }
 0x36f   : > { %904 = vrot.lane.b32.xlu1 %v1875_v42, %s1574_s15  ;;  %902 = vrot.lane.b32.xlu2 %v1866_v41, %s1574_s15 }
 0x370   : > { %926 = vrot.lane.b32.xlu0 %v1866_v41, %s1573_s12  ;;  %v740_v27 = vpop.permute.xlu0 %739  ;;  %v755_v28 = vpop.permute.xlu2 %754 }
 0x371   : > { %v761_v44 = vmul.f32 %v740_v27, %v1764_v4  ;;  %v764_v46 = vmul.f32 %v755_v28, %v1736_v51 }
 0x373   : > { %v809_v57 = vadd.f32 %v788_v19, %v761_v44  ;;  %v812_v29 = vadd.f32 %v803_v18, %v764_v46 }
 0x375   : > { %v1890_v45 = vmax.f32 %v809_v57, 0.0  ;;  %v1901_v31 = vmax.f32 %v812_v29, 0.0 }
 0x377   : > { %998 = vrot.lane.b32.xlu1 %v1875_v42, %s1575_s16  ;;  %996 = vrot.lane.b32.xlu2 %v1866_v41, %s1575_s16 }
 0x378   : > { %974 = vrot.lane.b32.xlu0 %v1875_v42, %s1572_s11 }
 0x37f   : > { %906 = vrot.lane.b32.xlu1 %v1890_v45, %s1574_s15  ;;  %928 = vrot.lane.b32.xlu2 %v1875_v42, %s1573_s12 }
 0x380   : > { %976 = vrot.lane.b32.xlu0 %v1890_v45, %s1572_s11  ;;  %v750_v4 = vpop.permute.xlu1 %749 }
 0x381   : > { %v763_v47 = vmul.f32 %v750_v4, %v1757_v1  ;;  %v810_v1 = vadd.f32 %v793_v20, %v762_v48  ;;  %v2012_v20 = vld [vmem:[%s2247_s6 + $0x1] ss:$0 sm:$0xff] }
 0x383   : > { %v811_v30 = vadd.f32 %v798_v12, %v763_v47  ;;  %v1913_v50 = vmax.f32 %v810_v1, 0.0 }
 0x385   : > { %v1903_v49 = vmax.f32 %v811_v30, 0.0 }
 0x387   : > { %1000 = vrot.lane.b32.xlu1 %v1890_v45, %s1575_s16  ;;  %930 = vrot.lane.b32.xlu2 %v1890_v45, %s1573_s12 }
 0x388   : > { %837 = vrot.lane.b32.xlu0 %v1890_v45, %s1576_s17 }
 0x38f   : > { %978 = vrot.lane.b32.xlu2 %v1913_v50, %s1572_s11  ;;  %932 = vrot.lane.b32.xlu1 %v1913_v50, %s1573_s12 }
 0x390   : > { %908 = vrot.lane.b32.xlu0 %v1913_v50, %s1574_s15 }
 0x397   : > { %980 = vrot.lane.b32.xlu2 %v1903_v49, %s1572_s11  ;;  %934 = vrot.lane.b32.xlu1 %v1903_v49, %s1573_s12 }
 0x398   : > { %1002 = vrot.lane.b32.xlu0 %v1913_v50, %s1575_s16 }
 0x39f   : > { %865 = vrot.lane.b32.xlu2 %v1903_v49, %s1577_s18  ;;  %841 = vrot.lane.b32.xlu1 %v1903_v49, %s1576_s17 }
 0x3a0   : > { %910 = vrot.lane.b32.xlu0 %v1903_v49, %s1574_s15 }
 0x3a7   : > { %982 = vrot.lane.b32.xlu1 %v1901_v31, %s1572_s11  ;;  %912 = vrot.lane.b32.xlu2 %v1901_v31, %s1574_s15 }
 0x3a8   : > { %1004 = vrot.lane.b32.xlu0 %v1903_v49, %s1575_s16 }
 0x3af   : > { %861 = vrot.lane.b32.xlu1 %v1890_v45, %s1577_s18  ;;  %1006 = vrot.lane.b32.xlu2 %v1901_v31, %s1575_s16 }
 0x3b0   : > { %936 = vrot.lane.b32.xlu0 %v1901_v31, %s1573_s12 }
 0x3b1   : > { %v969_v56 = vpop.permute.xlu2 %968 }
 0x3b7   : > { %835 = vrot.lane.b32.xlu1 %v1875_v42, %s1576_s17  ;;  %839 = vrot.lane.b32.xlu2 %v1913_v50, %s1576_s17 }
 0x3b8   : > { %863 = vrot.lane.b32.xlu0 %v1913_v50, %s1577_s18 }
 0x3b9   : > { %v901_v52 = vpop.permute.xlu2 %900 }
 0x3bf   : > { %867 = vrot.lane.b32.xlu1 %v1901_v31, %s1577_s18  ;;  %833 = vrot.lane.b32.xlu2 %v1866_v41, %s1576_s17 }
 0x3c0   : > { %843 = vrot.lane.b32.xlu0 %v1901_v31, %s1576_s17 }
 0x3c1   : > { %v995_v53 = vpop.permute.xlu2 %994 }
 0x3c7   : > { %829 = vrot.lane.b32.xlu1 %v1848_v36, %s1576_s17  ;;  %859 = vrot.lane.b32.xlu2 %v1875_v42, %s1577_s18 }
 0x3c8   : > { %857 = vrot.lane.b32.xlu0 %v1866_v41, %s1577_s18 }
 0x3c9   : > { %v923_v54 = vpop.permute.xlu1 %922  ;;  %v903_v55 = vpop.permute.xlu2 %902 }
 0x3ca   : > { %v899_v58 = vpop.permute.xlu0 %898 }
 0x3cb   : > { %v947_v59 = vsel %vm946_vm12, %v899_v58, %v923_v54 }
 0x3cc   : > { %v2024_v34 = vmul.f32 %v2012_v20, %v947_v59  ;;  %v2027_v35 = vmul.f32 %v2017_v21, %v947_v59 }
 0x3cf   : > { %855 = vrot.lane.b32.xlu1 %v1858_v24, %s1577_s18  ;;  %853 = vrot.lane.b32.xlu2 %v1848_v36, %s1577_s18 }
 0x3d0   : > { %831 = vrot.lane.b32.xlu0 %v1858_v24, %s1576_s17  ;;  %s1511_s17 = sshll.u32 %s2257_s14, 4 }
 0x3d1   : > { %v971_v63 = vpop.permute.xlu1 %970  ;;  %v997_v5 = vpop.permute.xlu2 %996  ;;  %s359_s20 = scalar_lea.vmem %s2251_s10, %s1511_s17 }
 0x3d2   : > { %v1018_v2 = vsel %vm1016_vm13, %v971_v63, %v995_v53  ;;  %v993_v3 = vpop.permute.xlu0 %992 }
 0x3d3   : > { %v1017_v9 = vsel %vm1016_vm13, %v969_v56, %v993_v3  ;;  %v1980_v8 = vmul.f32 %v1961_v60, %v1018_v2  ;;  %v1983_v6 = vmul.f32 %v1968_v61, %v1018_v2  ;;  %v1986_v11 = vmul.f32 %v1973_v62, %v1018_v2 }
 0x3d4   : > { %v1992_v15 = vmul.f32 %v1961_v60, %v1017_v9  ;;  %v1995_v16 = vmul.f32 %v1968_v61, %v1017_v9  ;;  %v1998_v13 = vmul.f32 %v1973_v62, %v1017_v9 }
 0x3d6   : > { %v1115_v18 = vpack.c.bf16 %v1980_v8, %v1992_v15  ;;  %v1135_v12 = vpack.c.bf16 %v1983_v6, %v1995_v16  ;;  %v1540_v8 = vld [vmem:[%s2247_s6] ss:$0 sm:$0xff] }
 0x3d7   : > { %1149 = vperm.xlu2 %1534, %v1145_v14  }
 0x3d8   : > { %1154 = vperm.xlu0 %1532, %v1146_v17  }
 0x3d9   : > { %v973_v22 = vpop.permute.xlu1 %972  ;;  %v929_v10 = vpop.permute.xlu2 %928 }
 0x3da   : > { %v925_v23 = vpop.permute.xlu0 %924  ;;  %v2020_v32 = vsel %vm1016_vm13, %v973_v22, %v997_v5 }
 0x3db   : > { %v948_v33 = vsel %vm946_vm12, %v901_v52, %v925_v23 }
 0x3dc   : > { %v2030_v37 = vmul.f32 %v2012_v20, %v948_v33  ;;  %v2033_v38 = vmul.f32 %v2017_v21, %v948_v33 }
 0x3de   : > { %v1107_v39 = vpack.c.bf16 %v2030_v37, %v2024_v34  ;;  %v1512_v37 = vld [vmem:[%s2245_s4 + $0x4] sm:$0xf] }
 0x3e1   : > { %v905_v25 = vpop.permute.xlu1 %904  ;;  %v931_v28 = vpop.permute.xlu2 %930 }
 0x3e2   : > { %v950_v0 = vsel %vm946_vm12, %v905_v25, %v929_v10  ;;  %v927_v7 = vpop.permute.xlu0 %926 }
 0x3e3   : > { %v2041_v26 = vmul.f32 %v2012_v20, %v950_v0  ;;  %v2044_v43 = vmul.f32 %v2017_v21, %v950_v0  ;;  %v949_v27 = vsel %vm946_vm12, %v903_v55, %v927_v7 }
 0x3e4   : > { %v2048_v44 = vmul.f32 %v2012_v20, %v949_v27  ;;  %v2051_v57 = vmul.f32 %v2017_v21, %v949_v27 }
 0x3e6   : > { %v1108_v46 = vpack.c.bf16 %v2041_v26, %v2048_v44 }
 0x3e9   : > { %v999_v29 = vpop.permute.xlu1 %998  ;;  %v979_v30 = vpop.permute.xlu2 %978 }
 0x3ea   : > { %v975_v47 = vpop.permute.xlu0 %974 }
 0x3f1   : > { %v907_v48 = vpop.permute.xlu1 %906  ;;  %v981_v52 = vpop.permute.xlu2 %980 }
 0x3f2   : > { %v977_v1 = vpop.permute.xlu0 %976 }
 0x3f9   : > { %v1001_v56 = vpop.permute.xlu1 %1000  ;;  %v2059_v58 = vpop.permute.xlu2 %865 }
 0x3fa   : > { %v2057_v53 = vpop.permute.xlu0 %837  ;;  %v1021_v27 = vsel %vm1016_vm13, %v977_v1, %v1001_v56 }
 0x401   : > { %v933_v54 = vpop.permute.xlu1 %932  ;;  %v913_v2 = vpop.permute.xlu2 %912 }
 0x402   : > { %v909_v55 = vpop.permute.xlu0 %908 }
 0x409   : > { %v935_v59 = vpop.permute.xlu1 %934  ;;  %v1007_v9 = vpop.permute.xlu2 %1006 }
 0x40a   : > { %v1003_v63 = vpop.permute.xlu0 %1002 }
 0x40b   : > { %v1022_v23 = vsel %vm1016_vm13, %v979_v30, %v1003_v63  ;;  %v1020_v30 = vsel %vm1016_vm13, %v975_v47, %v999_v29  ;;  %v1099_v63 = vmul.f32 %v1968_v61, %v1021_v27 }
 0x40c   : > { %v1048_v4 = vmul.f32 %v1961_v60, %v1022_v23 }
 0x411   : > { %v2061_v3 = vpop.permute.xlu1 %841  ;;  %v840_v19 = vpop.permute.xlu2 %839 }
 0x412   : > { %v911_v5 = vpop.permute.xlu0 %910  ;;  %v2112_v6 = vsel %vm877_vm14, %v2061_v3, %v2059_v58  ;;  %v1032_v58 = vmul.f32 %v1973_v62, %v2020_v32 }
 0x419   : > { %v983_v14 = vpop.permute.xlu1 %982 }
 0x41a   : > { %v1005_v17 = vpop.permute.xlu0 %1004  ;;  %v1024_v22 = vsel %vm1016_vm13, %v983_v14, %v1007_v9  ;;  %v1100_v9 = vmul.f32 %v1968_v61, %v1022_v23  ;;  %v2077_v14 = vsel %vm946_vm12, %v911_v5, %v935_v59  ;;  %v1045_v59 = vmul.f32 %v1961_v60, %v2020_v32 }
 0x41b   : > { %v1023_v33 = vsel %vm1016_vm13, %v981_v52, %v1005_v17  ;;  %v1050_v10 = vmul.f32 %v1961_v60, %v1024_v22  ;;  %v1102_v25 = vmul.f32 %v1968_v61, %v1024_v22  ;;  %v1047_v52 = vmul.f32 %v1961_v60, %v1021_v27 }
 0x41c   : > { %v1049_v0 = vmul.f32 %v1961_v60, %v1023_v33  ;;  %v1101_v7 = vmul.f32 %v1968_v61, %v1023_v33  ;;  %v1097_v5 = vmul.f32 %v1968_v61, %v2020_v32  ;;  %v1088_v32 = vmul.f32 %v2017_v21, %v2077_v14 }
 0x41d   : > { %v1117_v56 = vpack.c.bf16 %v1048_v4, %v1047_v52  ;;  %v951_v4 = vsel %vm946_vm12, %v907_v48, %v931_v28  ;;  %v1037_v28 = vmul.f32 %v1973_v62, %v1024_v22  ;;  %v834_v48 = vpop.permute.xlu2 %833  ;;  %v1034_v22 = vmul.f32 %v1973_v62, %v1021_v27 }
 0x41e   : > { %v1118_v51 = vpack.c.bf16 %v1050_v10, %v1049_v0  ;;  %v1138_v40 = vpack.c.bf16 %v1102_v25, %v1101_v7  ;;  %v1137_v10 = vpack.c.bf16 %v1100_v9, %v1099_v63  ;;  %v1046_v25 = vmul.f32 %v1961_v60, %v1020_v30 }
 0x41f   : > { %v952_v0 = vsel %vm946_vm12, %v909_v55, %v933_v54  ;;  %v964_v9 = vmul.f32 %v2012_v20, %v951_v4  ;;  %v1036_v60 = vmul.f32 %v1973_v62, %v1023_v33 }
 0x420   : > { %1199 = vmatpush.bf16.msra.mxu3 %v1118_v51  ;;  %1245 = vmatpush.bf16.msrb.mxu0 %v1138_v40  ;;  %v1098_v51 = vmul.f32 %v1968_v61, %v1020_v30  ;;  %v966_v40 = vmul.f32 %v2012_v20, %v2077_v14  ;;  %v965_v54 = vmul.f32 %v2012_v20, %v952_v0 }
 0x421   : > { %v862_v17 = vpop.permute.xlu1 %861  ;;  %v1114_v61 = vpack.c.bf16 %v1037_v28, %v1036_v60  ;;  %v2253_v60 = vpack.c.bf16 %v2044_v43, %v2051_v57  ;;  %v1516_v43 = vld [vmem:[%s2245_s4 + $0x20] sm:$0xf0]  ;;  %v2254_v57 = vpack.c.bf16 %v2033_v38, %v2027_v35 }
 0x422   : > { %v937_v1 = vpop.permute.xlu0 %936  ;;  %v1136_v7 = vpack.c.bf16 %v1098_v51, %v1097_v5  ;;  %v2127_v3 = vsel %vm877_vm14, %v2057_v53, %v862_v17  ;;  %v1086_v5 = vmul.f32 %v2017_v21, %v951_v4  ;;  %v1485_v4 = vld [vmem:[%s2245_s4] sm:$0xf] }
 0x423   : > { %v954_v29 = vsel %vm946_vm12, %v913_v2, %v937_v1  ;;  %v1116_v2 = vpack.c.bf16 %v1046_v25, %v1045_v59  ;;  %v1109_v1 = vpack.c.bf16 %v965_v54, %v964_v9  ;;  %v894_v34 = vmul.f32 %v1540_v8, %v2127_v3 }
 0x424   : > { %1200 = vmatpush.bf16.msra.mxu3 %v1117_v56  ;;  %1246 = vmatpush.bf16.msrb.mxu0 %v1137_v10  ;;  %v967_v47 = vmul.f32 %v2012_v20, %v954_v29  ;;  %v1035_v20 = vmul.f32 %v1973_v62, %v1022_v23  ;;  %v1089_v56 = vmul.f32 %v2017_v21, %v954_v29 }
 0x425   : > { %v860_v33 = vpop.permute.xlu2 %859  ;;  %v1087_v25 = vmul.f32 %v2017_v21, %v952_v0 }
 0x426   : > { %v1110_v55 = vpack.c.bf16 %v967_v47, %v966_v40  ;;  %v1134_v51 = vpack.c.bf16 %v1089_v56, %v1088_v32  ;;  %v2252_v47 = vpack.c.bf16 %v1986_v11, %v1998_v13  ;;  %v1541_v11 = vld [vmem:[%s2247_s6 + $0x5] ss:$0 sm:$0xff] }
 0x427   : > { %v1062_v28 = vmul.f32 %v1541_v11, %v2112_v6 }
 0x428   : > { %1185 = vmatpush.bf16.msra.mxu2 %v1110_v55  ;;  %1201 = vmatpush.bf16.msra.mxu3 %v1116_v2  ;;  %v1133_v55 = vpack.c.bf16 %v1087_v25, %v1086_v5  ;;  %v2255_v25 = vpack.c.bf16 %v1901_v31, %v1903_v49  ;;  %v1119_v31 = vpack.c.bf16 %v1858_v24, %v1848_v36 }
 0x429   : > { %1247 = vmatpush.bf16.msrb.mxu0 %v1136_v7  ;;  %v836_v52 = vpop.permute.xlu1 %835 }
 0x42a   : > { %v864_v63 = vpop.permute.xlu0 %863 }
 0x42b   : > { %v2116_v26 = vsel %vm877_vm14, %v840_v19, %v864_v63 }
 0x42c   : > { %1186 = vmatpush.bf16.msra.mxu2 %v1109_v1  ;;  %1202 = vmatpush.bf16.msra.mxu3 %v1115_v18  ;;  %v1113_v18 = vpack.c.bf16 %v1035_v20, %v1034_v22  ;;  %v1514_v1 = vld [vmem:[%s2245_s4 + $0x10] sm:$0xf0] }
 0x42d   : > { %1248 = vmatpush.bf16.msrb.mxu0 %v1135_v12  ;;  %v1033_v12 = vmul.f32 %v1973_v62, %v1020_v30  ;;  %v895_v30 = vmul.f32 %v1540_v8, %v2116_v26  ;;  %v1487_v62 = vld [vmem:[%s2245_s4 + $0x14] sm:$0xf0]  ;;  %v854_v2 = vpop.permute.xlu2 %853  ;;  %v1486_v22 = vor.u32 %v1514_v1, %v1485_v4 }
 0x42e   : > { %v1490_v40 = vor.u32 %v1512_v37, %v1487_v62 }
 0x42f   : > { %v1112_v27 = vpack.c.bf16 %v1033_v12, %v1032_v58  ;;  %v1105_v10 = vpack.c.bf16 %v895_v30, %v894_v34 }
 0x430   : > { %1187 = vmatpush.bf16.msra.mxu2 %v1108_v46  ;;  %1203 = vmatpush.bf16.msra.mxu3 %v1114_v61  ;;  %v896_v46 = vmul.f32 %v1540_v8, %v2112_v6 }
 0x431   : > { %v868_v15 = vpop.permute.xlu1 %867 }
 0x432   : > { %v844_v16 = vpop.permute.xlu0 %843 }
 0x433   : > { %v885_v44 = vsel %vm877_vm14, %v844_v16, %v868_v15  ;;  %v1501_v16 = vld [vmem:[%s2245_s4 + $0x10] sm:$0xf] }
 0x434   : > { %1188 = vmatpush.bf16.msra.mxu2 %v1107_v39  ;;  %1204 = vmatpush.bf16.msra.mxu3 %v1113_v18  ;;  %v897_v23 = vmul.f32 %v1540_v8, %v885_v44  ;;  %v2141_v39 = vsel %vm877_vm14, %v836_v52, %v860_v33  ;;  %v1063_v52 = vmul.f32 %v1541_v11, %v885_v44 }
 0x435   : > { %v893_v14 = vmul.f32 %v1540_v8, %v2141_v39  ;;  %v1060_v18 = vmul.f32 %v1541_v11, %v2127_v3 }
 0x436   : > { %v1106_v19 = vpack.c.bf16 %v897_v23, %v896_v46  ;;  %v1126_v20 = vpack.c.bf16 %v1063_v52, %v1062_v28  ;;  %v1502_v46 = vor.u32 %v1516_v43, %v1501_v16 }
 0x438   : > { %1189 = vmatpush.bf16.msra.mxu2 %v1106_v19  ;;  %1205 = vmatpush.bf16.msra.mxu3 %v1112_v27  ;;  %v1059_v19 = vmul.f32 %v1541_v11, %v2141_v39 }
 0x439   : > { %v830_v53 = vpop.permute.xlu1 %829  ;;  %1503 = vmatmul.msk.bf16.vlgmr.msrb.gmra.mxu0 %vm418_vm1, %v1502_v46  ;;  %vm1267_vm1 = vcmask 130048  }
 0x43a   : > { %v858_v17 = vpop.permute.xlu0 %857  ;;  %v878_v0 = vsel %vm877_vm14, %v830_v53, %v854_v2  ;;  %v1513_v53 = vld [vmem:[%s2245_s4 + $0xc] sm:$0xf] }
 0x43b   : > { %v880_v29 = vsel %vm877_vm14, %v834_v48, %v858_v17  ;;  %v890_v63 = vmul.f32 %v1540_v8, %v878_v0  ;;  %v1542_v48 = vld [vmem:[%s2247_s6 + $0x6] ss:$0 sm:$0xff] }
 0x43c   : > { %1190 = vmatpush.bf16.msra.mxu2 %v1105_v10  ;;  %1206 = vmatpush.bf16.msra.mxu3 %v2252_v47  ;;  %v892_v59 = vmul.f32 %v1540_v8, %v880_v29  ;;  %v1076_v15 = vmul.f32 %v1542_v48, %v885_v44  ;;  %v1075_v12 = vmul.f32 %v1542_v48, %v2112_v6 }
 0x43d   : > { %v1074_v44 = vmul.f32 %v1542_v48, %v2116_v26  ;;  %v1058_v33 = vmul.f32 %v1541_v11, %v880_v29  ;;  %v1073_v35 = vmul.f32 %v1542_v48, %v2127_v3  ;;  %v1071_v56 = vmul.f32 %v1542_v48, %v880_v29  ;;  %v1495_v3 = vld [vmem:[%s2245_s4 + $0x1c] sm:$0xf0] }
 0x43e   : > { %v1104_v54 = vpack.c.bf16 %v893_v14, %v892_v59  ;;  %v1130_v58 = vpack.c.bf16 %v1076_v15, %v1075_v12  ;;  %v1056_v6 = vmul.f32 %v1541_v11, %v878_v0  ;;  %v1069_v32 = vmul.f32 %v1542_v48, %v878_v0 }
 0x43f   : > { %1207 = vmatmul.bf16.vlgmr.msra.gmra.mxu3 %v1490_v40  ;;  %v1124_v38 = vpack.c.bf16 %v1059_v19, %v1058_v33  ;;  %v1129_v27 = vpack.c.bf16 %v1074_v44, %v1073_v35  ;;  %v1498_v10 = vor.u32 %v1513_v53, %v1495_v3  ;;  %v1120_v29 = vpack.c.bf16 %v1875_v42, %v1866_v41  ;;  %v1515_v40 = vld [vmem:[%s2245_s4 + $0x18] sm:$0xf0]  ;;  %v1150_v41 = vpop.permute.xlu2 %1149  ;;  %v1257_v33 = vld [vmem:[%s2250_s9] sm:$0xff] }
 0x440   : > { %1227 = vmatpush.bf16.msrb.mxu3 %v1134_v51  ;;  %1191 = vmatpush.bf16.msra.mxu2 %v1104_v54  ;;  %v1493_v51 = vld [vmem:[%s2245_s4 + $0x8] sm:$0xf] }
 0x441   : > { %v856_v7 = vpop.permute.xlu1 %855  ;;  %v1494_v49 = vor.u32 %v1515_v40, %v1493_v51 }
 0x442   : > { %v832_v13 = vpop.permute.xlu0 %831 }
 0x443   : > { %v879_v9 = vsel %vm877_vm14, %v832_v13, %v856_v7 }
 0x444   : > { %1228 = vmatpush.bf16.msrb.mxu3 %v1133_v55  ;;  %v891_v21 = vmul.f32 %v1540_v8, %v879_v9  ;;  %v1061_v8 = vmul.f32 %v1541_v11, %v2116_v26  ;;  %v1057_v30 = vmul.f32 %v1541_v11, %v879_v9  ;;  %v1072_v26 = vmul.f32 %v1542_v48, %v2141_v39 }
 0x445   : > { %v1070_v62 = vmul.f32 %v1542_v48, %v879_v9  ;;  %v1121_v39 = vpack.c.bf16 %v1913_v50, %v1890_v45  ;;  %v1259_v48 = vld [vmem:[%s2248_s7] sm:$0xff] }
 0x446   : > { %v1103_v61 = vpack.c.bf16 %v891_v21, %v890_v63  ;;  %v1125_v23 = vpack.c.bf16 %v1061_v8, %v1060_v18  ;;  %v1123_v34 = vpack.c.bf16 %v1057_v30, %v1056_v6  ;;  %v1128_v37 = vpack.c.bf16 %v1072_v26, %v1071_v56 }
 0x447   : > { %v1127_v17 = vpack.c.bf16 %v1070_v62, %v1069_v32 }
 0x448   : > { %1229 = vmatpush.bf16.msrb.mxu3 %v2253_v60  ;;  %1192 = vmatpush.bf16.msra.mxu2 %v1103_v61 }
 0x44a   : > { %v1155_v2 = vpop.permute.xlu0 %1154 }
 0x44b   : > { %1193 = vmatmul.bf16.vlgmr.msra.gmra.mxu2 %v1486_v22 }
 0x44c   : > { %1213 = vmatpush.bf16.msrb.mxu2 %v1126_v20  ;;  %1230 = vmatpush.bf16.msrb.mxu3 %v2254_v57  ;;  %v1260_v20 = vld [vmem:[%s2248_s7 + $0x8] sm:$0xff] }
 0x450   : > { %1214 = vmatpush.bf16.msrb.mxu2 %v1125_v23  ;;  %1231 = vmatpush.bf16.msrb.mxu3 %v1130_v58 }
 0x454   : > { %1215 = vmatpush.bf16.msrb.mxu2 %v1124_v38  ;;  %1232 = vmatpush.bf16.msrb.mxu3 %v1129_v27 }
 0x458   : > { %1216 = vmatpush.bf16.msrb.mxu2 %v1123_v34  ;;  %1233 = vmatpush.bf16.msrb.mxu3 %v1128_v37 }
 0x45c   : > { %1217 = vmatpush.bf16.msrb.mxu2 %v2255_v25  ;;  %1234 = vmatpush.bf16.msrb.mxu3 %v1127_v17 }
 0x45f   : > { %1235 = vmatmul.bf16.vlgmr.msrb.gmra.mxu3 %v1498_v10  ;;  %v1255_v10 = vld [vmem:[%s2249_s8] sm:$0xff] }
 0x460   : > { %1218 = vmatpush.bf16.msrb.mxu2 %v1121_v39 }
 0x464   : > { %1219 = vmatpush.bf16.msrb.mxu2 %v1120_v29 }
 0x468   : > { %1220 = vmatpush.bf16.msrb.mxu2 %v1119_v31 }
 0x46b   : > { %1221 = vmatmul.bf16.vlgmr.msrb.gmra.mxu2 %v1494_v49  ;;  %v1256_v49 = vld [vmem:[%s2249_s8 + $0x8] sm:$0xff] }
 0x4b6   : > { %v1250_v0 = vpop.f32.mrf.mxu0 }
 0x4be   : > { %v1252_v4 = vpop.f32.mrf.mxu0 }
 0x4c2   : > { %v1208_v50 = vpop.f32.mrf.mxu3 }
 0x4ca   : > { %v1210_v59 = vpop.f32.mrf.mxu3 }
 0x4ce   : > { %v1194_v45 = vpop.f32.mrf.mxu2 }
 0x4cf   : > { %v1195_v42 = vadd.f32 %v1194_v45, %v1150_v41 }
 0x4d1   : > { %v1209_v14 = vadd.f32 %v1208_v50, %v1195_v42  ;;  %v1258_v50 = vld [vmem:[%s2250_s9 + $0x8] sm:$0xff] }
 0x4d6   : > { %v1196_v47 = vpop.f32.mrf.mxu2 }
 0x4d7   : > { %v1197_v7 = vadd.f32 %v1196_v47, %v1155_v2 }
 0x4d9   : > { %v1211_v9 = vadd.f32 %v1210_v59, %v1197_v7 }
 0x4e2   : > { %v1236_v5 = vpop.f32.mrf.mxu3 }
 0x4ea   : > { %v1238_v63 = vpop.f32.mrf.mxu3 }
 0x4ee   : > { %v1222_v54 = vpop.f32.mrf.mxu2 }
 0x4ef   : > { %v1223_v55 = vadd.f32 %v1222_v54, %v1209_v14 }
 0x4f1   : > { %v1237_v11 = vadd.f32 %v1236_v5, %v1223_v55 }
 0x4f3   : > { %v1251_v13 = vadd.f32 %v1250_v0, %v1237_v11 }
 0x4f5   : > { %v1261_v36 = vsel %vm393_vm0, %v1251_v13, 0.0 }
 0x4f6   : > { %v1224_v24 = vpop.f32.mrf.mxu2  ;;  %1262 = vadd.xlane.f32.xlu0 %v1261_v36 }
 0x4f7   : > { %v1225_v52 = vadd.f32 %v1224_v24, %v1211_v9 }
 0x4f9   : > { %v1239_v21 = vadd.f32 %v1238_v63, %v1225_v52 }
 0x4fb   : > { %v1253_v1 = vadd.f32 %v1252_v4, %v1239_v21 }
 0x4fd   : > { %v1264_v60 = vsel %vm393_vm0, %v1253_v1, 0.0 }
 0x4fe   : > { %1265 = vadd.xlane.f32.xlu1 %v1264_v60 }
 0x569   : > { %v1263_v61 = vpop.xlane.xlu0 %1262 }
 0x571   : > { %v1266_v28 = vpop.xlane.xlu1 %1265 }
 0x572   : > { %1288 = vmatpush.msrb.mxu1 %v1266_v28 }
 0x574   : > { %1289 = vmatpush.msrb.mxu1 %v1263_v61 }
 0x575   : > { %1504 = vmatmul.msk.f32.vlgmr.msrb.gmra.mxu1 %vm1267_vm1, %v1259_v48 }
 0x57d   : > { %1505 = vmatmul.msk.f32.gmra.mxu1 %vm1267_vm1, %v1260_v20 }
 0x5f2   : > { %v1291_v22 = vpop.f32.mrf.mxu1 }
 0x5f3   : > { %v1297_v16 = vmul.f32 0.125, %v1291_v22 }
 0x5fa   : > { %v1294_v8 = vpop.f32.mrf.mxu1 }
 0x5fb   : > { %v1298_v15 = vmul.f32 0.125, %v1294_v8 }
 0x5fd   : > { %1306 = vperm.xlu2 %1534, %v1298_v15  }
 0x605   : > { %1301 = vperm.xlu2 %1534, %v1297_v16  }
 0x657   : > { %v1307_v43 = vpop.permute.xlu2 %1306 }
 0x658   : > { %v1310_v57 = vsub.f32 %v1253_v1, %v1307_v43 }
 0x65a   : > { %v1312_v18 = vmul.f32 %v1310_v57, %v1310_v57 }
 0x65c   : > { %v1316_v12 = vsel %vm393_vm0, %v1312_v18, 0.0 }
 0x65d   : > { %1317 = vadd.xlane.f32.xlu2 %v1316_v12 }
 0x65f   : > { %v1302_v46 = vpop.permute.xlu2 %1301 }
 0x660   : > { %v1309_v44 = vsub.f32 %v1251_v13, %v1302_v46 }
 0x662   : > { %v1311_v23 = vmul.f32 %v1309_v44, %v1309_v44 }
 0x664   : > { %v1313_v58 = vsel %vm393_vm0, %v1311_v23, 0.0 }
 0x665   : > { %1314 = vadd.xlane.f32.xlu1 %v1313_v58 }
 0x675   : > { %1382 = vperm.xlu2 %1534, %v1257_v33  }
 0x6d0   : > { %v1318_v19 = vpop.xlane.xlu2 %1317 }
 0x6d1   : > { %1333 = vmatpush.msra.mxu2 %v1318_v19 }
 0x6d8   : > { %v1315_v35 = vpop.xlane.xlu1 %1314  ;;  %v1383_v14 = vpop.permute.xlu2 %1382 }
 0x6d9   : > { %1334 = vmatpush.msra.mxu2 %v1315_v35 }
 0x6da   : > { %1506 = vmatmul.msk.f32.vlgmr.msra.gmra.mxu2 %vm1267_vm1, %v1259_v48 }
 0x6e2   : > { %1507 = vmatmul.msk.f32.gmra.mxu2 %vm1267_vm1, %v1260_v20 }
 0x75d   : > { %v1336_v38 = vpop.f32.mrf.mxu2 }
 0x75e   : > { %v1342_v27 = vmul.f32 0.125, %v1336_v38 }
 0x760   : > { %v1344_v30 = vadd.f32 1e-05, %v1342_v27 }
 0x762   : > { %1559 = vrsqrt.f32 %v1344_v30  ;;  %vm1352_vm2 = vweird.f32 %v1344_v30 }
 0x765   : > { %v1339_v56 = vpop.f32.mrf.mxu2 }
 0x766   : > { %v1343_v6 = vmul.f32 0.125, %v1339_v56 }
 0x768   : > { %v1560_v26 = vpop.eup %1559  ;;  %v1345_v34 = vadd.f32 1e-05, %v1343_v6 }
 0x769   : > { %v1347_v37 = vmul.f32 %v1560_v26, %v1344_v30  ;;  %vm1353_vm15 = vweird.f32 %v1560_v26 }
 0x76a   : > { %1561 = vrsqrt.f32 %v1345_v34  ;;  %vm1354_vm3 = vmor %vm1352_vm2, %vm1353_vm15  ;;  %vm1362_vm5 = vweird.f32 %v1345_v34 }
 0x76b   : > { %v1348_v62 = vmul.f32 %v1560_v26, %v1347_v37 }
 0x76d   : > { %v1349_v32 = vmul.f32 0.5, %v1348_v62 }
 0x76f   : > { %v1350_v53 = vsub.f32 1.5, %v1349_v32 }
 0x770   : > { %v1562_v3 = vpop.eup %1561 }
 0x771   : > { %v1357_v17 = vmul.f32 %v1562_v3, %v1345_v34  ;;  %v1351_v25 = vmul.f32 %v1560_v26, %v1350_v53  ;;  %vm1363_vm4 = vweird.f32 %v1562_v3 }
 0x772   : > { %vm1364_vm6 = vmor %vm1362_vm5, %vm1363_vm4 }
 0x773   : > { %v1358_v39 = vmul.f32 %v1562_v3, %v1357_v17  ;;  %v1355_v29 = vsel %vm1354_vm3, %v1560_v26, %v1351_v25 }
 0x774   : > { %v1366_v51 = vmul.f32 %v1355_v29, %v1255_v10 }
 0x775   : > { %v1359_v40 = vmul.f32 0.5, %v1358_v39 }
 0x776   : > { %1370 = vperm.xlu0 %1532, %v1366_v51  }
 0x777   : > { %v1360_v31 = vsub.f32 1.5, %v1359_v40 }
 0x779   : > { %v1361_v45 = vmul.f32 %v1562_v3, %v1360_v31 }
 0x77b   : > { %v1365_v47 = vsel %vm1364_vm6, %v1562_v3, %v1361_v45 }
 0x77c   : > { %v1367_v59 = vmul.f32 %v1365_v47, %v1256_v49 }
 0x77e   : > { %1387 = vperm.xlu0 %1532, %v1258_v50   ;;  %1375 = vperm.xlu1 %1533, %v1367_v59  }
 0x7e8   : > { %v1371_v41 = vpop.permute.xlu0 %1370 }
 0x7e9   : > { %v1378_v42 = vmul.f32 %v1371_v41, %v1309_v44 }
 0x7eb   : > { %v1390_v5 = vadd.f32 %v1383_v14, %v1378_v42 }
 0x7ed   : > { %v1392_v54 = vmax.f32 %v1390_v5, 0.0 }
 0x7ef   : > { %1394 = vst.msk [vmem:[%s359_s20] sm:$0xff] %vm393_vm0, %v1392_v54 }
 0x7f0   : > { %v1376_v55 = vpop.permute.xlu1 %1375  ;;  %v1388_v0 = vpop.permute.xlu0 %1387 }
 0x7f1   : > { %v1379_v2 = vmul.f32 %v1376_v55, %v1310_v57 }
 0x7f3   : > { %v1391_v7 = vadd.f32 %v1388_v0, %v1379_v2 }
 0x7f5   : > { %v1393_v11 = vmax.f32 %v1391_v7, 0.0 }
 0x7f7   : > { %1395 = vst.msk [vmem:[%s359_s20 + $0x8] sm:$0xff] %vm393_vm0, %v1393_v11 }
 0x7f8 PF: > { %s20_s13 = sadd.s32 1, %s1569_s13  }
 0x7f9   : > { %p17_p4 = scmp.ge.s32.totalorder %s20_s13, 4  }
 0x7fb   :  { %19 = sbr.rel (!%p17_p4) target bundleno = 1 (0x1), region = 97 }

// kernel: vae_decoder_forward.11
= control target key start
LH: loop header
LB: loop body
LE: loop exit
PB: predicated region body
PF: predicated region fallthrough
CT: control target
= control target key end

     0   :  { %s1554_s17 = smov 0   ;;  %s2225_s0 = inlined_call_operand.vmem [shape: f32[2,32,64], index: 0, kind: input, shape index: {}]   ;;  %s2226_s1 = inlined_call_operand.vmem [shape: bf16[16,32], index: 1, kind: input, shape index: {}]   ;;  %s2227_s2 = inlined_call_operand.vmem [shape: bf16[64,256], index: 2, kind: input, shape index: {}]   ;;  %s2228_s3 = inlined_call_operand.vmem [shape: f32[16,16], index: 3, kind: input, shape index: {}]   ;;  %s2229_s4 = inlined_call_operand.vmem [shape: f32[16,1], index: 4, kind: input, shape index: {}]   ;;  %s2230_s5 = inlined_call_operand.vmem [shape: f32[16,1], index: 5, kind: input, shape index: {}]   ;;  %s2231_s6 = inlined_call_operand.vmem [shape: bf16[16,144], index: 6, kind: input, shape index: {}]   ;;  %s2232_s7 = inlined_call_operand.vmem [shape: f32[16,1], index: 7, kind: input, shape index: {}]   ;;  %s2233_s8 = inlined_call_operand.vmem [shape: f32[16,1], index: 8, kind: input, shape index: {}]   ;;  %s2234_s9 = inlined_call_operand.vmem [shape: bf16[16,144], index: 9, kind: input, shape index: {}]   ;;  %s2235_s10 = inlined_call_operand.vmem [shape: f32[9,1,256], index: 10, kind: input, shape index: {}]   ;;  %s2236_s11 = inlined_call_operand.vmem [shape: f32[2,16,256], index: 11, kind: output, shape index: {}]  }
   0x1 LB: > { %s1349_s18 = sadd.s32 4294967295, %s1483_s17   ;;  %p1353_p0 = scmp.ge.s32.totalorder %s1483_s17, 1  ;;  %s1483_s17 = sphi %s1554_s17, %s21_s17  }
   0x2   : > { %p337_p1 = scmp.lt.s32.totalorder %s1483_s17, 3 }
   0x4   : > { %p338_p2 = pnand %p1353_p0, %p337_p1 }
   0x5   : > { %p377_p3 = scmp.lt.s32.totalorder (!%p338_p2), %s1349_s18, 1  ;;  %s1486_s20 = smov (!%p338_p2), 112  }
   0x6   : > { %341 = sbr.rel (%p338_p2) target bundleno = 2552 (0x9f8), region = 64  ;;  %s1487_s21 = smov (!%p338_p2), 127  }
   0x7   : > { %s1488_s22 = smov (!%p338_p2), 1   ;;  %s1489_s23 = smov (!%p338_p2), 113  }
   0x8   : > { %s1490_s24 = smov (!%p338_p2), 16   ;;  %s1491_s25 = smov (!%p338_p2), 17  }
   0x9   : > { %s1492_s26 = smov (!%p338_p2), 15   ;;  %s1493_s28 = smov (!%p338_p2), 111  }
   0xb   : > { %v1389_v0 = vld [vmem:[%s2227_s2 + $0x30] sm:$0xf]  ;;  %v1444_v1 = vld [vmem:[%s2227_s2 + $0x34] sm:$0xf0]  ;;  %v1443_v2 = vld [vmem:[%s2227_s2 + $0x34] sm:$0xf] }
   0xc   : > { %v1391_v3 = vld [vmem:[%s2227_s2 + $0x38] sm:$0xf0]  ;;  %s2238_s18 = smov (!%p377_p3, %s1349_s18), 1  ;;  %v1390_v4 = vor.u32 %v1444_v1, %v1389_v0  ;;  %v1436_v12 = vld [vmem:[%s2226_s1] sm:$0xff]  ;;  %vm401_vm0 = vcmask 261120   ;;  %vm468_vm1 = vcmask 523264  }
   0xd   : > { %v1394_v5 = vor.u32 %v1443_v2, %v1391_v3  ;;  %s1434_s27 = sshll.u32 %s2238_s18, 5  ;;  %v1381_v13 = vld [vmem:[%s2227_s2 + $0x20] sm:$0xf]  ;;  %v1442_v14 = vld [vmem:[%s2227_s2 + $0x24] sm:$0xf0]  ;;  %vm512_vm2 = vcmask 130048  }
   0xe   : > { %476 = vmatpush.bf16.msra.mxu1 %v1390_v4  ;;  %s381_s30 = scalar_lea.vmem %s2225_s0, %s1434_s27  ;;  %v1441_v15 = vld [vmem:[%s2227_s2 + $0x24] sm:$0xf]  ;;  %v1382_v16 = vor.u32 %v1442_v14, %v1381_v13  ;;  %v1383_v17 = vld [vmem:[%s2227_s2 + $0x28] sm:$0xf0]  ;;  %v1373_v19 = vld [vmem:[%s2227_s2 + $0x10] sm:$0xf]  ;;  %s386_s12 = scalar_lea.vmem %s2236_s11, %s1434_s27 }
   0xf   : > { %490 = vmatpush.bf16.msra.mxu2 %v1394_v5  ;;  %v390_v6 = vld [vmem:[%s381_s30 + $0x10] sm:$0xff]  ;;  %v391_v7 = vld [vmem:[%s381_s30 + $0x18] sm:$0xff]  ;;  %v388_v8 = vld [vmem:[%s381_s30] sm:$0xff]  ;;  %v1386_v18 = vor.u32 %v1441_v15, %v1383_v17  ;;  %v1485_v44 = vmov 0  }
  0x10   : > { %v395_v9 = vpack.c.bf16 %v391_v7, %v390_v6  ;;  %v389_v10 = vld [vmem:[%s381_s30 + $0x8] sm:$0xff]  ;;  %v1440_v20 = vld [vmem:[%s2227_s2 + $0x14] sm:$0xf0]  ;;  %v1439_v21 = vld [vmem:[%s2227_s2 + $0x14] sm:$0xf]  ;;  %1466 = vset.pattern.permute.xlu1 %v1485_v44  ;;  %1467 = vset.pattern.permute.xlu0 %v1485_v44 }
  0x11   : > { %v394_v11 = vpack.c.bf16 %v389_v10, %v388_v8  ;;  %v1374_v22 = vor.u32 %v1440_v20, %v1373_v19  ;;  %v1375_v23 = vld [vmem:[%s2227_s2 + $0x18] sm:$0xf0]  ;;  %v1365_v25 = vld [vmem:[%s2227_s2] sm:$0xf]  ;;  %v1438_v26 = vld [vmem:[%s2227_s2 + $0x4] sm:$0xf0]  ;;  %1468 = vset.pattern.permute.xlu2 %v1485_v44 }
  0x12   : > { %411 = vmatpush.bf16.msra.mxu0 %v395_v9  ;;  %477 = vmatpush.bf16.msra.mxu1 %v1382_v16  ;;  %v1378_v24 = vor.u32 %v1439_v21, %v1375_v23  ;;  %v1437_v27 = vld [vmem:[%s2227_s2 + $0x4] sm:$0xf]  ;;  %v1366_v28 = vor.u32 %v1438_v26, %v1365_v25  ;;  %v1367_v29 = vld [vmem:[%s2227_s2 + $0x8] sm:$0xf0] }
  0x13   : > { %491 = vmatpush.bf16.msra.mxu2 %v1386_v18  ;;  %v1370_v30 = vor.u32 %v1437_v27, %v1367_v29  ;;  %v1636_v41 = vld [vmem:[%s2228_s3] sm:$0xff]  ;;  %v1643_v43 = vld [vmem:[%s2228_s3 + $0x8] sm:$0xff] }
  0x14   : > { %v503_v49 = vld [vmem:[%s2230_s5 + $0x8] sm:$0xff]  ;;  %v502_v2 = vld [vmem:[%s2230_s5] sm:$0xff] }
  0x15   : > { %v500_v14 = vld [vmem:[%s2229_s4] sm:$0xff]  ;;  %v501_v21 = vld [vmem:[%s2229_s4 + $0x8] sm:$0xff] }
  0x16   : > { %412 = vmatpush.bf16.msra.mxu0 %v394_v11  ;;  %478 = vmatpush.bf16.msra.mxu1 %v1374_v22 }
  0x17   : > { %492 = vmatpush.bf16.msra.mxu2 %v1378_v24 }
  0x19   : > { %1362 = vmatmul.msk.bf16.vlgmr.msra.gmra.mxu0 %vm401_vm0, %v1436_v12 }
  0x1a   : > { %479 = vmatpush.bf16.msra.mxu1 %v1366_v28 }
  0x1b   : > { %493 = vmatpush.bf16.msra.mxu2 %v1370_v30 }
  0x96   : > { %v414_v31 = vpop.f32.mrf.mxu0 }
  0x9e   : > { %v416_v32 = vpop.f32.mrf.mxu0 }
  0x9f   : > { %v419_v33 = vpack.c.bf16 %v416_v32, %v414_v31 }
  0xa1   : > { %1395 = vmatmul.msk.bf16.vlgmr.msra.gmra.mxu1 %vm468_vm1, %v419_v33  ;;  %1396 = vmatmul.msk.bf16.vlgmr.msra.gmra.mxu2 %vm468_vm1, %v419_v33 }
 0x11e   : > { %v1621_v34 = vpop.f32.mrf.mxu1 }
 0x124   : > { %v1623_v35 = vpop.f32.mrf.mxu2 }
 0x125   : > { %v506_v39 = vadd.f32 %v1623_v35, %v1621_v34 }
 0x126   : > { %v1625_v36 = vpop.f32.mrf.mxu1 }
 0x12c   : > { %v1627_v37 = vpop.f32.mrf.mxu2 }
 0x12d   : > { %v509_v38 = vadd.f32 %v1627_v37, %v1625_v36 }
 0x12f   : > { %510 = vadd.xlane.f32.xlu0 %v509_v38 }
 0x137   : > { %507 = vadd.xlane.f32.xlu0 %v506_v39 }
 0x1a2   : > { %v511_v40 = vpop.xlane.xlu0 %510 }
 0x1a3   : > { %533 = vmatpush.msra.mxu3 %v511_v40 }
 0x1aa   : > { %v508_v42 = vpop.xlane.xlu0 %507 }
 0x1ab   : > { %534 = vmatpush.msra.mxu3 %v508_v42 }
 0x1ac   : > { %1397 = vmatmul.msk.f32.vlgmr.msra.gmra.mxu3 %vm512_vm2, %v1636_v41 }
 0x1b4   : > { %1398 = vmatmul.msk.f32.gmra.mxu3 %vm512_vm2, %v1643_v43 }
 0x22f   : > { %v536_v45 = vpop.f32.mrf.mxu3 }
 0x230   : > { %v542_v48 = vmul.f32 0.001953125, %v536_v45 }
 0x237   : > { %v539_v46 = vpop.f32.mrf.mxu3 }
 0x238   : > { %v543_v47 = vmul.f32 0.001953125, %v539_v46 }
 0x23a   : > { %551 = vperm.xlu1 %1466, %v543_v47  }
 0x242   : > { %546 = vperm.xlu1 %1466, %v542_v48  }
 0x24a   : > { %638 = vperm.xlu1 %1466, %v503_v49  }
 0x2ac   : > { %v552_v50 = vpop.permute.xlu1 %551 }
 0x2ad   : > { %v1651_v51 = vsub.f32 %v1625_v36, %v552_v50  ;;  %v1654_v52 = vsub.f32 %v1627_v37, %v552_v50 }
 0x2af   : > { %v560_v53 = vmul.f32 %v1651_v51, %v1651_v51  ;;  %v561_v54 = vmul.f32 %v1654_v52, %v1654_v52 }
 0x2b1   : > { %v565_v55 = vadd.f32 %v561_v54, %v560_v53 }
 0x2b3   : > { %566 = vadd.xlane.f32.xlu2 %v565_v55 }
 0x2b4   : > { %v547_v56 = vpop.permute.xlu1 %546 }
 0x2b5   : > { %v554_v57 = vsub.f32 %v1621_v34, %v547_v56  ;;  %v555_v58 = vsub.f32 %v1623_v35, %v547_v56 }
 0x2b7   : > { %v558_v59 = vmul.f32 %v554_v57, %v554_v57  ;;  %v559_v60 = vmul.f32 %v555_v58, %v555_v58 }
 0x2b9   : > { %v562_v61 = vadd.f32 %v559_v60, %v558_v59 }
 0x2bb   : > { %563 = vadd.xlane.f32.xlu2 %v562_v61 }
 0x2bc   : > { %v639_v33 = vpop.permute.xlu1 %638 }
 0x2d3   : > { %633 = vperm.xlu2 %1468, %v502_v2   ;;  %v1406_v2 = vld [vmem:[%s2235_s10 + $0xe] sm:$0x3] }
 0x326   : > { %v567_v62 = vpop.xlane.xlu2 %566 }
 0x327   : > { %582 = vmatpush.msrb.mxu3 %v567_v62  ;;  %v657_v62 = vlaneseq }
 0x32e   : > { %v564_v63 = vpop.xlane.xlu2 %563 }
 0x32f   : > { %583 = vmatpush.msrb.mxu3 %v564_v63  ;;  %v1767_v63 = vand.u32 127, %v657_v62 }
 0x330   : > { %1399 = vmatmul.msk.f32.vlgmr.msrb.gmra.mxu3 %vm512_vm2, %v1636_v41 }
 0x331   : > { %vm802_vm9 = vcmp.lt.s32.totalorder %v1767_v63, 112  ;;  %vm778_vm10 = vcmp.lt.s32.totalorder %v1767_v63, 113  ;;  %vm754_vm11 = vcmp.lt.s32.totalorder %v1767_v63, 127  ;;  %vm730_vm12 = vcmp.lt.s32.totalorder %v1767_v63, 1 }
 0x332   : > { %vm706_vm13 = vcmp.lt.s32.totalorder %v1767_v63, 15  ;;  %vm682_vm14 = vcmp.lt.s32.totalorder %v1767_v63, 16  ;;  %vm659_vm15 = vcmp.lt.s32.totalorder %v1767_v63, 17  ;;  %vm826_vm0 = vcmp.lt.s32.totalorder %v1767_v63, 111 }
 0x336   : > { %v634_v26 = vpop.permute.xlu2 %633 }
 0x338   : > { %1400 = vmatmul.msk.f32.gmra.mxu3 %vm512_vm2, %v1643_v43 }
 0x3b3   : > { %v585_v0 = vpop.f32.mrf.mxu3 }
 0x3b4   : > { %v591_v1 = vmul.f32 0.001953125, %v585_v0 }
 0x3b6   : > { %v593_v3 = vadd.f32 1e-05, %v591_v1 }
 0x3b8   : > { %1469 = vrsqrt.f32 %v593_v3  ;;  %vm601_vm4 = vweird.f32 %v593_v3 }
 0x3bb   : > { %v588_v4 = vpop.f32.mrf.mxu3 }
 0x3bc   : > { %v592_v5 = vmul.f32 0.001953125, %v588_v4  ;;  %v1405_v4 = vld [vmem:[%s2235_s10 + $0xc] sm:$0x3] }
 0x3be   : > { %v1470_v6 = vpop.eup %1469  ;;  %v594_v7 = vadd.f32 1e-05, %v592_v5  ;;  %v1776_v5 = vperm.slane %v1406_v2, 0 }
 0x3bf   : > { %v596_v8 = vmul.f32 %v1470_v6, %v593_v3  ;;  %vm602_vm3 = vweird.f32 %v1470_v6 }
 0x3c0   : > { %1471 = vrsqrt.f32 %v594_v7  ;;  %vm603_vm5 = vmor %vm601_vm4, %vm602_vm3  ;;  %vm611_vm6 = vweird.f32 %v594_v7 }
 0x3c1   : > { %v597_v9 = vmul.f32 %v1470_v6, %v596_v8 }
 0x3c3   : > { %v598_v10 = vmul.f32 0.5, %v597_v9  ;;  %v1785_v9 = vperm.slane %v1405_v4, 0 }
 0x3c5   : > { %v599_v11 = vsub.f32 1.5, %v598_v10  ;;  %v1787_v10 = vperm.slane %v1405_v4, 1 }
 0x3c6   : > { %v1472_v12 = vpop.eup %1471 }
 0x3c7   : > { %v606_v13 = vmul.f32 %v1472_v12, %v594_v7  ;;  %v600_v15 = vmul.f32 %v1470_v6, %v599_v11  ;;  %vm612_vm7 = vweird.f32 %v1472_v12 }
 0x3c8   : > { %vm613_vm8 = vmor %vm611_vm6, %vm612_vm7 }
 0x3c9   : > { %v607_v16 = vmul.f32 %v1472_v12, %v606_v13  ;;  %v604_v17 = vsel %vm603_vm5, %v1470_v6, %v600_v15  ;;  %v1778_v6 = vperm.slane %v1406_v2, 1 }
 0x3ca   : > { %v615_v18 = vmul.f32 %v604_v17, %v500_v14 }
 0x3cb   : > { %v608_v19 = vmul.f32 0.5, %v607_v16  ;;  %v1404_v16 = vld [vmem:[%s2235_s10 + $0xa] sm:$0x3] }
 0x3cc   : > { %619 = vperm.xlu0 %1467, %v615_v18  }
 0x3cd   : > { %v609_v20 = vsub.f32 1.5, %v608_v19 }
 0x3cf   : > { %v610_v22 = vmul.f32 %v1472_v12, %v609_v20 }
 0x3d1   : > { %v614_v23 = vsel %vm613_vm8, %v1472_v12, %v610_v22 }
 0x3d2   : > { %v616_v24 = vmul.f32 %v614_v23, %v501_v21 }
 0x3d4   : > { %624 = vperm.xlu1 %1466, %v616_v24  }
 0x43e   : > { %v620_v25 = vpop.permute.xlu0 %619 }
 0x43f   : > { %v627_v27 = vmul.f32 %v620_v25, %v554_v57  ;;  %v628_v28 = vmul.f32 %v620_v25, %v555_v58 }
 0x441   : > { %v641_v29 = vadd.f32 %v634_v26, %v627_v27  ;;  %v642_v30 = vadd.f32 %v634_v26, %v628_v28  ;;  %v1811_v28 = vperm.slane %v1404_v16, 0 }
 0x443   : > { %v1675_v31 = vmax.f32 %v641_v29, 0.0  ;;  %v1677_v32 = vmax.f32 %v642_v30, 0.0  ;;  %v1813_v29 = vperm.slane %v1404_v16, 1 }
 0x445   : > { %798 = vrot.lane.b32.xlu2 %v1677_v32, %s1486_s20  ;;  %746 = vrot.lane.b32.xlu0 %v1675_v31, %s1487_s21 }
 0x446   : > { %794 = vrot.lane.b32.xlu1 %v1675_v31, %s1486_s20  ;;  %v625_v38 = vpop.permute.xlu1 %624 }
 0x447   : > { %v629_v39 = vmul.f32 %v625_v38, %v1651_v51  ;;  %v630_v42 = vmul.f32 %v625_v38, %v1654_v52 }
 0x449   : > { %v643_v40 = vadd.f32 %v639_v33, %v629_v39  ;;  %v644_v45 = vadd.f32 %v639_v33, %v630_v42 }
 0x44b   : > { %v1705_v44 = vmax.f32 %v643_v40, 0.0  ;;  %v1713_v46 = vmax.f32 %v644_v45, 0.0 }
 0x44d   : > { %726 = vrot.lane.b32.xlu0 %v1677_v32, %s1488_s22  ;;  %770 = vrot.lane.b32.xlu2 %v1675_v31, %s1489_s23 }
 0x44e   : > { %774 = vrot.lane.b32.xlu1 %v1677_v32, %s1489_s23 }
 0x455   : > { %674 = vrot.lane.b32.xlu0 %v1675_v31, %s1490_s24  ;;  %750 = vrot.lane.b32.xlu2 %v1677_v32, %s1487_s21 }
 0x456   : > { %722 = vrot.lane.b32.xlu1 %v1675_v31, %s1488_s22 }
 0x45d   : > { %653 = vrot.lane.b32.xlu0 %v1677_v32, %s1491_s25  ;;  %698 = vrot.lane.b32.xlu2 %v1675_v31, %s1492_s26 }
 0x45e   : > { %702 = vrot.lane.b32.xlu1 %v1677_v32, %s1492_s26 }
 0x465   : > { %678 = vrot.lane.b32.xlu2 %v1677_v32, %s1490_s24  ;;  %772 = vrot.lane.b32.xlu0 %v1705_v44, %s1489_s23 }
 0x466   : > { %649 = vrot.lane.b32.xlu1 %v1675_v31, %s1491_s25 }
 0x46d   : > { %818 = vrot.lane.b32.xlu2 %v1675_v31, %s1493_s28  ;;  %752 = vrot.lane.b32.xlu0 %v1713_v46, %s1487_s21 }
 0x46e   : > { %796 = vrot.lane.b32.xlu1 %v1705_v44, %s1486_s20 }
 0x475   : > { %776 = vrot.lane.b32.xlu2 %v1713_v46, %s1489_s23  ;;  %700 = vrot.lane.b32.xlu0 %v1705_v44, %s1492_s26 }
 0x476   : > { %800 = vrot.lane.b32.xlu1 %v1713_v46, %s1486_s20 }
 0x47d   : > { %724 = vrot.lane.b32.xlu2 %v1705_v44, %s1488_s22  ;;  %680 = vrot.lane.b32.xlu0 %v1713_v46, %s1490_s24 }
 0x47e   : > { %748 = vrot.lane.b32.xlu1 %v1705_v44, %s1487_s21 }
 0x485   : > { %704 = vrot.lane.b32.xlu2 %v1713_v46, %s1492_s26  ;;  %820 = vrot.lane.b32.xlu0 %v1705_v44, %s1493_s28 }
 0x486   : > { %728 = vrot.lane.b32.xlu1 %v1713_v46, %s1488_s22 }
 0x48d   : > { %651 = vrot.lane.b32.xlu2 %v1705_v44, %s1491_s25 }
 0x48e   : > { %676 = vrot.lane.b32.xlu1 %v1705_v44, %s1490_s24 }
 0x495   : > { %824 = vrot.lane.b32.xlu2 %v1713_v46, %s1493_s28 }
 0x496   : > { %655 = vrot.lane.b32.xlu1 %v1713_v46, %s1491_s25 }
 0x49e   : > { %822 = vrot.lane.b32.xlu1 %v1677_v32, %s1493_s28 }
 0x49f   : > { %v799_v47 = vpop.permute.xlu2 %798 }
 0x4a7   : > { %v771_v48 = vpop.permute.xlu2 %770 }
 0x4af   : > { %v751_v51 = vpop.permute.xlu2 %750 }
 0x4b7   : > { %v747_v50 = vpop.permute.xlu0 %746  ;;  %v1751_v54 = vpop.permute.xlu2 %698 }
 0x4b8   : > { %v795_v49 = vpop.permute.xlu1 %794  ;;  %v755_v30 = vsel %vm754_vm11, %v747_v50, %v751_v51  ;;  %v757_v40 = vsel %vm754_vm11, %v751_v51, %v747_v50 }
 0x4b9   : > { %v803_v7 = vsel %vm802_vm9, %v795_v49, %v799_v47  ;;  %v805_v8 = vsel %vm802_vm9, %v799_v47, %v795_v49  ;;  %v1403_v49 = vld [vmem:[%s2235_s10 + $0x6] sm:$0x3] }
 0x4ba   : > { %v814_v17 = vmul.f32 %v1776_v5, %v803_v7  ;;  %v815_v18 = vmul.f32 %v1778_v6, %v805_v8  ;;  %v1402_v7 = vld [vmem:[%s2235_s10 + $0x4] sm:$0x3]  ;;  %v1842_v8 = vperm.slane %v1403_v49, 1 }
 0x4bf   : > { %v1749_v53 = vpop.permute.xlu0 %726  ;;  %v1757_v57 = vpop.permute.xlu2 %678 }
 0x4c0   : > { %v775_v52 = vpop.permute.xlu1 %774 }
 0x4c1   : > { %v779_v21 = vsel %vm778_vm10, %v771_v48, %v775_v52  ;;  %v781_v22 = vsel %vm778_vm10, %v775_v52, %v771_v48  ;;  %v766_v48 = vmul.f32 %v1811_v28, %v755_v30 }
 0x4c2   : > { %v790_v33 = vmul.f32 %v1785_v9, %v779_v21  ;;  %v791_v38 = vmul.f32 %v1787_v10, %v781_v22  ;;  %v1868_v21 = vperm.slane %v1402_v7, 1 }
 0x4c7   : > { %v1755_v56 = vpop.permute.xlu0 %674  ;;  %v1765_v61 = vpop.permute.xlu2 %818 }
 0x4c8   : > { %v1753_v55 = vpop.permute.xlu1 %722 }
 0x4c9   : > { %v733_v4 = vsel %vm730_vm12, %v1749_v53, %v1753_v55 }
 0x4cf   : > { %v1761_v59 = vpop.permute.xlu0 %653  ;;  %v777_v3 = vpop.permute.xlu2 %776 }
 0x4d0   : > { %v1759_v58 = vpop.permute.xlu1 %702 }
 0x4d1   : > { %v707_v22 = vsel %vm706_vm13, %v1751_v54, %v1759_v58 }
 0x4d7   : > { %v773_v1 = vpop.permute.xlu0 %772  ;;  %v725_v39 = vpop.permute.xlu2 %724 }
 0x4d8   : > { %v1763_v60 = vpop.permute.xlu1 %649  ;;  %v780_v12 = vsel %vm778_vm10, %v773_v1, %v777_v3  ;;  %v782_v13 = vsel %vm778_vm10, %v777_v3, %v773_v1  ;;  %v1833_v1 = vperm.slane %v1403_v49, 0 }
 0x4d9   : > { %v792_v23 = vmul.f32 %v1785_v9, %v780_v12  ;;  %v793_v24 = vmul.f32 %v1787_v10, %v782_v13  ;;  %v731_v12 = vsel %vm730_vm12, %v1753_v55, %v1749_v53  ;;  %v850_v13 = vpack.c.bf16 %v1705_v44, %v1675_v31  ;;  %v1401_v55 = vld [vmem:[%s2235_s10 + $0x2] sm:$0x3] }
 0x4da   : > { %v1883_v30 = vperm.slane %v1401_v55, 0 }
 0x4db   : > { %v854_v45 = vpack.c.bf16 %v792_v23, %v790_v33  ;;  %v855_v47 = vpack.c.bf16 %v793_v24, %v791_v38  ;;  %v709_v23 = vsel %vm706_vm13, %v1759_v58, %v1751_v54  ;;  %v1885_v33 = vperm.slane %v1401_v55, 1 }
 0x4dc   : > { %v685_v38 = vsel %vm682_vm14, %v1757_v57, %v1755_v56  ;;  %v683_v54 = vsel %vm682_vm14, %v1755_v56, %v1757_v57  ;;  %v664_v56 = vld [vmem:[%s2235_s10] sm:$0x3] }
 0x4df   : > { %v753_v25 = vpop.permute.xlu0 %752  ;;  %v705_v16 = vpop.permute.xlu2 %704 }
 0x4e0   : > { %v797_v0 = vpop.permute.xlu1 %796 }
 0x4e7   : > { %v652_v57 = vpop.permute.xlu2 %651 }
 0x4e8   : > { %v801_v11 = vpop.permute.xlu1 %800 }
 0x4e9   : > { %v804_v14 = vsel %vm802_vm9, %v797_v0, %v801_v11  ;;  %v806_v15 = vsel %vm802_vm9, %v801_v11, %v797_v0  ;;  %v767_v0 = vmul.f32 %v1813_v29, %v757_v40  ;;  %v701_v11 = vpop.permute.xlu0 %700  ;;  %v719_v40 = vmul.f32 %v1868_v21, %v707_v22 }
 0x4ea   : > { %v816_v19 = vmul.f32 %v1776_v5, %v804_v14  ;;  %v817_v20 = vmul.f32 %v1778_v6, %v806_v15  ;;  %v742_v14 = vmul.f32 %v1833_v1, %v733_v4  ;;  %v1852_v15 = vperm.slane %v1402_v7, 0 }
 0x4eb   : > { %v710_v53 = vsel %vm706_vm13, %v705_v16, %v701_v11  ;;  %v1911_v4 = vperm.slane %v664_v56, 1  ;;  %v660_v7 = vsel %vm659_vm15, %v1763_v60, %v1761_v59 }
 0x4ec   : > { %v856_v26 = vpack.c.bf16 %v816_v19, %v814_v17  ;;  %v857_v27 = vpack.c.bf16 %v817_v20, %v815_v18  ;;  %v851_v18 = vpack.c.bf16 %v1713_v46, %v1677_v32  ;;  %v708_v19 = vsel %vm706_vm13, %v701_v11, %v705_v16 }
 0x4ed   : > { %v743_v20 = vmul.f32 %v1842_v8, %v731_v12  ;;  %v720_v24 = vmul.f32 %v1852_v15, %v710_v53  ;;  %v662_v11 = vsel %vm659_vm15, %v1761_v59, %v1763_v60  ;;  %v1410_v53 = vld [vmem:[%s2231_s6] sm:$0xf]  ;;  %v1446_v59 = vld [vmem:[%s2231_s6 + $0x4] sm:$0xf0]  ;;  %v1407_v60 = vld [vmem:[%s2235_s10 + $0x10] sm:$0x3] }
 0x4ee   : > { %874 = vmatpush.bf16.msrb.mxu0 %v856_v26  ;;  %902 = vmatpush.bf16.msrb.mxu2 %v857_v27  ;;  %v1941_v22 = vperm.slane %v1407_v60, 1 }
 0x4f0   : > { %v749_v42 = vpop.permute.xlu1 %748 }
 0x4f1   : > { %v756_v52 = vsel %vm754_vm11, %v749_v42, %v753_v25  ;;  %v758_v62 = vsel %vm754_vm11, %v753_v25, %v749_v42  ;;  %v721_v25 = vmul.f32 %v1868_v21, %v708_v19  ;;  %v681_v58 = vpop.permute.xlu0 %680 }
 0x4f2   : > { %v768_v50 = vmul.f32 %v1811_v28, %v756_v52  ;;  %v769_v51 = vmul.f32 %v1813_v29, %v758_v62  ;;  %875 = vmatpush.bf16.msrb.mxu0 %v854_v45  ;;  %903 = vmatpush.bf16.msrb.mxu2 %v855_v47  ;;  %v695_v62 = vmul.f32 %v1885_v33, %v683_v54 }
 0x4f3   : > { %v847_v47 = vpack.c.bf16 %v721_v25, %v719_v40 }
 0x4f4   : > { %v852_v2 = vpack.c.bf16 %v768_v50, %v766_v48  ;;  %v853_v3 = vpack.c.bf16 %v769_v51, %v767_v0  ;;  %v694_v48 = vmul.f32 %v1883_v30, %v685_v38 }
 0x4f6   : > { %876 = vmatpush.bf16.msrb.mxu0 %v852_v2  ;;  %904 = vmatpush.bf16.msrb.mxu2 %v853_v3  ;;  %v1909_v3 = vperm.slane %v664_v56, 0 }
 0x4f8   : > { %v729_v17 = vpop.permute.xlu1 %728  ;;  %v670_v16 = vmul.f32 %v1909_v3, %v662_v11 }
 0x4f9   : > { %v732_v31 = vsel %vm730_vm12, %v725_v39, %v729_v17  ;;  %v734_v44 = vsel %vm730_vm12, %v729_v17, %v725_v39  ;;  %v718_v39 = vmul.f32 %v1852_v15, %v709_v23  ;;  %v671_v17 = vmul.f32 %v1911_v4, %v660_v7 }
 0x4fa   : > { %v744_v32 = vmul.f32 %v1833_v1, %v734_v44  ;;  %v745_v46 = vmul.f32 %v1842_v8, %v732_v31  ;;  %877 = vmatpush.bf16.msrb.mxu0 %v850_v13  ;;  %905 = vmatpush.bf16.msrb.mxu2 %v851_v18  ;;  %v821_v31 = vpop.permute.xlu0 %820 }
 0x4fb   : > { %v846_v45 = vpack.c.bf16 %v720_v24, %v718_v39 }
 0x4fc   : > { %v848_v26 = vpack.c.bf16 %v744_v32, %v742_v14  ;;  %v849_v27 = vpack.c.bf16 %v745_v46, %v743_v20  ;;  %v1411_v20 = vor.u32 %v1446_v59, %v1410_v53  ;;  %v825_v32 = vpop.permute.xlu2 %824  ;;  %v1939_v46 = vperm.slane %v1407_v60, 0 }
 0x4fd   : > { %v828_v23 = vsel %vm826_vm0, %v821_v31, %v825_v32  ;;  %v830_v24 = vsel %vm826_vm0, %v825_v32, %v821_v31 }
 0x4fe   : > { %878 = vmatpush.bf16.msrb.mxu0 %v848_v26  ;;  %906 = vmatpush.bf16.msrb.mxu2 %v849_v27  ;;  %v840_v38 = vmul.f32 %v1939_v46, %v828_v23  ;;  %v841_v39 = vmul.f32 %v1941_v22, %v830_v24 }
 0x500   : > { %v677_v42 = vpop.permute.xlu1 %676 }
 0x501   : > { %v684_v49 = vsel %vm682_vm14, %v677_v42, %v681_v58  ;;  %v686_v52 = vsel %vm682_vm14, %v681_v58, %v677_v42  ;;  %v1445_v58 = vld [vmem:[%s2231_s6 + $0x4] sm:$0xf]  ;;  %v1412_v42 = vld [vmem:[%s2231_s6 + $0x8] sm:$0xf0] }
 0x502   : > { %v696_v0 = vmul.f32 %v1883_v30, %v686_v52  ;;  %v697_v50 = vmul.f32 %v1885_v33, %v684_v49  ;;  %879 = vmatpush.bf16.msrb.mxu0 %v846_v45  ;;  %907 = vmatpush.bf16.msrb.mxu2 %v847_v47  ;;  %v1415_v47 = vor.u32 %v1445_v58, %v1412_v42 }
 0x504   : > { %v844_v51 = vpack.c.bf16 %v696_v0, %v694_v48  ;;  %v845_v2 = vpack.c.bf16 %v697_v50, %v695_v62 }
 0x506   : > { %880 = vmatpush.bf16.msrb.mxu0 %v844_v51  ;;  %908 = vmatpush.bf16.msrb.mxu2 %v845_v2 }
 0x508   : > { %v656_v12 = vpop.permute.xlu1 %655 }
 0x509   : > { %v661_v13 = vsel %vm659_vm15, %v652_v57, %v656_v12  ;;  %v663_v14 = vsel %vm659_vm15, %v656_v12, %v652_v57 }
 0x50a   : > { %v672_v18 = vmul.f32 %v1909_v3, %v663_v14  ;;  %v673_v19 = vmul.f32 %v1911_v4, %v661_v13  ;;  %v933_v14 = vld [vmem:[%s2233_s8 + $0x8] sm:$0xff] }
 0x50c   : > { %v842_v44 = vpack.c.bf16 %v672_v18, %v670_v16  ;;  %v843_v55 = vpack.c.bf16 %v673_v19, %v671_v17 }
 0x50e   : > { %881 = vmatpush.bf16.msrb.mxu0 %v842_v44  ;;  %909 = vmatpush.bf16.msrb.mxu2 %v843_v55 }
 0x510   : > { %v823_v25 = vpop.permute.xlu1 %822 }
 0x511   : > { %v827_v26 = vsel %vm826_vm0, %v1765_v61, %v823_v25  ;;  %v829_v27 = vsel %vm826_vm0, %v823_v25, %v1765_v61  ;;  %910 = vmatmul.bf16.vlgmr.msrb.gmra.mxu2 %v1411_v20  ;;  %882 = vmatmul.bf16.vlgmr.msrb.gmra.mxu0 %v1411_v20 }
 0x512   : > { %v838_v40 = vmul.f32 %v1939_v46, %v827_v26  ;;  %v839_v54 = vmul.f32 %v1941_v22, %v829_v27 }
 0x514   : > { %v859_v45 = vpack.c.bf16 %v841_v39, %v839_v54  ;;  %v858_v61 = vpack.c.bf16 %v840_v38, %v838_v40  ;;  %v932_v39 = vld [vmem:[%s2233_s8] sm:$0xff] }
 0x516   : > { %895 = vmatpush.bf16.msrb.mxu1 %v858_v61  ;;  %923 = vmatpush.bf16.msra.mxu3 %v859_v45 }
 0x519   : > { %1416 = vmatmul.msk.bf16.vlgmr.msrb.gmra.mxu1 %vm512_vm2, %v1415_v47  ;;  %1417 = vmatmul.msk.bf16.vlgmr.msra.gmra.mxu3 %vm512_vm2, %v1415_v47 }
 0x58e   : > { %v883_v49 = vpop.f32.mrf.mxu0 }
 0x594   : > { %v911_v52 = vpop.f32.mrf.mxu2 }
 0x596   : > { %v897_v48 = vpop.f32.mrf.mxu1  ;;  %v885_v51 = vpop.f32.mrf.mxu0 }
 0x597   : > { %v898_v62 = vadd.f32 %v897_v48, %v883_v49 }
 0x59c   : > { %v925_v0 = vpop.f32.mrf.mxu3  ;;  %v913_v2 = vpop.f32.mrf.mxu2 }
 0x59d   : > { %v926_v50 = vadd.f32 %v925_v0, %v911_v52 }
 0x59e   : > { %v899_v57 = vpop.f32.mrf.mxu1 }
 0x59f   : > { %v934_v56 = vadd.f32 %v926_v50, %v898_v62  ;;  %v900_v11 = vadd.f32 %v899_v57, %v885_v51 }
 0x5a1   : > { %935 = vadd.xlane.f32.xlu1 %v934_v56 }
 0x5a4   : > { %v927_v7 = vpop.f32.mrf.mxu3 }
 0x5a5   : > { %v928_v12 = vadd.f32 %v927_v7, %v913_v2 }
 0x5a7   : > { %v937_v13 = vadd.f32 %v928_v12, %v900_v11 }
 0x5a9   : > { %938 = vadd.xlane.f32.xlu0 %v937_v13  ;;  %v931_v13 = vld [vmem:[%s2232_s7 + $0x8] sm:$0xff] }
 0x5ba   : > { %1059 = vperm.xlu1 %1466, %v933_v14  }
 0x614   : > { %v936_v17 = vpop.xlane.xlu1 %935 }
 0x61c   : > { %v939_v16 = vpop.xlane.xlu0 %938 }
 0x61d   : > { %954 = vmatpush.msra.mxu1 %v939_v16 }
 0x61f   : > { %955 = vmatpush.msra.mxu1 %v936_v17 }
 0x620   : > { %1418 = vmatmul.msk.f32.vlgmr.msra.gmra.mxu1 %vm512_vm2, %v1636_v41 }
 0x628   : > { %1419 = vmatmul.msk.f32.gmra.mxu1 %vm512_vm2, %v1643_v43 }
 0x69d   : > { %v957_v18 = vpop.f32.mrf.mxu1 }
 0x69e   : > { %v963_v59 = vmul.f32 0.001953125, %v957_v18  ;;  %v1060_v18 = vpop.permute.xlu1 %1059 }
 0x6a5   : > { %v960_v19 = vpop.f32.mrf.mxu1 }
 0x6a6   : > { %v964_v53 = vmul.f32 0.001953125, %v960_v19 }
 0x6a8   : > { %972 = vperm.xlu2 %1468, %v964_v53  }
 0x6b0   : > { %967 = vperm.xlu2 %1468, %v963_v59  }
 0x702   : > { %v973_v60 = vpop.permute.xlu2 %972 }
 0x703   : > { %v1972_v31 = vsub.f32 %v900_v11, %v973_v60  ;;  %v1974_v44 = vsub.f32 %v928_v12, %v973_v60 }
 0x705   : > { %v981_v55 = vmul.f32 %v1972_v31, %v1972_v31  ;;  %v982_v20 = vmul.f32 %v1974_v44, %v1974_v44 }
 0x707   : > { %v986_v32 = vadd.f32 %v982_v20, %v981_v55 }
 0x709   : > { %987 = vadd.xlane.f32.xlu2 %v986_v32 }
 0x70a   : > { %v968_v23 = vpop.permute.xlu2 %967 }
 0x70b   : > { %v975_v24 = vsub.f32 %v898_v62, %v968_v23  ;;  %v976_v25 = vsub.f32 %v926_v50, %v968_v23 }
 0x70d   : > { %v979_v26 = vmul.f32 %v975_v24, %v975_v24  ;;  %v980_v27 = vmul.f32 %v976_v25, %v976_v25 }
 0x70f   : > { %v983_v38 = vadd.f32 %v980_v27, %v979_v26 }
 0x711   : > { %984 = vadd.xlane.f32.xlu0 %v983_v38 }
 0x721   : > { %1054 = vperm.xlu2 %1468, %v932_v39  }
 0x77c   : > { %v988_v40 = vpop.xlane.xlu2 %987 }
 0x77d   : > { %1003 = vmatpush.msrb.mxu3 %v988_v40 }
 0x784   : > { %v985_v54 = vpop.xlane.xlu0 %984  ;;  %v1055_v60 = vpop.permute.xlu2 %1054 }
 0x785   : > { %1004 = vmatpush.msrb.mxu3 %v985_v54 }
 0x786   : > { %1420 = vmatmul.msk.f32.vlgmr.msrb.gmra.mxu3 %vm512_vm2, %v1636_v41 }
 0x78e   : > { %1421 = vmatmul.msk.f32.gmra.mxu3 %vm512_vm2, %v1643_v43  ;;  %v930_v43 = vld [vmem:[%s2232_s7] sm:$0xff] }
 0x809   : > { %v1006_v58 = vpop.f32.mrf.mxu3 }
 0x80a   : > { %v1012_v42 = vmul.f32 0.001953125, %v1006_v58 }
 0x80c   : > { %v1014_v45 = vadd.f32 1e-05, %v1012_v42 }
 0x80e   : > { %1473 = vrsqrt.f32 %v1014_v45  ;;  %vm1022_vm3 = vweird.f32 %v1014_v45 }
 0x811   : > { %v1009_v61 = vpop.f32.mrf.mxu3 }
 0x812   : > { %v1013_v47 = vmul.f32 0.001953125, %v1009_v61 }
 0x814   : > { %v1474_v48 = vpop.eup %1473  ;;  %v1015_v49 = vadd.f32 1e-05, %v1013_v47 }
 0x815   : > { %v1017_v52 = vmul.f32 %v1474_v48, %v1014_v45  ;;  %vm1023_vm1 = vweird.f32 %v1474_v48 }
 0x816   : > { %1475 = vrsqrt.f32 %v1015_v49  ;;  %vm1024_vm4 = vmor %vm1022_vm3, %vm1023_vm1  ;;  %vm1032_vm5 = vweird.f32 %v1015_v49 }
 0x817   : > { %v1018_v62 = vmul.f32 %v1474_v48, %v1017_v52 }
 0x819   : > { %v1019_v0 = vmul.f32 0.5, %v1018_v62 }
 0x81b   : > { %v1020_v50 = vsub.f32 1.5, %v1019_v0 }
 0x81c   : > { %v1476_v56 = vpop.eup %1475 }
 0x81d   : > { %v1027_v41 = vmul.f32 %v1476_v56, %v1015_v49  ;;  %v1021_v57 = vmul.f32 %v1474_v48, %v1020_v50  ;;  %vm1033_vm6 = vweird.f32 %v1476_v56 }
 0x81e   : > { %vm1034_vm7 = vmor %vm1032_vm5, %vm1033_vm6 }
 0x81f   : > { %v1028_v51 = vmul.f32 %v1476_v56, %v1027_v41  ;;  %v1025_v2 = vsel %vm1024_vm4, %v1474_v48, %v1021_v57 }
 0x820   : > { %v1036_v7 = vmul.f32 %v1025_v2, %v930_v43 }
 0x821   : > { %v1029_v11 = vmul.f32 0.5, %v1028_v51 }
 0x822   : > { %1040 = vperm.xlu1 %1466, %v1036_v7  }
 0x823   : > { %v1030_v12 = vsub.f32 1.5, %v1029_v11 }
 0x825   : > { %v1031_v14 = vmul.f32 %v1476_v56, %v1030_v12 }
 0x827   : > { %v1035_v16 = vsel %vm1034_vm7, %v1476_v56, %v1031_v14 }
 0x828   : > { %v1037_v17 = vmul.f32 %v1035_v16, %v931_v13 }
 0x82a   : > { %1045 = vperm.xlu0 %1467, %v1037_v17  }
 0x894   : > { %v1041_v19 = vpop.permute.xlu1 %1040 }
 0x895   : > { %v1048_v53 = vmul.f32 %v1041_v19, %v975_v24  ;;  %v1049_v59 = vmul.f32 %v1041_v19, %v976_v25 }
 0x897   : > { %v1062_v55 = vadd.f32 %v1055_v60, %v1048_v53  ;;  %v1063_v20 = vadd.f32 %v1055_v60, %v1049_v59 }
 0x899   : > { %v1993_v32 = vmax.f32 %v1062_v55, 0.0  ;;  %v1995_v23 = vmax.f32 %v1063_v20, 0.0 }
 0x89b   : > { %1154 = vrot.lane.b32.xlu2 %v1995_v23, %s1489_s23  ;;  %1150 = vrot.lane.b32.xlu1 %v1993_v32, %s1489_s23 }
 0x89c   : > { %1166 = vrot.lane.b32.xlu0 %v1993_v32, %s1486_s20  ;;  %v1046_v24 = vpop.permute.xlu0 %1045 }
 0x89d   : > { %v1051_v25 = vmul.f32 %v1046_v24, %v1974_v44  ;;  %v1050_v27 = vmul.f32 %v1046_v24, %v1972_v31 }
 0x89f   : > { %v1065_v26 = vadd.f32 %v1060_v18, %v1051_v25  ;;  %v1064_v44 = vadd.f32 %v1060_v18, %v1050_v27 }
 0x8a1   : > { %v2023_v38 = vmax.f32 %v1065_v26, 0.0  ;;  %v2031_v39 = vmax.f32 %v1064_v44, 0.0 }
 0x8a3   : > { %1118 = vrot.lane.b32.xlu2 %v1993_v32, %s1488_s22  ;;  %1138 = vrot.lane.b32.xlu1 %v1995_v23, %s1487_s21 }
 0x8a4   : > { %1170 = vrot.lane.b32.xlu0 %v1995_v23, %s1486_s20 }
 0x8ab   : > { %1106 = vrot.lane.b32.xlu2 %v1995_v23, %s1492_s26  ;;  %1102 = vrot.lane.b32.xlu1 %v1993_v32, %s1492_s26 }
 0x8ac   : > { %1134 = vrot.lane.b32.xlu0 %v1993_v32, %s1487_s21 }
 0x8b3   : > { %1070 = vrot.lane.b32.xlu2 %v1993_v32, %s1491_s25  ;;  %1090 = vrot.lane.b32.xlu1 %v1995_v23, %s1490_s24 }
 0x8b4   : > { %1122 = vrot.lane.b32.xlu0 %v1995_v23, %s1488_s22 }
 0x8bb   : > { %1172 = vrot.lane.b32.xlu2 %v2023_v38, %s1486_s20  ;;  %1182 = vrot.lane.b32.xlu1 %v1993_v32, %s1493_s28 }
 0x8bc   : > { %1086 = vrot.lane.b32.xlu0 %v1993_v32, %s1490_s24 }
 0x8c3   : > { %1136 = vrot.lane.b32.xlu2 %v2031_v39, %s1487_s21  ;;  %1168 = vrot.lane.b32.xlu1 %v2031_v39, %s1486_s20 }
 0x8c4   : > { %1074 = vrot.lane.b32.xlu0 %v1995_v23, %s1491_s25 }
 0x8cb   : > { %1124 = vrot.lane.b32.xlu2 %v2023_v38, %s1488_s22  ;;  %1156 = vrot.lane.b32.xlu1 %v2023_v38, %s1489_s23 }
 0x8cc   : > { %1152 = vrot.lane.b32.xlu0 %v2031_v39, %s1489_s23 }
 0x8d3   : > { %1088 = vrot.lane.b32.xlu2 %v2031_v39, %s1490_s24  ;;  %1120 = vrot.lane.b32.xlu1 %v2031_v39, %s1488_s22 }
 0x8d4   : > { %1140 = vrot.lane.b32.xlu0 %v2023_v38, %s1487_s21 }
 0x8db   : > { %1076 = vrot.lane.b32.xlu2 %v2023_v38, %s1491_s25  ;;  %1108 = vrot.lane.b32.xlu1 %v2023_v38, %s1492_s26 }
 0x8dc   : > { %1104 = vrot.lane.b32.xlu0 %v2031_v39, %s1492_s26 }
 0x8e3   : > { %1186 = vrot.lane.b32.xlu2 %v1995_v23, %s1493_s28  ;;  %1072 = vrot.lane.b32.xlu1 %v2031_v39, %s1491_s25 }
 0x8e4   : > { %1092 = vrot.lane.b32.xlu0 %v2023_v38, %s1490_s24 }
 0x8eb   : > { %1188 = vrot.lane.b32.xlu1 %v2023_v38, %s1493_s28 }
 0x8ec   : > { %1184 = vrot.lane.b32.xlu0 %v2031_v39, %s1493_s28 }
 0x8f5   : > { %v1155_v31 = vpop.permute.xlu2 %1154 }
 0x8fd   : > { %v2067_v40 = vpop.permute.xlu2 %1118 }
 0x905   : > { %v2069_v42 = vpop.permute.xlu2 %1106 }
 0x90d   : > { %v1151_v54 = vpop.permute.xlu1 %1150  ;;  %v2071_v47 = vpop.permute.xlu2 %1070 }
 0x90e   : > { %v1167_v58 = vpop.permute.xlu0 %1166  ;;  %v1158_v53 = vsel %vm778_vm10, %v1151_v54, %v1155_v31  ;;  %v1160_v59 = vsel %vm778_vm10, %v1155_v31, %v1151_v54 }
 0x90f   : > { %v1163_v24 = vmul.f32 %v1160_v59, %v1787_v10 }
 0x915   : > { %v1139_v45 = vpop.permute.xlu1 %1138  ;;  %v1173_v0 = vpop.permute.xlu2 %1172 }
 0x916   : > { %v1171_v61 = vpop.permute.xlu0 %1170 }
 0x917   : > { %v1174_v43 = vsel %vm802_vm9, %v1167_v58, %v1171_v61  ;;  %v1176_v57 = vsel %vm802_vm9, %v1171_v61, %v1167_v58 }
 0x918   : > { %v1178_v12 = vmul.f32 %v1174_v43, %v1776_v5  ;;  %v1179_v13 = vmul.f32 %v1176_v57, %v1778_v6 }
 0x91d   : > { %v2073_v48 = vpop.permute.xlu1 %1102  ;;  %v1137_v41 = vpop.permute.xlu2 %1136 }
 0x91e   : > { %v1135_v49 = vpop.permute.xlu0 %1134 }
 0x91f   : > { %v1142_v31 = vsel %vm754_vm11, %v1135_v49, %v1139_v45  ;;  %v1144_v54 = vsel %vm754_vm11, %v1139_v45, %v1135_v49 }
 0x920   : > { %v1147_v57 = vmul.f32 %v1144_v54, %v1813_v29 }
 0x925   : > { %v2075_v52 = vpop.permute.xlu1 %1090  ;;  %v1125_v19 = vpop.permute.xlu2 %1124 }
 0x926   : > { %v1123_v62 = vpop.permute.xlu0 %1122 }
 0x92d   : > { %v2077_v50 = vpop.permute.xlu1 %1182  ;;  %v1089_v58 = vpop.permute.xlu2 %1088 }
 0x92e   : > { %v2079_v56 = vpop.permute.xlu0 %1086 }
 0x935   : > { %v1169_v51 = vpop.permute.xlu1 %1168 }
 0x936   : > { %v1175_v2 = vsel %vm802_vm9, %v1169_v51, %v1173_v0  ;;  %v1177_v7 = vsel %vm802_vm9, %v1173_v0, %v1169_v51  ;;  %v2089_v11 = vpop.permute.xlu0 %1074 }
 0x937   : > { %v1180_v14 = vmul.f32 %v1175_v2, %v1776_v5  ;;  %v1181_v16 = vmul.f32 %v1177_v7, %v1778_v6  ;;  %v1162_v6 = vmul.f32 %v1158_v53, %v1785_v9  ;;  %v1080_v54 = vsel %vm659_vm15, %v2089_v11, %v2071_v47 }
 0x939   : > { %v1212_v17 = vpack.c.bf16 %v1180_v14, %v1178_v12  ;;  %v1213_v18 = vpack.c.bf16 %v1181_v16, %v1179_v13 }
 0x93b   : > { %1230 = vmatpush.bf16.msra.mxu0 %v1212_v17  ;;  %1258 = vmatpush.bf16.msra.mxu2 %v1213_v18  ;;  %v1206_v17 = vpack.c.bf16 %v2031_v39, %v1993_v32  ;;  %v1207_v18 = vpack.c.bf16 %v2023_v38, %v1995_v23  ;;  %v1110_v32 = vsel %vm706_vm13, %v2073_v48, %v2069_v42 }
 0x93c   : > { %v1112_v23 = vsel %vm706_vm13, %v2069_v42, %v2073_v48  ;;  %v1094_v42 = vsel %vm682_vm14, %v2079_v56, %v2075_v52 }
 0x93d   : > { %v1157_v60 = vpop.permute.xlu1 %1156 }
 0x93e   : > { %v1153_v55 = vpop.permute.xlu0 %1152 }
 0x93f   : > { %v1159_v20 = vsel %vm778_vm10, %v1153_v55, %v1157_v60  ;;  %v1161_v5 = vsel %vm778_vm10, %v1157_v60, %v1153_v55  ;;  %v1114_v55 = vmul.f32 %v1112_v23, %v1852_v15 }
 0x940   : > { %v1164_v25 = vmul.f32 %v1159_v20, %v1785_v9  ;;  %v1165_v26 = vmul.f32 %v1161_v5, %v1787_v10  ;;  %v1146_v10 = vmul.f32 %v1142_v31, %v1811_v28  ;;  %v1115_v20 = vmul.f32 %v1110_v32, %v1868_v21 }
 0x941   : > { %v1078_v31 = vsel %vm659_vm15, %v2071_v47, %v2089_v11  ;;  %v1424_v47 = vld [vmem:[%s2234_s9] sm:$0xf]  ;;  %v1448_v11 = vld [vmem:[%s2234_s9 + $0x4] sm:$0xf0] }
 0x942   : > { %v1210_v27 = vpack.c.bf16 %v1164_v25, %v1162_v6  ;;  %v1211_v44 = vpack.c.bf16 %v1165_v26, %v1163_v24 }
 0x944   : > { %1231 = vmatpush.bf16.msra.mxu0 %v1210_v27  ;;  %1259 = vmatpush.bf16.msra.mxu2 %v1211_v44 }
 0x945   : > { %v1121_v61 = vpop.permute.xlu1 %1120 }
 0x946   : > { %v1141_v0 = vpop.permute.xlu0 %1140  ;;  %v1127_v45 = vsel %vm730_vm12, %v1121_v61, %v1125_v19  ;;  %v1129_v49 = vsel %vm730_vm12, %v1125_v19, %v1121_v61  ;;  %v1077_v19 = vpop.permute.xlu2 %1076 }
 0x947   : > { %v1143_v43 = vsel %vm754_vm11, %v1137_v41, %v1141_v0  ;;  %v1145_v9 = vsel %vm754_vm11, %v1141_v0, %v1137_v41  ;;  %v1126_v41 = vsel %vm730_vm12, %v2067_v40, %v1123_v62  ;;  %v1133_v14 = vmul.f32 %v1127_v45, %v1842_v8 }
 0x948   : > { %v1148_v51 = vmul.f32 %v1143_v43, %v1811_v28  ;;  %v1149_v2 = vmul.f32 %v1145_v9, %v1813_v29  ;;  %v1128_v28 = vsel %vm730_vm12, %v1123_v62, %v2067_v40  ;;  %v1132_v29 = vmul.f32 %v1129_v49, %v1833_v1 }
 0x949   : > { %v1130_v40 = vmul.f32 %v1128_v28, %v1833_v1  ;;  %v1131_v62 = vmul.f32 %v1126_v41, %v1842_v8  ;;  %v1096_v8 = vsel %vm682_vm14, %v2075_v52, %v2079_v56  ;;  %v1099_v52 = vmul.f32 %v1094_v42, %v1885_v33 }
 0x94a   : > { %v1208_v7 = vpack.c.bf16 %v1148_v51, %v1146_v10  ;;  %v1209_v12 = vpack.c.bf16 %v1149_v2, %v1147_v57  ;;  %v1098_v5 = vmul.f32 %v1096_v8, %v1883_v30  ;;  %v1083_v9 = vmul.f32 %v1078_v31, %v1911_v4 }
 0x94b   : > { %v1204_v60 = vpack.c.bf16 %v1132_v29, %v1130_v40  ;;  %v1205_v1 = vpack.c.bf16 %v1133_v14, %v1131_v62  ;;  %v1425_v49 = vor.u32 %v1448_v11, %v1424_v47  ;;  %v1426_v29 = vld [vmem:[%s2234_s9 + $0x8] sm:$0xf0] }
 0x94c   : > { %1232 = vmatpush.bf16.msra.mxu0 %v1208_v7  ;;  %1260 = vmatpush.bf16.msra.mxu2 %v1209_v12 }
 0x94d   : > { %v1109_v13 = vpop.permute.xlu1 %1108 }
 0x94e   : > { %v1105_v16 = vpop.permute.xlu0 %1104  ;;  %v1187_v61 = vpop.permute.xlu2 %1186 }
 0x94f   : > { %v1111_v53 = vsel %vm706_vm13, %v1105_v16, %v1109_v13  ;;  %v1113_v59 = vsel %vm706_vm13, %v1109_v13, %v1105_v16  ;;  %v1190_v10 = vsel %vm826_vm0, %v2077_v50, %v1187_v61 }
 0x950   : > { %1233 = vmatpush.bf16.msra.mxu0 %v1206_v17  ;;  %1261 = vmatpush.bf16.msra.mxu2 %v1207_v18  ;;  %v1116_v38 = vmul.f32 %v1113_v59, %v1852_v15  ;;  %v1117_v39 = vmul.f32 %v1111_v53, %v1868_v21  ;;  %v1194_v7 = vmul.f32 %v1190_v10, %v1939_v46 }
 0x952   : > { %v1202_v24 = vpack.c.bf16 %v1116_v38, %v1114_v55  ;;  %v1203_v25 = vpack.c.bf16 %v1117_v39, %v1115_v20 }
 0x954   : > { %1234 = vmatpush.bf16.msra.mxu0 %v1204_v60  ;;  %1262 = vmatpush.bf16.msra.mxu2 %v1205_v1 }
 0x955   : > { %v1073_v48 = vpop.permute.xlu1 %1072 }
 0x956   : > { %v1093_v6 = vpop.permute.xlu0 %1092  ;;  %v1079_v26 = vsel %vm659_vm15, %v1073_v48, %v1077_v19  ;;  %v1081_v15 = vsel %vm659_vm15, %v1077_v19, %v1073_v48 }
 0x957   : > { %v1095_v21 = vsel %vm682_vm14, %v1089_v58, %v1093_v6  ;;  %v1097_v27 = vsel %vm682_vm14, %v1093_v6, %v1089_v58  ;;  %v1084_v58 = vmul.f32 %v1081_v15, %v1909_v3  ;;  %v1085_v0 = vmul.f32 %v1079_v26, %v1911_v4 }
 0x958   : > { %v1100_v56 = vmul.f32 %v1097_v27, %v1883_v30  ;;  %v1101_v44 = vmul.f32 %v1095_v21, %v1885_v33  ;;  %1235 = vmatpush.bf16.msra.mxu0 %v1202_v24  ;;  %1263 = vmatpush.bf16.msra.mxu2 %v1203_v25  ;;  %v1082_v33 = vmul.f32 %v1080_v54, %v1909_v3 }
 0x959   : > { %v1192_v3 = vsel %vm826_vm0, %v1187_v61, %v2077_v50  ;;  %v1199_v2 = vpack.c.bf16 %v1085_v0, %v1083_v9  ;;  %v1447_v50 = vld [vmem:[%s2234_s9 + $0x4] sm:$0xf] }
 0x95a   : > { %v1200_v30 = vpack.c.bf16 %v1100_v56, %v1098_v5  ;;  %v1201_v43 = vpack.c.bf16 %v1101_v44, %v1099_v52  ;;  %v1198_v51 = vpack.c.bf16 %v1084_v58, %v1082_v33  ;;  %v1195_v41 = vmul.f32 %v1192_v3, %v1941_v22 }
 0x95b   : > { %v1429_v16 = vor.u32 %v1447_v50, %v1426_v29 }
 0x95c   : > { %1236 = vmatpush.bf16.msra.mxu0 %v1200_v30  ;;  %1264 = vmatpush.bf16.msra.mxu2 %v1201_v43 }
 0x95d   : > { %v1189_v57 = vpop.permute.xlu1 %1188 }
 0x95e   : > { %v1185_v4 = vpop.permute.xlu0 %1184 }
 0x95f   : > { %v1191_v12 = vsel %vm826_vm0, %v1185_v4, %v1189_v57  ;;  %v1193_v45 = vsel %vm826_vm0, %v1189_v57, %v1185_v4 }
 0x960   : > { %v1196_v28 = vmul.f32 %v1191_v12, %v1939_v46  ;;  %v1197_v13 = vmul.f32 %v1193_v45, %v1941_v22  ;;  %1237 = vmatpush.bf16.msra.mxu0 %v1198_v51  ;;  %1265 = vmatpush.bf16.msra.mxu2 %v1199_v2 }
 0x962   : > { %v1214_v63 = vpack.c.bf16 %v1196_v28, %v1194_v7  ;;  %v1215_v14 = vpack.c.bf16 %v1197_v13, %v1195_v41 }
 0x963   : > { %1238 = vmatmul.bf16.vlgmr.msra.gmra.mxu0 %v1425_v49  ;;  %1266 = vmatmul.bf16.vlgmr.msra.gmra.mxu2 %v1425_v49 }
 0x964   : > { %1251 = vmatpush.bf16.msrb.mxu1 %v1214_v63  ;;  %1279 = vmatpush.bf16.msra.mxu3 %v1215_v14 }
 0x967   : > { %1430 = vmatmul.msk.bf16.vlgmr.msrb.gmra.mxu1 %vm512_vm2, %v1429_v16  ;;  %1431 = vmatmul.msk.bf16.vlgmr.msra.gmra.mxu3 %vm512_vm2, %v1429_v16 }
 0x9e0   : > { %v1239_v46 = vpop.f32.mrf.mxu0 }
 0x9e4   : > { %v1253_v22 = vpop.f32.mrf.mxu1 }
 0x9e5   : > { %v1254_v17 = vadd.f32 %v1253_v22, %v1239_v46 }
 0x9e6   : > { %v1267_v19 = vpop.f32.mrf.mxu2 }
 0x9e7   : > { %v1286_v18 = vadd.f32 %v1254_v17, %v1621_v34 }
 0x9e8   : > { %v1241_v40 = vpop.f32.mrf.mxu0 }
 0x9e9   : > { %1290 = vst [vmem:[%s386_s12] sm:$0xff] %v1286_v18 }
 0x9ea   : > { %v1281_v53 = vpop.f32.mrf.mxu3 }
 0x9eb   : > { %v1282_v59 = vadd.f32 %v1281_v53, %v1267_v19 }
 0x9ec   : > { %v1255_v62 = vpop.f32.mrf.mxu1 }
 0x9ed   : > { %v1287_v32 = vadd.f32 %v1282_v59, %v1623_v35  ;;  %v1256_v23 = vadd.f32 %v1255_v62, %v1241_v40 }
 0x9ee   : > { %v1269_v39 = vpop.f32.mrf.mxu2 }
 0x9ef   : > { %1291 = vst [vmem:[%s386_s12 + $0x8] sm:$0xff] %v1287_v32  ;;  %v1288_v38 = vadd.f32 %v1256_v23, %v1625_v36 }
 0x9f1   : > { %1292 = vst [vmem:[%s386_s12 + $0x10] sm:$0xff] %v1288_v38 }
 0x9f2   : > { %v1283_v60 = vpop.f32.mrf.mxu3 }
 0x9f3   : > { %v1284_v1 = vadd.f32 %v1283_v60, %v1269_v39 }
 0x9f5   : > { %v1289_v8 = vadd.f32 %v1284_v1, %v1627_v37 }
 0x9f7   : > { %1293 = vst [vmem:[%s386_s12 + $0x18] sm:$0xff] %v1289_v8 }
 0x9f8 PF: > { %s21_s17 = sadd.s32 1, %s1483_s17  }
 0x9f9   : > { %p18_p4 = scmp.ge.s32.totalorder %s21_s17, 4  }
 0x9fb   :  { %20 = sbr.rel (!%p18_p4) target bundleno = 1 (0x1), region = 101 }

// kernel: vae_decoder_forward.10
= control target key start
LH: loop header
LB: loop body
LE: loop exit
PB: predicated region body
PF: predicated region fallthrough
CT: control target
= control target key end

     0   :  { %s2077_s17 = smov 0   ;;  %s2958_s0 = inlined_call_operand.vmem [shape: f32[2,64,16], index: 0, kind: input, shape index: {}]   ;;  %s2959_s1 = inlined_call_operand.vmem [shape: bf16[32,64], index: 1, kind: input, shape index: {}]   ;;  %s2960_s2 = inlined_call_operand.vmem [shape: bf16[16,64], index: 2, kind: input, shape index: {}]   ;;  %s2961_s3 = inlined_call_operand.vmem [shape: f32[32,32], index: 3, kind: input, shape index: {}]   ;;  %s2962_s4 = inlined_call_operand.vmem [shape: f32[32,1], index: 4, kind: input, shape index: {}]   ;;  %s2963_s5 = inlined_call_operand.vmem [shape: f32[32,1], index: 5, kind: input, shape index: {}]   ;;  %s2964_s6 = inlined_call_operand.vmem [shape: bf16[32,288], index: 6, kind: input, shape index: {}]   ;;  %s2965_s7 = inlined_call_operand.vmem [shape: f32[32,1], index: 7, kind: input, shape index: {}]   ;;  %s2966_s8 = inlined_call_operand.vmem [shape: f32[32,1], index: 8, kind: input, shape index: {}]   ;;  %s2967_s9 = inlined_call_operand.vmem [shape: bf16[32,288], index: 9, kind: input, shape index: {}]   ;;  %s2968_s10 = inlined_call_operand.vmem [shape: f32[9,1,64], index: 10, kind: input, shape index: {}]   ;;  %s2969_s11 = inlined_call_operand.vmem [shape: f32[2,32,64], index: 11, kind: output, shape index: {}]  }
   0x1 LB: > { %s1813_s18 = sadd.s32 4294967295, %s1998_s17   ;;  %p1817_p0 = scmp.ge.s32.totalorder %s1998_s17, 1  ;;  %s1998_s17 = sphi %s2077_s17, %s21_s17  }
   0x2   : > { %p337_p1 = scmp.lt.s32.totalorder %s1998_s17, 3 }
   0x4   : > { %p338_p2 = pnand %p1817_p0, %p337_p1 }
   0x5   : > { %p377_p3 = scmp.lt.s32.totalorder (!%p338_p2), %s1813_s18, 1  ;;  %s2002_s20 = smov (!%p338_p2), 121  }
   0x6   : > { %341 = sbr.rel (%p338_p2) target bundleno = 2775 (0xad7), region = 64  ;;  %s2003_s21 = smov (!%p338_p2), 56  }
   0x7   : > { %s2005_s23 = smov (!%p338_p2), 71   ;;  %s2006_s24 = smov (!%p338_p2), 1  }
   0x8   : > { %s2984_s25 = smov (!%p338_p2), 57   ;;  %s2970_s26 = smov (!%p338_p2), 63  }
   0x9   : > { %s2982_s27 = smov (!%p338_p2), 127   ;;  %s2986_s28 = smov (!%p338_p2), 7  }
   0xa   : > { %s2011_s29 = smov (!%p338_p2), 72   ;;  %s2974_s30 = smov (!%p338_p2), 8  }
   0xb   : > { %s3001_s18 = smov (!%p377_p3, %s1813_s18), 1  ;;  %v1917_v12 = vld [vmem:[%s2959_s1] sm:$0xff]  ;;  %vm414_vm0 = vcmask 523264   ;;  %v1918_v13 = vld [vmem:[%s2959_s1 + $0x8] sm:$0xff]  ;;  %vm450_vm1 = vcmask 130048   ;;  %vm500_vm2 = vcmask 261120  }
   0xc   : > { %s1915_s19 = sshll.u32 %s3001_s18, 6  ;;  %v1919_v14 = vld [vmem:[%s2960_s2] sm:$0xff]  ;;  %v2128_v34 = vld [vmem:[%s2961_s3 + $0x8] sm:$0xff]  ;;  %v2135_v35 = vld [vmem:[%s2961_s3 + $0x10] sm:$0xff]  ;;  %v2000_v37 = vmov 0   ;;  %s2972_s12 = smov 119  }
   0xd   : > { %s381_s22 = scalar_lea.vmem %s2958_s0, %s1915_s19  ;;  %464 = vmatpush.bf16.msra.mxu1 %v1919_v14  ;;  %v2121_v32 = vld [vmem:[%s2961_s3] sm:$0xff]  ;;  %v2142_v36 = vld [vmem:[%s2961_s3 + $0x18] sm:$0xff]  ;;  %1959 = vset.pattern.permute.xlu1 %v2000_v37  ;;  %v482_v62 = vld [vmem:[%s2963_s5 + $0x10] sm:$0xff]  ;;  %s2001_s19 = smov 120   ;;  %vm860_vm15 = vcmask 7168  }
   0xe   : > { %v394_v0 = vld [vmem:[%s381_s22 + $0x30] sm:$0xff]  ;;  %v395_v1 = vld [vmem:[%s381_s22 + $0x38] sm:$0xff]  ;;  %v392_v2 = vld [vmem:[%s381_s22 + $0x20] sm:$0xff]  ;;  %1958 = vset.pattern.permute.xlu0 %v2000_v37  ;;  %1957 = vset.pattern.permute.xlu2 %v2000_v37  ;;  %s2976_s13 = smov 55   ;;  %s2980_s14 = smov 73  }
   0xf   : > { %v403_v3 = vpack.c.bf16 %v395_v1, %v394_v0  ;;  %v393_v4 = vld [vmem:[%s381_s22 + $0x28] sm:$0xff]  ;;  %v390_v6 = vld [vmem:[%s381_s22 + $0x10] sm:$0xff]  ;;  %v391_v7 = vld [vmem:[%s381_s22 + $0x18] sm:$0xff]  ;;  %s2978_s15 = smov 9   ;;  %s2996_s16 = smov 73  }
  0x10   : > { %v402_v5 = vpack.c.bf16 %v393_v4, %v392_v2  ;;  %v401_v8 = vpack.c.bf16 %v391_v7, %v390_v6  ;;  %v388_v9 = vld [vmem:[%s381_s22] sm:$0xff]  ;;  %v389_v10 = vld [vmem:[%s381_s22 + $0x8] sm:$0xff]  ;;  %v483_v0 = vld [vmem:[%s2963_s5 + $0x18] sm:$0xff]  ;;  %s2004_s22 = smov 65  }
  0x11   : > { %425 = vmatpush.bf16.msra.mxu0 %v403_v3  ;;  %v400_v11 = vpack.c.bf16 %v389_v10, %v388_v9  ;;  %v480_v63 = vld [vmem:[%s2963_s5] sm:$0xff]  ;;  %v481_v1 = vld [vmem:[%s2963_s5 + $0x8] sm:$0xff] }
  0x15   : > { %426 = vmatpush.bf16.msra.mxu0 %v402_v5 }
  0x19   : > { %427 = vmatpush.bf16.msra.mxu0 %v401_v8 }
  0x1d   : > { %428 = vmatpush.bf16.msra.mxu0 %v400_v11 }
  0x20   : > { %1830 = vmatmul.msk.bf16.vlgmr.msra.gmra.mxu0 %vm414_vm0, %v1917_v12 }
  0x30   : > { %1831 = vmatmul.msk.bf16.gmra.mxu0 %vm414_vm0, %v1918_v13 }
  0x9d   : > { %v430_v15 = vpop.f32.mrf.mxu0 }
  0xa5   : > { %v432_v16 = vpop.f32.mrf.mxu0 }
  0xa6   : > { %v440_v17 = vpack.c.bf16 %v432_v16, %v430_v15 }
  0xa8   : > { %1836 = vmatmul.msk.bf16.vlgmr.msra.gmra.mxu1 %vm450_vm1, %v440_v17 }
  0xad   : > { %v435_v18 = vpop.f32.mrf.mxu0 }
  0xb5   : > { %v437_v19 = vpop.f32.mrf.mxu0 }
  0xb6   : > { %v441_v20 = vpack.c.bf16 %v437_v19, %v435_v18 }
  0xb8   : > { %1837 = vmatmul.msk.bf16.gmra.mxu1 %vm450_vm1, %v441_v20  ;;  %vm936_vm1 = vcmask 465920  }
 0x125   : > { %v2102_v21 = vpop.f32.mrf.mxu1 }
 0x126   : > { %v488_v25 = vsel %vm414_vm0, %v2102_v21, 0.0 }
 0x12d   : > { %v2104_v22 = vpop.f32.mrf.mxu1 }
 0x12e   : > { %v491_v23 = vsel %vm414_vm0, %v2104_v22, 0.0 }
 0x12f   : > { %492 = vadd.xlane.f32.xlu1 %v491_v23 }
 0x135   : > { %v2108_v24 = vpop.f32.mrf.mxu1 }
 0x136   : > { %v494_v28 = vsel %vm414_vm0, %v2108_v24, 0.0 }
 0x137   : > { %489 = vadd.xlane.f32.xlu1 %v488_v25  ;;  %v476_v25 = vld [vmem:[%s2962_s4] sm:$0xff] }
 0x13d   : > { %v2112_v26 = vpop.f32.mrf.mxu1 }
 0x13e   : > { %v497_v27 = vsel %vm414_vm0, %v2112_v26, 0.0 }
 0x13f   : > { %498 = vadd.xlane.f32.xlu0 %v497_v27 }
 0x147   : > { %495 = vadd.xlane.f32.xlu0 %v494_v28 }
 0x1a2   : > { %v493_v30 = vpop.xlane.xlu1 %492 }
 0x1aa   : > { %v490_v33 = vpop.xlane.xlu1 %489 }
 0x1b2   : > { %v499_v29 = vpop.xlane.xlu0 %498 }
 0x1b3   : > { %525 = vmatpush.msra.mxu2 %v499_v29 }
 0x1ba   : > { %v496_v31 = vpop.xlane.xlu0 %495 }
 0x1bb   : > { %526 = vmatpush.msra.mxu2 %v496_v31 }
 0x1bd   : > { %527 = vmatpush.msra.mxu2 %v493_v30 }
 0x1bf   : > { %528 = vmatpush.msra.mxu2 %v490_v33 }
 0x1c0   : > { %1838 = vmatmul.msk.f32.vlgmr.msra.gmra.mxu2 %vm500_vm2, %v2121_v32 }
 0x1c8   : > { %1839 = vmatmul.msk.f32.gmra.mxu2 %vm500_vm2, %v2128_v34 }
 0x1d0   : > { %1840 = vmatmul.msk.f32.gmra.mxu2 %vm500_vm2, %v2135_v35 }
 0x1d8   : > { %1841 = vmatmul.msk.f32.gmra.mxu2 %vm500_vm2, %v2142_v36 }
 0x243   : > { %v530_v38 = vpop.f32.mrf.mxu2 }
 0x244   : > { %v542_v39 = vmul.f32 0.00390625, %v530_v38 }
 0x246   : > { %548 = vperm.xlu1 %1959, %v542_v39  }
 0x24b   : > { %v533_v40 = vpop.f32.mrf.mxu2 }
 0x24c   : > { %v543_v41 = vmul.f32 0.00390625, %v533_v40 }
 0x24e   : > { %553 = vperm.xlu0 %1958, %v543_v41  }
 0x253   : > { %v536_v42 = vpop.f32.mrf.mxu2 }
 0x254   : > { %v544_v45 = vmul.f32 0.00390625, %v536_v42  ;;  %v477_v42 = vld [vmem:[%s2962_s4 + $0x8] sm:$0xff] }
 0x25b   : > { %v539_v43 = vpop.f32.mrf.mxu2 }
 0x25c   : > { %v545_v44 = vmul.f32 0.00390625, %v539_v43 }
 0x25e   : > { %563 = vperm.xlu2 %1957, %v545_v44  }
 0x266   : > { %558 = vperm.xlu2 %1957, %v544_v45  }
 0x2b8   : > { %v564_v46 = vpop.permute.xlu2 %563  ;;  %v549_v48 = vpop.permute.xlu1 %548 }
 0x2b9   : > { %v2147_v47 = vsub.f32 %v2112_v26, %v564_v46  ;;  %v2152_v50 = vsub.f32 %v2102_v21, %v549_v48 }
 0x2bb   : > { %v573_v49 = vmul.f32 %v2147_v47, %v2147_v47  ;;  %v570_v56 = vmul.f32 %v2152_v50, %v2152_v50 }
 0x2bd   : > { %v583_v51 = vsel %vm414_vm0, %v573_v49, 0.0  ;;  %v574_v60 = vsel %vm414_vm0, %v570_v56, 0.0 }
 0x2be   : > { %584 = vadd.xlane.f32.xlu2 %v583_v51 }
 0x2c0   : > { %v554_v52 = vpop.permute.xlu0 %553  ;;  %v559_v53 = vpop.permute.xlu2 %558 }
 0x2c1   : > { %v2156_v54 = vsub.f32 %v2104_v22, %v554_v52  ;;  %v2159_v55 = vsub.f32 %v2108_v24, %v559_v53  ;;  %v478_v53 = vld [vmem:[%s2962_s4 + $0x10] sm:$0xff] }
 0x2c3   : > { %v571_v57 = vmul.f32 %v2156_v54, %v2156_v54  ;;  %v572_v58 = vmul.f32 %v2159_v55, %v2159_v55 }
 0x2c5   : > { %v577_v59 = vsel %vm414_vm0, %v571_v57, 0.0  ;;  %v580_v61 = vsel %vm414_vm0, %v572_v58, 0.0 }
 0x2c6   : > { %578 = vadd.xlane.f32.xlu0 %v577_v59  ;;  %575 = vadd.xlane.f32.xlu2 %v574_v60 }
 0x2c7   : > { %581 = vadd.xlane.f32.xlu1 %v580_v61 }
 0x2de   : > { %703 = vperm.xlu2 %1957, %v482_v62   ;;  %v479_v62 = vld [vmem:[%s2962_s4 + $0x18] sm:$0xff] }
 0x2e0   : > { %693 = vperm.xlu1 %1959, %v480_v63  }
 0x2e6   : > { %708 = vperm.xlu2 %1957, %v483_v0  }
 0x2ee   : > { %698 = vperm.xlu2 %1957, %v481_v1  }
 0x331   : > { %v585_v2 = vpop.xlane.xlu2 %584 }
 0x332   : > { %598 = vmatpush.msra.mxu3 %v585_v2 }
 0x339   : > { %v579_v4 = vpop.xlane.xlu0 %578  ;;  %v576_v5 = vpop.xlane.xlu2 %575 }
 0x33a   : > { %v582_v3 = vpop.xlane.xlu1 %581 }
 0x33b   : > { %599 = vmatpush.msra.mxu3 %v582_v3 }
 0x33d   : > { %600 = vmatpush.msra.mxu3 %v579_v4 }
 0x33f   : > { %601 = vmatpush.msra.mxu3 %v576_v5 }
 0x340   : > { %1842 = vmatmul.msk.f32.vlgmr.msra.gmra.mxu3 %vm500_vm2, %v2121_v32 }
 0x341   : > { %v704_v2 = vpop.permute.xlu2 %703 }
 0x348   : > { %1843 = vmatmul.msk.f32.gmra.mxu3 %vm500_vm2, %v2128_v34 }
 0x349   : > { %v2202_v4 = vpop.permute.xlu2 %708 }
 0x350   : > { %1844 = vmatmul.msk.f32.gmra.mxu3 %vm500_vm2, %v2135_v35 }
 0x358   : > { %1845 = vmatmul.msk.f32.gmra.mxu3 %vm500_vm2, %v2142_v36 }
 0x3c3   : > { %v603_v6 = vpop.f32.mrf.mxu3 }
 0x3c4   : > { %v615_v7 = vmul.f32 0.00390625, %v603_v6  ;;  %v694_v6 = vpop.permute.xlu1 %693 }
 0x3c6   : > { %v619_v8 = vadd.f32 1e-05, %v615_v7 }
 0x3c8   : > { %1968 = vrsqrt.f32 %v619_v8  ;;  %vm629_vm4 = vweird.f32 %v619_v8 }
 0x3cb   : > { %v606_v9 = vpop.f32.mrf.mxu3 }
 0x3cc   : > { %v616_v10 = vmul.f32 0.00390625, %v606_v9  ;;  %v699_v9 = vpop.permute.xlu2 %698 }
 0x3ce   : > { %v1969_v11 = vpop.eup %1968  ;;  %v620_v12 = vadd.f32 1e-05, %v616_v10 }
 0x3cf   : > { %v624_v13 = vmul.f32 %v1969_v11, %v619_v8  ;;  %vm630_vm3 = vweird.f32 %v1969_v11 }
 0x3d0   : > { %1970 = vrsqrt.f32 %v620_v12  ;;  %vm631_vm5 = vmor %vm629_vm4, %vm630_vm3  ;;  %vm639_vm6 = vweird.f32 %v620_v12  ;;  %vm898_vm3 = vcmask 515072   ;;  %vm822_vm4 = vcmask 56320  }
 0x3d1   : > { %v625_v14 = vmul.f32 %v1969_v11, %v624_v13 }
 0x3d3   : > { %v626_v15 = vmul.f32 0.5, %v625_v14  ;;  %v609_v16 = vpop.f32.mrf.mxu3 }
 0x3d4   : > { %v617_v17 = vmul.f32 0.00390625, %v609_v16 }
 0x3d5   : > { %v627_v18 = vsub.f32 1.5, %v626_v15 }
 0x3d6   : > { %v1971_v19 = vpop.eup %1970  ;;  %v621_v20 = vadd.f32 1e-05, %v617_v17 }
 0x3d7   : > { %v634_v23 = vmul.f32 %v1971_v19, %v620_v12  ;;  %v628_v27 = vmul.f32 %v1969_v11, %v627_v18  ;;  %vm640_vm7 = vweird.f32 %v1971_v19 }
 0x3d8   : > { %1972 = vrsqrt.f32 %v621_v20  ;;  %vm641_vm8 = vmor %vm639_vm6, %vm640_vm7  ;;  %vm649_vm9 = vweird.f32 %v621_v20  ;;  %vm1012_vm6 = vcmask 449536   ;;  %vm974_vm7 = vcmask 457728  }
 0x3d9   : > { %v635_v28 = vmul.f32 %v1971_v19, %v634_v23  ;;  %v632_v29 = vsel %vm631_vm5, %v1969_v11, %v628_v27  ;;  %vm784_vm5 = vcmask 64512  }
 0x3da   : > { %v663_v30 = vmul.f32 %v632_v29, %v476_v25 }
 0x3db   : > { %v636_v31 = vmul.f32 0.5, %v635_v28  ;;  %v612_v33 = vpop.f32.mrf.mxu3 }
 0x3dc   : > { %v618_v37 = vmul.f32 0.00390625, %v612_v33  ;;  %669 = vperm.xlu0 %1958, %v663_v30  }
 0x3dd   : > { %v637_v38 = vsub.f32 1.5, %v636_v31 }
 0x3de   : > { %v1973_v39 = vpop.eup %1972  ;;  %v622_v40 = vadd.f32 1e-05, %v618_v37 }
 0x3df   : > { %v644_v41 = vmul.f32 %v1973_v39, %v621_v20  ;;  %v638_v43 = vmul.f32 %v1971_v19, %v637_v38  ;;  %vm650_vm10 = vweird.f32 %v1973_v39 }
 0x3e0   : > { %1974 = vrsqrt.f32 %v622_v40  ;;  %vm651_vm11 = vmor %vm649_vm9, %vm650_vm10  ;;  %vm659_vm12 = vweird.f32 %v622_v40 }
 0x3e1   : > { %v645_v44 = vmul.f32 %v1973_v39, %v644_v41  ;;  %v642_v45 = vsel %vm641_vm8, %v1971_v19, %v638_v43  ;;  %vm747_vm8 = vcmask 72704  }
 0x3e2   : > { %v664_v46 = vmul.f32 %v642_v45, %v477_v42  ;;  %v2336_v45 = vld [vmem:[%s2968_s10 + $0x6] ss:$0 sm:$0xff] }
 0x3e3   : > { %v646_v48 = vmul.f32 0.5, %v645_v44 }
 0x3e4   : > { %674 = vperm.xlu2 %1957, %v664_v46  }
 0x3e5   : > { %v647_v49 = vsub.f32 1.5, %v646_v48 }
 0x3e6   : > { %v1975_v51 = vpop.eup %1974 }
 0x3e7   : > { %v654_v52 = vmul.f32 %v1975_v51, %v622_v40  ;;  %v648_v56 = vmul.f32 %v1973_v39, %v647_v49  ;;  %vm660_vm13 = vweird.f32 %v1975_v51 }
 0x3e8   : > { %vm661_vm14 = vmor %vm659_vm12, %vm660_vm13 }
 0x3e9   : > { %v655_v57 = vmul.f32 %v1975_v51, %v654_v52  ;;  %v652_v58 = vsel %vm651_vm11, %v1973_v39, %v648_v56 }
 0x3ea   : > { %v665_v59 = vmul.f32 %v652_v58, %v478_v53  ;;  %v2357_v58 = vld [vmem:[%s2968_s10 + $0x2] ss:$0 sm:$0xff] }
 0x3eb   : > { %v656_v60 = vmul.f32 0.5, %v655_v57 }
 0x3ec   : > { %679 = vperm.xlu2 %1957, %v665_v59  }
 0x3ed   : > { %v657_v61 = vsub.f32 1.5, %v656_v60 }
 0x3ef   : > { %v658_v63 = vmul.f32 %v1975_v51, %v657_v61 }
 0x3f1   : > { %v662_v0 = vsel %vm661_vm14, %v1975_v51, %v658_v63 }
 0x3f2   : > { %v666_v1 = vmul.f32 %v662_v0, %v479_v62 }
 0x3f4   : > { %684 = vperm.xlu1 %1959, %v666_v1  }
 0x44e   : > { %v670_v3 = vpop.permute.xlu0 %669 }
 0x44f   : > { %v687_v5 = vmul.f32 %v670_v3, %v2152_v50  ;;  %v675_v50 = vpop.permute.xlu2 %674  ;;  %v2378_v3 = vld [vmem:[%s2968_s10 + $0x7] ss:$0 sm:$0xff] }
 0x450   : > { %v688_v10 = vmul.f32 %v675_v50, %v2156_v54 }
 0x451   : > { %v711_v7 = vadd.f32 %v694_v6, %v687_v5  ;;  %v2388_v5 = vld [vmem:[%s2968_s10 + $0x1] ss:$0 sm:$0xff] }
 0x452   : > { %v712_v11 = vadd.f32 %v699_v9, %v688_v10 }
 0x453   : > { %v2205_v8 = vmax.f32 %v711_v7, 0.0 }
 0x454   : > { %v2226_v12 = vmax.f32 %v712_v11, 0.0 }
 0x455   : > { %950 = vrot.lane.b32.xlu0 %v2205_v8, %s2001_s19  ;;  %912 = vrot.lane.b32.xlu2 %v2205_v8, %s2002_s20 }
 0x456   : > { %962 = vrot.lane.b32.xlu1 %v2205_v8, %s2003_s21 }
 0x457   : > { %v680_v54 = vpop.permute.xlu2 %679 }
 0x458   : > { %v689_v13 = vmul.f32 %v680_v54, %v2159_v55 }
 0x45a   : > { %v713_v14 = vadd.f32 %v704_v2, %v689_v13 }
 0x45c   : > { %v2259_v15 = vmax.f32 %v713_v14, 0.0 }
 0x45d   : > { %836 = vrot.lane.b32.xlu0 %v2205_v8, %s2004_s22  ;;  %798 = vrot.lane.b32.xlu2 %v2205_v8, %s2005_s23 }
 0x45e   : > { %848 = vrot.lane.b32.xlu1 %v2205_v8, %s2006_s24 }
 0x465   : > { %924 = vrot.lane.b32.xlu0 %v2205_v8, %s2984_s25  ;;  %886 = vrot.lane.b32.xlu2 %v2205_v8, %s2970_s26 }
 0x466   : > { %874 = vrot.lane.b32.xlu1 %v2205_v8, %s2982_s27  ;;  %v685_v16 = vpop.permute.xlu1 %684 }
 0x467   : > { %v690_v17 = vmul.f32 %v685_v16, %v2147_v47 }
 0x469   : > { %v714_v18 = vadd.f32 %v2202_v4, %v690_v17  ;;  %v2407_v17 = vld [vmem:[%s2968_s10 + $0x3] ss:$0 sm:$0xff] }
 0x46b   : > { %v2293_v20 = vmax.f32 %v714_v18, 0.0  ;;  %v2412_v18 = vld [vmem:[%s2968_s10 + $0x8] ss:$0 sm:$0xff] }
 0x46d   : > { %810 = vrot.lane.b32.xlu0 %v2205_v8, %s2986_s28  ;;  %760 = vrot.lane.b32.xlu2 %v2205_v8, %s2011_s29 }
 0x46e   : > { %914 = vrot.lane.b32.xlu1 %v2226_v12, %s2002_s20 }
 0x475   : > { %772 = vrot.lane.b32.xlu0 %v2205_v8, %s2974_s30  ;;  %988 = vrot.lane.b32.xlu2 %v2205_v8, %s2972_s12 }
 0x476   : > { %800 = vrot.lane.b32.xlu1 %v2226_v12, %s2005_s23 }
 0x47d   : > { %1000 = vrot.lane.b32.xlu0 %v2205_v8, %s2976_s13  ;;  %952 = vrot.lane.b32.xlu2 %v2226_v12, %s2001_s19 }
 0x47e   : > { %888 = vrot.lane.b32.xlu1 %v2226_v12, %s2970_s26 }
 0x485   : > { %964 = vrot.lane.b32.xlu0 %v2226_v12, %s2003_s21  ;;  %838 = vrot.lane.b32.xlu2 %v2226_v12, %s2004_s22 }
 0x486   : > { %762 = vrot.lane.b32.xlu1 %v2226_v12, %s2011_s29 }
 0x48d   : > { %850 = vrot.lane.b32.xlu0 %v2226_v12, %s2006_s24  ;;  %926 = vrot.lane.b32.xlu2 %v2226_v12, %s2984_s25 }
 0x48e   : > { %990 = vrot.lane.b32.xlu1 %v2226_v12, %s2972_s12 }
 0x495   : > { %876 = vrot.lane.b32.xlu0 %v2226_v12, %s2982_s27  ;;  %812 = vrot.lane.b32.xlu2 %v2226_v12, %s2986_s28 }
 0x496   : > { %954 = vrot.lane.b32.xlu1 %v2259_v15, %s2001_s19 }
 0x49d   : > { %774 = vrot.lane.b32.xlu2 %v2226_v12, %s2974_s30  ;;  %852 = vrot.lane.b32.xlu0 %v2259_v15, %s2006_s24 }
 0x49e   : > { %916 = vrot.lane.b32.xlu1 %v2259_v15, %s2002_s20 }
 0x4a5   : > { %1002 = vrot.lane.b32.xlu2 %v2226_v12, %s2976_s13  ;;  %878 = vrot.lane.b32.xlu0 %v2259_v15, %s2982_s27 }
 0x4a6   : > { %802 = vrot.lane.b32.xlu1 %v2259_v15, %s2005_s23 }
 0x4ad   : > { %764 = vrot.lane.b32.xlu0 %v2259_v15, %s2011_s29  ;;  %966 = vrot.lane.b32.xlu2 %v2259_v15, %s2003_s21 }
 0x4ae   : > { %890 = vrot.lane.b32.xlu1 %v2259_v15, %s2970_s26 }
 0x4af   : > { %v913_v55 = vpop.permute.xlu2 %912 }
 0x4b5   : > { %727 = vrot.lane.b32.xlu0 %v2259_v15, %s2980_s14  ;;  %840 = vrot.lane.b32.xlu2 %v2259_v15, %s2004_s22 }
 0x4b6   : > { %776 = vrot.lane.b32.xlu1 %v2259_v15, %s2974_s30 }
 0x4b7   : > { %v799_v19 = vpop.permute.xlu2 %798 }
 0x4bd   : > { %956 = vrot.lane.b32.xlu0 %v2293_v20, %s2001_s19  ;;  %928 = vrot.lane.b32.xlu2 %v2259_v15, %s2984_s25 }
 0x4be   : > { %992 = vrot.lane.b32.xlu1 %v2259_v15, %s2972_s12 }
 0x4bf   : > { %v887_v47 = vpop.permute.xlu2 %886 }
 0x4c5   : > { %918 = vrot.lane.b32.xlu0 %v2293_v20, %s2002_s20  ;;  %814 = vrot.lane.b32.xlu2 %v2259_v15, %s2986_s28 }
 0x4c6   : > { %739 = vrot.lane.b32.xlu1 %v2259_v15, %s2978_s15 }
 0x4c7   : > { %v951_v23 = vpop.permute.xlu0 %950  ;;  %v761_v25 = vpop.permute.xlu2 %760 }
 0x4c8   : > { %v963_v27 = vpop.permute.xlu1 %962 }
 0x4c9   : > { %v975_v4 = vsel %vm974_vm7, %v951_v23, %v963_v27 }
 0x4ca   : > { %v984_v10 = vmul.f32 %v2378_v3, %v975_v4 }
 0x4cd   : > { %804 = vrot.lane.b32.xlu0 %v2293_v20, %s2005_s23  ;;  %1004 = vrot.lane.b32.xlu2 %v2259_v15, %s2976_s13 }
 0x4ce   : > { %968 = vrot.lane.b32.xlu1 %v2293_v20, %s2003_s21 }
 0x4cf   : > { %v837_v28 = vpop.permute.xlu0 %836  ;;  %v989_v29 = vpop.permute.xlu2 %988 }
 0x4d0   : > { %v849_v30 = vpop.permute.xlu1 %848 }
 0x4d1   : > { %v2314_v31 = vsel %vm860_vm15, %v837_v28, %v849_v30 }
 0x4d2   : > { %v870_v27 = vmul.f32 %v2407_v17, %v2314_v31 }
 0x4d5   : > { %892 = vrot.lane.b32.xlu0 %v2293_v20, %s2970_s26  ;;  %854 = vrot.lane.b32.xlu2 %v2293_v20, %s2006_s24  ;;  %s2995_s26 = smov 8  }
 0x4d6   : > { %842 = vrot.lane.b32.xlu1 %v2293_v20, %s2004_s22 }
 0x4d7   : > { %v925_v33 = vpop.permute.xlu0 %924  ;;  %v953_v37 = vpop.permute.xlu2 %952 }
 0x4d8   : > { %v937_v38 = vsel %vm936_vm1, %v913_v55, %v925_v33  ;;  %v875_v39 = vpop.permute.xlu1 %874 }
 0x4d9   : > { %v2324_v40 = vsel %vm898_vm3, %v875_v39, %v887_v47  ;;  %v2347_v53 = vmul.f32 %v2336_v45, %v937_v38  ;;  %v2432_v39 = vld [vmem:[%s2968_s10 + $0x5] ss:$0 sm:$0xff] }
 0x4dd   : > { %778 = vrot.lane.b32.xlu0 %v2293_v20, %s2974_s30  ;;  %880 = vrot.lane.b32.xlu2 %v2293_v20, %s2982_s27  ;;  %s2991_s30 = smov 7  }
 0x4de   : > { %930 = vrot.lane.b32.xlu1 %v2293_v20, %s2984_s25  ;;  %s2997_s25 = smov 9  }
 0x4df   : > { %v811_v41 = vpop.permute.xlu0 %810  ;;  %v839_v42 = vpop.permute.xlu2 %838 }
 0x4e0   : > { %v823_v43 = vsel %vm822_vm4, %v799_v19, %v811_v41  ;;  %v915_v44 = vpop.permute.xlu1 %914 }
 0x4e1   : > { %v2368_v0 = vmul.f32 %v2357_v58, %v823_v43  ;;  %v2437_v43 = vmul.f32 %v2432_v39, %v2324_v40 }
 0x4e5   : > { %994 = vrot.lane.b32.xlu0 %v2293_v20, %s2972_s12  ;;  %766 = vrot.lane.b32.xlu2 %v2293_v20, %s2011_s29  ;;  %s2992_s12 = smov 57  }
 0x4e6   : > { %816 = vrot.lane.b32.xlu1 %v2293_v20, %s2986_s28 }
 0x4e7   : > { %v773_v46 = vpop.permute.xlu0 %772  ;;  %v927_v48 = vpop.permute.xlu2 %926 }
 0x4e8   : > { %v785_v49 = vsel %vm784_vm5, %v761_v25, %v773_v46  ;;  %v801_v51 = vpop.permute.xlu1 %800  ;;  %v938_v52 = vsel %vm936_vm1, %v915_v44, %v927_v48 }
 0x4e9   : > { %v2350_v56 = vmul.f32 %v2336_v45, %v938_v52  ;;  %v2397_v13 = vmul.f32 %v2388_v5, %v785_v49 }
 0x4eb   : > { %v1038_v57 = vpack.c.bf16 %v2350_v56, %v2347_v53 }
 0x4ed   : > { %741 = vrot.lane.b32.xlu0 %v2293_v20, %s2978_s15  ;;  %729 = vrot.lane.b32.xlu2 %v2293_v20, %s2980_s14 }
 0x4ee   : > { %723 = vrot.lane.b32.xlu1 %v2205_v8, %s2980_s14 }
 0x4ef   : > { %v1001_v59 = vpop.permute.xlu0 %1000  ;;  %v813_v60 = vpop.permute.xlu2 %812 }
 0x4f0   : > { %v1013_v61 = vsel %vm1012_vm6, %v989_v29, %v1001_v59  ;;  %v889_v62 = vpop.permute.xlu1 %888  ;;  %v824_v63 = vsel %vm822_vm4, %v801_v51, %v813_v60 }
 0x4f1   : > { %v2371_v1 = vmul.f32 %v2357_v58, %v824_v63  ;;  %v2422_v30 = vmul.f32 %v2412_v18, %v1013_v61 }
 0x4f3   : > { %v1030_v2 = vpack.c.bf16 %v2371_v1, %v2368_v0  ;;  %v1920_v0 = vld [vmem:[%s2964_s6 + $0x4] sm:$0xf]  ;;  %v1857_v1 = vld [vmem:[%s2964_s6 + $0xc] sm:$0xf0] }
 0x4f5   : > { %725 = vrot.lane.b32.xlu0 %v2226_v12, %s2980_s14  ;;  %735 = vrot.lane.b32.xlu2 %v2205_v8, %s2978_s15 }
 0x4f6   : > { %1006 = vrot.lane.b32.xlu1 %v2293_v20, %s2976_s13  ;;  %s2993_s13 = smov 63  }
 0x4f7   : > { %v965_v6 = vpop.permute.xlu0 %964  ;;  %v775_v7 = vpop.permute.xlu2 %774 }
 0x4f8   : > { %v763_v9 = vpop.permute.xlu1 %762  ;;  %v976_v50 = vsel %vm974_vm7, %v953_v37, %v965_v6 }
 0x4f9   : > { %v985_v11 = vmul.f32 %v2378_v3, %v976_v50  ;;  %v786_v54 = vsel %vm784_vm5, %v763_v9, %v775_v7 }
 0x4fa   : > { %v2400_v14 = vmul.f32 %v2388_v5, %v786_v54 }
 0x4fb   : > { %v1040_v55 = vpack.c.bf16 %v985_v11, %v984_v10 }
 0x4fe   : > { %737 = vrot.lane.b32.xlu1 %v2226_v12, %s2978_s15  ;;  %s2994_s15 = smov 127  }
 0x4ff   : > { %v851_v19 = vpop.permute.xlu0 %850  ;;  %v1003_v47 = vpop.permute.xlu2 %1002 }
 0x500   : > { %v991_v23 = vpop.permute.xlu1 %990  ;;  %v862_v25 = vsel %vm860_vm15, %v839_v42, %v851_v19 }
 0x501   : > { %v871_v28 = vmul.f32 %v2407_v17, %v862_v25  ;;  %v1014_v29 = vsel %vm1012_vm6, %v991_v23, %v1003_v47 }
 0x502   : > { %v2425_v33 = vmul.f32 %v2412_v18, %v1014_v29 }
 0x503   : > { %v1032_v37 = vpack.c.bf16 %v871_v28, %v870_v27 }
 0x507   : > { %v877_v31 = vpop.permute.xlu0 %876  ;;  %v967_v51 = vpop.permute.xlu2 %966 }
 0x508   : > { %v900_v41 = vsel %vm898_vm3, %v877_v31, %v889_v62  ;;  %v955_v42 = vpop.permute.xlu1 %954 }
 0x509   : > { %v2440_v44 = vmul.f32 %v2432_v39, %v900_v41  ;;  %v977_v54 = vsel %vm974_vm7, %v955_v42, %v967_v51 }
 0x50a   : > { %v986_v25 = vmul.f32 %v2378_v3, %v977_v54 }
 0x50b   : > { %v2988_v53 = vpack.c.bf16 %v2440_v44, %v2437_v43  ;;  %v1034_v44 = vpack.c.bf16 %v2226_v12, %v2205_v8  ;;  %v1863_v8 = vld [vmem:[%s2964_s6 + $0x8] sm:$0xf]  ;;  %v1922_v12 = vld [vmem:[%s2964_s6 + $0x10] sm:$0xf0] }
 0x50f   : > { %v853_v48 = vpop.permute.xlu0 %852  ;;  %v841_v60 = vpop.permute.xlu2 %840 }
 0x510   : > { %v917_v49 = vpop.permute.xlu1 %916  ;;  %v863_v31 = vsel %vm860_vm15, %v841_v60, %v853_v48 }
 0x511   : > { %v872_v46 = vmul.f32 %v2407_v17, %v863_v31 }
 0x517   : > { %v879_v52 = vpop.permute.xlu0 %878  ;;  %v929_v4 = vpop.permute.xlu2 %928 }
 0x518   : > { %v803_v59 = vpop.permute.xlu1 %802 }
 0x51f   : > { %v765_v61 = vpop.permute.xlu0 %764  ;;  %v815_v9 = vpop.permute.xlu2 %814 }
 0x520   : > { %v891_v63 = vpop.permute.xlu1 %890 }
 0x527   : > { %v2444_v62 = vpop.permute.xlu0 %727  ;;  %v2450_v11 = vpop.permute.xlu2 %1004 }
 0x528   : > { %v777_v6 = vpop.permute.xlu1 %776 }
 0x52f   : > { %v957_v40 = vpop.permute.xlu0 %956  ;;  %v855_v29 = vpop.permute.xlu2 %854 }
 0x530   : > { %v2446_v7 = vpop.permute.xlu1 %992 }
 0x537   : > { %v919_v50 = vpop.permute.xlu0 %918 }
 0x538   : > { %v2448_v10 = vpop.permute.xlu1 %739 }
 0x53f   : > { %v805_v19 = vpop.permute.xlu0 %804 }
 0x540   : > { %v969_v47 = vpop.permute.xlu1 %968 }
 0x541   : > { %v978_v23 = vsel %vm974_vm7, %v957_v40, %v969_v47  ;;  %v939_v40 = vsel %vm936_vm1, %v917_v49, %v929_v4  ;;  %v881_v47 = vpop.permute.xlu2 %880 }
 0x542   : > { %v987_v27 = vmul.f32 %v2378_v3, %v978_v23  ;;  %v948_v48 = vmul.f32 %v2336_v45, %v939_v40  ;;  %v2491_v40 = vld [vmem:[%s2968_s10] ss:$0 sm:$0xff] }
 0x544   : > { %v1041_v28 = vpack.c.bf16 %v987_v27, %v986_v25 }
 0x546   : > { %1107 = vmatpush.bf16.msrb.mxu2 %v1041_v28 }
 0x547   : > { %v893_v41 = vpop.permute.xlu0 %892 }
 0x548   : > { %v843_v38 = vpop.permute.xlu1 %842  ;;  %v902_v27 = vsel %vm898_vm3, %v881_v47, %v893_v41  ;;  %v1860_v47 = vor.u32 %v1920_v0, %v1857_v1 }
 0x549   : > { %v864_v16 = vsel %vm860_vm15, %v843_v38, %v855_v29  ;;  %v767_v31 = vpop.permute.xlu2 %766 }
 0x54a   : > { %v873_v42 = vmul.f32 %v2407_v17, %v864_v16  ;;  %1108 = vmatpush.bf16.msrb.mxu2 %v1040_v55  ;;  %v901_v55 = vsel %vm898_vm3, %v879_v52, %v891_v63  ;;  %v825_v16 = vsel %vm822_vm4, %v803_v59, %v815_v9  ;;  %v787_v9 = vsel %vm784_vm5, %v765_v61, %v777_v6 }
 0x54b   : > { %v834_v29 = vmul.f32 %v2357_v58, %v825_v16  ;;  %v1035_v61 = vpack.c.bf16 %v2293_v20, %v2259_v15  ;;  %v1015_v15 = vsel %vm1012_vm6, %v2446_v7, %v2450_v11  ;;  %v750_v20 = vsel %vm747_vm8, %v2444_v62, %v2448_v10 }
 0x54c   : > { %v1033_v51 = vpack.c.bf16 %v873_v42, %v872_v46  ;;  %v911_v46 = vmul.f32 %v2432_v39, %v902_v27  ;;  %v796_v42 = vmul.f32 %v2388_v5, %v787_v9  ;;  %v2989_v7 = vpack.c.bf16 %v2400_v14, %v2397_v13 }
 0x54d   : > { %v2990_v16 = vpack.c.bf16 %v2425_v33, %v2422_v30  ;;  %v1869_v30 = vld [vmem:[%s2964_s6 + $0x24] sm:$0xf0] }
 0x54e   : > { %1088 = vmatpush.bf16.msrb.mxu1 %v1033_v51 }
 0x54f   : > { %v779_v54 = vpop.permute.xlu0 %778 }
 0x550   : > { %v931_v23 = vpop.permute.xlu1 %930  ;;  %v788_v59 = vsel %vm784_vm5, %v767_v31, %v779_v54  ;;  %v1925_v31 = vld [vmem:[%s2964_s6 + $0x28] sm:$0xf0] }
 0x551   : > { %v940_v25 = vsel %vm936_vm1, %v919_v50, %v931_v23  ;;  %v910_v50 = vmul.f32 %v2432_v39, %v901_v55  ;;  %v730_v56 = vpop.permute.xlu2 %729  ;;  %v1024_v23 = vmul.f32 %v2412_v18, %v1015_v15 }
 0x552   : > { %v949_v60 = vmul.f32 %v2336_v45, %v940_v25  ;;  %1089 = vmatpush.bf16.msrb.mxu1 %v1032_v37  ;;  %v758_v25 = vmul.f32 %v2491_v40, %v750_v20 }
 0x553   : > { %v1037_v63 = vpack.c.bf16 %v911_v46, %v910_v50  ;;  %v1855_v46 = vld [vmem:[%s2964_s6] sm:$0xf]  ;;  %v1923_v50 = vld [vmem:[%s2964_s6 + $0x1c] sm:$0xf] }
 0x554   : > { %v1039_v38 = vpack.c.bf16 %v949_v60, %v948_v48  ;;  %v1872_v33 = vor.u32 %v1923_v50, %v1869_v30 }
 0x556   : > { %1109 = vmatpush.bf16.msrb.mxu2 %v1039_v38  ;;  %v1864_v38 = vor.u32 %v1922_v12, %v1863_v8 }
 0x557   : > { %v995_v49 = vpop.permute.xlu0 %994 }
 0x558   : > { %v817_v4 = vpop.permute.xlu1 %816 }
 0x559   : > { %v826_v28 = vsel %vm822_vm4, %v805_v19, %v817_v4  ;;  %v797_v19 = vmul.f32 %v2388_v5, %v788_v59  ;;  %v736_v11 = vpop.permute.xlu2 %735 }
 0x55a   : > { %v835_v37 = vmul.f32 %v2357_v58, %v826_v28  ;;  %1110 = vmatpush.bf16.msrb.mxu2 %v1038_v57 }
 0x55b   : > { %v1029_v57 = vpack.c.bf16 %v797_v19, %v796_v42 }
 0x55c   : > { %v1031_v52 = vpack.c.bf16 %v835_v37, %v834_v29  ;;  %v1875_v29 = vld [vmem:[%s2964_s6 + $0x20] sm:$0xf] }
 0x55d   : > { %v1876_v37 = vor.u32 %v1925_v31, %v1875_v29 }
 0x55e   : > { %1090 = vmatpush.bf16.msrb.mxu1 %v1031_v52  ;;  %1111 = vmatpush.bf16.msrb.mxu2 %v1037_v63  ;;  %v1867_v52 = vld [vmem:[%s2964_s6 + $0x18] sm:$0xf]  ;;  %v1924_v63 = vld [vmem:[%s2964_s6 + $0x20] sm:$0xf0] }
 0x55f   : > { %v742_v51 = vpop.permute.xlu0 %741  ;;  %v1868_v59 = vor.u32 %v1924_v63, %v1867_v52 }
 0x560   : > { %v724_v41 = vpop.permute.xlu1 %723  ;;  %v751_v6 = vsel %vm747_vm8, %v730_v56, %v742_v51 }
 0x562   : > { %1091 = vmatpush.bf16.msrb.mxu1 %v1030_v2  ;;  %1112 = vmatpush.bf16.msrb.mxu2 %v2988_v53  ;;  %v759_v2 = vmul.f32 %v2491_v40, %v751_v6 }
 0x564   : > { %v1027_v62 = vpack.c.bf16 %v759_v2, %v758_v25 }
 0x566   : > { %1092 = vmatpush.bf16.msrb.mxu1 %v1029_v57  ;;  %1113 = vmatpush.bf16.msrb.mxu2 %v1035_v61 }
 0x567   : > { %v726_v60 = vpop.permute.xlu0 %725 }
 0x568   : > { %v1007_v43 = vpop.permute.xlu1 %1006 }
 0x569   : > { %v1016_v54 = vsel %vm1012_vm6, %v995_v49, %v1007_v43  ;;  %v1921_v49 = vld [vmem:[%s2964_s6 + $0x8] sm:$0xf0] }
 0x56a   : > { %v1025_v48 = vmul.f32 %v2412_v18, %v1016_v54  ;;  %1093 = vmatpush.bf16.msrb.mxu1 %v2989_v7  ;;  %1114 = vmatpush.bf16.msrb.mxu2 %v1034_v44  ;;  %v748_v18 = vsel %vm747_vm8, %v724_v41, %v736_v11  ;;  %v1856_v28 = vor.u32 %v1921_v49, %v1855_v46 }
 0x56b   : > { %v756_v27 = vmul.f32 %v2491_v40, %v748_v18 }
 0x56c   : > { %v1043_v10 = vpack.c.bf16 %v1025_v48, %v1024_v23 }
 0x56d   : > { %1115 = vmatmul.bf16.vlgmr.msrb.gmra.mxu2 %v1860_v47 }
 0x56e   : > { %1094 = vmatpush.bf16.msrb.mxu1 %v1027_v62  ;;  %1132 = vmatpush.bf16.msrb.mxu3 %v1043_v10 }
 0x570   : > { %v738_v13 = vpop.permute.xlu1 %737 }
 0x571   : > { %v749_v14 = vsel %vm747_vm8, %v726_v60, %v738_v13 }
 0x572   : > { %v757_v55 = vmul.f32 %v2491_v40, %v749_v14  ;;  %1133 = vmatpush.bf16.msrb.mxu3 %v2990_v16 }
 0x574   : > { %v1026_v4 = vpack.c.bf16 %v757_v55, %v756_v27 }
 0x575   : > { %1877 = vmatmul.msk.bf16.vlgmr.msrb.gmra.mxu3 %vm500_vm2, %v1864_v38 }
 0x576   : > { %1095 = vmatpush.bf16.msrb.mxu1 %v1026_v4 }
 0x579   : > { %1096 = vmatmul.bf16.vlgmr.msrb.gmra.mxu1 %v1856_v28 }
 0x57d   : > { %1120 = vmatmul.bf16.gmra.mxu2 %v1872_v33 }
 0x585   : > { %1878 = vmatmul.msk.bf16.gmra.mxu3 %vm500_vm2, %v1876_v37 }
 0x589   : > { %1101 = vmatmul.bf16.gmra.mxu1 %v1868_v59  ;;  %v1151_v59 = vld [vmem:[%s2966_s8 + $0x10] sm:$0xff] }
 0x5f0   : > { %v1116_v9 = vpop.f32.mrf.mxu2 }
 0x5f6   : > { %v1097_v19 = vpop.f32.mrf.mxu1 }
 0x5f7   : > { %v1117_v25 = vadd.f32 %v1116_v9, %v1097_v19  ;;  %v1152_v9 = vld [vmem:[%s2966_s8 + $0x18] sm:$0xff]  ;;  %v1150_v19 = vld [vmem:[%s2966_s8 + $0x8] sm:$0xff] }
 0x5f8   : > { %v1135_v41 = vpop.f32.mrf.mxu3  ;;  %v1118_v42 = vpop.f32.mrf.mxu2 }
 0x5f9   : > { %v1136_v7 = vadd.f32 %v1135_v41, %v1117_v25  ;;  %v1149_v41 = vld [vmem:[%s2966_s8] sm:$0xff] }
 0x5fb   : > { %v1153_v62 = vsel %vm414_vm0, %v1136_v7, 0.0 }
 0x5fe   : > { %v1099_v51 = vpop.f32.mrf.mxu1 }
 0x5ff   : > { %v1119_v53 = vadd.f32 %v1118_v42, %v1099_v51 }
 0x600   : > { %v1137_v56 = vpop.f32.mrf.mxu3  ;;  %v1121_v6 = vpop.f32.mrf.mxu2 }
 0x601   : > { %v1138_v57 = vadd.f32 %v1137_v56, %v1119_v53 }
 0x603   : > { %v1156_v61 = vsel %vm414_vm0, %v1138_v57, 0.0 }
 0x604   : > { %1157 = vadd.xlane.f32.xlu1 %v1156_v61  ;;  %v1985_v61 = vld [vmem:[%s2961_s3 + $0x8] sm:$0xff] }
 0x606   : > { %v1102_v0 = vpop.f32.mrf.mxu1 }
 0x607   : > { %v1122_v1 = vadd.f32 %v1121_v6, %v1102_v0  ;;  %v1986_v6 = vld [vmem:[%s2961_s3 + $0x10] sm:$0xff]  ;;  %v1987_v0 = vld [vmem:[%s2961_s3 + $0x18] sm:$0xff] }
 0x608   : > { %v1140_v15 = vpop.f32.mrf.mxu3  ;;  %v1123_v43 = vpop.f32.mrf.mxu2 }
 0x609   : > { %v1141_v20 = vadd.f32 %v1140_v15, %v1122_v1 }
 0x60b   : > { %v1159_v2 = vsel %vm414_vm0, %v1141_v20, 0.0 }
 0x60c   : > { %1160 = vadd.xlane.f32.xlu2 %v1159_v2 }
 0x60e   : > { %v1104_v44 = vpop.f32.mrf.mxu1 }
 0x60f   : > { %v1124_v54 = vadd.f32 %v1123_v43, %v1104_v44 }
 0x610   : > { %v1142_v47 = vpop.f32.mrf.mxu3 }
 0x611   : > { %v1143_v23 = vadd.f32 %v1142_v47, %v1124_v54 }
 0x613   : > { %v1162_v48 = vsel %vm414_vm0, %v1143_v23, 0.0 }
 0x614   : > { %1163 = vadd.xlane.f32.xlu0 %v1162_v48 }
 0x61c   : > { %1154 = vadd.xlane.f32.xlu0 %v1153_v62 }
 0x677   : > { %v1158_v8 = vpop.xlane.xlu1 %1157 }
 0x67f   : > { %v1161_v11 = vpop.xlane.xlu2 %1160 }
 0x687   : > { %v1164_v10 = vpop.xlane.xlu0 %1163 }
 0x688   : > { %1177 = vmatpush.msrb.mxu0 %v1164_v10 }
 0x68a   : > { %1178 = vmatpush.msrb.mxu0 %v1161_v11 }
 0x68c   : > { %1179 = vmatpush.msrb.mxu0 %v1158_v8 }
 0x68f   : > { %v1155_v12 = vpop.xlane.xlu0 %1154 }
 0x690   : > { %1180 = vmatpush.msrb.mxu0 %v1155_v12  ;;  %v1145_v12 = vld [vmem:[%s2965_s7] sm:$0xff] }
 0x691   : > { %1879 = vmatmul.msk.f32.vlgmr.msrb.gmra.mxu0 %vm500_vm2, %v2121_v32 }
 0x699   : > { %1880 = vmatmul.msk.f32.gmra.mxu0 %vm500_vm2, %v2128_v34 }
 0x6a1   : > { %1881 = vmatmul.msk.f32.gmra.mxu0 %vm500_vm2, %v2135_v35 }
 0x6a9   : > { %1882 = vmatmul.msk.f32.gmra.mxu0 %vm500_vm2, %v2142_v36 }
 0x70e   : > { %v1182_v18 = vpop.f32.mrf.mxu0 }
 0x70f   : > { %v1194_v32 = vmul.f32 0.00390625, %v1182_v18 }
 0x716   : > { %v1185_v60 = vpop.f32.mrf.mxu0 }
 0x717   : > { %v1195_v13 = vmul.f32 0.00390625, %v1185_v60 }
 0x719   : > { %1205 = vperm.xlu0 %1958, %v1195_v13  }
 0x71e   : > { %v1188_v14 = vpop.f32.mrf.mxu0 }
 0x71f   : > { %v1196_v38 = vmul.f32 0.00390625, %v1188_v14 }
 0x721   : > { %1210 = vperm.xlu1 %1959, %v1196_v38  }
 0x726   : > { %v1191_v27 = vpop.f32.mrf.mxu0 }
 0x727   : > { %v1197_v55 = vmul.f32 0.00390625, %v1191_v27 }
 0x729   : > { %1215 = vperm.xlu2 %1957, %v1197_v55  }
 0x731   : > { %1200 = vperm.xlu2 %1957, %v1194_v32  }
 0x783   : > { %v1216_v16 = vpop.permute.xlu2 %1215 }
 0x784   : > { %v2566_v34 = vsub.f32 %v1143_v23, %v1216_v16 }
 0x786   : > { %v1225_v35 = vmul.f32 %v2566_v34, %v2566_v34 }
 0x788   : > { %v1235_v36 = vsel %vm414_vm0, %v1225_v35, 0.0 }
 0x789   : > { %1236 = vadd.xlane.f32.xlu0 %v1235_v36 }
 0x78b   : > { %v1206_v46 = vpop.permute.xlu0 %1205  ;;  %v1201_v49 = vpop.permute.xlu2 %1200 }
 0x78c   : > { %v2571_v4 = vsub.f32 %v1138_v57, %v1206_v46  ;;  %v2573_v28 = vsub.f32 %v1136_v7, %v1201_v49  ;;  %v1984_v57 = vld [vmem:[%s2961_s3] sm:$0xff]  ;;  %v1146_v46 = vld [vmem:[%s2965_s7 + $0x8] sm:$0xff] }
 0x78e   : > { %v1223_v50 = vmul.f32 %v2571_v4, %v2571_v4  ;;  %v1222_v30 = vmul.f32 %v2573_v28, %v2573_v28 }
 0x790   : > { %v1229_v33 = vsel %vm414_vm0, %v1223_v50, 0.0  ;;  %v1226_v29 = vsel %vm414_vm0, %v1222_v30, 0.0 }
 0x791   : > { %1230 = vadd.xlane.f32.xlu2 %v1229_v33  ;;  %1227 = vadd.xlane.f32.xlu0 %v1226_v29 }
 0x793   : > { %v1211_v31 = vpop.permute.xlu1 %1210 }
 0x794   : > { %v2581_v37 = vsub.f32 %v1141_v20, %v1211_v31 }
 0x796   : > { %v1224_v52 = vmul.f32 %v2581_v37, %v2581_v37 }
 0x798   : > { %v1232_v63 = vsel %vm414_vm0, %v1224_v52, 0.0 }
 0x799   : > { %1233 = vadd.xlane.f32.xlu1 %v1232_v63 }
 0x7a5   : > { %1355 = vperm.xlu0 %1958, %v1151_v59   ;;  %v1147_v59 = vld [vmem:[%s2965_s7 + $0x10] sm:$0xff] }
 0x7ad   : > { %1360 = vperm.xlu0 %1958, %v1152_v9  }
 0x7b2   : > { %1350 = vperm.xlu1 %1959, %v1150_v19  }
 0x7b5   : > { %1345 = vperm.xlu0 %1958, %v1149_v41  }
 0x7fc   : > { %v1237_v42 = vpop.xlane.xlu0 %1236 }
 0x7fd   : > { %1250 = vmatpush.msra.mxu1 %v1237_v42 }
 0x804   : > { %v1231_v53 = vpop.xlane.xlu2 %1230  ;;  %v1228_v56 = vpop.xlane.xlu0 %1227 }
 0x80c   : > { %v1234_v51 = vpop.xlane.xlu1 %1233 }
 0x80d   : > { %1251 = vmatpush.msra.mxu1 %v1234_v51 }
 0x80f   : > { %1252 = vmatpush.msra.mxu1 %v1231_v53 }
 0x811   : > { %1253 = vmatpush.msra.mxu1 %v1228_v56  ;;  %v1148_v56 = vld [vmem:[%s2965_s7 + $0x18] sm:$0xff] }
 0x812   : > { %1883 = vmatmul.msk.f32.vlgmr.msra.gmra.mxu1 %vm500_vm2, %v1984_v57 }
 0x81a   : > { %1884 = vmatmul.msk.f32.gmra.mxu1 %vm500_vm2, %v1985_v61 }
 0x822   : > { %1885 = vmatmul.msk.f32.gmra.mxu1 %vm500_vm2, %v1986_v6 }
 0x82a   : > { %1886 = vmatmul.msk.f32.gmra.mxu1 %vm500_vm2, %v1987_v0  ;;  %v1356_v0 = vpop.permute.xlu0 %1355 }
 0x88f   : > { %v1255_v1 = vpop.f32.mrf.mxu1 }
 0x890   : > { %v1267_v15 = vmul.f32 0.00390625, %v1255_v1  ;;  %v1361_v1 = vpop.permute.xlu0 %1360 }
 0x892   : > { %v1271_v20 = vadd.f32 1e-05, %v1267_v15  ;;  %v1351_v15 = vpop.permute.xlu1 %1350 }
 0x894   : > { %1976 = vrsqrt.f32 %v1271_v20  ;;  %vm1281_vm10 = vweird.f32 %v1271_v20 }
 0x897   : > { %v1258_v2 = vpop.f32.mrf.mxu1 }
 0x898   : > { %v1268_v43 = vmul.f32 0.00390625, %v1258_v2 }
 0x89a   : > { %v1977_v44 = vpop.eup %1976  ;;  %v1272_v54 = vadd.f32 1e-05, %v1268_v43  ;;  %v1346_v43 = vpop.permute.xlu0 %1345 }
 0x89b   : > { %v1276_v47 = vmul.f32 %v1977_v44, %v1271_v20  ;;  %vm1282_vm9 = vweird.f32 %v1977_v44 }
 0x89c   : > { %1978 = vrsqrt.f32 %v1272_v54  ;;  %vm1283_vm11 = vmor %vm1281_vm10, %vm1282_vm9  ;;  %vm1291_vm12 = vweird.f32 %v1272_v54 }
 0x89d   : > { %v1277_v23 = vmul.f32 %v1977_v44, %v1276_v47 }
 0x89f   : > { %v1278_v25 = vmul.f32 0.5, %v1277_v23  ;;  %v1261_v48 = vpop.f32.mrf.mxu1 }
 0x8a0   : > { %v1269_v7 = vmul.f32 0.00390625, %v1261_v48 }
 0x8a1   : > { %v1279_v62 = vsub.f32 1.5, %v1278_v25 }
 0x8a2   : > { %v1979_v10 = vpop.eup %1978  ;;  %v1273_v11 = vadd.f32 1e-05, %v1269_v7 }
 0x8a3   : > { %v1286_v8 = vmul.f32 %v1979_v10, %v1272_v54  ;;  %v1280_v18 = vmul.f32 %v1977_v44, %v1279_v62  ;;  %vm1292_vm13 = vweird.f32 %v1979_v10 }
 0x8a4   : > { %1980 = vrsqrt.f32 %v1273_v11  ;;  %vm1293_vm14 = vmor %vm1291_vm12, %vm1292_vm13  ;;  %vm1301_vm9 = vweird.f32 %v1273_v11 }
 0x8a5   : > { %v1287_v60 = vmul.f32 %v1979_v10, %v1286_v8  ;;  %v1284_v13 = vsel %vm1283_vm11, %v1977_v44, %v1280_v18 }
 0x8a6   : > { %v1315_v14 = vmul.f32 %v1284_v13, %v1145_v12 }
 0x8a7   : > { %v1288_v38 = vmul.f32 0.5, %v1287_v60  ;;  %v1264_v27 = vpop.f32.mrf.mxu1 }
 0x8a8   : > { %v1270_v55 = vmul.f32 0.00390625, %v1264_v27  ;;  %1321 = vperm.xlu1 %1959, %v1315_v14  }
 0x8a9   : > { %v1289_v32 = vsub.f32 1.5, %v1288_v38 }
 0x8aa   : > { %v1981_v16 = vpop.eup %1980  ;;  %v1274_v35 = vadd.f32 1e-05, %v1270_v55 }
 0x8ab   : > { %v1296_v36 = vmul.f32 %v1981_v16, %v1273_v11  ;;  %v1290_v49 = vmul.f32 %v1979_v10, %v1289_v32  ;;  %vm1302_vm10 = vweird.f32 %v1981_v16 }
 0x8ac   : > { %1982 = vrsqrt.f32 %v1274_v35  ;;  %vm1303_vm11 = vmor %vm1301_vm9, %vm1302_vm10  ;;  %vm1311_vm12 = vweird.f32 %v1274_v35 }
 0x8ad   : > { %v1297_v50 = vmul.f32 %v1981_v16, %v1296_v36  ;;  %v1294_v30 = vsel %vm1293_vm14, %v1979_v10, %v1290_v49 }
 0x8ae   : > { %v1316_v33 = vmul.f32 %v1294_v30, %v1146_v46 }
 0x8af   : > { %v1298_v29 = vmul.f32 0.5, %v1297_v50 }
 0x8b0   : > { %1326 = vperm.xlu2 %1957, %v1316_v33  }
 0x8b1   : > { %v1299_v31 = vsub.f32 1.5, %v1298_v29 }
 0x8b2   : > { %v1983_v52 = vpop.eup %1982 }
 0x8b3   : > { %v1306_v63 = vmul.f32 %v1983_v52, %v1274_v35  ;;  %v1300_v9 = vmul.f32 %v1981_v16, %v1299_v31  ;;  %vm1312_vm13 = vweird.f32 %v1983_v52 }
 0x8b4   : > { %vm1313_vm14 = vmor %vm1311_vm12, %vm1312_vm13 }
 0x8b5   : > { %v1307_v19 = vmul.f32 %v1983_v52, %v1306_v63  ;;  %v1304_v41 = vsel %vm1303_vm11, %v1981_v16, %v1300_v9 }
 0x8b6   : > { %v1317_v42 = vmul.f32 %v1304_v41, %v1147_v59 }
 0x8b7   : > { %v1308_v51 = vmul.f32 0.5, %v1307_v19 }
 0x8b8   : > { %1331 = vperm.xlu1 %1959, %v1317_v42  }
 0x8b9   : > { %v1309_v53 = vsub.f32 1.5, %v1308_v51 }
 0x8bb   : > { %v1310_v57 = vmul.f32 %v1983_v52, %v1309_v53 }
 0x8bd   : > { %v1314_v61 = vsel %vm1313_vm14, %v1983_v52, %v1310_v57 }
 0x8be   : > { %v1318_v6 = vmul.f32 %v1314_v61, %v1148_v56 }
 0x8c0   : > { %1336 = vperm.xlu2 %1957, %v1318_v6  }
 0x91a   : > { %v1322_v20 = vpop.permute.xlu1 %1321 }
 0x91b   : > { %v1339_v2 = vmul.f32 %v1322_v20, %v2573_v28  ;;  %v1327_v28 = vpop.permute.xlu2 %1326 }
 0x91c   : > { %v1340_v47 = vmul.f32 %v1327_v28, %v2571_v4 }
 0x91d   : > { %v1363_v44 = vadd.f32 %v1346_v43, %v1339_v2 }
 0x91e   : > { %v1364_v23 = vadd.f32 %v1351_v15, %v1340_v47 }
 0x91f   : > { %v2627_v54 = vmax.f32 %v1363_v44, 0.0 }
 0x920   : > { %v2654_v25 = vmax.f32 %v1364_v23, 0.0 }
 0x921   : > { %1483 = vrot.lane.b32.xlu0 %v2627_v54, %s2006_s24  ;;  %1471 = vrot.lane.b32.xlu1 %v2627_v54, %s2004_s22 }
 0x922   : > { %1567 = vrot.lane.b32.xlu2 %v2627_v54, %s2001_s19 }
 0x929   : > { %1535 = vrot.lane.b32.xlu0 %v2627_v54, %s2002_s20  ;;  %1579 = vrot.lane.b32.xlu1 %v2627_v54, %s2003_s21 }
 0x92a   : > { %1439 = vrot.lane.b32.xlu2 %v2627_v54, %s2005_s23  ;;  %v1332_v4 = vpop.permute.xlu1 %1331 }
 0x92b   : > { %v1341_v48 = vmul.f32 %v1332_v4, %v2581_v37  ;;  %v1337_v37 = vpop.permute.xlu2 %1336 }
 0x92c   : > { %v1342_v8 = vmul.f32 %v1337_v37, %v2566_v34 }
 0x92d   : > { %v1365_v7 = vadd.f32 %v1356_v0, %v1341_v48 }
 0x92e   : > { %v1366_v12 = vadd.f32 %v1361_v1, %v1342_v8 }
 0x92f   : > { %v2687_v62 = vmax.f32 %v1365_v7, 0.0 }
 0x930   : > { %v2720_v60 = vmax.f32 %v1366_v12, 0.0 }
 0x931   : > { %1407 = vrot.lane.b32.xlu0 %v2627_v54, %s2011_s29  ;;  %1451 = vrot.lane.b32.xlu1 %v2627_v54, %s2991_s30 }
 0x932   : > { %1547 = vrot.lane.b32.xlu2 %v2627_v54, %s2992_s12 }
 0x939   : > { %1515 = vrot.lane.b32.xlu0 %v2627_v54, %s2993_s13  ;;  %1503 = vrot.lane.b32.xlu1 %v2627_v54, %s2994_s15 }
 0x93a   : > { %1419 = vrot.lane.b32.xlu2 %v2627_v54, %s2995_s26 }
 0x941   : > { %1375 = vrot.lane.b32.xlu0 %v2627_v54, %s2996_s16  ;;  %1485 = vrot.lane.b32.xlu1 %v2654_v25, %s2006_s24 }
 0x942   : > { %1387 = vrot.lane.b32.xlu2 %v2627_v54, %s2997_s25 }
 0x949   : > { %1569 = vrot.lane.b32.xlu0 %v2654_v25, %s2001_s19  ;;  %1537 = vrot.lane.b32.xlu1 %v2654_v25, %s2002_s20 }
 0x94a   : > { %1473 = vrot.lane.b32.xlu2 %v2654_v25, %s2004_s22 }
 0x951   : > { %1441 = vrot.lane.b32.xlu0 %v2654_v25, %s2005_s23  ;;  %1409 = vrot.lane.b32.xlu1 %v2654_v25, %s2011_s29 }
 0x952   : > { %1581 = vrot.lane.b32.xlu2 %v2654_v25, %s2003_s21 }
 0x959   : > { %1549 = vrot.lane.b32.xlu0 %v2654_v25, %s2992_s12  ;;  %1517 = vrot.lane.b32.xlu1 %v2654_v25, %s2993_s13 }
 0x95a   : > { %1453 = vrot.lane.b32.xlu2 %v2654_v25, %s2991_s30 }
 0x961   : > { %1421 = vrot.lane.b32.xlu0 %v2654_v25, %s2995_s26  ;;  %1377 = vrot.lane.b32.xlu1 %v2654_v25, %s2996_s16 }
 0x962   : > { %1505 = vrot.lane.b32.xlu2 %v2654_v25, %s2994_s15 }
 0x969   : > { %1389 = vrot.lane.b32.xlu0 %v2654_v25, %s2997_s25  ;;  %1487 = vrot.lane.b32.xlu1 %v2687_v62, %s2006_s24 }
 0x96a   : > { %1475 = vrot.lane.b32.xlu2 %v2687_v62, %s2004_s22 }
 0x971   : > { %1571 = vrot.lane.b32.xlu0 %v2687_v62, %s2001_s19  ;;  %1539 = vrot.lane.b32.xlu1 %v2687_v62, %s2002_s20 }
 0x972   : > { %1583 = vrot.lane.b32.xlu2 %v2687_v62, %s2003_s21 }
 0x979   : > { %1443 = vrot.lane.b32.xlu0 %v2687_v62, %s2005_s23  ;;  %1411 = vrot.lane.b32.xlu1 %v2687_v62, %s2011_s29 }
 0x97a   : > { %1455 = vrot.lane.b32.xlu2 %v2687_v62, %s2991_s30 }
 0x97c   : > { %v1568_v10 = vpop.permute.xlu2 %1567 }
 0x981   : > { %1551 = vrot.lane.b32.xlu0 %v2687_v62, %s2992_s12  ;;  %1519 = vrot.lane.b32.xlu1 %v2687_v62, %s2993_s13 }
 0x982   : > { %1507 = vrot.lane.b32.xlu2 %v2687_v62, %s2994_s15 }
 0x984   : > { %v1440_v11 = vpop.permute.xlu2 %1439 }
 0x989   : > { %1423 = vrot.lane.b32.xlu0 %v2687_v62, %s2995_s26  ;;  %1391 = vrot.lane.b32.xlu1 %v2687_v62, %s2997_s25 }
 0x98a   : > { %1379 = vrot.lane.b32.xlu2 %v2687_v62, %s2996_s16 }
 0x98c   : > { %v1548_v18 = vpop.permute.xlu2 %1547 }
 0x991   : > { %1573 = vrot.lane.b32.xlu1 %v2720_v60, %s2001_s19  ;;  %1477 = vrot.lane.b32.xlu0 %v2720_v60, %s2004_s22  ;;  %s2998_s19 = smov 119  }
 0x992   : > { %1489 = vrot.lane.b32.xlu2 %v2720_v60, %s2006_s24 }
 0x993   : > { %v1484_v34 = vpop.permute.xlu0 %1483  ;;  %v1472_v13 = vpop.permute.xlu1 %1471 }
 0x994   : > { %v1495_v14 = vsel %vm860_vm15, %v1472_v13, %v1484_v34  ;;  %v1420_v38 = vpop.permute.xlu2 %1419 }
 0x995   : > { %v2761_v42 = vmul.f32 %v2407_v17, %v1495_v14 }
 0x999   : > { %1445 = vrot.lane.b32.xlu1 %v2720_v60, %s2005_s23  ;;  %1585 = vrot.lane.b32.xlu0 %v2720_v60, %s2003_s21 }
 0x99a   : > { %1541 = vrot.lane.b32.xlu2 %v2720_v60, %s2002_s20  ;;  %s2999_s20 = smov 55  }
 0x99b   : > { %v1536_v27 = vpop.permute.xlu0 %1535  ;;  %v1580_v55 = vpop.permute.xlu1 %1579 }
 0x99c   : > { %v1559_v32 = vsel %vm936_vm1, %v1536_v27, %v1548_v18  ;;  %v1591_v16 = vsel %vm974_vm7, %v1568_v10, %v1580_v55  ;;  %v1388_v35 = vpop.permute.xlu2 %1387 }
 0x99d   : > { %v2776_v0 = vmul.f32 %v2378_v3, %v1591_v16 }
 0x9a1   : > { %1553 = vrot.lane.b32.xlu1 %v2720_v60, %s2992_s12  ;;  %1457 = vrot.lane.b32.xlu0 %v2720_v60, %s2991_s30 }
 0x9a2   : > { %1413 = vrot.lane.b32.xlu2 %v2720_v60, %s2011_s29 }
 0x9a3   : > { %v1408_v36 = vpop.permute.xlu0 %1407  ;;  %v1452_v46 = vpop.permute.xlu1 %1451 }
 0x9a4   : > { %v1431_v49 = vsel %vm784_vm5, %v1408_v36, %v1420_v38  ;;  %v1463_v50 = vsel %vm822_vm4, %v1440_v11, %v1452_v46  ;;  %v1474_v30 = vpop.permute.xlu2 %1473  ;;  %v2803_v11 = vmul.f32 %v2336_v45, %v1559_v32 }
 0x9a5   : > { %v2791_v28 = vmul.f32 %v2357_v58, %v1463_v50  ;;  %v2820_v55 = vmul.f32 %v2388_v5, %v1431_v49 }
 0x9a9   : > { %1425 = vrot.lane.b32.xlu1 %v2720_v60, %s2995_s26  ;;  %1509 = vrot.lane.b32.xlu0 %v2720_v60, %s2994_s15 }
 0x9aa   : > { %1521 = vrot.lane.b32.xlu2 %v2720_v60, %s2993_s13 }
 0x9ab   : > { %v1516_v33 = vpop.permute.xlu0 %1515  ;;  %v1504_v29 = vpop.permute.xlu1 %1503 }
 0x9ac   : > { %v1527_v31 = vsel %vm898_vm3, %v1504_v29, %v1516_v33  ;;  %v1582_v52 = vpop.permute.xlu2 %1581 }
 0x9ad   : > { %v2806_v8 = vmul.f32 %v2432_v39, %v1527_v31 }
 0x9b1   : > { %1603 = vrot.lane.b32.xlu1 %v2687_v62, %s2998_s19  ;;  %1381 = vrot.lane.b32.xlu0 %v2720_v60, %s2996_s16 }
 0x9b2   : > { %1599 = vrot.lane.b32.xlu2 %v2627_v54, %s2998_s19 }
 0x9b3   : > { %v1376_v63 = vpop.permute.xlu0 %1375  ;;  %v1486_v59 = vpop.permute.xlu1 %1485 }
 0x9b4   : > { %v1399_v9 = vsel %vm747_vm8, %v1376_v63, %v1388_v35  ;;  %v1496_v19 = vsel %vm860_vm15, %v1474_v30, %v1486_v59  ;;  %v1454_v41 = vpop.permute.xlu2 %1453 }
 0x9b5   : > { %v2764_v51 = vmul.f32 %v2407_v17, %v1496_v19  ;;  %v2829_v50 = vmul.f32 %v2491_v40, %v1399_v9 }
 0x9b7   : > { %v1637_v53 = vpack.c.bf16 %v2764_v51, %v2761_v42  ;;  %v1989_v51 = vld [vmem:[%s2968_s10 + $0x6] ss:$0 sm:$0xff] }
 0x9b9   : > { %1617 = vrot.lane.b32.xlu1 %v2720_v60, %s2999_s20  ;;  %1615 = vrot.lane.b32.xlu0 %v2687_v62, %s2999_s20 }
 0x9ba   : > { %1393 = vrot.lane.b32.xlu2 %v2720_v60, %s2997_s25 }
 0x9bb   : > { %v1570_v56 = vpop.permute.xlu0 %1569  ;;  %v1538_v57 = vpop.permute.xlu1 %1537 }
 0x9bc   : > { %v1592_v61 = vsel %vm974_vm7, %v1570_v56, %v1582_v52  ;;  %v1506_v6 = vpop.permute.xlu2 %1505 }
 0x9bd   : > { %v2779_v1 = vmul.f32 %v2378_v3, %v1592_v61 }
 0x9bf   : > { %v1645_v15 = vpack.c.bf16 %v2779_v1, %v2776_v0  ;;  %v1990_v0 = vld [vmem:[%s2968_s10 + $0x1] ss:$0 sm:$0xff] }
 0x9c1   : > { %1611 = vrot.lane.b32.xlu1 %v2627_v54, %s2999_s20  ;;  %1601 = vrot.lane.b32.xlu0 %v2654_v25, %s2998_s19 }
 0x9c2   : > { %1605 = vrot.lane.b32.xlu2 %v2720_v60, %s2998_s19  ;;  %s1916_s19 = sshll.u32 %s3001_s18, 5 }
 0x9c3   : > { %v1442_v20 = vpop.permute.xlu0 %1441  ;;  %v1410_v2 = vpop.permute.xlu1 %1409  ;;  %s386_s22 = scalar_lea.vmem %s2969_s11, %s1916_s19 }
 0x9c4   : > { %v1464_v43 = vsel %vm822_vm4, %v1442_v20, %v1454_v41  ;;  %v1476_v44 = vpop.permute.xlu2 %1475 }
 0x9c5   : > { %v2794_v47 = vmul.f32 %v2357_v58, %v1464_v43 }
 0x9c7   : > { %v1635_v23 = vpack.c.bf16 %v2794_v47, %v2791_v28 }
 0x9ca   : > { %1613 = vrot.lane.b32.xlu2 %v2654_v25, %s2999_s20 }
 0x9cb   : > { %v1550_v4 = vpop.permute.xlu0 %1549  ;;  %v1518_v48 = vpop.permute.xlu1 %1517 }
 0x9cc   : > { %v1560_v7 = vsel %vm936_vm1, %v1538_v57, %v1550_v4  ;;  %v1528_v37 = vsel %vm898_vm3, %v1506_v6, %v1518_v48  ;;  %v1584_v10 = vpop.permute.xlu2 %1583 }
 0x9cd   : > { %v2809_v58 = vmul.f32 %v2336_v45, %v1560_v7  ;;  %v2812_v12 = vmul.f32 %v2432_v39, %v1528_v37 }
 0x9cf   : > { %v1643_v18 = vpack.c.bf16 %v2809_v58, %v2803_v11  ;;  %v1641_v34 = vpack.c.bf16 %v2812_v12, %v2806_v8  ;;  %v1889_v58 = vld [vmem:[%s2967_s9] sm:$0xf]  ;;  %v1926_v8 = vld [vmem:[%s2967_s9 + $0x4] sm:$0xf]  ;;  %v1891_v12 = vld [vmem:[%s2967_s9 + $0xc] sm:$0xf0] }
 0x9d3   : > { %v1422_v13 = vpop.permute.xlu0 %1421  ;;  %v1378_v14 = vpop.permute.xlu1 %1377 }
 0x9d4   : > { %v1432_v38 = vsel %vm784_vm5, %v1410_v2, %v1422_v13  ;;  %v1456_v27 = vpop.permute.xlu2 %1455 }
 0x9d5   : > { %v2823_v45 = vmul.f32 %v2388_v5, %v1432_v38 }
 0x9d7   : > { %v1633_v32 = vpack.c.bf16 %v2823_v45, %v2820_v55 }
 0x9db   : > { %v1390_v16 = vpop.permute.xlu0 %1389  ;;  %v1488_v35 = vpop.permute.xlu1 %1487 }
 0x9dc   : > { %v1400_v36 = vsel %vm747_vm8, %v1378_v14, %v1390_v16  ;;  %v1508_v46 = vpop.permute.xlu2 %1507  ;;  %v1497_v61 = vsel %vm860_vm15, %v1476_v44, %v1488_v35 }
 0x9dd   : > { %v2832_v30 = vmul.f32 %v2491_v40, %v1400_v36  ;;  %v1501_v43 = vmul.f32 %v2407_v17, %v1497_v61 }
 0x9df   : > { %v1631_v49 = vpack.c.bf16 %v2832_v30, %v2829_v50  ;;  %v1897_v50 = vld [vmem:[%s2967_s9 + $0x8] sm:$0xf]  ;;  %v1928_v30 = vld [vmem:[%s2967_s9 + $0x10] sm:$0xf0] }
 0x9e3   : > { %v1572_v33 = vpop.permute.xlu0 %1571  ;;  %v1540_v5 = vpop.permute.xlu1 %1539 }
 0x9e4   : > { %v2836_v29 = vpop.permute.xlu2 %1379  ;;  %v1593_v7 = vsel %vm974_vm7, %v1572_v33, %v1584_v10 }
 0x9e5   : > { %v1597_v16 = vmul.f32 %v2378_v3, %v1593_v7 }
 0x9eb   : > { %v1444_v31 = vpop.permute.xlu0 %1443  ;;  %v1412_v52 = vpop.permute.xlu1 %1411 }
 0x9ec   : > { %v1490_v63 = vpop.permute.xlu2 %1489 }
 0x9f3   : > { %v1552_v59 = vpop.permute.xlu0 %1551  ;;  %v1520_v19 = vpop.permute.xlu1 %1519 }
 0x9f4   : > { %v1542_v41 = vpop.permute.xlu2 %1541  ;;  %v1561_v36 = vsel %vm936_vm1, %v1540_v5, %v1552_v59 }
 0x9fb   : > { %v1424_v56 = vpop.permute.xlu0 %1423  ;;  %v1392_v57 = vpop.permute.xlu1 %1391 }
 0x9fc   : > { %v1414_v9 = vpop.permute.xlu2 %1413 }
 0xa03   : > { %v1574_v6 = vpop.permute.xlu1 %1573  ;;  %v1478_v20 = vpop.permute.xlu0 %1477 }
 0xa04   : > { %v1498_v2 = vsel %vm860_vm15, %v1478_v20, %v1490_v63  ;;  %v1522_v37 = vpop.permute.xlu2 %1521  ;;  %v1433_v20 = vsel %vm784_vm5, %v1412_v52, %v1424_v56 }
 0xa05   : > { %v1502_v4 = vmul.f32 %v2407_v17, %v1498_v2  ;;  %v1465_v17 = vsel %vm822_vm4, %v1444_v31, %v1456_v27  ;;  %v1437_v1 = vmul.f32 %v1990_v0, %v1433_v20 }
 0xa07   : > { %v1638_v48 = vpack.c.bf16 %v1502_v4, %v1501_v43 }
 0xa09   : > { %1693 = vmatpush.bf16.msra.mxu2 %v1638_v48 }
 0xa0b   : > { %v1446_v13 = vpop.permute.xlu1 %1445  ;;  %v1586_v14 = vpop.permute.xlu0 %1585 }
 0xa0c   : > { %v1594_v38 = vsel %vm974_vm7, %v1574_v6, %v1586_v14  ;;  %v2851_v63 = vpop.permute.xlu2 %1599 }
 0xa0d   : > { %v1598_v44 = vmul.f32 %v2378_v3, %v1594_v38  ;;  %1694 = vmatpush.bf16.msra.mxu2 %v1637_v53  ;;  %v1988_v3 = vld [vmem:[%s2968_s10 + $0x2] ss:$0 sm:$0xff]  ;;  %v1565_v53 = vmul.f32 %v1989_v51, %v1561_v36 }
 0xa0e   : > { %v1469_v42 = vmul.f32 %v1988_v3, %v1465_v17 }
 0xa0f   : > { %v1646_v35 = vpack.c.bf16 %v1598_v44, %v1597_v16 }
 0xa11   : > { %1712 = vmatpush.bf16.msra.mxu3 %v1646_v35 }
 0xa13   : > { %v1554_v10 = vpop.permute.xlu1 %1553  ;;  %v1458_v33 = vpop.permute.xlu0 %1457 }
 0xa14   : > { %v1562_v61 = vsel %vm936_vm1, %v1542_v41, %v1554_v10  ;;  %v1466_v6 = vsel %vm822_vm4, %v1446_v13, %v1458_v33  ;;  %v1529_v41 = vsel %vm898_vm3, %v1508_v46, %v1520_v19  ;;  %v1394_v52 = vpop.permute.xlu2 %1393  ;;  %v1898_v33 = vor.u32 %v1928_v30, %v1897_v50 }
 0xa15   : > { %v1566_v27 = vmul.f32 %v1989_v51, %v1562_v61  ;;  %v1470_v5 = vmul.f32 %v1988_v3, %v1466_v6  ;;  %1713 = vmatpush.bf16.msra.mxu3 %v1645_v15  ;;  %v1533_v4 = vmul.f32 %v2432_v39, %v1529_v41  ;;  %v1901_v61 = vld [vmem:[%s2967_s9 + $0x18] sm:$0xf]  ;;  %v1929_v6 = vld [vmem:[%s2967_s9 + $0x1c] sm:$0xf]  ;;  %v1903_v3 = vld [vmem:[%s2967_s9 + $0x24] sm:$0xf0] }
 0xa16   : > { %v1906_v51 = vor.u32 %v1929_v6, %v1903_v3 }
 0xa17   : > { %v1636_v31 = vpack.c.bf16 %v1470_v5, %v1469_v42  ;;  %v1644_v59 = vpack.c.bf16 %v1566_v27, %v1565_v53  ;;  %v1909_v53 = vld [vmem:[%s2967_s9 + $0x20] sm:$0xf]  ;;  %v1931_v27 = vld [vmem:[%s2967_s9 + $0x28] sm:$0xf0] }
 0xa18   : > { %v1910_v5 = vor.u32 %v1931_v27, %v1909_v53 }
 0xa19   : > { %1695 = vmatpush.bf16.msra.mxu2 %v1636_v31  ;;  %1714 = vmatpush.bf16.msra.mxu3 %v1644_v59 }
 0xa1b   : > { %v1426_v2 = vpop.permute.xlu1 %1425  ;;  %v1510_v43 = vpop.permute.xlu0 %1509 }
 0xa1c   : > { %v1434_v48 = vsel %vm784_vm5, %v1414_v9, %v1426_v2  ;;  %v1530_v7 = vsel %vm898_vm3, %v1510_v43, %v1522_v37  ;;  %v1401_v9 = vsel %vm747_vm8, %v2836_v29, %v1392_v57  ;;  %v1606_v11 = vpop.permute.xlu2 %1605  ;;  %v1991_v29 = vld [vmem:[%s2968_s10 + $0x8] ss:$0 sm:$0xff] }
 0xa1d   : > { %v1438_v15 = vmul.f32 %v1990_v0, %v1434_v48  ;;  %v1534_v46 = vmul.f32 %v2432_v39, %v1530_v7  ;;  %1696 = vmatpush.bf16.msra.mxu2 %v1635_v23  ;;  %1715 = vmatpush.bf16.msra.mxu3 %v1643_v18  ;;  %v1405_v14 = vmul.f32 %v2491_v40, %v1401_v9 }
 0xa1e   : > { %v1640_v23 = vpack.c.bf16 %v2720_v60, %v2687_v62  ;;  %v1639_v18 = vpack.c.bf16 %v2654_v25, %v2627_v54 }
 0xa1f   : > { %v1634_v19 = vpack.c.bf16 %v1438_v15, %v1437_v1  ;;  %v1642_v56 = vpack.c.bf16 %v1534_v46, %v1533_v4 }
 0xa21   : > { %1697 = vmatpush.bf16.msra.mxu2 %v1634_v19  ;;  %1716 = vmatpush.bf16.msra.mxu3 %v1642_v56 }
 0xa23   : > { %v1604_v37 = vpop.permute.xlu1 %1603  ;;  %v1382_v13 = vpop.permute.xlu0 %1381 }
 0xa24   : > { %v1402_v39 = vsel %vm747_vm8, %v1382_v13, %v1394_v52  ;;  %v1614_v54 = vpop.permute.xlu2 %1613 }
 0xa25   : > { %v1406_v28 = vmul.f32 %v2491_v40, %v1402_v39  ;;  %1698 = vmatpush.bf16.msra.mxu2 %v1633_v32  ;;  %1717 = vmatpush.bf16.msra.mxu3 %v1641_v34  ;;  %v1927_v40 = vld [vmem:[%s2967_s9 + $0x8] sm:$0xf0]  ;;  %v1894_v32 = vor.u32 %v1926_v8, %v1891_v12 }
 0xa26   : > { %v1890_v45 = vor.u32 %v1927_v40, %v1889_v58 }
 0xa27   : > { %v1632_v47 = vpack.c.bf16 %v1406_v28, %v1405_v14 }
 0xa29   : > { %1699 = vmatpush.bf16.msra.mxu2 %v1632_v47  ;;  %1718 = vmatpush.bf16.msra.mxu3 %v1640_v23 }
 0xa2b   : > { %v1618_v62 = vpop.permute.xlu1 %1617  ;;  %v1616_v60 = vpop.permute.xlu0 %1615 }
 0xa2c   : > { %v1626_v34 = vsel %vm1012_vm6, %v1606_v11, %v1618_v62  ;;  %v1625_v55 = vsel %vm1012_vm6, %v1604_v37, %v1616_v60 }
 0xa2d   : > { %v1630_v57 = vmul.f32 %v1991_v29, %v1626_v34  ;;  %v1629_v38 = vmul.f32 %v1991_v29, %v1625_v55  ;;  %1700 = vmatpush.bf16.msra.mxu2 %v1631_v49  ;;  %1719 = vmatpush.bf16.msra.mxu3 %v1639_v18 }
 0xa2f   : > { %v1648_v16 = vpack.c.bf16 %v1630_v57, %v1629_v38 }
 0xa30   : > { %1701 = vmatmul.bf16.vlgmr.msra.gmra.mxu2 %v1890_v45  ;;  %1720 = vmatmul.bf16.vlgmr.msra.gmra.mxu3 %v1894_v32 }
 0xa31   : > { %1737 = vmatpush.bf16.msra.mxu0 %v1648_v16 }
 0xa33   : > { %v1612_v25 = vpop.permute.xlu1 %1611  ;;  %v1602_v44 = vpop.permute.xlu0 %1601 }
 0xa34   : > { %v1623_v35 = vsel %vm1012_vm6, %v2851_v63, %v1612_v25  ;;  %v1624_v17 = vsel %vm1012_vm6, %v1602_v44, %v1614_v54  ;;  %v1930_v63 = vld [vmem:[%s2967_s9 + $0x20] sm:$0xf0] }
 0xa35   : > { %v1627_v36 = vmul.f32 %v1991_v29, %v1623_v35  ;;  %v1628_v10 = vmul.f32 %v1991_v29, %v1624_v17  ;;  %v1902_v42 = vor.u32 %v1930_v63, %v1901_v61 }
 0xa37   : > { %v1647_v49 = vpack.c.bf16 %v1628_v10, %v1627_v36 }
 0xa39   : > { %1738 = vmatpush.bf16.msra.mxu0 %v1647_v49 }
 0xa3c   : > { %1911 = vmatmul.msk.bf16.vlgmr.msra.gmra.mxu0 %vm500_vm2, %v1898_v33 }
 0xa40   : > { %1706 = vmatmul.bf16.gmra.mxu2 %v1902_v42  ;;  %1725 = vmatmul.bf16.gmra.mxu3 %v1906_v51 }
 0xa4c   : > { %1912 = vmatmul.msk.bf16.gmra.mxu0 %vm500_vm2, %v1910_v5 }
 0xab3   : > { %v1702_v31 = vpop.f32.mrf.mxu2  ;;  %v1721_v59 = vpop.f32.mrf.mxu3 }
 0xab4   : > { %v1722_v41 = vadd.f32 %v1721_v59, %v1702_v31 }
 0xab9   : > { %v1740_v20 = vpop.f32.mrf.mxu0 }
 0xaba   : > { %v1741_v2 = vadd.f32 %v1740_v20, %v1722_v41 }
 0xabb   : > { %v1704_v43 = vpop.f32.mrf.mxu2  ;;  %v1723_v4 = vpop.f32.mrf.mxu3 }
 0xabc   : > { %v1750_v48 = vadd.f32 %v1741_v2, %v2102_v21  ;;  %v1724_v7 = vadd.f32 %v1723_v4, %v1704_v43 }
 0xabe   : > { %1754 = vst.msk [vmem:[%s386_s22] sm:$0xff] %vm414_vm0, %v1750_v48 }
 0xac1   : > { %v1742_v0 = vpop.f32.mrf.mxu0 }
 0xac2   : > { %v1743_v1 = vadd.f32 %v1742_v0, %v1724_v7 }
 0xac3   : > { %v1707_v15 = vpop.f32.mrf.mxu2  ;;  %v1726_v46 = vpop.f32.mrf.mxu3 }
 0xac4   : > { %v1751_v52 = vadd.f32 %v1743_v1, %v2104_v22  ;;  %v1727_v19 = vadd.f32 %v1726_v46, %v1707_v15 }
 0xac6   : > { %1755 = vst.msk [vmem:[%s386_s22 + $0x8] sm:$0xff] %vm414_vm0, %v1751_v52 }
 0xac9   : > { %v1745_v56 = vpop.f32.mrf.mxu0 }
 0xaca   : > { %v1746_v9 = vadd.f32 %v1745_v56, %v1727_v19 }
 0xacb   : > { %v1709_v13 = vpop.f32.mrf.mxu2  ;;  %v1728_v39 = vpop.f32.mrf.mxu3 }
 0xacc   : > { %v1752_v37 = vadd.f32 %v1746_v9, %v2108_v24  ;;  %v1729_v21 = vadd.f32 %v1728_v39, %v1709_v13 }
 0xace   : > { %1756 = vst.msk [vmem:[%s386_s22 + $0x10] sm:$0xff] %vm414_vm0, %v1752_v37 }
 0xad1   : > { %v1747_v14 = vpop.f32.mrf.mxu0 }
 0xad2   : > { %v1748_v28 = vadd.f32 %v1747_v14, %v1729_v21 }
 0xad4   : > { %v1753_v47 = vadd.f32 %v1748_v28, %v2112_v26 }
 0xad6   : > { %1757 = vst.msk [vmem:[%s386_s22 + $0x18] sm:$0xff] %vm414_vm0, %v1753_v47 }
 0xad7 PF: > { %s21_s17 = sadd.s32 1, %s1998_s17  }
 0xad8   : > { %p18_p4 = scmp.ge.s32.totalorder %s21_s17, 4  }
 0xada   :  { %20 = sbr.rel (!%p18_p4) target bundleno = 1 (0x1), region = 101 }

// kernel: vae_decoder_forward.13
= control target key start
LH: loop header
LB: loop body
LE: loop exit
PB: predicated region body
PF: predicated region fallthrough
CT: control target
= control target key end

     0   :  { %s800_s26 = smov 0   ;;  %s865_s0 = inlined_call_operand.vmem [shape: f32[2,8,1024], index: 0, kind: input, shape index: {}]   ;;  %s866_s1 = inlined_call_operand.vmem [shape: f32[2,1,1024], index: 1, kind: input, shape index: {}]   ;;  %s867_s2 = inlined_call_operand.vmem [shape: f32[8,8], index: 2, kind: input, shape index: {}]   ;;  %s868_s3 = inlined_call_operand.vmem [shape: f32[8,1], index: 3, kind: input, shape index: {}]   ;;  %s869_s4 = inlined_call_operand.vmem [shape: f32[8,1], index: 4, kind: input, shape index: {}]   ;;  %s870_s5 = inlined_call_operand.vmem [shape: bf16[1,8], index: 5, kind: input, shape index: {}]   ;;  %s871_s6 = inlined_call_operand.<no memory space> [shape: f32[1,1], index: 6, kind: input, shape index: {}]   ;;  %s872_s7 = inlined_call_operand.vmem [shape: f32[2,1,1], index: 7, kind: output, shape index: {}]  }
   0x1   :  { %v12_v0 = vstv %s871_s6 }
   0x2   :  { %13 = vst [vmem:[#allocation2] sm:$0x1] %v12_v0 }
   0x3 LB: > { %s713_s27 = sadd.s32 4294967295, %s754_s26   ;;  %p717_p0 = scmp.ge.s32.totalorder %s754_s26, 1  ;;  %s754_s26 = sphi %s800_s26, %s19_s26  }
   0x4   : > { %p248_p1 = scmp.lt.s32.totalorder %s754_s26, 3 }
   0x6   : > { %p249_p2 = pnand %p717_p0, %p248_p1 }
   0x7   : > { %p282_p3 = scmp.lt.s32.totalorder (!%p249_p2), %s713_s27, 1 }
   0x8   : > { %252 = sbr.rel (%p249_p2) target bundleno = 1096 (0x448), region = 48 }
   0xd   : > { %s874_s27 = smov (!%p282_p3, %s713_s27), 1  ;;  %v305_v16 = vld [vmem:[%s867_s2] sm:$0xff]  ;;  %vm315_vm0 = vcmask 64512   ;;  %v756_v18 = vmov 0   ;;  %vm456_vm4 = vcmask 1043456   ;;  %vm601_vm5 = vcmask 1040384  }
   0xe   : > { %s733_s6 = sshll.u32 %s874_s27, 6  ;;  %743 = vset.pattern.permute.xlu0 %v756_v18  ;;  %744 = vset.pattern.permute.xlu1 %v756_v18  ;;  %v304_v46 = vld [vmem:[%s869_s4] sm:$0xff]  ;;  %s720_s16 = sshll.u32 %s874_s27, 3  ;;  %vm603_vm6 = vcmask 1042434   ;;  %vm605_vm7 = vcmask 1041408   ;;  %vm609_vm8 = vcmask 1046534  }
   0xf   : > { %s286_s30 = scalar_lea.vmem %s865_s0, %s733_s6  ;;  %745 = vset.pattern.permute.xlu2 %v756_v18  ;;  %v438_v47 = vld [vmem:[#allocation2] sm:$0x1]  ;;  %s290_s19 = scalar_lea.vmem %s866_s1, %s720_s16  ;;  %vm607_vm9 = vcmask 1044484   ;;  %vm611_vm10 = vcmask 1045508   ;;  %vm652_vm11 = vcmask 0  }
  0x10   : > { %v295_v1 = vld [vmem:[%s286_s30] sm:$0xff]  ;;  %v296_v2 = vld [vmem:[%s286_s30 + $0x8] sm:$0xff]  ;;  %v297_v3 = vld [vmem:[%s286_s30 + $0x10] sm:$0xff]  ;;  %418 = vperm.xlu2 %745, %v304_v46   ;;  %s293_s22 = scalar_lea.vmem %s872_s7, %s874_s27 }
  0x11   : > { %v306_v4 = vadd.f32 %v296_v2, %v295_v1  ;;  %v298_v5 = vld [vmem:[%s286_s30 + $0x18] sm:$0xff]  ;;  %v299_v7 = vld [vmem:[%s286_s30 + $0x20] sm:$0xff]  ;;  %v300_v9 = vld [vmem:[%s286_s30 + $0x28] sm:$0xff] }
  0x12   : > { %v301_v11 = vld [vmem:[%s286_s30 + $0x30] sm:$0xff]  ;;  %v302_v13 = vld [vmem:[%s286_s30 + $0x38] sm:$0xff]  ;;  %v303_v56 = vld [vmem:[%s868_s3] sm:$0xff] }
  0x13   : > { %v307_v6 = vadd.f32 %v306_v4, %v297_v3 }
  0x15   : > { %v308_v8 = vadd.f32 %v307_v6, %v298_v5 }
  0x17   : > { %v309_v10 = vadd.f32 %v308_v8, %v299_v7 }
  0x18   : > { %449 = vperm.xlu2 %745, %v438_v47  }
  0x19   : > { %v310_v12 = vadd.f32 %v309_v10, %v300_v9 }
  0x1b   : > { %v311_v14 = vadd.f32 %v310_v12, %v301_v11 }
  0x1d   : > { %v312_v15 = vadd.f32 %v311_v14, %v302_v13 }
  0x1f   : > { %313 = vadd.xlane.f32.xlu0 %v312_v15 }
  0x92   : > { %v314_v17 = vpop.xlane.xlu0 %313 }
  0x93   : > { %334 = vmatpush.msra.mxu0 %v314_v17 }
  0x94   : > { %721 = vmatmul.msk.f32.vlgmr.msra.gmra.mxu0 %vm315_vm0, %v305_v16 }
 0x111   : > { %v336_v19 = vpop.f32.mrf.mxu0 }
 0x112   : > { %v339_v20 = vmul.f32 0.0009765625, %v336_v19 }
 0x114   : > { %342 = vperm.xlu0 %743, %v339_v20  }
 0x186   : > { %v343_v21 = vpop.permute.xlu0 %342 }
 0x187   : > { %v345_v22 = vsub.f32 %v295_v1, %v343_v21  ;;  %v346_v23 = vsub.f32 %v296_v2, %v343_v21  ;;  %v347_v24 = vsub.f32 %v297_v3, %v343_v21  ;;  %v348_v25 = vsub.f32 %v298_v5, %v343_v21  ;;  %v419_v1 = vpop.permute.xlu2 %418 }
 0x188   : > { %v349_v28 = vsub.f32 %v299_v7, %v343_v21  ;;  %v350_v31 = vsub.f32 %v300_v9, %v343_v21  ;;  %v351_v34 = vsub.f32 %v301_v11, %v343_v21  ;;  %v352_v37 = vsub.f32 %v302_v13, %v343_v21 }
 0x189   : > { %v353_v26 = vmul.f32 %v345_v22, %v345_v22  ;;  %v354_v27 = vmul.f32 %v346_v23, %v346_v23  ;;  %v355_v29 = vmul.f32 %v347_v24, %v347_v24  ;;  %v356_v32 = vmul.f32 %v348_v25, %v348_v25 }
 0x18a   : > { %v357_v35 = vmul.f32 %v349_v28, %v349_v28  ;;  %v358_v38 = vmul.f32 %v350_v31, %v350_v31  ;;  %v359_v40 = vmul.f32 %v351_v34, %v351_v34  ;;  %v360_v42 = vmul.f32 %v352_v37, %v352_v37 }
 0x18b   : > { %v361_v30 = vadd.f32 %v354_v27, %v353_v26 }
 0x18d   : > { %v362_v33 = vadd.f32 %v361_v30, %v355_v29 }
 0x18f   : > { %v363_v36 = vadd.f32 %v362_v33, %v356_v32 }
 0x191   : > { %v364_v39 = vadd.f32 %v363_v36, %v357_v35 }
 0x193   : > { %v365_v41 = vadd.f32 %v364_v39, %v358_v38  ;;  %v437_v38 = vld [vmem:[%s870_s5] sm:$0x1] }
 0x195   : > { %v366_v43 = vadd.f32 %v365_v41, %v359_v40 }
 0x197   : > { %v367_v44 = vadd.f32 %v366_v43, %v360_v42 }
 0x199   : > { %368 = vadd.xlane.f32.xlu1 %v367_v44 }
 0x20c   : > { %v369_v45 = vpop.xlane.xlu1 %368 }
 0x20d   : > { %385 = vmatpush.msra.mxu1 %v369_v45  ;;  %v450_v45 = vpop.permute.xlu2 %449 }
 0x20e   : > { %722 = vmatmul.msk.f32.vlgmr.msra.gmra.mxu1 %vm315_vm0, %v305_v16 }
 0x28b   : > { %v387_v48 = vpop.f32.mrf.mxu1 }
 0x28c   : > { %v390_v49 = vmul.f32 0.0009765625, %v387_v48  ;;  %v452_v48 = vperm.slane %v450_v45, 0 }
 0x28e   : > { %v391_v50 = vadd.f32 1e-05, %v390_v49 }
 0x290   : > { %746 = vrsqrt.f32 %v391_v50  ;;  %vm398_vm2 = vweird.f32 %v391_v50 }
 0x296   : > { %v747_v51 = vpop.eup %746 }
 0x297   : > { %v393_v52 = vmul.f32 %v747_v51, %v391_v50  ;;  %vm399_vm1 = vweird.f32 %v747_v51 }
 0x298   : > { %vm400_vm3 = vmor %vm398_vm2, %vm399_vm1 }
 0x299   : > { %v394_v53 = vmul.f32 %v747_v51, %v393_v52 }
 0x29b   : > { %v395_v54 = vmul.f32 0.5, %v394_v53 }
 0x29d   : > { %v396_v55 = vsub.f32 1.5, %v395_v54 }
 0x29f   : > { %v397_v57 = vmul.f32 %v747_v51, %v396_v55 }
 0x2a1   : > { %v401_v58 = vsel %vm400_vm3, %v747_v51, %v397_v57 }
 0x2a2   : > { %v402_v59 = vmul.f32 %v401_v58, %v303_v56 }
 0x2a4   : > { %405 = vperm.xlu1 %744, %v402_v59  }
 0x316   : > { %v406_v60 = vpop.permute.xlu1 %405 }
 0x317   : > { %v408_v61 = vmul.f32 %v406_v60, %v345_v22  ;;  %v409_v62 = vmul.f32 %v406_v60, %v346_v23  ;;  %v410_v63 = vmul.f32 %v406_v60, %v347_v24  ;;  %v411_v0 = vmul.f32 %v406_v60, %v348_v25 }
 0x318   : > { %v412_v2 = vmul.f32 %v406_v60, %v349_v28  ;;  %v413_v3 = vmul.f32 %v406_v60, %v350_v31  ;;  %v414_v4 = vmul.f32 %v406_v60, %v351_v34  ;;  %v415_v5 = vmul.f32 %v406_v60, %v352_v37 }
 0x319   : > { %v421_v6 = vadd.f32 %v419_v1, %v408_v61  ;;  %v422_v7 = vadd.f32 %v419_v1, %v409_v62  ;;  %v423_v8 = vadd.f32 %v419_v1, %v410_v63  ;;  %v424_v9 = vadd.f32 %v419_v1, %v411_v0 }
 0x31a   : > { %v425_v10 = vadd.f32 %v419_v1, %v412_v2  ;;  %v426_v11 = vadd.f32 %v419_v1, %v413_v3  ;;  %v427_v12 = vadd.f32 %v419_v1, %v414_v4  ;;  %v428_v13 = vadd.f32 %v419_v1, %v415_v5 }
 0x31b   : > { %v429_v14 = vmax.f32 %v421_v6, 0.0  ;;  %v430_v15 = vmax.f32 %v422_v7, 0.0  ;;  %v431_v16 = vmax.f32 %v423_v8, 0.0  ;;  %v432_v17 = vmax.f32 %v424_v9, 0.0  ;;  %v585_v9 = vld [vmem:[%s290_s19] sm:$0xff] }
 0x31c   : > { %v433_v18 = vmax.f32 %v425_v10, 0.0  ;;  %v434_v19 = vmax.f32 %v426_v11, 0.0  ;;  %v435_v20 = vmax.f32 %v427_v12, 0.0  ;;  %v436_v21 = vmax.f32 %v428_v13, 0.0 }
 0x31d   : > { %v439_v22 = vpack.c.bf16 %v429_v14, %v429_v14  ;;  %v440_v23 = vpack.c.bf16 %v430_v15, %v430_v15  ;;  %v441_v24 = vpack.c.bf16 %v431_v16, %v431_v16  ;;  %v442_v25 = vpack.c.bf16 %v432_v17, %v432_v17 }
 0x31e   : > { %v443_v26 = vpack.c.bf16 %v433_v18, %v433_v18  ;;  %v444_v27 = vpack.c.bf16 %v434_v19, %v434_v19  ;;  %v445_v28 = vpack.c.bf16 %v435_v20, %v435_v20  ;;  %v446_v29 = vpack.c.bf16 %v436_v21, %v436_v21 }
 0x31f   : > { %v458_v30 = vsel %vm456_vm4, %v439_v22, 0  ;;  %v461_v31 = vsel %vm456_vm4, %v440_v23, 0  ;;  %v464_v32 = vsel %vm456_vm4, %v441_v24, 0  ;;  %v467_v33 = vsel %vm456_vm4, %v442_v25, 0 }
 0x320   : > { %488 = vmatpush.bf16.msra.mxu2 %v458_v30  ;;  %501 = vmatpush.bf16.msra.mxu3 %v461_v31  ;;  %v470_v34 = vsel %vm456_vm4, %v443_v26, 0  ;;  %v473_v35 = vsel %vm456_vm4, %v444_v27, 0  ;;  %v476_v36 = vsel %vm456_vm4, %v445_v28, 0  ;;  %v479_v37 = vsel %vm456_vm4, %v446_v29, 0 }
 0x321   : > { %514 = vmatpush.bf16.msrb.mxu0 %v464_v32  ;;  %527 = vmatpush.bf16.msrb.mxu1 %v467_v33 }
 0x323   : > { %723 = vmatmul.msk.bf16.vlgmr.msra.gmra.mxu2 %vm315_vm0, %v437_v38  ;;  %724 = vmatmul.msk.bf16.vlgmr.msra.gmra.mxu3 %vm315_vm0, %v437_v38 }
 0x324   : > { %540 = vmatpush.bf16.msrb.mxu2 %v470_v34  ;;  %553 = vmatpush.bf16.msrb.mxu3 %v473_v35 }
 0x325   : > { %566 = vmatpush.bf16.msra.mxu0 %v476_v36  ;;  %579 = vmatpush.bf16.msra.mxu1 %v479_v37 }
 0x326   : > { %725 = vmatmul.msk.bf16.vlgmr.msrb.gmra.mxu0 %vm315_vm0, %v437_v38  ;;  %726 = vmatmul.msk.bf16.vlgmr.msrb.gmra.mxu1 %vm315_vm0, %v437_v38 }
 0x333   : > { %727 = vmatmul.msk.bf16.vlgmr.msrb.gmra.mxu2 %vm315_vm0, %v437_v38  ;;  %728 = vmatmul.msk.bf16.vlgmr.msrb.gmra.mxu3 %vm315_vm0, %v437_v38 }
 0x336   : > { %729 = vmatmul.msk.bf16.vlgmr.msra.gmra.mxu0 %vm315_vm0, %v437_v38  ;;  %730 = vmatmul.msk.bf16.vlgmr.msra.gmra.mxu1 %vm315_vm0, %v437_v38 }
 0x3a3   : > { %v516_v39 = vpop.f32.mrf.mxu0  ;;  %v529_v40 = vpop.f32.mrf.mxu1 }
 0x3a4   : > { %v517_v52 = vadd.f32 %v516_v39, %v452_v48  ;;  %v530_v53 = vadd.f32 %v529_v40, %v452_v48 }
 0x3a6   : > { %v490_v41 = vpop.f32.mrf.mxu2  ;;  %v503_v42 = vpop.f32.mrf.mxu3  ;;  %v595_v57 = vrot.slane %v517_v52, 6  ;;  %v596_v58 = vrot.slane %v530_v53, 5 }
 0x3a7   : > { %v504_v49 = vadd.f32 %v503_v42, %v452_v48  ;;  %v491_v59 = vadd.f32 %v490_v41, %v452_v48 }
 0x3a8   : > { %v604_v7 = vsel %vm603_vm6, %v595_v57, %v596_v58 }
 0x3a9   : > { %v594_v56 = vrot.slane %v504_v49, 7 }
 0x3ab   : > { %v518_v43 = vpop.f32.mrf.mxu0  ;;  %v531_v44 = vpop.f32.mrf.mxu1  ;;  %v602_v2 = vsel %vm601_vm5, %v491_v59, %v594_v56 }
 0x3ac   : > { %v606_v11 = vsel %vm605_vm7, %v602_v2, %v604_v7 }
 0x3ae   : > { %v492_v46 = vpop.f32.mrf.mxu2  ;;  %v505_v47 = vpop.f32.mrf.mxu3 }
 0x3b3   : > { %v568_v50 = vpop.f32.mrf.mxu0  ;;  %v581_v51 = vpop.f32.mrf.mxu1 }
 0x3b4   : > { %v569_v54 = vadd.f32 %v568_v50, %v452_v48  ;;  %v582_v55 = vadd.f32 %v581_v51, %v452_v48 }
 0x3b6   : > { %v542_v60 = vpop.f32.mrf.mxu2  ;;  %v555_v61 = vpop.f32.mrf.mxu3  ;;  %v599_v62 = vrot.slane %v569_v54, 2  ;;  %v600_v63 = vrot.slane %v582_v55, 1 }
 0x3b7   : > { %v543_v0 = vadd.f32 %v542_v60, %v452_v48  ;;  %v556_v1 = vadd.f32 %v555_v61, %v452_v48 }
 0x3b8   : > { %v610_v8 = vsel %vm609_vm8, %v599_v62, %v600_v63 }
 0x3b9   : > { %v597_v3 = vrot.slane %v543_v0, 4  ;;  %v598_v4 = vrot.slane %v556_v1, 3 }
 0x3bb   : > { %v570_v5 = vpop.f32.mrf.mxu0  ;;  %v583_v6 = vpop.f32.mrf.mxu1  ;;  %v608_v10 = vsel %vm607_vm9, %v597_v3, %v598_v4 }
 0x3bc   : > { %v612_v12 = vsel %vm611_vm10, %v608_v10, %v610_v8 }
 0x3bd   : > { %v613_v13 = vsel %vm456_vm4, %v606_v11, %v612_v12 }
 0x3be   : > { %v615_v14 = vsub.f32 %v585_v9, %v613_v13  ;;  %v544_v15 = vpop.f32.mrf.mxu2  ;;  %v557_v16 = vpop.f32.mrf.mxu3 }
 0x3c0   : > { %v616_v17 = vmul.f32 %v615_v14, %v615_v14 }
 0x3c2   : > { %v618_v18 = vperm.slane %v616_v17, 0  ;;  %v619_v19 = vperm.slane %v616_v17, 1  ;;  %v620_v20 = vperm.slane %v616_v17, 2  ;;  %v621_v21 = vperm.slane %v616_v17, 3 }
 0x3c3   : > { %v622_v25 = vperm.slane %v616_v17, 4  ;;  %v623_v28 = vperm.slane %v616_v17, 5  ;;  %v624_v31 = vperm.slane %v616_v17, 6  ;;  %v625_v34 = vperm.slane %v616_v17, 7 }
 0x3c4   : > { %v634_v22 = vsel %vm601_vm5, %v618_v18, 0.0  ;;  %v635_v23 = vsel %vm601_vm5, %v619_v19, 0.0  ;;  %v637_v26 = vsel %vm601_vm5, %v620_v20, 0.0  ;;  %v639_v29 = vsel %vm601_vm5, %v621_v21, 0.0 }
 0x3c5   : > { %v636_v24 = vadd.f32 %v635_v23, %v634_v22  ;;  %v641_v32 = vsel %vm601_vm5, %v622_v25, 0.0  ;;  %v643_v35 = vsel %vm601_vm5, %v623_v28, 0.0  ;;  %v645_v37 = vsel %vm601_vm5, %v624_v31, 0.0 }
 0x3c6   : > { %v647_v39 = vsel %vm601_vm5, %v625_v34, 0.0 }
 0x3c7   : > { %v638_v27 = vadd.f32 %v637_v26, %v636_v24 }
 0x3c9   : > { %v640_v30 = vadd.f32 %v639_v29, %v638_v27 }
 0x3cb   : > { %v642_v33 = vadd.f32 %v641_v32, %v640_v30 }
 0x3cd   : > { %v644_v36 = vadd.f32 %v643_v35, %v642_v33 }
 0x3cf   : > { %v646_v38 = vadd.f32 %v645_v37, %v644_v36 }
 0x3d1   : > { %v648_v40 = vadd.f32 %v647_v39, %v646_v38 }
 0x3d3   : > { %649 = vadd.xlane.f32.xlu2 %v648_v40 }
 0x446   : > { %v650_v41 = vpop.xlane.xlu2 %649 }
 0x447   : > { %653 = vst.msk [vmem:[%s293_s22] sm:$0x1] %vm652_vm11, %v650_v41 }
 0x448 PF: > { %s19_s26 = sadd.s32 1, %s754_s26  }
 0x449   : > { %p16_p4 = scmp.ge.s32.totalorder %s19_s26, 4  }
 0x44b   :  { %18 = sbr.rel (!%p16_p4) target bundleno = 3 (0x3), region = 81 }

// kernel: vae_decoder_forward.12
= control target key start
LH: loop header
LB: loop body
LE: loop exit
PB: predicated region body
PF: predicated region fallthrough
CT: control target
= control target key end

     0   :  { %s3540_s17 = smov 0   ;;  %s5597_s0 = inlined_call_operand.vmem [shape: f32[2,16,256], index: 0, kind: input, shape index: {}]   ;;  %s5598_s1 = inlined_call_operand.vmem [shape: bf16[8,16], index: 1, kind: input, shape index: {}]   ;;  %s5599_s2 = inlined_call_operand.vmem [shape: bf16[256,1024], index: 2, kind: input, shape index: {}]   ;;  %s5600_s3 = inlined_call_operand.vmem [shape: f32[8,8], index: 3, kind: input, shape index: {}]   ;;  %s5601_s4 = inlined_call_operand.vmem [shape: f32[8,1], index: 4, kind: input, shape index: {}]   ;;  %s5602_s5 = inlined_call_operand.vmem [shape: f32[8,1], index: 5, kind: input, shape index: {}]   ;;  %s5603_s6 = inlined_call_operand.vmem [shape: bf16[8,72], index: 6, kind: input, shape index: {}]   ;;  %s5604_s7 = inlined_call_operand.vmem [shape: f32[8,1], index: 7, kind: input, shape index: {}]   ;;  %s5605_s8 = inlined_call_operand.vmem [shape: f32[8,1], index: 8, kind: input, shape index: {}]   ;;  %s5606_s9 = inlined_call_operand.vmem [shape: bf16[8,72], index: 9, kind: input, shape index: {}]   ;;  %s5607_s10 = inlined_call_operand.vmem [shape: f32[9,1,1024], index: 10, kind: input, shape index: {}]   ;;  %s5608_s11 = inlined_call_operand.vmem [shape: f32[2,8,1024], index: 11, kind: output, shape index: {}]  }
   0x1 LB: > { %s2756_s18 = sadd.s32 4294967295, %s3469_s17   ;;  %p2760_p0 = scmp.ge.s32.totalorder %s3469_s17, 1  ;;  %s3469_s17 = sphi %s3540_s17, %s21_s17  }
   0x2   : > { %p337_p1 = scmp.lt.s32.totalorder %s3469_s17, 3 }
   0x4   : > { %p338_p2 = pnand %p2760_p0, %p337_p1 }
   0x5   : > { %p377_p3 = scmp.lt.s32.totalorder (!%p338_p2), %s2756_s18, 1  ;;  %s3472_s14 = smov (!%p338_p2), 96  }
   0x6   : > { %341 = sbr.rel (%p338_p2) target bundleno = 2687 (0xa7f), region = 64  ;;  %s3473_s15 = smov (!%p338_p2), 95  }
   0x7   : > { %s3474_s16 = smov (!%p338_p2), 97   ;;  %s3475_s19 = smov (!%p338_p2), 127  }
   0x8   : > { %s3477_s21 = smov (!%p338_p2), 31   ;;  %s3478_s22 = smov (!%p338_p2), 32  }
   0x9   : > { %s3479_s23 = smov (!%p338_p2), 33  }
   0xb   : > { %v2993_v0 = vld [vmem:[%s5599_s2 + $0x1c0] sm:$0xf]  ;;  %s5702_s18 = smov (!%p377_p3, %s2756_s18), 1  ;;  %v3366_v6 = vld [vmem:[%s5599_s2 + $0x1c4] sm:$0xf]  ;;  %vm395_vm0 = vcmask 130048  }
   0xc   : > { %v3370_v1 = vld [vmem:[%s5599_s2 + $0x1dc] sm:$0xf0]  ;;  %v2995_v7 = vld [vmem:[%s5599_s2 + $0x1e0] sm:$0xf0]  ;;  %s3308_s20 = sshll.u32 %s5702_s18, 5  ;;  %vm1415_vm1 = vcmask 64512  }
   0xd   : > { %v3249_v2 = vld [vmem:[%s5599_s2 + $0x3c0] sm:$0xf]  ;;  %v2994_v4 = vor.u32 %v3370_v1, %v2993_v0  ;;  %v3430_v8 = vld [vmem:[%s5599_s2 + $0x3c4] sm:$0xf]  ;;  %s381_s27 = scalar_lea.vmem %s5597_s0, %s3308_s20  ;;  %v2998_v20 = vor.u32 %v3366_v6, %v2995_v7  ;;  %s3476_s20 = smov 1   ;;  %vm1999_vm6 = vcmask 1043456  }
   0xe   : > { %v3434_v3 = vld [vmem:[%s5599_s2 + $0x3dc] sm:$0xf0]  ;;  %v3251_v9 = vld [vmem:[%s5599_s2 + $0x3e0] sm:$0xf0]  ;;  %v390_v18 = vld [vmem:[%s381_s27 + $0x10] sm:$0xff]  ;;  %vm1995_vm14 = vcmask 588800  }
   0xf   : > { %v3250_v5 = vor.u32 %v3434_v3, %v3249_v2  ;;  %v2961_v10 = vld [vmem:[%s5599_s2 + $0x180] sm:$0xf]  ;;  %1195 = vmatpush.bf16.msra.mxu2 %v2994_v4  ;;  %v3358_v15 = vld [vmem:[%s5599_s2 + $0x184] sm:$0xf]  ;;  %v389_v19 = vld [vmem:[%s381_s27 + $0x8] sm:$0xff]  ;;  %v3254_v24 = vor.u32 %v3430_v8, %v3251_v9 }
  0x10   : > { %v3362_v11 = vld [vmem:[%s5599_s2 + $0x19c] sm:$0xf0]  ;;  %v2963_v16 = vld [vmem:[%s5599_s2 + $0x1a0] sm:$0xf0]  ;;  %v391_v23 = vld [vmem:[%s381_s27 + $0x18] sm:$0xff] }
  0x11   : > { %1208 = vmatpush.bf16.msra.mxu3 %v3250_v5  ;;  %v3217_v12 = vld [vmem:[%s5599_s2 + $0x380] sm:$0xf]  ;;  %v2962_v13 = vor.u32 %v3362_v11, %v2961_v10  ;;  %v3422_v25 = vld [vmem:[%s5599_s2 + $0x384] sm:$0xf]  ;;  %v394_v27 = vpack.c.bf16 %v391_v23, %v389_v19  ;;  %v2966_v34 = vor.u32 %v3358_v15, %v2963_v16 }
  0x12   : > { %v3426_v14 = vld [vmem:[%s5599_s2 + $0x39c] sm:$0xf0]  ;;  %v3219_v26 = vld [vmem:[%s5599_s2 + $0x3a0] sm:$0xf0] }
  0x13   : > { %v388_v17 = vld [vmem:[%s381_s27] sm:$0xff]  ;;  %v3218_v21 = vor.u32 %v3426_v14, %v3217_v12  ;;  %1196 = vmatpush.bf16.msra.mxu2 %v2962_v13  ;;  %419 = vmatpush.bf16.msra.mxu1 %v394_v27  ;;  %v3222_v39 = vor.u32 %v3422_v25, %v3219_v26  ;;  %v3001_v25 = vld [vmem:[%s5599_s2 + $0x1c8] sm:$0xf] }
  0x14   : > { %v393_v22 = vpack.c.bf16 %v390_v18, %v388_v17  ;;  %v2929_v28 = vld [vmem:[%s5599_s2 + $0x140] sm:$0xf]  ;;  %v3350_v36 = vld [vmem:[%s5599_s2 + $0x144] sm:$0xf]  ;;  %v3371_v26 = vld [vmem:[%s5599_s2 + $0x1e4] sm:$0xf0] }
  0x15   : > { %1209 = vmatpush.bf16.msra.mxu3 %v3218_v21  ;;  %v3354_v29 = vld [vmem:[%s5599_s2 + $0x15c] sm:$0xf0]  ;;  %v2931_v37 = vld [vmem:[%s5599_s2 + $0x160] sm:$0xf0] }
  0x16   : > { %v3185_v30 = vld [vmem:[%s5599_s2 + $0x340] sm:$0xf]  ;;  %406 = vmatpush.bf16.msra.mxu0 %v393_v22  ;;  %v2930_v32 = vor.u32 %v3354_v29, %v2929_v28  ;;  %v3414_v43 = vld [vmem:[%s5599_s2 + $0x344] sm:$0xf]  ;;  %v2934_v49 = vor.u32 %v3350_v36, %v2931_v37  ;;  %v3257_v29 = vld [vmem:[%s5599_s2 + $0x3c8] sm:$0xf]  ;;  %v3002_v36 = vor.u32 %v3371_v26, %v3001_v25 }
  0x17   : > { %v392_v31 = vld [vmem:[%s5598_s1] sm:$0xf]  ;;  %1234 = vmatpush.bf16.msrb.mxu1 %v3254_v24  ;;  %v3187_v44 = vld [vmem:[%s5599_s2 + $0x360] sm:$0xf0] }
  0x18   : > { %v3418_v33 = vld [vmem:[%s5599_s2 + $0x35c] sm:$0xf0]  ;;  %1197 = vmatpush.bf16.msra.mxu2 %v2930_v32  ;;  %2766 = vmatmul.msk.bf16.vlgmr.msra.gmra.mxu1 %vm395_vm0, %v392_v31  ;;  %v3190_v52 = vor.u32 %v3414_v43, %v3187_v44  ;;  %v3342_v53 = vld [vmem:[%s5599_s2 + $0x104] sm:$0xf]  ;;  %v3225_v44 = vld [vmem:[%s5599_s2 + $0x388] sm:$0xf] }
  0x19   : > { %v3186_v35 = vor.u32 %v3418_v33, %v3185_v30  ;;  %v2897_v38 = vld [vmem:[%s5599_s2 + $0x100] sm:$0xf]  ;;  %2765 = vmatmul.msk.bf16.vlgmr.msra.gmra.mxu0 %vm395_vm0, %v392_v31  ;;  %v2899_v54 = vld [vmem:[%s5599_s2 + $0x120] sm:$0xf0]  ;;  %v3435_v30 = vld [vmem:[%s5599_s2 + $0x3e4] sm:$0xf0] }
  0x1a   : > { %1221 = vmatpush.bf16.msrb.mxu0 %v2998_v20  ;;  %v3346_v40 = vld [vmem:[%s5599_s2 + $0x11c] sm:$0xf0]  ;;  %v3406_v55 = vld [vmem:[%s5599_s2 + $0x304] sm:$0xf]  ;;  %v2902_v61 = vor.u32 %v3342_v53, %v2899_v54  ;;  %v2937_v54 = vld [vmem:[%s5599_s2 + $0x148] sm:$0xf] }
  0x1b   : > { %v3153_v41 = vld [vmem:[%s5599_s2 + $0x300] sm:$0xf]  ;;  %v2898_v45 = vor.u32 %v3346_v40, %v2897_v38  ;;  %1210 = vmatpush.bf16.msra.mxu3 %v3186_v35  ;;  %1235 = vmatpush.bf16.msrb.mxu1 %v3222_v39  ;;  %v3155_v56 = vld [vmem:[%s5599_s2 + $0x320] sm:$0xf0]  ;;  %v3258_v39 = vor.u32 %v3435_v30, %v3257_v29  ;;  %v2969_v40 = vld [vmem:[%s5599_s2 + $0x188] sm:$0xf] }
  0x1c   : > { %v3410_v42 = vld [vmem:[%s5599_s2 + $0x31c] sm:$0xf0]  ;;  %v3158_v0 = vor.u32 %v3406_v55, %v3155_v56  ;;  %v3334_v1 = vld [vmem:[%s5599_s2 + $0xc4] sm:$0xf]  ;;  %v3355_v55 = vld [vmem:[%s5599_s2 + $0x164] sm:$0xf0] }
  0x1d   : > { %v3154_v46 = vor.u32 %v3410_v42, %v3153_v41  ;;  %v2865_v47 = vld [vmem:[%s5599_s2 + $0xc0] sm:$0xf]  ;;  %1198 = vmatpush.bf16.msra.mxu2 %v2898_v45  ;;  %v2867_v2 = vld [vmem:[%s5599_s2 + $0xe0] sm:$0xf0]  ;;  %v3363_v41 = vld [vmem:[%s5599_s2 + $0x1a4] sm:$0xf0] }
  0x1e   : > { %v3338_v48 = vld [vmem:[%s5599_s2 + $0xdc] sm:$0xf0]  ;;  %1222 = vmatpush.bf16.msrb.mxu0 %v2966_v34  ;;  %v3398_v3 = vld [vmem:[%s5599_s2 + $0x2c4] sm:$0xf]  ;;  %v2870_v9 = vor.u32 %v3334_v1, %v2867_v2  ;;  %v3427_v45 = vld [vmem:[%s5599_s2 + $0x3a4] sm:$0xf0]  ;;  %v2938_v1 = vor.u32 %v3355_v55, %v2937_v54 }
  0x1f   : > { %v3121_v50 = vld [vmem:[%s5599_s2 + $0x2c0] sm:$0xf]  ;;  %v2866_v57 = vor.u32 %v3338_v48, %v2865_v47  ;;  %1211 = vmatpush.bf16.msra.mxu3 %v3154_v46  ;;  %1236 = vmatpush.bf16.msrb.mxu1 %v3190_v52  ;;  %v3123_v4 = vld [vmem:[%s5599_s2 + $0x2e0] sm:$0xf0]  ;;  %v3367_v47 = vld [vmem:[%s5599_s2 + $0x1cc] sm:$0xf]  ;;  %v3226_v53 = vor.u32 %v3427_v45, %v3225_v44 }
  0x20   : > { %v3402_v51 = vld [vmem:[%s5599_s2 + $0x2dc] sm:$0xf0]  ;;  %v3126_v12 = vor.u32 %v3398_v3, %v3123_v4  ;;  %v3326_v13 = vld [vmem:[%s5599_s2 + $0x84] sm:$0xf]  ;;  %v3003_v48 = vld [vmem:[%s5599_s2 + $0x1e8] sm:$0xf0] }
  0x21   : > { %v3122_v58 = vor.u32 %v3402_v51, %v3121_v50  ;;  %v2833_v59 = vld [vmem:[%s5599_s2 + $0x80] sm:$0xf]  ;;  %1199 = vmatpush.bf16.msra.mxu2 %v2866_v57  ;;  %v2835_v14 = vld [vmem:[%s5599_s2 + $0xa0] sm:$0xf0]  ;;  %v3259_v50 = vld [vmem:[%s5599_s2 + $0x3e8] sm:$0xf0]  ;;  %v2970_v51 = vor.u32 %v3363_v41, %v2969_v40  ;;  %v3006_v57 = vor.u32 %v3367_v47, %v3003_v48 }
  0x22   : > { %v3330_v60 = vld [vmem:[%s5599_s2 + $0x9c] sm:$0xf0]  ;;  %1223 = vmatpush.bf16.msrb.mxu0 %v2934_v49  ;;  %v3390_v15 = vld [vmem:[%s5599_s2 + $0x284] sm:$0xf]  ;;  %v2838_v23 = vor.u32 %v3326_v13, %v2835_v14  ;;  %v3431_v49 = vld [vmem:[%s5599_s2 + $0x3cc] sm:$0xf] }
  0x23   : > { %v3089_v62 = vld [vmem:[%s5599_s2 + $0x280] sm:$0xf]  ;;  %v2834_v5 = vor.u32 %v3330_v60, %v2833_v59  ;;  %1212 = vmatpush.bf16.msra.mxu3 %v3122_v58  ;;  %1237 = vmatpush.bf16.msrb.mxu1 %v3158_v0  ;;  %v3091_v16 = vld [vmem:[%s5599_s2 + $0x2a0] sm:$0xf0]  ;;  %v3193_v58 = vld [vmem:[%s5599_s2 + $0x348] sm:$0xf]  ;;  %v3262_v60 = vor.u32 %v3431_v49, %v3259_v50 }
  0x24   : > { %v3394_v63 = vld [vmem:[%s5599_s2 + $0x29c] sm:$0xf0]  ;;  %v3318_v19 = vld [vmem:[%s5599_s2 + $0x44] sm:$0xf]  ;;  %v3094_v27 = vor.u32 %v3390_v15, %v3091_v16  ;;  %v3419_v59 = vld [vmem:[%s5599_s2 + $0x364] sm:$0xf0] }
  0x25   : > { %v3090_v6 = vor.u32 %v3394_v63, %v3089_v62  ;;  %v2801_v7 = vld [vmem:[%s5599_s2 + $0x40] sm:$0xf]  ;;  %1200 = vmatpush.bf16.msra.mxu2 %v2834_v5  ;;  %v2803_v28 = vld [vmem:[%s5599_s2 + $0x60] sm:$0xf0]  ;;  %v2971_v62 = vld [vmem:[%s5599_s2 + $0x1a8] sm:$0xf0]  ;;  %v3194_v2 = vor.u32 %v3419_v59, %v3193_v58 }
  0x26   : > { %v3322_v8 = vld [vmem:[%s5599_s2 + $0x5c] sm:$0xf0]  ;;  %1224 = vmatpush.bf16.msrb.mxu0 %v2902_v61  ;;  %v3382_v31 = vld [vmem:[%s5599_s2 + $0x244] sm:$0xf]  ;;  %v2806_v37 = vor.u32 %v3318_v19, %v2803_v28  ;;  %v3359_v61 = vld [vmem:[%s5599_s2 + $0x18c] sm:$0xf] }
  0x27   : > { %v3057_v10 = vld [vmem:[%s5599_s2 + $0x240] sm:$0xf]  ;;  %v2802_v17 = vor.u32 %v3322_v8, %v2801_v7  ;;  %1213 = vmatpush.bf16.msra.mxu3 %v3090_v6  ;;  %1238 = vmatpush.bf16.msrb.mxu1 %v3126_v12  ;;  %v3059_v32 = vld [vmem:[%s5599_s2 + $0x260] sm:$0xf0]  ;;  %v3423_v63 = vld [vmem:[%s5599_s2 + $0x38c] sm:$0xf]  ;;  %v2974_v5 = vor.u32 %v3359_v61, %v2971_v62 }
  0x28   : > { %v3386_v11 = vld [vmem:[%s5599_s2 + $0x25c] sm:$0xf0]  ;;  %v3310_v35 = vld [vmem:[%s5599_s2 + $0x4] sm:$0xf]  ;;  %v3062_v42 = vor.u32 %v3382_v31, %v3059_v32  ;;  %v3227_v0 = vld [vmem:[%s5599_s2 + $0x3a8] sm:$0xf0] }
  0x29   : > { %v3058_v18 = vor.u32 %v3386_v11, %v3057_v10  ;;  %v2769_v20 = vld [vmem:[%s5599_s2] sm:$0xf]  ;;  %1201 = vmatpush.bf16.msra.mxu2 %v2802_v17  ;;  %v2771_v38 = vld [vmem:[%s5599_s2 + $0x20] sm:$0xf0]  ;;  %v2905_v3 = vld [vmem:[%s5599_s2 + $0x108] sm:$0xf]  ;;  %v3230_v8 = vor.u32 %v3423_v63, %v3227_v0 }
  0x2a   : > { %v3314_v21 = vld [vmem:[%s5599_s2 + $0x1c] sm:$0xf0]  ;;  %1225 = vmatpush.bf16.msrb.mxu0 %v2870_v9  ;;  %v3374_v43 = vld [vmem:[%s5599_s2 + $0x204] sm:$0xf]  ;;  %v2774_v52 = vor.u32 %v3310_v35, %v2771_v38  ;;  %v3347_v4 = vld [vmem:[%s5599_s2 + $0x124] sm:$0xf0] }
  0x2b   : > { %v3025_v22 = vld [vmem:[%s5599_s2 + $0x200] sm:$0xf]  ;;  %v2770_v33 = vor.u32 %v3314_v21, %v2769_v20  ;;  %1214 = vmatpush.bf16.msra.mxu3 %v3058_v18  ;;  %1239 = vmatpush.bf16.msrb.mxu1 %v3094_v27  ;;  %v3027_v46 = vld [vmem:[%s5599_s2 + $0x220] sm:$0xf0]  ;;  %v3161_v6 = vld [vmem:[%s5599_s2 + $0x308] sm:$0xf]  ;;  %v2906_v13 = vor.u32 %v3347_v4, %v2905_v3 }
  0x2c   : > { %v3378_v24 = vld [vmem:[%s5599_s2 + $0x21c] sm:$0xf0]  ;;  %v3030_v56 = vor.u32 %v3374_v43, %v3027_v46  ;;  %v3411_v7 = vld [vmem:[%s5599_s2 + $0x324] sm:$0xf0]  ;;  %v3351_v9 = vld [vmem:[%s5599_s2 + $0x14c] sm:$0xf] }
  0x2d   : > { %v3026_v34 = vor.u32 %v3378_v24, %v3025_v22  ;;  %1202 = vmatpush.bf16.msra.mxu2 %v2770_v33  ;;  %v2939_v10 = vld [vmem:[%s5599_s2 + $0x168] sm:$0xf0]  ;;  %v3162_v14 = vor.u32 %v3411_v7, %v3161_v6  ;;  %v2873_v15 = vld [vmem:[%s5599_s2 + $0xc8] sm:$0xf]  ;;  %v3009_v7 = vld [vmem:[%s5599_s2 + $0x1d0] sm:$0xf] }
  0x2e   : > { %1226 = vmatpush.bf16.msrb.mxu0 %v2838_v23  ;;  %v3415_v11 = vld [vmem:[%s5599_s2 + $0x34c] sm:$0xf]  ;;  %v3339_v16 = vld [vmem:[%s5599_s2 + $0xe4] sm:$0xf0]  ;;  %v2942_v17 = vor.u32 %v3351_v9, %v2939_v10  ;;  %v3265_v9 = vld [vmem:[%s5599_s2 + $0x3d0] sm:$0xf] }
  0x2f   : > { %1215 = vmatpush.bf16.msra.mxu3 %v3026_v34  ;;  %1240 = vmatpush.bf16.msrb.mxu1 %v3062_v42  ;;  %v3195_v12 = vld [vmem:[%s5599_s2 + $0x368] sm:$0xf0]  ;;  %v3129_v18 = vld [vmem:[%s5599_s2 + $0x2c8] sm:$0xf]  ;;  %v2874_v25 = vor.u32 %v3339_v16, %v2873_v15  ;;  %v3436_v10 = vld [vmem:[%s5599_s2 + $0x3ec] sm:$0xf0] }
  0x30   : > { %v3403_v19 = vld [vmem:[%s5599_s2 + $0x2e4] sm:$0xf0]  ;;  %v3198_v20 = vor.u32 %v3415_v11, %v3195_v12  ;;  %v3343_v21 = vld [vmem:[%s5599_s2 + $0x10c] sm:$0xf]  ;;  %v3368_v11 = vld [vmem:[%s5599_s2 + $0x1d4] sm:$0xf] }
  0x31   : > { %1247 = vmatpush.bf16.msrb.mxu2 %v3002_v36  ;;  %v2907_v22 = vld [vmem:[%s5599_s2 + $0x128] sm:$0xf0]  ;;  %v3130_v26 = vor.u32 %v3403_v19, %v3129_v18  ;;  %v2841_v27 = vld [vmem:[%s5599_s2 + $0x88] sm:$0xf]  ;;  %v3011_v12 = vld [vmem:[%s5599_s2 + $0x1f0] sm:$0xf0]  ;;  %v3266_v19 = vor.u32 %v3436_v10, %v3265_v9 }
  0x32   : > { %1227 = vmatpush.bf16.msrb.mxu0 %v2806_v37  ;;  %v3407_v23 = vld [vmem:[%s5599_s2 + $0x30c] sm:$0xf]  ;;  %v3331_v28 = vld [vmem:[%s5599_s2 + $0xa4] sm:$0xf0]  ;;  %v2910_v29 = vor.u32 %v3343_v21, %v2907_v22  ;;  %v3364_v21 = vld [vmem:[%s5599_s2 + $0x1ac] sm:$0xf0] }
  0x33   : > { %1260 = vmatpush.bf16.msrb.mxu3 %v3258_v39  ;;  %1241 = vmatpush.bf16.msrb.mxu1 %v3030_v56  ;;  %v3163_v24 = vld [vmem:[%s5599_s2 + $0x328] sm:$0xf0]  ;;  %v3097_v30 = vld [vmem:[%s5599_s2 + $0x288] sm:$0xf]  ;;  %v2842_v37 = vor.u32 %v3331_v28, %v2841_v27  ;;  %v3360_v27 = vld [vmem:[%s5599_s2 + $0x194] sm:$0xf] }
  0x34   : > { %v3395_v31 = vld [vmem:[%s5599_s2 + $0x2a4] sm:$0xf0]  ;;  %v3166_v32 = vor.u32 %v3407_v23, %v3163_v24  ;;  %v3335_v33 = vld [vmem:[%s5599_s2 + $0xcc] sm:$0xf]  ;;  %v3014_v23 = vor.u32 %v3368_v11, %v3011_v12  ;;  %v2979_v28 = vld [vmem:[%s5599_s2 + $0x1b0] sm:$0xf0] }
  0x35   : > { %1248 = vmatpush.bf16.msrb.mxu2 %v2970_v51  ;;  %v2875_v34 = vld [vmem:[%s5599_s2 + $0xe8] sm:$0xf0]  ;;  %v3098_v38 = vor.u32 %v3395_v31, %v3097_v30  ;;  %v2809_v39 = vld [vmem:[%s5599_s2 + $0x48] sm:$0xf]  ;;  %v3235_v30 = vld [vmem:[%s5599_s2 + $0x3b0] sm:$0xf0] }
  0x36   : > { %1228 = vmatpush.bf16.msrb.mxu0 %v2774_v52  ;;  %v3399_v35 = vld [vmem:[%s5599_s2 + $0x2cc] sm:$0xf]  ;;  %v3323_v40 = vld [vmem:[%s5599_s2 + $0x64] sm:$0xf0]  ;;  %v2878_v41 = vor.u32 %v3335_v33, %v2875_v34  ;;  %v2945_v33 = vld [vmem:[%s5599_s2 + $0x150] sm:$0xf] }
  0x37   : > { %1261 = vmatpush.bf16.msrb.mxu3 %v3226_v53  ;;  %1286 = vmatpush.bf16.msra.mxu1 %v3262_v60  ;;  %v3131_v36 = vld [vmem:[%s5599_s2 + $0x2e8] sm:$0xf0]  ;;  %v3065_v42 = vld [vmem:[%s5599_s2 + $0x248] sm:$0xf]  ;;  %v2810_v49 = vor.u32 %v3323_v40, %v2809_v39  ;;  %v3356_v34 = vld [vmem:[%s5599_s2 + $0x16c] sm:$0xf0] }
  0x38   : > { %v3387_v43 = vld [vmem:[%s5599_s2 + $0x264] sm:$0xf0]  ;;  %v3134_v44 = vor.u32 %v3399_v35, %v3131_v36  ;;  %v3327_v45 = vld [vmem:[%s5599_s2 + $0x8c] sm:$0xf]  ;;  %v2982_v35 = vor.u32 %v3360_v27, %v2979_v28  ;;  %v3352_v39 = vld [vmem:[%s5599_s2 + $0x154] sm:$0xf] }
  0x39   : > { %1249 = vmatpush.bf16.msrb.mxu2 %v2938_v1  ;;  %v2843_v46 = vld [vmem:[%s5599_s2 + $0xa8] sm:$0xf0]  ;;  %v3066_v50 = vor.u32 %v3387_v43, %v3065_v42  ;;  %v2777_v59 = vld [vmem:[%s5599_s2 + $0x8] sm:$0xf]  ;;  %v2947_v40 = vld [vmem:[%s5599_s2 + $0x170] sm:$0xf0] }
  0x3a   : > { %1273 = vmatpush.bf16.msra.mxu0 %v3006_v57  ;;  %v3391_v47 = vld [vmem:[%s5599_s2 + $0x28c] sm:$0xf]  ;;  %v2846_v51 = vor.u32 %v3327_v45, %v2843_v46  ;;  %v3315_v60 = vld [vmem:[%s5599_s2 + $0x24] sm:$0xf0]  ;;  %v3203_v42 = vld [vmem:[%s5599_s2 + $0x370] sm:$0xf0]  ;;  %v2946_v45 = vor.u32 %v3356_v34, %v2945_v33 }
  0x3b   : > { %1262 = vmatpush.bf16.msrb.mxu3 %v3194_v2  ;;  %1287 = vmatpush.bf16.msra.mxu1 %v3230_v8  ;;  %v3099_v48 = vld [vmem:[%s5599_s2 + $0x2a8] sm:$0xf0]  ;;  %v3033_v61 = vld [vmem:[%s5599_s2 + $0x208] sm:$0xf]  ;;  %v2778_v62 = vor.u32 %v3315_v60, %v2777_v59  ;;  %v3372_v8 = vld [vmem:[%s5599_s2 + $0x1ec] sm:$0xf0] }
  0x3c   : > { %v3102_v52 = vor.u32 %v3391_v47, %v3099_v48  ;;  %v3319_v53 = vld [vmem:[%s5599_s2 + $0x4c] sm:$0xf]  ;;  %v3379_v63 = vld [vmem:[%s5599_s2 + $0x224] sm:$0xf0]  ;;  %v3010_v18 = vor.u32 %v3372_v8, %v3009_v7  ;;  %v2913_v47 = vld [vmem:[%s5599_s2 + $0x110] sm:$0xf] }
  0x3d   : > { %1250 = vmatpush.bf16.msrb.mxu2 %v2906_v13  ;;  %v2811_v54 = vld [vmem:[%s5599_s2 + $0x68] sm:$0xf0]  ;;  %v3034_v2 = vor.u32 %v3379_v63, %v3033_v61  ;;  %v3432_v13 = vld [vmem:[%s5599_s2 + $0x3d4] sm:$0xf]  ;;  %v3348_v48 = vld [vmem:[%s5599_s2 + $0x12c] sm:$0xf0] }
  0x3e   : > { %1274 = vmatpush.bf16.msra.mxu0 %v2974_v5  ;;  %v3383_v55 = vld [vmem:[%s5599_s2 + $0x24c] sm:$0xf]  ;;  %v2814_v57 = vor.u32 %v3319_v53, %v2811_v54  ;;  %v3344_v53 = vld [vmem:[%s5599_s2 + $0x114] sm:$0xf]  ;;  %v2881_v59 = vld [vmem:[%s5599_s2 + $0xd0] sm:$0xf] }
  0x3f   : > { %1263 = vmatpush.bf16.msrb.mxu3 %v3162_v14  ;;  %1288 = vmatpush.bf16.msra.mxu1 %v3198_v20  ;;  %v3067_v56 = vld [vmem:[%s5599_s2 + $0x268] sm:$0xf0]  ;;  %v3267_v14 = vld [vmem:[%s5599_s2 + $0x3f0] sm:$0xf0]  ;;  %v2977_v20 = vld [vmem:[%s5599_s2 + $0x190] sm:$0xf] }
  0x40   : > { %v3070_v58 = vor.u32 %v3383_v55, %v3067_v56  ;;  %v3311_v0 = vld [vmem:[%s5599_s2 + $0xc] sm:$0xf]  ;;  %v3270_v24 = vor.u32 %v3432_v13, %v3267_v14  ;;  %v2978_v31 = vor.u32 %v3364_v21, %v2977_v20  ;;  %v2915_v54 = vld [vmem:[%s5599_s2 + $0x130] sm:$0xf0]  ;;  %v3340_v60 = vld [vmem:[%s5599_s2 + $0xec] sm:$0xf0] }
  0x41   : > { %1251 = vmatpush.bf16.msrb.mxu2 %v2874_v25  ;;  %v2779_v1 = vld [vmem:[%s5599_s2 + $0x28] sm:$0xf0]  ;;  %v3233_v25 = vld [vmem:[%s5599_s2 + $0x390] sm:$0xf]  ;;  %v3408_v55 = vld [vmem:[%s5599_s2 + $0x314] sm:$0xf]  ;;  %v2918_v61 = vor.u32 %v3344_v53, %v2915_v54 }
  0x42   : > { %1275 = vmatpush.bf16.msra.mxu0 %v2942_v17  ;;  %v2782_v3 = vor.u32 %v3311_v0, %v2779_v1  ;;  %v3375_v4 = vld [vmem:[%s5599_s2 + $0x20c] sm:$0xf]  ;;  %v3171_v56 = vld [vmem:[%s5599_s2 + $0x330] sm:$0xf0]  ;;  %v3137_v63 = vld [vmem:[%s5599_s2 + $0x2d0] sm:$0xf] }
  0x43   : > { %1264 = vmatpush.bf16.msrb.mxu3 %v3130_v26  ;;  %1289 = vmatpush.bf16.msra.mxu1 %v3166_v32  ;;  %v3035_v5 = vld [vmem:[%s5599_s2 + $0x228] sm:$0xf0]  ;;  %v3428_v26 = vld [vmem:[%s5599_s2 + $0x3ac] sm:$0xf0]  ;;  %v3336_v1 = vld [vmem:[%s5599_s2 + $0xd4] sm:$0xf] }
  0x44   : > { %v3038_v6 = vor.u32 %v3375_v4, %v3035_v5  ;;  %v3234_v32 = vor.u32 %v3428_v26, %v3233_v25  ;;  %v3404_v0 = vld [vmem:[%s5599_s2 + $0x2ec] sm:$0xf0]  ;;  %v3139_v4 = vld [vmem:[%s5599_s2 + $0x2f0] sm:$0xf0]  ;;  %v2882_v5 = vor.u32 %v3340_v60, %v2881_v59 }
  0x45   : > { %1252 = vmatpush.bf16.msrb.mxu2 %v2842_v37  ;;  %v3201_v37 = vld [vmem:[%s5599_s2 + $0x350] sm:$0xf]  ;;  %v3328_v13 = vld [vmem:[%s5599_s2 + $0x94] sm:$0xf] }
  0x46   : > { %1276 = vmatpush.bf16.msra.mxu0 %v2910_v29  ;;  %v3424_v29 = vld [vmem:[%s5599_s2 + $0x394] sm:$0xf]  ;;  %v2849_v7 = vld [vmem:[%s5599_s2 + $0x90] sm:$0xf] }
  0x47   : > { %1265 = vmatpush.bf16.msrb.mxu3 %v3098_v38  ;;  %1290 = vmatpush.bf16.msra.mxu1 %v3134_v44  ;;  %v3238_v36 = vor.u32 %v3424_v29, %v3235_v30  ;;  %v3420_v38 = vld [vmem:[%s5599_s2 + $0x36c] sm:$0xf0]  ;;  %v2851_v14 = vld [vmem:[%s5599_s2 + $0xb0] sm:$0xf0] }
  0x48   : > { %v3202_v46 = vor.u32 %v3420_v38, %v3201_v37  ;;  %v3332_v8 = vld [vmem:[%s5599_s2 + $0xac] sm:$0xf0]  ;;  %v3320_v27 = vld [vmem:[%s5599_s2 + $0x54] sm:$0xf] }
  0x49   : > { %1253 = vmatpush.bf16.msrb.mxu2 %v2810_v49  ;;  %v2950_v49 = vor.u32 %v3352_v39, %v2947_v40  ;;  %v3105_v11 = vld [vmem:[%s5599_s2 + $0x290] sm:$0xf]  ;;  %v2819_v28 = vld [vmem:[%s5599_s2 + $0x70] sm:$0xf0] }
  0x4a   : > { %1277 = vmatpush.bf16.msra.mxu0 %v2878_v41  ;;  %v3416_v41 = vld [vmem:[%s5599_s2 + $0x354] sm:$0xf]  ;;  %v3396_v12 = vld [vmem:[%s5599_s2 + $0x2ac] sm:$0xf0]  ;;  %v2822_v37 = vor.u32 %v3320_v27, %v2819_v28  ;;  %v3409_v27 = vld [vmem:[%s5599_s2 + $0x31c] sm:$0xf] }
  0x4b   : > { %1266 = vmatpush.bf16.msrb.mxu3 %v3066_v50  ;;  %1291 = vmatpush.bf16.msra.mxu1 %v3102_v52  ;;  %v3206_v50 = vor.u32 %v3416_v41, %v3203_v42  ;;  %v3412_v52 = vld [vmem:[%s5599_s2 + $0x32c] sm:$0xf0]  ;;  %v3384_v29 = vld [vmem:[%s5599_s2 + $0x254] sm:$0xf]  ;;  %v3179_v28 = vld [vmem:[%s5599_s2 + $0x338] sm:$0xf0] }
  0x4c   : > { %v2817_v20 = vld [vmem:[%s5599_s2 + $0x50] sm:$0xf]  ;;  %v3075_v30 = vld [vmem:[%s5599_s2 + $0x270] sm:$0xf0] }
  0x4d   : > { %1254 = vmatpush.bf16.msrb.mxu2 %v2778_v62  ;;  %v3174_v62 = vor.u32 %v3408_v55, %v3171_v56  ;;  %v3324_v21 = vld [vmem:[%s5599_s2 + $0x6c] sm:$0xf0]  ;;  %v3078_v38 = vor.u32 %v3384_v29, %v3075_v30  ;;  %v3312_v39 = vld [vmem:[%s5599_s2 + $0x14] sm:$0xf] }
  0x4e   : > { %1278 = vmatpush.bf16.msra.mxu0 %v2846_v51  ;;  %v3169_v51 = vld [vmem:[%s5599_s2 + $0x310] sm:$0xf]  ;;  %v2787_v40 = vld [vmem:[%s5599_s2 + $0x30] sm:$0xf0] }
  0x4f   : > { %1292 = vmatpush.bf16.msra.mxu1 %v3070_v58  ;;  %1267 = vmatpush.bf16.msrb.mxu3 %v3034_v2  ;;  %v3170_v58 = vor.u32 %v3412_v52, %v3169_v51  ;;  %v2883_v2 = vld [vmem:[%s5599_s2 + $0xf0] sm:$0xf0]  ;;  %v3073_v25 = vld [vmem:[%s5599_s2 + $0x250] sm:$0xf]  ;;  %v3433_v51 = vld [vmem:[%s5599_s2 + $0x3dc] sm:$0xf]  ;;  %v2790_v53 = vor.u32 %v3312_v39, %v2787_v40 }
  0x50   : > { %v2886_v9 = vor.u32 %v3336_v1, %v2883_v2  ;;  %v3388_v26 = vld [vmem:[%s5599_s2 + $0x26c] sm:$0xf0]  ;;  %v3376_v41 = vld [vmem:[%s5599_s2 + $0x214] sm:$0xf]  ;;  %v3275_v52 = vld [vmem:[%s5599_s2 + $0x3f8] sm:$0xf0] }
  0x51   : > { %v3074_v33 = vor.u32 %v3388_v26, %v3073_v25  ;;  %v3316_v34 = vld [vmem:[%s5599_s2 + $0x2c] sm:$0xf0]  ;;  %v3043_v42 = vld [vmem:[%s5599_s2 + $0x230] sm:$0xf0]  ;;  %v3278_v60 = vor.u32 %v3433_v51, %v3275_v52  ;;  %v3425_v1 = vld [vmem:[%s5599_s2 + $0x39c] sm:$0xf] }
  0x52   : > { %1279 = vmatpush.bf16.msra.mxu0 %v2814_v57  ;;  %v2914_v57 = vor.u32 %v3348_v48, %v2913_v47  ;;  %v3369_v47 = vld [vmem:[%s5599_s2 + $0x1dc] sm:$0xf]  ;;  %v3046_v54 = vor.u32 %v3376_v41, %v3043_v42 }
  0x53   : > { %1293 = vmatpush.bf16.msra.mxu1 %v3038_v6  ;;  %v3138_v6 = vor.u32 %v3404_v0, %v3137_v63  ;;  %v3361_v63 = vld [vmem:[%s5599_s2 + $0x19c] sm:$0xf] }
  0x54   : > { %v2987_v0 = vld [vmem:[%s5599_s2 + $0x1b8] sm:$0xf0] }
  0x55   : > { %v3243_v2 = vld [vmem:[%s5599_s2 + $0x3b8] sm:$0xf0] }
  0x56   : > { %1280 = vmatpush.bf16.msra.mxu0 %v2782_v3  ;;  %v3400_v3 = vld [vmem:[%s5599_s2 + $0x2d4] sm:$0xf]  ;;  %v3345_v25 = vld [vmem:[%s5599_s2 + $0x11c] sm:$0xf] }
  0x57   : > { %v3142_v10 = vor.u32 %v3400_v3, %v3139_v4  ;;  %v2923_v26 = vld [vmem:[%s5599_s2 + $0x138] sm:$0xf0] }
  0x58   : > { %v3401_v39 = vld [vmem:[%s5599_s2 + $0x2dc] sm:$0xf] }
  0x59   : > { %v3147_v40 = vld [vmem:[%s5599_s2 + $0x2f8] sm:$0xf0] }
  0x5a   : > { %v3393_v51 = vld [vmem:[%s5599_s2 + $0x29c] sm:$0xf] }
  0x5b   : > { %v3115_v52 = vld [vmem:[%s5599_s2 + $0x2b8] sm:$0xf0] }
  0x95   : > { %v421_v17 = vpop.f32.mrf.mxu1 }
  0x96   : > { %v408_v15 = vpop.f32.mrf.mxu0  ;;  %v3975_v22 = vpack.c.bf16 %v421_v17, %v421_v17  ;;  %v3107_v17 = vld [vmem:[%s5599_s2 + $0x2b0] sm:$0xf0] }
  0x97   : > { %v3967_v16 = vpack.c.bf16 %v408_v15, %v408_v15  ;;  %v3392_v15 = vld [vmem:[%s5599_s2 + $0x294] sm:$0xf] }
  0x98   : > { %1216 = vmatmul.bf16.vlgmr.msra.gmra.mxu3 %v3975_v22  ;;  %1242 = vmatmul.bf16.vlgmr.msrb.gmra.mxu1 %v3975_v22 }
  0x99   : > { %1203 = vmatmul.bf16.vlgmr.msra.gmra.mxu2 %v3967_v16  ;;  %1229 = vmatmul.bf16.vlgmr.msrb.gmra.mxu0 %v3967_v16 }
  0x9a   : > { %1299 = vmatpush.bf16.msra.mxu2 %v3010_v18  ;;  %1312 = vmatpush.bf16.msra.mxu3 %v3266_v19  ;;  %v2850_v18 = vor.u32 %v3332_v8, %v2849_v7  ;;  %v3106_v19 = vor.u32 %v3396_v12, %v3105_v11  ;;  %v2990_v7 = vor.u32 %v3361_v63, %v2987_v0  ;;  %v3353_v11 = vld [vmem:[%s5599_s2 + $0x15c] sm:$0xf] }
  0x9b   : > { %1325 = vmatpush.bf16.msrb.mxu0 %v3014_v23  ;;  %1338 = vmatpush.bf16.msrb.mxu1 %v3270_v24  ;;  %v2854_v23 = vor.u32 %v3328_v13, %v2851_v14  ;;  %v3110_v24 = vor.u32 %v3392_v15, %v3107_v17  ;;  %v3246_v8 = vor.u32 %v3425_v1, %v3243_v2  ;;  %v2955_v12 = vld [vmem:[%s5599_s2 + $0x178] sm:$0xf0] }
  0x9c   : > { %v3417_v13 = vld [vmem:[%s5599_s2 + $0x35c] sm:$0xf] }
  0x9d   : > { %v423_v44 = vpop.f32.mrf.mxu1  ;;  %v3211_v14 = vld [vmem:[%s5599_s2 + $0x378] sm:$0xf0] }
  0x9e   : > { %v410_v43 = vpop.f32.mrf.mxu0  ;;  %1300 = vmatpush.bf16.msra.mxu2 %v2978_v31  ;;  %1313 = vmatpush.bf16.msra.mxu3 %v3234_v32  ;;  %v2785_v31 = vld [vmem:[%s5599_s2 + $0x10] sm:$0xf]  ;;  %v2818_v32 = vor.u32 %v3324_v21, %v2817_v20  ;;  %v3373_v44 = vld [vmem:[%s5599_s2 + $0x1f4] sm:$0xf0]  ;;  %v2958_v20 = vor.u32 %v3353_v11, %v2955_v12  ;;  %v3214_v21 = vor.u32 %v3417_v13, %v3211_v14  ;;  %v3385_v63 = vld [vmem:[%s5599_s2 + $0x25c] sm:$0xf] }
  0x9f   : > { %1326 = vmatpush.bf16.msrb.mxu0 %v2982_v35  ;;  %1339 = vmatpush.bf16.msrb.mxu1 %v3238_v36  ;;  %v3041_v35 = vld [vmem:[%s5599_s2 + $0x210] sm:$0xf]  ;;  %v3017_v43 = vld [vmem:[%s5599_s2 + $0x1d8] sm:$0xf]  ;;  %v2786_v48 = vor.u32 %v3316_v34, %v2785_v31  ;;  %v3182_v34 = vor.u32 %v3409_v27, %v3179_v28  ;;  %v3083_v0 = vld [vmem:[%s5599_s2 + $0x278] sm:$0xf0] }
  0xa0   : > { %v3380_v36 = vld [vmem:[%s5599_s2 + $0x22c] sm:$0xf0]  ;;  %v3018_v55 = vor.u32 %v3373_v44, %v3017_v43  ;;  %v2889_v31 = vld [vmem:[%s5599_s2 + $0xd8] sm:$0xf]  ;;  %v3377_v11 = vld [vmem:[%s5599_s2 + $0x21c] sm:$0xf] }
  0xa1   : > { %v2857_v43 = vld [vmem:[%s5599_s2 + $0x98] sm:$0xf]  ;;  %v3051_v12 = vld [vmem:[%s5599_s2 + $0x238] sm:$0xf0] }
  0xa2   : > { %1301 = vmatpush.bf16.msra.mxu2 %v2946_v45  ;;  %1314 = vmatpush.bf16.msra.mxu3 %v3202_v46  ;;  %v3273_v45 = vld [vmem:[%s5599_s2 + $0x3d8] sm:$0xf] }
  0xa3   : > { %1327 = vmatpush.bf16.msrb.mxu0 %v2950_v49  ;;  %1340 = vmatpush.bf16.msrb.mxu1 %v3206_v50  ;;  %v3437_v46 = vld [vmem:[%s5599_s2 + $0x3f4] sm:$0xf0]  ;;  %v3042_v49 = vor.u32 %v3380_v36, %v3041_v35  ;;  %v3019_v50 = vld [vmem:[%s5599_s2 + $0x1f8] sm:$0xf0] }
  0xa4   : > { %v3274_v56 = vor.u32 %v3437_v46, %v3273_v45  ;;  %v3022_v59 = vor.u32 %v3369_v47, %v3019_v50  ;;  %v3145_v35 = vld [vmem:[%s5599_s2 + $0x2d8] sm:$0xf]  ;;  %v3150_v46 = vor.u32 %v3401_v39, %v3147_v40  ;;  %v2859_v50 = vld [vmem:[%s5599_s2 + $0xb8] sm:$0xf0] }
  0xa5   : > { %v3405_v36 = vld [vmem:[%s5599_s2 + $0x2f4] sm:$0xf0] }
  0xa6   : > { %1302 = vmatpush.bf16.msra.mxu2 %v2914_v57  ;;  %1315 = vmatpush.bf16.msra.mxu3 %v3170_v58  ;;  %v2985_v57 = vld [vmem:[%s5599_s2 + $0x198] sm:$0xf]  ;;  %v3146_v42 = vor.u32 %v3405_v36, %v3145_v35 }
  0xa7   : > { %1328 = vmatpush.bf16.msrb.mxu0 %v2918_v61  ;;  %1341 = vmatpush.bf16.msrb.mxu1 %v3174_v62  ;;  %v3365_v58 = vld [vmem:[%s5599_s2 + $0x1b4] sm:$0xf0] }
  0xa8   : > { %1268 = vmatmul.bf16.vlgmr.msrb.gmra.mxu3 %v3975_v22  ;;  %1294 = vmatmul.bf16.vlgmr.msra.gmra.mxu1 %v3975_v22  ;;  %v3241_v61 = vld [vmem:[%s5599_s2 + $0x398] sm:$0xf]  ;;  %v2986_v3 = vor.u32 %v3365_v58, %v2985_v57  ;;  %v3118_v58 = vor.u32 %v3393_v51, %v3115_v52 }
  0xa9   : > { %1255 = vmatmul.bf16.vlgmr.msrb.gmra.mxu2 %v3967_v16  ;;  %1281 = vmatmul.bf16.vlgmr.msra.gmra.mxu0 %v3967_v16  ;;  %v3429_v62 = vld [vmem:[%s5599_s2 + $0x3b4] sm:$0xf0] }
  0xaa   : > { %1303 = vmatpush.bf16.msra.mxu2 %v2882_v5  ;;  %1316 = vmatpush.bf16.msra.mxu3 %v3138_v6  ;;  %v3242_v4 = vor.u32 %v3429_v62, %v3241_v61  ;;  %v2953_v5 = vld [vmem:[%s5599_s2 + $0x158] sm:$0xf]  ;;  %v3321_v61 = vld [vmem:[%s5599_s2 + $0x5c] sm:$0xf] }
  0xab   : > { %1329 = vmatpush.bf16.msrb.mxu0 %v2886_v9  ;;  %1342 = vmatpush.bf16.msrb.mxu1 %v3142_v10  ;;  %v3357_v6 = vld [vmem:[%s5599_s2 + $0x174] sm:$0xf0]  ;;  %v2827_v62 = vld [vmem:[%s5599_s2 + $0x78] sm:$0xf0] }
  0xac   : > { %v3209_v9 = vld [vmem:[%s5599_s2 + $0x358] sm:$0xf]  ;;  %v2954_v15 = vor.u32 %v3357_v6, %v2953_v5  ;;  %v2830_v5 = vor.u32 %v3321_v61, %v2827_v62  ;;  %v3086_v6 = vor.u32 %v3385_v63, %v3083_v0  ;;  %v1405_v0 = vld [vmem:[%s5600_s3] sm:$0xff] }
  0xad   : > { %v3421_v10 = vld [vmem:[%s5599_s2 + $0x374] sm:$0xf0] }
  0xae   : > { %1304 = vmatpush.bf16.msra.mxu2 %v2850_v18  ;;  %1317 = vmatpush.bf16.msra.mxu3 %v3106_v19  ;;  %v3210_v17 = vor.u32 %v3421_v10, %v3209_v9  ;;  %v2921_v18 = vld [vmem:[%s5599_s2 + $0x118] sm:$0xf]  ;;  %v3313_v9 = vld [vmem:[%s5599_s2 + $0x1c] sm:$0xf] }
  0xaf   : > { %1330 = vmatpush.bf16.msrb.mxu0 %v2854_v23  ;;  %1343 = vmatpush.bf16.msrb.mxu1 %v3110_v24  ;;  %v3349_v19 = vld [vmem:[%s5599_s2 + $0x134] sm:$0xf0]  ;;  %v2795_v10 = vld [vmem:[%s5599_s2 + $0x38] sm:$0xf0] }
  0xb0   : > { %v3177_v23 = vld [vmem:[%s5599_s2 + $0x318] sm:$0xf]  ;;  %v2922_v29 = vor.u32 %v3349_v19, %v2921_v18 }
  0xb1   : > { %v3413_v24 = vld [vmem:[%s5599_s2 + $0x334] sm:$0xf0] }
  0xb2   : > { %1305 = vmatpush.bf16.msra.mxu2 %v2818_v32  ;;  %1318 = vmatpush.bf16.msra.mxu3 %v3074_v33  ;;  %v3178_v30 = vor.u32 %v3413_v24, %v3177_v23  ;;  %v3341_v32 = vld [vmem:[%s5599_s2 + $0xf4] sm:$0xf0]  ;;  %v2926_v33 = vor.u32 %v3345_v25, %v2923_v26 }
  0xb3   : > { %1331 = vmatpush.bf16.msrb.mxu0 %v2822_v37  ;;  %1344 = vmatpush.bf16.msrb.mxu1 %v3078_v38  ;;  %v3337_v37 = vld [vmem:[%s5599_s2 + $0xdc] sm:$0xf]  ;;  %v2890_v41 = vor.u32 %v3341_v32, %v2889_v31  ;;  %v3333_v44 = vld [vmem:[%s5599_s2 + $0xb4] sm:$0xf0] }
  0xb4   : > { %v2891_v38 = vld [vmem:[%s5599_s2 + $0xf8] sm:$0xf0]  ;;  %v3113_v47 = vld [vmem:[%s5599_s2 + $0x298] sm:$0xf] }
  0xb5   : > { %v2894_v45 = vor.u32 %v3337_v37, %v2891_v38 }
  0xb6   : > { %1306 = vmatpush.bf16.msra.mxu2 %v2786_v48  ;;  %1319 = vmatpush.bf16.msra.mxu3 %v3042_v49  ;;  %v3397_v48 = vld [vmem:[%s5599_s2 + $0x2b4] sm:$0xf0]  ;;  %v3329_v49 = vld [vmem:[%s5599_s2 + $0x9c] sm:$0xf] }
  0xb7   : > { %1332 = vmatpush.bf16.msrb.mxu0 %v2790_v53  ;;  %1345 = vmatpush.bf16.msrb.mxu1 %v3046_v54  ;;  %v2858_v53 = vor.u32 %v3333_v44, %v2857_v43  ;;  %v3114_v54 = vor.u32 %v3397_v48, %v3113_v47  ;;  %v2862_v57 = vor.u32 %v3329_v49, %v2859_v50 }
  0xb9   : > { %1307 = vmatmul.bf16.vlgmr.msra.gmra.mxu2 %v3967_v16  ;;  %1320 = vmatmul.bf16.vlgmr.msra.gmra.mxu3 %v3975_v22 }
  0xba   : > { %1351 = vmatpush.bf16.msrb.mxu2 %v3018_v55  ;;  %1364 = vmatpush.bf16.msrb.mxu3 %v3274_v56  ;;  %v2825_v55 = vld [vmem:[%s5599_s2 + $0x58] sm:$0xf] }
  0xbb   : > { %1377 = vmatpush.bf16.msra.mxu0 %v3022_v59  ;;  %1390 = vmatpush.bf16.msra.mxu1 %v3278_v60  ;;  %v3325_v56 = vld [vmem:[%s5599_s2 + $0x74] sm:$0xf0] }
  0xbc   : > { %1333 = vmatmul.bf16.vlgmr.msrb.gmra.mxu0 %v3967_v16  ;;  %1346 = vmatmul.bf16.vlgmr.msrb.gmra.mxu1 %v3975_v22  ;;  %v3081_v59 = vld [vmem:[%s5599_s2 + $0x258] sm:$0xf]  ;;  %v2826_v1 = vor.u32 %v3325_v56, %v2825_v55 }
  0xbd   : > { %v3389_v60 = vld [vmem:[%s5599_s2 + $0x274] sm:$0xf0] }
  0xbe   : > { %1352 = vmatpush.bf16.msrb.mxu2 %v2986_v3  ;;  %1365 = vmatpush.bf16.msrb.mxu3 %v3242_v4  ;;  %v3082_v2 = vor.u32 %v3389_v60, %v3081_v59  ;;  %v2793_v3 = vld [vmem:[%s5599_s2 + $0x18] sm:$0xf] }
  0xbf   : > { %1378 = vmatpush.bf16.msra.mxu0 %v2990_v7  ;;  %1391 = vmatpush.bf16.msra.mxu1 %v3246_v8  ;;  %v3317_v4 = vld [vmem:[%s5599_s2 + $0x34] sm:$0xf0] }
  0xc0   : > { %v3049_v7 = vld [vmem:[%s5599_s2 + $0x218] sm:$0xf]  ;;  %v2794_v13 = vor.u32 %v3317_v4, %v2793_v3 }
  0xc1   : > { %v3381_v8 = vld [vmem:[%s5599_s2 + $0x234] sm:$0xf0] }
  0xc2   : > { %1353 = vmatpush.bf16.msrb.mxu2 %v2954_v15  ;;  %1366 = vmatpush.bf16.msrb.mxu3 %v3210_v17  ;;  %v3050_v14 = vor.u32 %v3381_v8, %v3049_v7  ;;  %v2798_v15 = vor.u32 %v3313_v9, %v2795_v10  ;;  %v3054_v17 = vor.u32 %v3377_v11, %v3051_v12 }
  0xc3   : > { %1379 = vmatpush.bf16.msra.mxu0 %v2958_v20  ;;  %1392 = vmatpush.bf16.msra.mxu1 %v3214_v21 }
  0xc6   : > { %1354 = vmatpush.bf16.msrb.mxu2 %v2922_v29  ;;  %1367 = vmatpush.bf16.msrb.mxu3 %v3178_v30 }
  0xc7   : > { %1380 = vmatpush.bf16.msra.mxu0 %v2926_v33  ;;  %1393 = vmatpush.bf16.msra.mxu1 %v3182_v34 }
  0xca   : > { %1355 = vmatpush.bf16.msrb.mxu2 %v2890_v41  ;;  %1368 = vmatpush.bf16.msrb.mxu3 %v3146_v42 }
  0xcb   : > { %1381 = vmatpush.bf16.msra.mxu0 %v2894_v45  ;;  %1394 = vmatpush.bf16.msra.mxu1 %v3150_v46 }
  0xce   : > { %1356 = vmatpush.bf16.msrb.mxu2 %v2858_v53  ;;  %1369 = vmatpush.bf16.msrb.mxu3 %v3114_v54 }
  0xcf   : > { %1382 = vmatpush.bf16.msra.mxu0 %v2862_v57  ;;  %1395 = vmatpush.bf16.msra.mxu1 %v3118_v58 }
  0xd2   : > { %1357 = vmatpush.bf16.msrb.mxu2 %v2826_v1  ;;  %1370 = vmatpush.bf16.msrb.mxu3 %v3082_v2  ;;  %v3471_v2 = vmov 0  }
  0xd3   : > { %1383 = vmatpush.bf16.msra.mxu0 %v2830_v5  ;;  %1396 = vmatpush.bf16.msra.mxu1 %v3086_v6 }
  0xd4   : > { %3455 = vset.pattern.permute.xlu0 %v3471_v2  ;;  %3457 = vset.pattern.permute.xlu1 %v3471_v2 }
  0xd5   : > { %3456 = vset.pattern.permute.xlu2 %v3471_v2 }
  0xd6   : > { %1358 = vmatpush.bf16.msrb.mxu2 %v2794_v13  ;;  %1371 = vmatpush.bf16.msrb.mxu3 %v3050_v14 }
  0xd7   : > { %1384 = vmatpush.bf16.msra.mxu0 %v2798_v15  ;;  %1397 = vmatpush.bf16.msra.mxu1 %v3054_v17 }
  0xd9   : > { %1359 = vmatmul.bf16.vlgmr.msrb.gmra.mxu2 %v3967_v16  ;;  %1372 = vmatmul.bf16.vlgmr.msrb.gmra.mxu3 %v3975_v22 }
  0xda   : > { %1385 = vmatmul.bf16.vlgmr.msra.gmra.mxu0 %v3967_v16  ;;  %1398 = vmatmul.bf16.vlgmr.msra.gmra.mxu1 %v3975_v22 }
 0x115   : > { %v1243_v19 = vpop.f32.mrf.mxu1 }
 0x116   : > { %v1230_v18 = vpop.f32.mrf.mxu0 }
 0x117   : > { %v4349_v42 = vadd.f32 %v1243_v19, %v1230_v18 }
 0x11b   : > { %v1217_v21 = vpop.f32.mrf.mxu3 }
 0x11c   : > { %v1204_v20 = vpop.f32.mrf.mxu2 }
 0x11d   : > { %v1245_v24 = vpop.f32.mrf.mxu1  ;;  %v4347_v41 = vadd.f32 %v1217_v21, %v1204_v20 }
 0x11e   : > { %v1232_v23 = vpop.f32.mrf.mxu0 }
 0x11f   : > { %v1406_v44 = vadd.f32 %v4349_v42, %v4347_v41 }
 0x123   : > { %v1219_v26 = vpop.f32.mrf.mxu3 }
 0x124   : > { %v1206_v25 = vpop.f32.mrf.mxu2 }
 0x125   : > { %v1295_v28 = vpop.f32.mrf.mxu1 }
 0x126   : > { %v1282_v27 = vpop.f32.mrf.mxu0 }
 0x127   : > { %v4356_v46 = vadd.f32 %v1295_v28, %v1282_v27 }
 0x12b   : > { %v1269_v30 = vpop.f32.mrf.mxu3 }
 0x12c   : > { %v1256_v29 = vpop.f32.mrf.mxu2 }
 0x12d   : > { %v1297_v32 = vpop.f32.mrf.mxu1  ;;  %v4351_v43 = vadd.f32 %v1269_v30, %v1256_v29 }
 0x12e   : > { %v1284_v31 = vpop.f32.mrf.mxu0  ;;  %v1404_v32 = vld [vmem:[%s5602_s5] sm:$0xff] }
 0x12f   : > { %v1407_v45 = vadd.f32 %v1406_v44, %v4351_v43  ;;  %1518 = vperm.xlu2 %3456, %v1404_v32  }
 0x131   : > { %v1408_v48 = vadd.f32 %v1407_v45, %v4356_v46 }
 0x133   : > { %v1271_v34 = vpop.f32.mrf.mxu3 }
 0x134   : > { %v1258_v33 = vpop.f32.mrf.mxu2 }
 0x139   : > { %v1334_v35 = vpop.f32.mrf.mxu0  ;;  %v1347_v16 = vpop.f32.mrf.mxu1 }
 0x13a   : > { %v4362_v52 = vadd.f32 %v1347_v16, %v1334_v35 }
 0x13c   : > { %v1308_v36 = vpop.f32.mrf.mxu2  ;;  %v1321_v22 = vpop.f32.mrf.mxu3 }
 0x13d   : > { %v4358_v47 = vadd.f32 %v1321_v22, %v1308_v36 }
 0x13f   : > { %v1409_v51 = vadd.f32 %v1408_v48, %v4358_v47 }
 0x141   : > { %v1336_v37 = vpop.f32.mrf.mxu0  ;;  %v1349_v38 = vpop.f32.mrf.mxu1  ;;  %v1410_v56 = vadd.f32 %v1409_v51, %v4362_v52 }
 0x144   : > { %v1310_v39 = vpop.f32.mrf.mxu2  ;;  %v1323_v40 = vpop.f32.mrf.mxu3 }
 0x145   : > { %v1403_v39 = vld [vmem:[%s5601_s4] sm:$0xff] }
 0x157   : > { %v1386_v49 = vpop.f32.mrf.mxu0  ;;  %v1399_v50 = vpop.f32.mrf.mxu1 }
 0x158   : > { %v4367_v57 = vadd.f32 %v1399_v50, %v1386_v49 }
 0x15c   : > { %v1360_v53 = vpop.f32.mrf.mxu2  ;;  %v1373_v54 = vpop.f32.mrf.mxu3 }
 0x15d   : > { %v4364_v55 = vadd.f32 %v1373_v54, %v1360_v53 }
 0x15f   : > { %v1388_v58 = vpop.f32.mrf.mxu0  ;;  %v1401_v59 = vpop.f32.mrf.mxu1  ;;  %v1411_v60 = vadd.f32 %v1410_v56, %v4364_v55 }
 0x161   : > { %v1412_v61 = vadd.f32 %v1411_v60, %v4367_v57 }
 0x163   : > { %1413 = vadd.xlane.f32.xlu0 %v1412_v61 }
 0x164   : > { %v1362_v62 = vpop.f32.mrf.mxu2  ;;  %v1375_v63 = vpop.f32.mrf.mxu3 }
 0x189   : > { %v4406_v49 = vpop.permute.xlu2 %1518 }
 0x1d6   : > { %v1414_v1 = vpop.xlane.xlu0 %1413 }
 0x1d7   : > { %1434 = vmatpush.msra.mxu2 %v1414_v1 }
 0x1d8   : > { %3279 = vmatmul.msk.f32.vlgmr.msra.gmra.mxu2 %vm1415_vm1, %v1405_v0 }
 0x25b   : > { %v1436_v3 = vpop.f32.mrf.mxu2 }
 0x25c   : > { %v1439_v4 = vmul.f32 0.0009765625, %v1436_v3 }
 0x25e   : > { %1442 = vperm.xlu0 %3455, %v1439_v4  }
 0x2d0   : > { %v1443_v5 = vpop.permute.xlu0 %1442 }
 0x2d1   : > { %v4376_v6 = vsub.f32 %v4347_v41, %v1443_v5  ;;  %v1446_v7 = vsub.f32 %v4349_v42, %v1443_v5  ;;  %v1447_v8 = vsub.f32 %v4351_v43, %v1443_v5  ;;  %v1448_v9 = vsub.f32 %v4356_v46, %v1443_v5 }
 0x2d2   : > { %v1449_v12 = vsub.f32 %v4358_v47, %v1443_v5  ;;  %v4385_v15 = vsub.f32 %v4362_v52, %v1443_v5  ;;  %v4388_v19 = vsub.f32 %v4364_v55, %v1443_v5  ;;  %v4391_v23 = vsub.f32 %v4367_v57, %v1443_v5 }
 0x2d3   : > { %v1453_v10 = vmul.f32 %v4376_v6, %v4376_v6  ;;  %v1454_v11 = vmul.f32 %v1446_v7, %v1446_v7  ;;  %v1455_v13 = vmul.f32 %v1447_v8, %v1447_v8  ;;  %v1456_v17 = vmul.f32 %v1448_v9, %v1448_v9 }
 0x2d4   : > { %v1457_v20 = vmul.f32 %v1449_v12, %v1449_v12  ;;  %v1458_v24 = vmul.f32 %v4385_v15, %v4385_v15  ;;  %v1459_v26 = vmul.f32 %v4388_v19, %v4388_v19  ;;  %v1460_v28 = vmul.f32 %v4391_v23, %v4391_v23 }
 0x2d5   : > { %v1461_v14 = vadd.f32 %v1454_v11, %v1453_v10 }
 0x2d7   : > { %v1462_v18 = vadd.f32 %v1461_v14, %v1455_v13  ;;  %v1553_v13 = vlaneseq }
 0x2d9   : > { %v1463_v21 = vadd.f32 %v1462_v18, %v1456_v17  ;;  %v4513_v17 = vld [vmem:[%s5607_s10 + $0x40] sm:$0xff] }
 0x2da   : > { %v1932_v18 = vperm.slane %v4513_v17, 2 }
 0x2db   : > { %v1464_v25 = vadd.f32 %v1463_v21, %v1457_v20 }
 0x2dd   : > { %v1465_v27 = vadd.f32 %v1464_v25, %v1458_v24 }
 0x2df   : > { %v1466_v29 = vadd.f32 %v1465_v27, %v1459_v26  ;;  %v1930_v26 = vperm.slane %v4513_v17, 0  ;;  %v1931_v27 = vperm.slane %v4513_v17, 1 }
 0x2e1   : > { %v1467_v30 = vadd.f32 %v1466_v29, %v1460_v28  ;;  %v1933_v28 = vperm.slane %v4513_v17, 3 }
 0x2e3   : > { %1468 = vadd.xlane.f32.xlu1 %v1467_v30 }
 0x356   : > { %v1469_v31 = vpop.xlane.xlu1 %1468 }
 0x357   : > { %1485 = vmatpush.msra.mxu3 %v1469_v31 }
 0x358   : > { %3280 = vmatmul.msk.f32.vlgmr.msra.gmra.mxu3 %vm1415_vm1, %v1405_v0 }
 0x3db   : > { %v1487_v33 = vpop.f32.mrf.mxu3 }
 0x3dc   : > { %v1490_v34 = vmul.f32 0.0009765625, %v1487_v33 }
 0x3de   : > { %v1491_v35 = vadd.f32 1e-05, %v1490_v34 }
 0x3e0   : > { %3458 = vrsqrt.f32 %v1491_v35  ;;  %vm1498_vm3 = vweird.f32 %v1491_v35 }
 0x3e6   : > { %v3459_v16 = vpop.eup %3458 }
 0x3e7   : > { %v1493_v36 = vmul.f32 %v3459_v16, %v1491_v35  ;;  %vm1499_vm2 = vweird.f32 %v3459_v16 }
 0x3e8   : > { %vm1500_vm4 = vmor %vm1498_vm3, %vm1499_vm2 }
 0x3e9   : > { %v1494_v22 = vmul.f32 %v3459_v16, %v1493_v36 }
 0x3eb   : > { %v1495_v37 = vmul.f32 0.5, %v1494_v22 }
 0x3ed   : > { %v1496_v38 = vsub.f32 1.5, %v1495_v37 }
 0x3ef   : > { %v1497_v40 = vmul.f32 %v3459_v16, %v1496_v38 }
 0x3f1   : > { %v1501_v44 = vsel %vm1500_vm4, %v3459_v16, %v1497_v40 }
 0x3f2   : > { %v1502_v45 = vmul.f32 %v1501_v44, %v1403_v39 }
 0x3f4   : > { %1505 = vperm.xlu1 %3457, %v1502_v45  }
 0x466   : > { %v1506_v48 = vpop.permute.xlu1 %1505 }
 0x467   : > { %v1510_v50 = vmul.f32 %v1506_v48, %v1447_v8  ;;  %v1512_v51 = vmul.f32 %v1506_v48, %v1449_v12  ;;  %v1509_v56 = vmul.f32 %v1506_v48, %v1446_v7  ;;  %v1511_v58 = vmul.f32 %v1506_v48, %v1448_v9 }
 0x468   : > { %v1508_v63 = vmul.f32 %v1506_v48, %v4376_v6  ;;  %v1515_v4 = vmul.f32 %v1506_v48, %v4391_v23  ;;  %v1514_v7 = vmul.f32 %v1506_v48, %v4388_v19  ;;  %v1513_v10 = vmul.f32 %v1506_v48, %v4385_v15 }
 0x469   : > { %v1523_v53 = vadd.f32 %v4406_v49, %v1510_v50  ;;  %v1525_v54 = vadd.f32 %v4406_v49, %v1512_v51  ;;  %v1522_v61 = vadd.f32 %v4406_v49, %v1509_v56  ;;  %v1524_v62 = vadd.f32 %v4406_v49, %v1511_v58  ;;  %v4573_v50 = vld [vmem:[%s5607_s10 + $0x30] sm:$0xff]  ;;  %v4578_v51 = vld [vmem:[%s5607_s10 + $0x38] sm:$0xff] }
 0x46a   : > { %v1521_v2 = vadd.f32 %v4406_v49, %v1508_v63  ;;  %v1528_v5 = vadd.f32 %v4406_v49, %v1515_v4  ;;  %v1527_v8 = vadd.f32 %v4406_v49, %v1514_v7  ;;  %v1526_v11 = vadd.f32 %v4406_v49, %v1513_v10 }
 0x46b   : > { %v4410_v59 = vmax.f32 %v1523_v53, 0.0  ;;  %v4412_v60 = vmax.f32 %v1525_v54, 0.0  ;;  %v4423_v0 = vmax.f32 %v1522_v61, 0.0  ;;  %v4425_v1 = vmax.f32 %v1524_v62, 0.0 }
 0x46c   : > { %v4434_v3 = vmax.f32 %v1521_v2, 0.0  ;;  %v4474_v6 = vmax.f32 %v1528_v5, 0.0  ;;  %v4484_v9 = vmax.f32 %v1527_v8, 0.0  ;;  %v4500_v12 = vmax.f32 %v1526_v11, 0.0 }
 0x46d   : > { %1854 = vrot.lane.b32.xlu0 %v4410_v59, %s3472_s14  ;;  %1906 = vrot.lane.b32.xlu2 %v4410_v59, %s3473_s15  ;;  %v4508_v15 = vand.u32 127, %v1553_v13  ;;  %v5628_v53 = vperm.slane %v4573_v50, 1  ;;  %v5622_v54 = vperm.slane %v4573_v50, 2  ;;  %v5627_v56 = vperm.slane %v4578_v51, 1 }
 0x46e   : > { %1910 = vrot.lane.b32.xlu1 %v4412_v60, %s3473_s15  ;;  %v5623_v58 = vperm.slane %v4578_v51, 2 }
 0x46f   : > { %vm1918_vm5 = vcmp.lt.s32.totalorder %v4508_v15, 95  ;;  %vm1814_vm7 = vcmp.lt.s32.totalorder %v4508_v15, 97  ;;  %vm1866_vm8 = vcmp.lt.s32.totalorder %v4508_v15, 96  ;;  %vm1762_vm9 = vcmp.lt.s32.totalorder %v4508_v15, 127 }
 0x470   : > { %vm1658_vm10 = vcmp.lt.s32.totalorder %v4508_v15, 31  ;;  %vm1710_vm11 = vcmp.lt.s32.totalorder %v4508_v15, 1  ;;  %vm1555_vm12 = vcmp.lt.s32.totalorder %v4508_v15, 33  ;;  %vm1606_vm13 = vcmp.lt.s32.totalorder %v4508_v15, 32 }
 0x475   : > { %1908 = vrot.lane.b32.xlu2 %v4425_v1, %s3473_s15  ;;  %1800 = vrot.lane.b32.xlu0 %v4423_v0, %s3474_s16 }
 0x476   : > { %1804 = vrot.lane.b32.xlu1 %v4425_v1, %s3474_s16 }
 0x47d   : > { %1852 = vrot.lane.b32.xlu0 %v4423_v0, %s3472_s14  ;;  %1902 = vrot.lane.b32.xlu2 %v4434_v3, %s3473_s15 }
 0x47e   : > { %1798 = vrot.lane.b32.xlu1 %v4434_v3, %s3474_s16 }
 0x485   : > { %1752 = vrot.lane.b32.xlu0 %v4425_v1, %s3475_s19  ;;  %1904 = vrot.lane.b32.xlu2 %v4423_v0, %s3473_s15 }
 0x486   : > { %1850 = vrot.lane.b32.xlu1 %v4434_v3, %s3472_s14 }
 0x48d   : > { %1754 = vrot.lane.b32.xlu0 %v4412_v60, %s3475_s19  ;;  %1802 = vrot.lane.b32.xlu2 %v4410_v59, %s3474_s16 }
 0x48e   : > { %1750 = vrot.lane.b32.xlu1 %v4410_v59, %s3475_s19 }
 0x495   : > { %1696 = vrot.lane.b32.xlu0 %v4423_v0, %s3476_s20  ;;  %1856 = vrot.lane.b32.xlu2 %v4425_v1, %s3472_s14 }
 0x496   : > { %1748 = vrot.lane.b32.xlu1 %v4423_v0, %s3475_s19 }
 0x49d   : > { %1648 = vrot.lane.b32.xlu0 %v4425_v1, %s3477_s21  ;;  %1806 = vrot.lane.b32.xlu2 %v4412_v60, %s3474_s16 }
 0x49e   : > { %1646 = vrot.lane.b32.xlu1 %v4410_v59, %s3477_s21 }
 0x4a5   : > { %1700 = vrot.lane.b32.xlu0 %v4425_v1, %s3476_s20  ;;  %1858 = vrot.lane.b32.xlu2 %v4412_v60, %s3472_s14 }
 0x4a6   : > { %1642 = vrot.lane.b32.xlu1 %v4434_v3, %s3477_s21 }
 0x4ad   : > { %1916 = vrot.lane.b32.xlu0 %v4474_v6, %s3473_s15  ;;  %1746 = vrot.lane.b32.xlu2 %v4434_v3, %s3475_s19 }
 0x4ae   : > { %1694 = vrot.lane.b32.xlu1 %v4434_v3, %s3476_s20 }
 0x4b5   : > { %1592 = vrot.lane.b32.xlu0 %v4423_v0, %s3478_s22  ;;  %1644 = vrot.lane.b32.xlu2 %v4423_v0, %s3477_s21 }
 0x4b6   : > { %1914 = vrot.lane.b32.xlu1 %v4484_v9, %s3473_s15 }
 0x4bd   : > { %1537 = vrot.lane.b32.xlu0 %v4434_v3, %s3479_s23  ;;  %1698 = vrot.lane.b32.xlu2 %v4410_v59, %s3476_s20 }
 0x4be   : > { %1541 = vrot.lane.b32.xlu1 %v4410_v59, %s3479_s23 }
 0x4c5   : > { %1590 = vrot.lane.b32.xlu0 %v4434_v3, %s3478_s22  ;;  %1656 = vrot.lane.b32.xlu2 %v4474_v6, %s3477_s21 }
 0x4c6   : > { %1912 = vrot.lane.b32.xlu1 %v4500_v12, %s3473_s15 }
 0x4c7   : > { %v1907_v14 = vpop.permute.xlu2 %1906 }
 0x4cd   : > { %1810 = vrot.lane.b32.xlu0 %v4484_v9, %s3474_s16  ;;  %1708 = vrot.lane.b32.xlu2 %v4474_v6, %s3476_s20 }
 0x4ce   : > { %1551 = vrot.lane.b32.xlu1 %v4474_v6, %s3479_s23 }
 0x4cf   : > { %v1909_v19 = vpop.permute.xlu2 %1908 }
 0x4d0   : > { %v1923_v20 = vsel %vm1918_vm5, %v1907_v14, %v1909_v19 }
 0x4d1   : > { %v1948_v21 = vmul.f32 %v1932_v18, %v1923_v20  ;;  %v1826_v20 = vperm.slane %v4573_v50, 0 }
 0x4d3   : > { %v1988_v23 = vpack.c.bf16 %v1948_v21, %v1948_v21  ;;  %v1878_v21 = vperm.slane %v4578_v51, 0 }
 0x4d5   : > { %1864 = vrot.lane.b32.xlu0 %v4474_v6, %s3472_s14  ;;  %1539 = vrot.lane.b32.xlu2 %v4423_v0, %s3479_s23  ;;  %v2007_v24 = vsel %vm1999_vm6, %v1988_v23, 0 }
 0x4d6   : > { %1604 = vrot.lane.b32.xlu1 %v4474_v6, %s3478_s22  ;;  %2053 = vmatpush.bf16.msrb.mxu2 %v2007_v24 }
 0x4d7   : > { %v4534_v25 = vpop.permute.xlu2 %1902 }
 0x4dd   : > { %1758 = vrot.lane.b32.xlu0 %v4484_v9, %s3475_s19  ;;  %1594 = vrot.lane.b32.xlu2 %v4410_v59, %s3478_s22 }
 0x4de   : > { %1862 = vrot.lane.b32.xlu1 %v4484_v9, %s3472_s14 }
 0x4df   : > { %v1855_v29 = vpop.permute.xlu0 %1854  ;;  %v1905_v30 = vpop.permute.xlu2 %1904 }
 0x4e0   : > { %v4545_v31 = vpop.permute.xlu1 %1910  ;;  %v1924_v32 = vsel %vm1918_vm5, %v1905_v30, %v1907_v14  ;;  %v1925_v33 = vsel %vm1918_vm5, %v4534_v25, %v1905_v30 }
 0x4e1   : > { %v1922_v34 = vsel %vm1918_vm5, %v1909_v19, %v4545_v31  ;;  %v1946_v35 = vmul.f32 %v1930_v26, %v1925_v33  ;;  %v1947_v16 = vmul.f32 %v1931_v27, %v1924_v32 }
 0x4e2   : > { %v1949_v36 = vmul.f32 %v1933_v28, %v1922_v34 }
 0x4e3   : > { %v1986_v22 = vpack.c.bf16 %v1946_v35, %v1946_v35  ;;  %v1987_v37 = vpack.c.bf16 %v1947_v16, %v1947_v16  ;;  %v4635_v35 = vld [vmem:[%s5607_s10 + $0x28] sm:$0xff] }
 0x4e4   : > { %v1989_v38 = vpack.c.bf16 %v1949_v36, %v1949_v36  ;;  %v5621_v36 = vperm.slane %v4573_v50, 3 }
 0x4e5   : > { %1652 = vrot.lane.b32.xlu0 %v4500_v12, %s3477_s21  ;;  %1543 = vrot.lane.b32.xlu2 %v4425_v1, %s3479_s23  ;;  %v2001_v39 = vsel %vm1999_vm6, %v1986_v22, 0  ;;  %v2004_v40 = vsel %vm1999_vm6, %v1987_v37, 0  ;;  %v5620_v22 = vperm.slane %v4578_v51, 3 }
 0x4e6   : > { %1860 = vrot.lane.b32.xlu1 %v4500_v12, %s3472_s14  ;;  %2027 = vmatpush.bf16.msrb.mxu0 %v2001_v39  ;;  %v2010_v44 = vsel %vm1999_vm6, %v1989_v38, 0  ;;  %v5617_v38 = vperm.slane %v4635_v35, 2  ;;  %v5613_v39 = vperm.slane %v4635_v35, 3 }
 0x4e7   : > { %2040 = vmatpush.bf16.msrb.mxu1 %v2004_v40  ;;  %2066 = vmatpush.bf16.msrb.mxu3 %v2010_v44  ;;  %v1801_v45 = vpop.permute.xlu0 %1800  ;;  %v1803_v48 = vpop.permute.xlu2 %1802 }
 0x4e8   : > { %v1805_v49 = vpop.permute.xlu1 %1804  ;;  %v1820_v62 = vsel %vm1814_vm7, %v1801_v45, %v1803_v48 }
 0x4e9   : > { %v1819_v61 = vsel %vm1814_vm7, %v1803_v48, %v1805_v49  ;;  %v1843_v8 = vmul.f32 %v5628_v53, %v1820_v62 }
 0x4ea   : > { %v1844_v10 = vmul.f32 %v5622_v54, %v1819_v61 }
 0x4ed   : > { %1706 = vrot.lane.b32.xlu0 %v4484_v9, %s3476_s20  ;;  %1596 = vrot.lane.b32.xlu2 %v4425_v1, %s3478_s22 }
 0x4ee   : > { %1756 = vrot.lane.b32.xlu1 %v4500_v12, %s3475_s19 }
 0x4ef   : > { %v1853_v63 = vpop.permute.xlu0 %1852  ;;  %v1857_v2 = vpop.permute.xlu2 %1856 }
 0x4f0   : > { %v1872_v4 = vsel %vm1866_vm8, %v1853_v63, %v1855_v29  ;;  %v4598_v5 = vpop.permute.xlu1 %1798  ;;  %v1871_v7 = vsel %vm1866_vm8, %v1855_v29, %v1857_v2 }
 0x4f1   : > { %v1895_v11 = vmul.f32 %v5627_v56, %v1872_v4  ;;  %v1896_v13 = vmul.f32 %v5623_v58, %v1871_v7  ;;  %v1821_v23 = vsel %vm1814_vm7, %v4598_v5, %v1801_v45 }
 0x4f2   : > { %v1842_v33 = vmul.f32 %v1826_v20, %v1821_v23 }
 0x4f3   : > { %v1979_v14 = vpack.c.bf16 %v1895_v11, %v1843_v8  ;;  %v1980_v19 = vpack.c.bf16 %v1896_v13, %v1844_v10  ;;  %v5624_v11 = vperm.slane %v4635_v35, 0 }
 0x4f5   : > { %1547 = vrot.lane.b32.xlu0 %v4500_v12, %s3479_s23  ;;  %1812 = vrot.lane.b32.xlu2 %v4474_v6, %s3474_s16 }
 0x4f6   : > { %1704 = vrot.lane.b32.xlu1 %v4500_v12, %s3476_s20  ;;  %2041 = vmatpush.bf16.msrb.mxu1 %v1979_v14 }
 0x4f7   : > { %2054 = vmatpush.bf16.msrb.mxu2 %v1980_v19  ;;  %v1753_v24 = vpop.permute.xlu0 %1752  ;;  %v4621_v29 = vpop.permute.xlu2 %1806 }
 0x4f8   : > { %v4623_v30 = vpop.permute.xlu1 %1850  ;;  %v1818_v37 = vsel %vm1814_vm7, %v1805_v49, %v4621_v29 }
 0x4f9   : > { %v1873_v32 = vsel %vm1866_vm8, %v4623_v30, %v1853_v63  ;;  %v1845_v61 = vmul.f32 %v5621_v36, %v1818_v37 }
 0x4fa   : > { %v1894_v34 = vmul.f32 %v1878_v21, %v1873_v32 }
 0x4fc   : > { %v1978_v16 = vpack.c.bf16 %v1894_v34, %v1842_v33 }
 0x4fd   : > { %1602 = vrot.lane.b32.xlu0 %v4484_v9, %s3478_s22  ;;  %1808 = vrot.lane.b32.xlu2 %v4500_v12, %s3474_s16 }
 0x4fe   : > { %1702 = vrot.lane.b32.xlu1 %v4412_v60, %s3476_s20  ;;  %2028 = vmatpush.bf16.msrb.mxu0 %v1978_v16 }
 0x4ff   : > { %v4651_v40 = vpop.permute.xlu0 %1754  ;;  %v4653_v44 = vpop.permute.xlu2 %1858 }
 0x500   : > { %v1766_v45 = vsel %vm1762_vm9, %v1753_v24, %v4651_v40  ;;  %v1751_v48 = vpop.permute.xlu1 %1750  ;;  %v1870_v49 = vsel %vm1866_vm8, %v1857_v2, %v4653_v44  ;;  %v5625_v2 = vperm.slane %v4635_v35, 1 }
 0x501   : > { %v1767_v62 = vsel %vm1762_vm9, %v1751_v48, %v1753_v24  ;;  %v1897_v63 = vmul.f32 %v5620_v22, %v1870_v49  ;;  %v1793_v7 = vmul.f32 %v5613_v39, %v1766_v45 }
 0x502   : > { %v1792_v4 = vmul.f32 %v5617_v38, %v1767_v62  ;;  %v1935_v38 = vperm.slane %v4513_v17, 5 }
 0x503   : > { %v1981_v8 = vpack.c.bf16 %v1897_v63, %v1845_v61  ;;  %v1973_v19 = vpack.c.bf16 %v1793_v7, %v4425_v1 }
 0x504   : > { %v1972_v10 = vpack.c.bf16 %v1792_v4, %v4410_v59 }
 0x505   : > { %1760 = vrot.lane.b32.xlu2 %v4474_v6, %s3475_s19  ;;  %2067 = vmatpush.bf16.msrb.mxu3 %v1981_v8 }
 0x506   : > { %1600 = vrot.lane.b32.xlu1 %v4500_v12, %s3478_s22  ;;  %2055 = vmatpush.bf16.msrb.mxu2 %v1972_v10 }
 0x507   : > { %v1697_v13 = vpop.permute.xlu0 %1696  ;;  %v4678_v14 = vpop.permute.xlu2 %1746 }
 0x508   : > { %v1749_v23 = vpop.permute.xlu1 %1748 }
 0x509   : > { %v1768_v59 = vsel %vm1762_vm9, %v1749_v23, %v1751_v48  ;;  %v1769_v24 = vsel %vm1762_vm9, %v4678_v14, %v1749_v23  ;;  %2068 = vmatpush.bf16.msrb.mxu3 %v1973_v19  ;;  %v4701_v48 = vld [vmem:[%s5607_s10 + $0x10] sm:$0xff] }
 0x50a   : > { %v1791_v32 = vmul.f32 %v5625_v2, %v1768_v59  ;;  %v1790_v33 = vmul.f32 %v5624_v11, %v1769_v24  ;;  %v5611_v49 = vperm.slane %v4701_v48, 2 }
 0x50c   : > { %v1970_v34 = vpack.c.bf16 %v1790_v33, %v4434_v3  ;;  %v1971_v16 = vpack.c.bf16 %v1791_v32, %v4423_v0  ;;  %v4706_v0 = vld [vmem:[%s5607_s10 + $0x18] sm:$0xff]  ;;  %v5609_v3 = vperm.slane %v4701_v48, 3 }
 0x50d   : > { %1654 = vrot.lane.b32.xlu2 %v4484_v9, %s3477_s21  ;;  %v5612_v61 = vperm.slane %v4706_v0, 2  ;;  %v5610_v62 = vperm.slane %v4706_v0, 3 }
 0x50e   : > { %1598 = vrot.lane.b32.xlu1 %v4412_v60, %s3478_s22  ;;  %2029 = vmatpush.bf16.msrb.mxu0 %v1970_v34 }
 0x50f   : > { %2042 = vmatpush.bf16.msrb.mxu1 %v1971_v16  ;;  %v4696_v1 = vpop.permute.xlu0 %1648  ;;  %v1645_v37 = vpop.permute.xlu2 %1644 }
 0x510   : > { %v1647_v45 = vpop.permute.xlu1 %1646 }
 0x511   : > { %v1663_v63 = vsel %vm1658_vm10, %v1647_v45, %v4696_v1  ;;  %v1664_v4 = vsel %vm1658_vm10, %v1645_v37, %v1647_v45  ;;  %v5618_v45 = vperm.slane %v4701_v48, 1 }
 0x512   : > { %v1689_v59 = vmul.f32 %v5609_v3, %v1663_v63  ;;  %v1688_v24 = vmul.f32 %v5611_v49, %v1664_v4  ;;  %v5616_v63 = vperm.slane %v4706_v0, 1 }
 0x515   : > { %1650 = vrot.lane.b32.xlu2 %v4412_v60, %s3477_s21 }
 0x517   : > { %v4721_v7 = vpop.permute.xlu0 %1700  ;;  %v1699_v8 = vpop.permute.xlu2 %1698 }
 0x518   : > { %v1643_v10 = vpop.permute.xlu1 %1642  ;;  %v1715_v19 = vsel %vm1710_vm11, %v1699_v8, %v4721_v7  ;;  %v1716_v23 = vsel %vm1710_vm11, %v1697_v13, %v1699_v8 }
 0x519   : > { %v1740_v32 = vmul.f32 %v5612_v61, %v1716_v23  ;;  %v1741_v33 = vmul.f32 %v5610_v62, %v1715_v19  ;;  %v1665_v4 = vsel %vm1658_vm10, %v1643_v10, %v1645_v37  ;;  %v5614_v37 = vperm.slane %v4706_v0, 0 }
 0x51b   : > { %v1964_v34 = vpack.c.bf16 %v1740_v32, %v1688_v24  ;;  %v1965_v16 = vpack.c.bf16 %v1741_v33, %v1689_v59  ;;  %v1687_v59 = vmul.f32 %v5618_v45, %v1665_v4  ;;  %v5615_v33 = vperm.slane %v4701_v48, 0 }
 0x51d   : > { %1549 = vrot.lane.b32.xlu2 %v4484_v9, %s3479_s23  ;;  %2056 = vmatpush.bf16.msrb.mxu2 %v1964_v34 }
 0x51e   : > { %2069 = vmatpush.bf16.msrb.mxu3 %v1965_v16 }
 0x51f   : > { %v4742_v8 = vpop.permute.xlu0 %1916  ;;  %v4744_v23 = vpop.permute.xlu2 %1656 }
 0x520   : > { %v1695_v3 = vpop.permute.xlu1 %1694  ;;  %v1666_v34 = vsel %vm1658_vm10, %v4744_v23, %v1643_v10  ;;  %v5619_v10 = vperm.slane %v4513_v17, 6 }
 0x521   : > { %v1717_v19 = vsel %vm1710_vm11, %v1695_v3, %v1697_v13 }
 0x522   : > { %v1739_v24 = vmul.f32 %v5616_v63, %v1717_v19 }
 0x524   : > { %v1963_v32 = vpack.c.bf16 %v1739_v24, %v1687_v59  ;;  %v1686_v59 = vmul.f32 %v5615_v33, %v1666_v34 }
 0x525   : > { %1545 = vrot.lane.b32.xlu2 %v4412_v60, %s3479_s23 }
 0x526   : > { %2043 = vmatpush.bf16.msrb.mxu1 %v1963_v32 }
 0x527   : > { %v1593_v13 = vpop.permute.xlu0 %1592  ;;  %v4759_v16 = vpop.permute.xlu2 %1708 }
 0x528   : > { %v1915_v4 = vpop.permute.xlu1 %1914  ;;  %v1718_v19 = vsel %vm1710_vm11, %v4759_v16, %v1695_v3  ;;  %v4775_v3 = vld [vmem:[%s5607_s10] sm:$0xff] }
 0x529   : > { %v1738_v24 = vmul.f32 %v5614_v37, %v1718_v19  ;;  %v1919_v39 = vsel %vm1918_vm5, %v1915_v4, %v4742_v8  ;;  %v5626_v19 = vperm.slane %v4775_v3, 1 }
 0x52a   : > { %v1952_v34 = vmul.f32 %v5619_v10, %v1919_v39 }
 0x52b   : > { %v1962_v62 = vpack.c.bf16 %v1738_v24, %v1686_v59  ;;  %v5629_v59 = vperm.slane %v4775_v3, 2 }
 0x52c   : > { %v1992_v10 = vpack.c.bf16 %v1952_v34, %v1952_v34 }
 0x52d   : > { %2030 = vmatpush.bf16.msrb.mxu0 %v1962_v62  ;;  %v4781_v62 = vld [vmem:[%s5607_s10 + $0x8] sm:$0xff] }
 0x52e   : > { %v5632_v37 = vperm.slane %v4781_v62, 1  ;;  %v5631_v33 = vperm.slane %v4781_v62, 2 }
 0x52f   : > { %v1538_v49 = vpop.permute.xlu0 %1537  ;;  %v1540_v61 = vpop.permute.xlu2 %1539 }
 0x530   : > { %v1542_v32 = vpop.permute.xlu1 %1541  ;;  %v1562_v24 = vsel %vm1555_vm12, %v1538_v49, %v1540_v61 }
 0x531   : > { %v1561_v63 = vsel %vm1555_vm12, %v1540_v61, %v1542_v32  ;;  %v1583_v22 = vmul.f32 %v5626_v19, %v1562_v24 }
 0x532   : > { %v1584_v11 = vmul.f32 %v5629_v59, %v1561_v63 }
 0x537   : > { %v1591_v45 = vpop.permute.xlu0 %1590  ;;  %v1595_v39 = vpop.permute.xlu2 %1594 }
 0x538   : > { %v1613_v36 = vsel %vm1606_vm13, %v1591_v45, %v1593_v13  ;;  %v1913_v54 = vpop.permute.xlu1 %1912  ;;  %v1612_v58 = vsel %vm1606_vm13, %v1593_v13, %v1595_v39  ;;  %v2019_v13 = vsel %vm1999_vm6, %v1992_v10, 0  ;;  %v1621_v10 = vperm.slane %v4781_v62, 3 }
 0x539   : > { %v1635_v61 = vmul.f32 %v5632_v37, %v1613_v36  ;;  %v1920_v2 = vsel %vm1918_vm5, %v1913_v54, %v1915_v4  ;;  %v1636_v34 = vmul.f32 %v5631_v33, %v1612_v58  ;;  %v5630_v58 = vperm.slane %v4513_v17, 7 }
 0x53a   : > { %v1951_v24 = vmul.f32 %v1935_v38, %v1920_v2 }
 0x53b   : > { %v1955_v19 = vpack.c.bf16 %v1635_v61, %v1583_v22  ;;  %v1956_v56 = vpack.c.bf16 %v1636_v34, %v1584_v11  ;;  %v1926_v22 = vsel %vm1918_vm5, %v4742_v8, %v4534_v25  ;;  %v5633_v11 = vperm.slane %v4775_v3, 3 }
 0x53c   : > { %v1991_v53 = vpack.c.bf16 %v1951_v24, %v1951_v24  ;;  %v1953_v2 = vmul.f32 %v5630_v58, %v1926_v22  ;;  %v1566_v61 = vperm.slane %v4775_v3, 0  ;;  %v1618_v8 = vperm.slane %v4781_v62, 0 }
 0x53d   : > { %2044 = vmatpush.bf16.msrb.mxu1 %v1955_v19  ;;  %2057 = vmatpush.bf16.msrb.mxu2 %v1956_v56  ;;  %v1934_v56 = vperm.slane %v4513_v17, 4 }
 0x53e   : > { %v2016_v63 = vsel %vm1999_vm6, %v1991_v53, 0  ;;  %v1921_v53 = vsel %vm1918_vm5, %v4545_v31, %v1913_v54 }
 0x53f   : > { %v4813_v36 = vpop.permute.xlu0 %1810  ;;  %v4815_v4 = vpop.permute.xlu2 %1543  ;;  %v1950_v19 = vmul.f32 %v1934_v56, %v1921_v53 }
 0x540   : > { %v4817_v59 = vpop.permute.xlu1 %1551  ;;  %v1560_v25 = vsel %vm1555_vm12, %v1542_v32, %v4815_v4 }
 0x541   : > { %2105 = vmatpush.bf16.msra.mxu2 %v2019_v13  ;;  %2092 = vmatpush.bf16.msra.mxu1 %v2016_v63  ;;  %v1563_v31 = vsel %vm1555_vm12, %v4817_v59, %v1538_v49  ;;  %v1993_v63 = vpack.c.bf16 %v1953_v2, %v1953_v2  ;;  %v1585_v22 = vmul.f32 %v5633_v11, %v1560_v25  ;;  %v5634_v2 = vperm.slane %v4578_v51, 7 }
 0x542   : > { %v1990_v53 = vpack.c.bf16 %v1950_v19, %v1950_v19  ;;  %v1582_v58 = vmul.f32 %v1566_v61, %v1563_v31  ;;  %v5637_v11 = vperm.slane %v4573_v50, 6 }
 0x543   : > { %v2022_v25 = vsel %vm1999_vm6, %v1993_v63, 0 }
 0x544   : > { %v2013_v31 = vsel %vm1999_vm6, %v1990_v53, 0 }
 0x547   : > { %v1865_v54 = vpop.permute.xlu0 %1864  ;;  %v4842_v34 = vpop.permute.xlu2 %1596 }
 0x548   : > { %v4844_v24 = vpop.permute.xlu1 %1604  ;;  %v1611_v13 = vsel %vm1606_vm13, %v1595_v39, %v4842_v34  ;;  %v1874_v19 = vsel %vm1866_vm8, %v1865_v54, %v4623_v30 }
 0x549   : > { %v1614_v32 = vsel %vm1606_vm13, %v4844_v24, %v1591_v45  ;;  %v1637_v49 = vmul.f32 %v1621_v10, %v1611_v13  ;;  %v5635_v45 = vperm.slane %v4573_v50, 7  ;;  %v5636_v13 = vperm.slane %v4578_v51, 6 }
 0x54a   : > { %v1634_v33 = vmul.f32 %v1618_v8, %v1614_v32  ;;  %v1901_v32 = vmul.f32 %v5634_v2, %v1874_v19  ;;  %v1830_v19 = vperm.slane %v4573_v50, 4 }
 0x54b   : > { %v1957_v37 = vpack.c.bf16 %v1637_v49, %v1585_v22 }
 0x54c   : > { %v1954_v39 = vpack.c.bf16 %v1634_v33, %v1582_v58  ;;  %v4872_v33 = vld [vmem:[%s5603_s6] sm:$0xf] }
 0x54d   : > { %2070 = vmatpush.bf16.msrb.mxu3 %v1957_v37  ;;  %3290 = vmatmul.msk.bf16.vlgmr.msrb.gmra.mxu2 %vm1995_vm14, %v4872_v33 }
 0x54e   : > { %2031 = vmatpush.bf16.msrb.mxu0 %v1954_v39  ;;  %3289 = vmatmul.msk.bf16.vlgmr.msrb.gmra.mxu1 %vm1995_vm14, %v4872_v33 }
 0x54f   : > { %v1759_v37 = vpop.permute.xlu0 %1758  ;;  %v1813_v58 = vpop.permute.xlu2 %1812 }
 0x550   : > { %v1863_v63 = vpop.permute.xlu1 %1862  ;;  %v1815_v30 = vsel %vm1814_vm7, %v4813_v36, %v1813_v58  ;;  %v1822_v22 = vsel %vm1814_vm7, %v1813_v58, %v4598_v5  ;;  %3291 = vmatmul.msk.bf16.vlgmr.msrb.gmra.mxu3 %vm1995_vm14, %v4872_v33  ;;  %v1831_v58 = vperm.slane %v4573_v50, 5 }
 0x551   : > { %2118 = vmatpush.bf16.msra.mxu3 %v2022_v25  ;;  %v1867_v49 = vsel %vm1866_vm8, %v1863_v63, %v1865_v54  ;;  %v1848_v53 = vmul.f32 %v5637_v11, %v1815_v30  ;;  %v1849_v39 = vmul.f32 %v5635_v45, %v1822_v22  ;;  %3288 = vmatmul.msk.bf16.vlgmr.msrb.gmra.mxu0 %vm1995_vm14, %v4872_v33  ;;  %v1882_v54 = vperm.slane %v4578_v51, 4 }
 0x552   : > { %2079 = vmatpush.bf16.msra.mxu0 %v2013_v31  ;;  %v1900_v5 = vmul.f32 %v5636_v13, %v1867_v49  ;;  %v1883_v30 = vperm.slane %v4578_v51, 5 }
 0x553   : > { %v1985_v25 = vpack.c.bf16 %v1901_v32, %v1849_v39 }
 0x554   : > { %v1984_v31 = vpack.c.bf16 %v1900_v5, %v1848_v53 }
 0x555   : > { %2119 = vmatpush.bf16.msra.mxu3 %v1985_v25 }
 0x556   : > { %2106 = vmatpush.bf16.msra.mxu2 %v1984_v31 }
 0x557   : > { %v4902_v2 = vpop.permute.xlu0 %1652  ;;  %v1809_v22 = vpop.permute.xlu2 %1808 }
 0x558   : > { %v1861_v45 = vpop.permute.xlu1 %1860  ;;  %v1816_v49 = vsel %vm1814_vm7, %v1809_v22, %v4813_v36  ;;  %v1817_v32 = vsel %vm1814_vm7, %v4621_v29, %v1809_v22 }
 0x559   : > { %v1868_v53 = vsel %vm1866_vm8, %v1861_v45, %v1863_v63  ;;  %v1869_v39 = vsel %vm1866_vm8, %v4653_v44, %v1861_v45  ;;  %v1846_v5 = vmul.f32 %v1830_v19, %v1817_v32  ;;  %v1847_v25 = vmul.f32 %v1831_v58, %v1816_v49 }
 0x55a   : > { %v1898_v36 = vmul.f32 %v1882_v54, %v1869_v39  ;;  %v1899_v31 = vmul.f32 %v1883_v30, %v1868_v53  ;;  %v1780_v63 = vperm.slane %v4635_v35, 6  ;;  %v1778_v44 = vperm.slane %v4635_v35, 4 }
 0x55b   : > { %v1779_v45 = vperm.slane %v4635_v35, 5  ;;  %v5654_v32 = vperm.slane %v4635_v35, 7 }
 0x55c   : > { %v1982_v29 = vpack.c.bf16 %v1898_v36, %v1846_v5  ;;  %v1983_v22 = vpack.c.bf16 %v1899_v31, %v1847_v25 }
 0x55e   : > { %2080 = vmatpush.bf16.msra.mxu0 %v1982_v29  ;;  %2093 = vmatpush.bf16.msra.mxu1 %v1983_v22 }
 0x55f   : > { %v1707_v13 = vpop.permute.xlu0 %1706  ;;  %v1761_v49 = vpop.permute.xlu2 %1760 }
 0x560   : > { %v1757_v11 = vpop.permute.xlu1 %1756  ;;  %v1763_v39 = vsel %vm1762_vm9, %v1759_v37, %v1761_v49  ;;  %v1770_v53 = vsel %vm1762_vm9, %v1761_v49, %v4678_v14 }
 0x561   : > { %v1764_v5 = vsel %vm1762_vm9, %v1757_v11, %v1759_v37  ;;  %v1765_v25 = vsel %vm1762_vm9, %v4651_v40, %v1757_v11  ;;  %v1796_v36 = vmul.f32 %v1780_v63, %v1763_v39  ;;  %v1797_v22 = vmul.f32 %v5654_v32, %v1770_v53 }
 0x562   : > { %v1794_v31 = vmul.f32 %v1778_v44, %v1765_v25  ;;  %v1795_v29 = vmul.f32 %v1779_v45, %v1764_v5  ;;  %v5638_v11 = vperm.slane %v4706_v0, 7  ;;  %v5647_v39 = vperm.slane %v4701_v48, 6 }
 0x563   : > { %v1976_v14 = vpack.c.bf16 %v1796_v36, %v4484_v9  ;;  %v1977_v40 = vpack.c.bf16 %v1797_v22, %v4474_v6  ;;  %v5646_v25 = vperm.slane %v4701_v48, 7  ;;  %v1711_v5 = vsel %vm1710_vm11, %v1707_v13, %v4759_v16 }
 0x564   : > { %v1974_v37 = vpack.c.bf16 %v1794_v31, %v4412_v60  ;;  %v1975_v49 = vpack.c.bf16 %v1795_v29, %v4500_v12  ;;  %v5639_v9 = vperm.slane %v4706_v0, 6  ;;  %v1745_v36 = vmul.f32 %v5638_v11, %v1711_v5 }
 0x565   : > { %2107 = vmatpush.bf16.msra.mxu2 %v1976_v14  ;;  %2120 = vmatpush.bf16.msra.mxu3 %v1977_v40  ;;  %v5651_v40 = vperm.slane %v4706_v0, 4  ;;  %v5650_v5 = vperm.slane %v4706_v0, 5  ;;  %v5642_v11 = vperm.slane %v4775_v3, 6 }
 0x566   : > { %2081 = vmatpush.bf16.msra.mxu0 %v1974_v37  ;;  %2094 = vmatpush.bf16.msra.mxu1 %v1975_v49  ;;  %v5653_v49 = vperm.slane %v4701_v48, 4 }
 0x567   : > { %v1655_v60 = vpop.permute.xlu2 %1654  ;;  %v1548_v31 = vpop.permute.xlu0 %1547 }
 0x568   : > { %v1705_v12 = vpop.permute.xlu1 %1704  ;;  %v1659_v6 = vsel %vm1658_vm10, %v1655_v60, %v4744_v23  ;;  %v1660_v53 = vsel %vm1658_vm10, %v4902_v2, %v1655_v60 }
 0x569   : > { %v1712_v16 = vsel %vm1710_vm11, %v1705_v12, %v1707_v13  ;;  %v1692_v29 = vmul.f32 %v5647_v39, %v1660_v53  ;;  %v1693_v22 = vmul.f32 %v5646_v25, %v1659_v6  ;;  %v5652_v13 = vperm.slane %v4701_v48, 5 }
 0x56a   : > { %v1744_v23 = vmul.f32 %v5639_v9, %v1712_v16  ;;  %v5645_v9 = vperm.slane %v4775_v3, 5 }
 0x56b   : > { %v1969_v14 = vpack.c.bf16 %v1745_v36, %v1693_v22 }
 0x56c   : > { %v1968_v37 = vpack.c.bf16 %v1744_v23, %v1692_v29 }
 0x56d   : > { %2121 = vmatpush.bf16.msra.mxu3 %v1969_v14 }
 0x56e   : > { %2108 = vmatpush.bf16.msra.mxu2 %v1968_v37 }
 0x56f   : > { %v1651_v60 = vpop.permute.xlu2 %1650 }
 0x570   : > { %v1703_v53 = vpop.permute.xlu1 %1702  ;;  %v1661_v6 = vsel %vm1658_vm10, %v1651_v60, %v4902_v2  ;;  %v1662_v36 = vsel %vm1658_vm10, %v4696_v1, %v1651_v60  ;;  %v1603_v1 = vpop.permute.xlu0 %1602 }
 0x571   : > { %v1713_v16 = vsel %vm1710_vm11, %v1703_v53, %v1705_v12  ;;  %v1714_v29 = vsel %vm1710_vm11, %v4721_v7, %v1703_v53  ;;  %v1690_v22 = vmul.f32 %v5653_v49, %v1662_v36  ;;  %v1691_v14 = vmul.f32 %v5652_v13, %v1661_v6 }
 0x572   : > { %v1742_v23 = vmul.f32 %v5651_v40, %v1714_v29  ;;  %v1743_v2 = vmul.f32 %v5650_v5, %v1713_v16  ;;  %v5640_v12 = vperm.slane %v4781_v62, 7  ;;  %v5641_v7 = vperm.slane %v4775_v3, 7 }
 0x573   : > { %v1607_v53 = vsel %vm1606_vm13, %v1603_v1, %v4844_v24  ;;  %v5643_v36 = vperm.slane %v4781_v62, 6 }
 0x574   : > { %v1966_v37 = vpack.c.bf16 %v1742_v23, %v1690_v22  ;;  %v1967_v60 = vpack.c.bf16 %v1743_v2, %v1691_v14  ;;  %v1641_v23 = vmul.f32 %v5640_v12, %v1607_v53  ;;  %v5649_v53 = vperm.slane %v4781_v62, 4 }
 0x576   : > { %2082 = vmatpush.bf16.msra.mxu0 %v1966_v37  ;;  %2095 = vmatpush.bf16.msra.mxu1 %v1967_v60 }
 0x577   : > { %v1550_v16 = vpop.permute.xlu2 %1549 }
 0x578   : > { %v1601_v29 = vpop.permute.xlu1 %1600  ;;  %v1556_v6 = vsel %vm1555_vm12, %v1550_v16, %v4817_v59  ;;  %v1557_v22 = vsel %vm1555_vm12, %v1548_v31, %v1550_v16  ;;  %v5648_v16 = vperm.slane %v4775_v3, 4 }
 0x579   : > { %v1608_v2 = vsel %vm1606_vm13, %v1601_v29, %v1603_v1  ;;  %v1588_v24 = vmul.f32 %v5642_v11, %v1557_v22  ;;  %v1589_v14 = vmul.f32 %v5641_v7, %v1556_v6  ;;  %v5644_v1 = vperm.slane %v4781_v62, 5 }
 0x57a   : > { %v1640_v37 = vmul.f32 %v5643_v36, %v1608_v2 }
 0x57b   : > { %v1961_v60 = vpack.c.bf16 %v1641_v23, %v1589_v14 }
 0x57c   : > { %v1960_v59 = vpack.c.bf16 %v1640_v37, %v1588_v24 }
 0x57d   : > { %2122 = vmatpush.bf16.msra.mxu3 %v1961_v60 }
 0x57e   : > { %2109 = vmatpush.bf16.msra.mxu2 %v1960_v59 }
 0x57f   : > { %v1546_v12 = vpop.permute.xlu2 %1545 }
 0x580   : > { %v1599_v22 = vpop.permute.xlu1 %1598  ;;  %v1558_v6 = vsel %vm1555_vm12, %v1546_v12, %v1548_v31  ;;  %v1559_v23 = vsel %vm1555_vm12, %v4815_v4, %v1546_v12  ;;  %3295 = vmatmul.msk.bf16.vlgmr.msra.gmra.mxu3 %vm1995_vm14, %v4872_v33 }
 0x581   : > { %v1609_v2 = vsel %vm1606_vm13, %v1599_v22, %v1601_v29  ;;  %v1610_v24 = vsel %vm1606_vm13, %v4842_v34, %v1599_v22  ;;  %v1586_v14 = vmul.f32 %v5648_v16, %v1559_v23  ;;  %v1587_v31 = vmul.f32 %v5645_v9, %v1558_v6  ;;  %3294 = vmatmul.msk.bf16.vlgmr.msra.gmra.mxu2 %vm1995_vm14, %v4872_v33 }
 0x582   : > { %v1638_v4 = vmul.f32 %v5649_v53, %v1610_v24  ;;  %v1639_v12 = vmul.f32 %v5644_v1, %v1609_v2 }
 0x584   : > { %v1958_v29 = vpack.c.bf16 %v1638_v4, %v1586_v14  ;;  %v1959_v37 = vpack.c.bf16 %v1639_v12, %v1587_v31 }
 0x586   : > { %2083 = vmatpush.bf16.msra.mxu0 %v1958_v29  ;;  %2096 = vmatpush.bf16.msra.mxu1 %v1959_v37 }
 0x589   : > { %3292 = vmatmul.msk.bf16.vlgmr.msra.gmra.mxu0 %vm1995_vm14, %v4872_v33  ;;  %3293 = vmatmul.msk.bf16.vlgmr.msra.gmra.mxu1 %vm1995_vm14, %v4872_v33 }
 0x5cb   : > { %v2046_v34 = vpop.f32.mrf.mxu1 }
 0x5ce   : > { %v2033_v60 = vpop.f32.mrf.mxu0 }
 0x5cf   : > { %v2130_v11 = vadd.f32 %v2046_v34, %v2033_v60 }
 0x5d0   : > { %v2059_v59 = vpop.f32.mrf.mxu2 }
 0x5d1   : > { %v2131_v2 = vadd.f32 %v2130_v11, %v2059_v59  ;;  %v3462_v11 = vld [vmem:[%s5600_s3] sm:$0xff] }
 0x5d3   : > { %v2072_v22 = vpop.f32.mrf.mxu3  ;;  %v2048_v6 = vpop.f32.mrf.mxu1 }
 0x5d4   : > { %v2132_v4 = vadd.f32 %v2131_v2, %v2072_v22 }
 0x5d6   : > { %v2035_v23 = vpop.f32.mrf.mxu0 }
 0x5d8   : > { %v2061_v24 = vpop.f32.mrf.mxu2 }
 0x5db   : > { %v2074_v7 = vpop.f32.mrf.mxu3 }
 0x603   : > { %v2124_v14 = vpop.f32.mrf.mxu3 }
 0x604   : > { %v2111_v31 = vpop.f32.mrf.mxu2 }
 0x606   : > { %v2085_v12 = vpop.f32.mrf.mxu0  ;;  %v2098_v29 = vpop.f32.mrf.mxu1 }
 0x607   : > { %v2133_v37 = vadd.f32 %v2132_v4, %v2085_v12 }
 0x609   : > { %v2134_v36 = vadd.f32 %v2133_v37, %v2098_v29 }
 0x60b   : > { %v2126_v1 = vpop.f32.mrf.mxu3  ;;  %v2135_v9 = vadd.f32 %v2134_v36, %v2111_v31  ;;  %v2129_v36 = vld [vmem:[%s5605_s8] sm:$0xff] }
 0x60c   : > { %v2113_v33 = vpop.f32.mrf.mxu2 }
 0x60d   : > { %v2136_v25 = vadd.f32 %v2135_v9, %v2124_v14 }
 0x60e   : > { %v2087_v39 = vpop.f32.mrf.mxu0  ;;  %v2100_v16 = vpop.f32.mrf.mxu1 }
 0x60f   : > { %2137 = vadd.xlane.f32.xlu0 %v2136_v25 }
 0x682   : > { %v2138_v6 = vpop.xlane.xlu0 %2137 }
 0x683   : > { %2154 = vmatpush.msrb.mxu0 %v2138_v6 }
 0x684   : > { %3296 = vmatmul.msk.f32.vlgmr.msrb.gmra.mxu0 %vm1415_vm1, %v3462_v11 }
 0x701   : > { %v2156_v7 = vpop.f32.mrf.mxu0 }
 0x702   : > { %v2159_v23 = vmul.f32 0.0009765625, %v2156_v7 }
 0x704   : > { %2162 = vperm.xlu2 %3456, %v2159_v23  }
 0x70c   : > { %2238 = vperm.xlu2 %3456, %v2129_v36  }
 0x75e   : > { %v2163_v9 = vpop.permute.xlu2 %2162 }
 0x75f   : > { %v2165_v39 = vsub.f32 %v2033_v60, %v2163_v9  ;;  %v2166_v16 = vsub.f32 %v2046_v34, %v2163_v9  ;;  %v2167_v25 = vsub.f32 %v2059_v59, %v2163_v9  ;;  %v2168_v1 = vsub.f32 %v2072_v22, %v2163_v9 }
 0x760   : > { %v2169_v4 = vsub.f32 %v2085_v12, %v2163_v9  ;;  %v5054_v6 = vsub.f32 %v2098_v29, %v2163_v9  ;;  %v5056_v23 = vsub.f32 %v2111_v31, %v2163_v9  ;;  %v5058_v13 = vsub.f32 %v2124_v14, %v2163_v9 }
 0x761   : > { %v2173_v24 = vmul.f32 %v2165_v39, %v2165_v39  ;;  %v2174_v2 = vmul.f32 %v2166_v16, %v2166_v16  ;;  %v2175_v37 = vmul.f32 %v2167_v25, %v2167_v25  ;;  %v2176_v53 = vmul.f32 %v2168_v1, %v2168_v1 }
 0x762   : > { %v2177_v5 = vmul.f32 %v2169_v4, %v2169_v4  ;;  %v2178_v34 = vmul.f32 %v5054_v6, %v5054_v6  ;;  %v2179_v59 = vmul.f32 %v5056_v23, %v5056_v23  ;;  %v2180_v12 = vmul.f32 %v5058_v13, %v5058_v13 }
 0x763   : > { %v2181_v33 = vadd.f32 %v2174_v2, %v2173_v24 }
 0x765   : > { %v2182_v7 = vadd.f32 %v2181_v33, %v2175_v37  ;;  %v2128_v33 = vld [vmem:[%s5604_s7] sm:$0xff] }
 0x767   : > { %v2183_v40 = vadd.f32 %v2182_v7, %v2176_v53 }
 0x769   : > { %v2184_v60 = vadd.f32 %v2183_v40, %v2177_v5 }
 0x76b   : > { %v2185_v22 = vadd.f32 %v2184_v60, %v2178_v34 }
 0x76d   : > { %v2186_v29 = vadd.f32 %v2185_v22, %v2179_v59 }
 0x76f   : > { %v2187_v36 = vadd.f32 %v2186_v29, %v2180_v12 }
 0x771   : > { %2188 = vadd.xlane.f32.xlu1 %v2187_v36 }
 0x7e4   : > { %v2189_v31 = vpop.xlane.xlu1 %2188 }
 0x7e5   : > { %2205 = vmatpush.msrb.mxu1 %v2189_v31 }
 0x7e6   : > { %3297 = vmatmul.msk.f32.vlgmr.msrb.gmra.mxu1 %vm1415_vm1, %v3462_v11  ;;  %v2239_v11 = vpop.permute.xlu2 %2238 }
 0x863   : > { %v2207_v53 = vpop.f32.mrf.mxu1 }
 0x864   : > { %v2210_v14 = vmul.f32 0.0009765625, %v2207_v53 }
 0x866   : > { %v2211_v9 = vadd.f32 1e-05, %v2210_v14 }
 0x868   : > { %3460 = vrsqrt.f32 %v2211_v9  ;;  %vm2218_vm0 = vweird.f32 %v2211_v9 }
 0x86e   : > { %v3461_v24 = vpop.eup %3460 }
 0x86f   : > { %v2213_v40 = vmul.f32 %v3461_v24, %v2211_v9  ;;  %vm2219_vm15 = vweird.f32 %v3461_v24 }
 0x870   : > { %vm2220_vm2 = vmor %vm2218_vm0, %vm2219_vm15 }
 0x871   : > { %v2214_v5 = vmul.f32 %v3461_v24, %v2213_v40 }
 0x873   : > { %v2215_v2 = vmul.f32 0.5, %v2214_v5 }
 0x875   : > { %v2216_v37 = vsub.f32 1.5, %v2215_v2 }
 0x877   : > { %v2217_v7 = vmul.f32 %v3461_v24, %v2216_v37 }
 0x879   : > { %v2221_v34 = vsel %vm2220_vm2, %v3461_v24, %v2217_v7 }
 0x87a   : > { %v2222_v60 = vmul.f32 %v2221_v34, %v2128_v33 }
 0x87c   : > { %2225 = vperm.xlu2 %3456, %v2222_v60  }
 0x8d6   : > { %v2226_v59 = vpop.permute.xlu2 %2225 }
 0x8d7   : > { %v2228_v22 = vmul.f32 %v2226_v59, %v2165_v39  ;;  %v2229_v12 = vmul.f32 %v2226_v59, %v2166_v16  ;;  %v2231_v31 = vmul.f32 %v2226_v59, %v2168_v1  ;;  %v2232_v24 = vmul.f32 %v2226_v59, %v2169_v4 }
 0x8d8   : > { %v2230_v16 = vmul.f32 %v2226_v59, %v2167_v25  ;;  %v2234_v25 = vmul.f32 %v2226_v59, %v5056_v23  ;;  %v2235_v37 = vmul.f32 %v2226_v59, %v5058_v13  ;;  %v2233_v13 = vmul.f32 %v2226_v59, %v5054_v6 }
 0x8d9   : > { %v2241_v29 = vadd.f32 %v2239_v11, %v2228_v22  ;;  %v2242_v36 = vadd.f32 %v2239_v11, %v2229_v12  ;;  %v2244_v9 = vadd.f32 %v2239_v11, %v2231_v31  ;;  %v2245_v1 = vadd.f32 %v2239_v11, %v2232_v24 }
 0x8da   : > { %v2243_v40 = vadd.f32 %v2239_v11, %v2230_v16  ;;  %v2247_v4 = vadd.f32 %v2239_v11, %v2234_v25  ;;  %v2248_v23 = vadd.f32 %v2239_v11, %v2235_v37  ;;  %v2246_v34 = vadd.f32 %v2239_v11, %v2233_v13 }
 0x8db   : > { %v5070_v53 = vmax.f32 %v2241_v29, 0.0  ;;  %v5072_v14 = vmax.f32 %v2242_v36, 0.0  ;;  %v5080_v39 = vmax.f32 %v2244_v9, 0.0  ;;  %v5088_v5 = vmax.f32 %v2245_v1, 0.0 }
 0x8dc   : > { %v5090_v2 = vmax.f32 %v2243_v40, 0.0  ;;  %v5124_v33 = vmax.f32 %v2247_v4, 0.0  ;;  %v5132_v7 = vmax.f32 %v2248_v23, 0.0  ;;  %v5153_v60 = vmax.f32 %v2246_v34, 0.0 }
 0x8dd   : > { %2419 = vrot.lane.b32.xlu1 %v5072_v14, %s3474_s16  ;;  %2417 = vrot.lane.b32.xlu0 %v5070_v53, %s3474_s16 }
 0x8de   : > { %2481 = vrot.lane.b32.xlu2 %v5070_v53, %s3473_s15 }
 0x8e5   : > { %2487 = vrot.lane.b32.xlu1 %v5080_v39, %s3473_s15  ;;  %2451 = vrot.lane.b32.xlu0 %v5072_v14, %s3472_s14 }
 0x8e6   : > { %2483 = vrot.lane.b32.xlu2 %v5072_v14, %s3473_s15 }
 0x8ed   : > { %2387 = vrot.lane.b32.xlu1 %v5072_v14, %s3475_s19  ;;  %2489 = vrot.lane.b32.xlu0 %v5088_v5, %s3473_s15 }
 0x8ee   : > { %2485 = vrot.lane.b32.xlu2 %v5090_v2, %s3473_s15 }
 0x8f5   : > { %2425 = vrot.lane.b32.xlu1 %v5088_v5, %s3474_s16  ;;  %2389 = vrot.lane.b32.xlu0 %v5090_v2, %s3475_s19 }
 0x8f6   : > { %2421 = vrot.lane.b32.xlu2 %v5090_v2, %s3474_s16 }
 0x8fd   : > { %2321 = vrot.lane.b32.xlu1 %v5070_v53, %s3477_s21  ;;  %2455 = vrot.lane.b32.xlu0 %v5080_v39, %s3472_s14 }
 0x8fe   : > { %2449 = vrot.lane.b32.xlu2 %v5070_v53, %s3472_s14 }
 0x905   : > { %2353 = vrot.lane.b32.xlu1 %v5070_v53, %s3476_s20  ;;  %2323 = vrot.lane.b32.xlu0 %v5072_v14, %s3477_s21 }
 0x906   : > { %2453 = vrot.lane.b32.xlu2 %v5090_v2, %s3472_s14 }
 0x90d   : > { %2391 = vrot.lane.b32.xlu1 %v5080_v39, %s3475_s19  ;;  %2355 = vrot.lane.b32.xlu0 %v5072_v14, %s3476_s20 }
 0x90e   : > { %2385 = vrot.lane.b32.xlu2 %v5070_v53, %s3475_s19 }
 0x915   : > { %2493 = vrot.lane.b32.xlu1 %v5124_v33, %s3473_s15  ;;  %2393 = vrot.lane.b32.xlu0 %v5088_v5, %s3475_s19 }
 0x916   : > { %2423 = vrot.lane.b32.xlu2 %v5080_v39, %s3474_s16 }
 0x91d   : > { %2271 = vrot.lane.b32.xlu1 %v5132_v7, %s3479_s23  ;;  %2257 = vrot.lane.b32.xlu0 %v5070_v53, %s3479_s23 }
 0x91e   : > { %2457 = vrot.lane.b32.xlu2 %v5088_v5, %s3472_s14 }
 0x925   : > { %2303 = vrot.lane.b32.xlu1 %v5132_v7, %s3478_s22  ;;  %2289 = vrot.lane.b32.xlu0 %v5070_v53, %s3478_s22 }
 0x926   : > { %2335 = vrot.lane.b32.xlu2 %v5132_v7, %s3477_s21 }
 0x92d   : > { %2357 = vrot.lane.b32.xlu1 %v5090_v2, %s3476_s20  ;;  %2325 = vrot.lane.b32.xlu0 %v5090_v2, %s3477_s21 }
 0x92e   : > { %2367 = vrot.lane.b32.xlu2 %v5132_v7, %s3476_s20 }
 0x935   : > { %2429 = vrot.lane.b32.xlu1 %v5124_v33, %s3474_s16  ;;  %2359 = vrot.lane.b32.xlu0 %v5080_v39, %s3476_s20 }
 0x936   : > { %2491 = vrot.lane.b32.xlu2 %v5153_v60, %s3473_s15 }
 0x938   : > { %v5161_v6 = vpop.permute.xlu2 %2481 }
 0x93d   : > { %2495 = vrot.lane.b32.xlu1 %v5132_v7, %s3473_s15  ;;  %2459 = vrot.lane.b32.xlu0 %v5153_v60, %s3472_s14 }
 0x93e   : > { %2259 = vrot.lane.b32.xlu2 %v5072_v14, %s3479_s23 }
 0x940   : > { %v2484_v11 = vpop.permute.xlu2 %2483 }
 0x941   : > { %v2503_v59 = vsel %vm1918_vm5, %v5161_v6, %v2484_v11 }
 0x942   : > { %v2505_v22 = vmul.f32 %v2503_v59, %v1930_v26 }
 0x944   : > { %v2545_v12 = vpack.c.bf16 %v2505_v22, %v2505_v22 }
 0x945   : > { %2293 = vrot.lane.b32.xlu1 %v5090_v2, %s3478_s22  ;;  %2261 = vrot.lane.b32.xlu0 %v5090_v2, %s3479_s23 }
 0x946   : > { %2291 = vrot.lane.b32.xlu2 %v5072_v14, %s3478_s22  ;;  %v2558_v29 = vsel %vm1999_vm6, %v2545_v12, 0 }
 0x947   : > { %2584 = vmatpush.bf16.msrb.mxu2 %v2558_v29 }
 0x948   : > { %v2486_v36 = vpop.permute.xlu2 %2485 }
 0x949   : > { %v2502_v31 = vsel %vm1918_vm5, %v2484_v11, %v2486_v36 }
 0x94a   : > { %v2506_v26 = vmul.f32 %v2502_v31, %v1931_v27 }
 0x94c   : > { %v2546_v9 = vpack.c.bf16 %v2506_v26, %v2506_v26 }
 0x94d   : > { %2397 = vrot.lane.b32.xlu1 %v5124_v33, %s3475_s19  ;;  %2295 = vrot.lane.b32.xlu0 %v5080_v39, %s3478_s22 }
 0x94e   : > { %2327 = vrot.lane.b32.xlu2 %v5080_v39, %s3477_s21  ;;  %v2561_v24 = vsel %vm1999_vm6, %v2546_v9, 0 }
 0x94f   : > { %2597 = vmatpush.bf16.msrb.mxu3 %v2561_v24  ;;  %v2420_v16 = vpop.permute.xlu1 %2419  ;;  %v5192_v1 = vpop.permute.xlu0 %2417  ;;  %v5655_v24 = vperm.slane %v4573_v50, 1 }
 0x950   : > { %v2422_v40 = vpop.permute.xlu2 %2421  ;;  %v2439_v27 = vsel %vm1814_vm7, %v5192_v1, %v2420_v16 }
 0x951   : > { %v2441_v11 = vmul.f32 %v2439_v27, %v1826_v20  ;;  %v2438_v20 = vsel %vm1814_vm7, %v2420_v16, %v2422_v40  ;;  %v5656_v16 = vperm.slane %v4578_v51, 1 }
 0x952   : > { %v2442_v27 = vmul.f32 %v2438_v20, %v5655_v24  ;;  %v5658_v20 = vperm.slane %v4635_v35, 0 }
 0x955   : > { %2329 = vrot.lane.b32.xlu1 %v5088_v5, %s3477_s21  ;;  %2431 = vrot.lane.b32.xlu0 %v5132_v7, %s3474_s16 }
 0x956   : > { %2427 = vrot.lane.b32.xlu2 %v5153_v60, %s3474_s16  ;;  %s3309_s16 = sshll.u32 %s5702_s18, 6 }
 0x957   : > { %v2488_v25 = vpop.permute.xlu1 %2487  ;;  %v2452_v4 = vpop.permute.xlu0 %2451 }
 0x958   : > { %v2501_v37 = vsel %vm1918_vm5, %v2486_v36, %v2488_v25  ;;  %v5205_v23 = vpop.permute.xlu2 %2449 }
 0x959   : > { %v2507_v13 = vmul.f32 %v2501_v37, %v1932_v18  ;;  %v2471_v34 = vsel %vm1866_vm8, %v5205_v23, %v2452_v4 }
 0x95a   : > { %v2473_v59 = vmul.f32 %v2471_v34, %v1878_v21 }
 0x95b   : > { %v2547_v22 = vpack.c.bf16 %v2507_v13, %v2507_v13 }
 0x95c   : > { %v2537_v12 = vpack.c.bf16 %v2473_v59, %v2441_v11 }
 0x95d   : > { %2363 = vrot.lane.b32.xlu1 %v5153_v60, %s3476_s20  ;;  %2331 = vrot.lane.b32.xlu0 %v5153_v60, %s3477_s21  ;;  %v2564_v18 = vsel %vm1999_vm6, %v2547_v22, 0  ;;  %v5657_v22 = vperm.slane %v4635_v35, 1 }
 0x95e   : > { %2461 = vrot.lane.b32.xlu2 %v5124_v33, %s3472_s14  ;;  %2585 = vmatpush.bf16.msrb.mxu2 %v2537_v12 }
 0x95f   : > { %2610 = vmatpush.bf16.msra.mxu0 %v2564_v18  ;;  %v2388_v29 = vpop.permute.xlu1 %2387  ;;  %v5225_v21 = vpop.permute.xlu0 %2489 }
 0x960   : > { %v2500_v36 = vsel %vm1918_vm5, %v2488_v25, %v5225_v21  ;;  %v2454_v31 = vpop.permute.xlu2 %2453 }
 0x961   : > { %v2508_v26 = vmul.f32 %v2500_v36, %v1933_v28  ;;  %v2470_v9 = vsel %vm1866_vm8, %v2452_v4, %v2454_v31 }
 0x962   : > { %v2474_v37 = vmul.f32 %v2470_v9, %v5656_v16 }
 0x963   : > { %v2548_v13 = vpack.c.bf16 %v2508_v26, %v2508_v26 }
 0x964   : > { %v2538_v34 = vpack.c.bf16 %v2474_v37, %v2442_v27 }
 0x965   : > { %2267 = vrot.lane.b32.xlu1 %v5153_v60, %s3479_s23  ;;  %2399 = vrot.lane.b32.xlu0 %v5132_v7, %s3475_s19  ;;  %v2567_v25 = vsel %vm1999_vm6, %v2548_v13, 0  ;;  %v5660_v13 = vperm.slane %v4573_v50, 2 }
 0x966   : > { %2263 = vrot.lane.b32.xlu2 %v5080_v39, %s3479_s23  ;;  %2598 = vmatpush.bf16.msrb.mxu3 %v2538_v34 }
 0x967   : > { %2623 = vmatpush.bf16.msra.mxu1 %v2567_v25  ;;  %v5245_v28 = vpop.permute.xlu1 %2425  ;;  %v2390_v4 = vpop.permute.xlu0 %2389 }
 0x968   : > { %v2406_v11 = vsel %vm1762_vm9, %v2388_v29, %v2390_v4  ;;  %v5249_v59 = vpop.permute.xlu2 %2385 }
 0x969   : > { %v2410_v12 = vmul.f32 %v2406_v11, %v5657_v22  ;;  %v2407_v18 = vsel %vm1762_vm9, %v5249_v59, %v2388_v29 }
 0x96a   : > { %v2409_v36 = vmul.f32 %v2407_v18, %v5658_v20  ;;  %v5661_v18 = vperm.slane %v4573_v50, 3 }
 0x96b   : > { %v2530_v26 = vpack.c.bf16 %v2410_v12, %v5072_v14  ;;  %v5659_v14 = vperm.slane %v4578_v51, 2 }
 0x96c   : > { %v2529_v9 = vpack.c.bf16 %v2409_v36, %v5070_v53  ;;  %v5662_v36 = vperm.slane %v4578_v51, 3 }
 0x96d   : > { %2333 = vrot.lane.b32.xlu1 %v5124_v33, %s3477_s21  ;;  %2297 = vrot.lane.b32.xlu0 %v5088_v5, %s3478_s22  ;;  %s386_s21 = scalar_lea.vmem %s5608_s11, %s3309_s16 }
 0x96e   : > { %2395 = vrot.lane.b32.xlu2 %v5153_v60, %s3475_s19  ;;  %2586 = vmatpush.bf16.msrb.mxu2 %v2529_v9 }
 0x96f   : > { %2599 = vmatpush.bf16.msrb.mxu3 %v2530_v26  ;;  %v2322_v24 = vpop.permute.xlu1 %2321  ;;  %v2456_v29 = vpop.permute.xlu0 %2455 }
 0x970   : > { %v2469_v27 = vsel %vm1866_vm8, %v2454_v31, %v2456_v29  ;;  %v2424_v16 = vpop.permute.xlu2 %2423 }
 0x971   : > { %v2475_v53 = vmul.f32 %v2469_v27, %v5659_v14  ;;  %v2437_v37 = vsel %vm1814_vm7, %v2422_v40, %v2424_v16  ;;  %v2436_v31 = vsel %vm1814_vm7, %v2424_v16, %v5245_v28 }
 0x972   : > { %v2443_v34 = vmul.f32 %v2437_v37, %v5660_v13  ;;  %v2444_v20 = vmul.f32 %v2436_v31, %v5661_v18  ;;  %v5663_v13 = vperm.slane %v4701_v48, 1 }
 0x974   : > { %v2539_v25 = vpack.c.bf16 %v2475_v53, %v2443_v34 }
 0x975   : > { %2301 = vrot.lane.b32.xlu1 %v5124_v33, %s3478_s22  ;;  %2365 = vrot.lane.b32.xlu0 %v5124_v33, %s3476_s20 }
 0x976   : > { %2463 = vrot.lane.b32.xlu2 %v5132_v7, %s3472_s14  ;;  %2611 = vmatpush.bf16.msra.mxu0 %v2539_v25  ;;  %v5664_v25 = vperm.slane %v4635_v35, 2 }
 0x977   : > { %v2354_v11 = vpop.permute.xlu1 %2353  ;;  %v2324_v40 = vpop.permute.xlu0 %2323 }
 0x978   : > { %v5283_v22 = vpop.permute.xlu2 %2457  ;;  %v2343_v27 = vsel %vm1658_vm10, %v2322_v24, %v2324_v40 }
 0x979   : > { %v2468_v12 = vsel %vm1866_vm8, %v2456_v29, %v5283_v22  ;;  %v2346_v34 = vmul.f32 %v2343_v27, %v5663_v13 }
 0x97a   : > { %v2476_v26 = vmul.f32 %v2468_v12, %v5662_v36  ;;  %v5665_v12 = vperm.slane %v4706_v0, 1 }
 0x97c   : > { %v2540_v9 = vpack.c.bf16 %v2476_v26, %v2444_v20 }
 0x97e   : > { %2361 = vrot.lane.b32.xlu2 %v5088_v5, %s3476_s20  ;;  %2624 = vmatpush.bf16.msra.mxu1 %v2540_v9 }
 0x97f   : > { %v2392_v16 = vpop.permute.xlu1 %2391  ;;  %v2356_v14 = vpop.permute.xlu0 %2355 }
 0x980   : > { %v2405_v53 = vsel %vm1762_vm9, %v2390_v4, %v2392_v16  ;;  %v2375_v29 = vsel %vm1710_vm11, %v2354_v11, %v2356_v14  ;;  %v5300_v37 = vpop.permute.xlu2 %2335 }
 0x981   : > { %v2411_v31 = vmul.f32 %v2405_v53, %v5664_v25  ;;  %v2378_v18 = vmul.f32 %v2375_v29, %v5665_v12  ;;  %v2344_v4 = vsel %vm1658_vm10, %v5300_v37, %v2322_v24  ;;  %v5668_v25 = vperm.slane %v4706_v0, 0 }
 0x983   : > { %v2522_v20 = vpack.c.bf16 %v2378_v18, %v2346_v34  ;;  %v2531_v36 = vpack.c.bf16 %v2411_v31, %v5090_v2  ;;  %v5666_v2 = vperm.slane %v4635_v35, 3  ;;  %v5667_v34 = vperm.slane %v4701_v48, 0 }
 0x985   : > { %2600 = vmatpush.bf16.msrb.mxu3 %v2522_v20  ;;  %2612 = vmatpush.bf16.msra.mxu0 %v2531_v36  ;;  %v2345_v24 = vmul.f32 %v2344_v4, %v5667_v34 }
 0x986   : > { %2265 = vrot.lane.b32.xlu2 %v5088_v5, %s3479_s23 }
 0x987   : > { %v5314_v26 = vpop.permute.xlu1 %2493  ;;  %v5316_v9 = vpop.permute.xlu0 %2393 }
 0x988   : > { %v2404_v27 = vsel %vm1762_vm9, %v2392_v16, %v5316_v9  ;;  %v5321_v53 = vpop.permute.xlu2 %2367 }
 0x989   : > { %v2412_v29 = vmul.f32 %v2404_v27, %v5666_v2  ;;  %v2376_v13 = vsel %vm1710_vm11, %v5321_v53, %v2354_v11 }
 0x98a   : > { %v2377_v31 = vmul.f32 %v2376_v13, %v5668_v25 }
 0x98b   : > { %v2532_v12 = vpack.c.bf16 %v2412_v29, %v5080_v39 }
 0x98c   : > { %v2521_v18 = vpack.c.bf16 %v2377_v31, %v2345_v24 }
 0x98d   : > { %2625 = vmatpush.bf16.msra.mxu1 %v2532_v12  ;;  %v5363_v12 = vld [vmem:[%s5606_s9] sm:$0xf] }
 0x98e   : > { %2299 = vrot.lane.b32.xlu2 %v5153_v60, %s3478_s22  ;;  %2587 = vmatpush.bf16.msrb.mxu2 %v2521_v18 }
 0x98f   : > { %v5335_v16 = vpop.permute.xlu1 %2271  ;;  %v2258_v20 = vpop.permute.xlu0 %2257 }
 0x990   : > { %v2492_v36 = vpop.permute.xlu2 %2491  ;;  %v2280_v39 = vsel %vm1555_vm12, %v5335_v16, %v2258_v20 }
 0x991   : > { %v2499_v11 = vsel %vm1918_vm5, %v5225_v21, %v2492_v36  ;;  %v2281_v21 = vmul.f32 %v2280_v39, %v1566_v61  ;;  %v2498_v24 = vsel %vm1918_vm5, %v2492_v36, %v5314_v26 }
 0x992   : > { %v2509_v4 = vmul.f32 %v2499_v11, %v1934_v56  ;;  %v2510_v61 = vmul.f32 %v2498_v24, %v1935_v38  ;;  %v5670_v38 = vperm.slane %v4701_v48, 2  ;;  %v5671_v24 = vperm.slane %v4775_v3, 1 }
 0x994   : > { %v2549_v34 = vpack.c.bf16 %v2509_v4, %v2509_v4 }
 0x996   : > { %2269 = vrot.lane.b32.xlu2 %v5124_v33, %s3479_s23  ;;  %v2570_v31 = vsel %vm1999_vm6, %v2549_v34, 0 }
 0x997   : > { %v5347_v27 = vpop.permute.xlu1 %2303  ;;  %v2290_v2 = vpop.permute.xlu0 %2289 }
 0x998   : > { %v2312_v29 = vsel %vm1606_vm13, %v5347_v27, %v2290_v2  ;;  %v2260_v13 = vpop.permute.xlu2 %2259 }
 0x999   : > { %v2313_v56 = vmul.f32 %v2312_v29, %v1618_v8  ;;  %v2279_v8 = vsel %vm1555_vm12, %v2258_v20, %v2260_v13  ;;  %v5669_v29 = vperm.slane %v4706_v0, 2 }
 0x99b   : > { %v2513_v25 = vpack.c.bf16 %v2313_v56, %v2281_v21  ;;  %v2550_v56 = vpack.c.bf16 %v2510_v61, %v2510_v61 }
 0x99d   : > { %2588 = vmatpush.bf16.msrb.mxu2 %v2513_v25  ;;  %v5672_v25 = vperm.slane %v4781_v62, 1  ;;  %v2573_v32 = vsel %vm1999_vm6, %v2550_v56, 0 }
 0x99f   : > { %v2358_v18 = vpop.permute.xlu1 %2357  ;;  %v2326_v11 = vpop.permute.xlu0 %2325 }
 0x9a0   : > { %v2374_v36 = vsel %vm1710_vm11, %v2356_v14, %v2358_v18  ;;  %v2342_v4 = vsel %vm1658_vm10, %v2324_v40, %v2326_v11  ;;  %v2292_v39 = vpop.permute.xlu2 %2291  ;;  %3298 = vmatmul.msk.bf16.vlgmr.msrb.gmra.mxu2 %vm1995_vm14, %v5363_v12  ;;  %v2282_v14 = vmul.f32 %v2279_v8, %v5671_v24  ;;  %v5673_v8 = vperm.slane %v4706_v0, 3 }
 0x9a1   : > { %2636 = vmatpush.bf16.msra.mxu2 %v2570_v31  ;;  %v2379_v21 = vmul.f32 %v2374_v36, %v5669_v29  ;;  %v2347_v34 = vmul.f32 %v2342_v4, %v5670_v38  ;;  %v2311_v20 = vsel %vm1606_vm13, %v2290_v2, %v2292_v39 }
 0x9a2   : > { %v2314_v40 = vmul.f32 %v2311_v20, %v5672_v25 }
 0x9a3   : > { %v2523_v31 = vpack.c.bf16 %v2379_v21, %v2347_v34 }
 0x9a4   : > { %v2514_v49 = vpack.c.bf16 %v2314_v40, %v2282_v14  ;;  %v5675_v40 = vperm.slane %v4513_v17, 6 }
 0x9a5   : > { %2613 = vmatpush.bf16.msra.mxu0 %v2523_v31 }
 0x9a6   : > { %2601 = vmatpush.bf16.msrb.mxu3 %v2514_v49 }
 0x9a7   : > { %v5386_v36 = vpop.permute.xlu1 %2429  ;;  %v5388_v4 = vpop.permute.xlu0 %2359 }
 0x9a8   : > { %v2373_v2 = vsel %vm1710_vm11, %v2358_v18, %v5388_v4  ;;  %v5393_v61 = vpop.permute.xlu2 %2327 }
 0x9a9   : > { %v2380_v29 = vmul.f32 %v2373_v2, %v5673_v8  ;;  %v2341_v49 = vsel %vm1658_vm10, %v2326_v11, %v5393_v61  ;;  %3299 = vmatmul.msk.bf16.vlgmr.msrb.gmra.mxu3 %vm1995_vm14, %v5363_v12 }
 0x9aa   : > { %2649 = vmatpush.bf16.msra.mxu3 %v2573_v32  ;;  %v5674_v32 = vperm.slane %v4701_v48, 3 }
 0x9ac   : > { %v2348_v21 = vmul.f32 %v2341_v49, %v5674_v32 }
 0x9ae   : > { %v2524_v38 = vpack.c.bf16 %v2380_v29, %v2348_v21  ;;  %v5677_v21 = vperm.slane %v4775_v3, 2 }
 0x9af   : > { %v2496_v34 = vpop.permute.xlu1 %2495  ;;  %v2460_v20 = vpop.permute.xlu0 %2459 }
 0x9b0   : > { %2626 = vmatpush.bf16.msra.mxu1 %v2524_v38  ;;  %v2467_v18 = vsel %vm1866_vm8, %v5283_v22, %v2460_v20  ;;  %v2428_v56 = vpop.permute.xlu2 %2427  ;;  %v2497_v11 = vsel %vm1918_vm5, %v5314_v26, %v2496_v34 }
 0x9b1   : > { %v2477_v24 = vmul.f32 %v2467_v18, %v1882_v54  ;;  %v2435_v14 = vsel %vm1814_vm7, %v5245_v28, %v2428_v56  ;;  %v2511_v31 = vmul.f32 %v2497_v11, %v5675_v40  ;;  %v2434_v22 = vsel %vm1814_vm7, %v2428_v56, %v5386_v36 }
 0x9b2   : > { %v2445_v25 = vmul.f32 %v2435_v14, %v1830_v19  ;;  %v5676_v19 = vperm.slane %v4781_v62, 2  ;;  %v2446_v56 = vmul.f32 %v2434_v22, %v1831_v58 }
 0x9b3   : > { %v2551_v49 = vpack.c.bf16 %v2511_v31, %v2511_v31 }
 0x9b4   : > { %v2541_v2 = vpack.c.bf16 %v2477_v24, %v2445_v25  ;;  %v5678_v25 = vperm.slane %v4513_v17, 7 }
 0x9b5   : > { %v2576_v14 = vsel %vm1999_vm6, %v2551_v49, 0 }
 0x9b6   : > { %2637 = vmatpush.bf16.msra.mxu2 %v2541_v2  ;;  %v5679_v2 = vperm.slane %v4775_v3, 3 }
 0x9b7   : > { %v2294_v54 = vpop.permute.xlu1 %2293  ;;  %v2262_v8 = vpop.permute.xlu0 %2261 }
 0x9b8   : > { %v2310_v26 = vsel %vm1606_vm13, %v2292_v39, %v2294_v54  ;;  %v2278_v28 = vsel %vm1555_vm12, %v2260_v13, %v2262_v8  ;;  %v2462_v29 = vpop.permute.xlu2 %2461  ;;  %v2504_v13 = vsel %vm1918_vm5, %v2496_v34, %v5161_v6 }
 0x9b9   : > { %v2315_v32 = vmul.f32 %v2310_v26, %v5676_v19  ;;  %v2283_v38 = vmul.f32 %v2278_v28, %v5677_v21  ;;  %v2466_v18 = vsel %vm1866_vm8, %v2460_v20, %v2462_v29  ;;  %v2512_v40 = vmul.f32 %v2504_v13, %v5678_v25 }
 0x9ba   : > { %v2478_v39 = vmul.f32 %v2466_v18, %v1883_v30  ;;  %v5683_v25 = vperm.slane %v4578_v51, 7 }
 0x9bb   : > { %v2515_v24 = vpack.c.bf16 %v2315_v32, %v2283_v38  ;;  %v2552_v34 = vpack.c.bf16 %v2512_v40, %v2512_v40 }
 0x9bc   : > { %v2542_v11 = vpack.c.bf16 %v2478_v39, %v2446_v56 }
 0x9bd   : > { %2614 = vmatpush.bf16.msra.mxu0 %v2515_v24 }
 0x9be   : > { %2650 = vmatpush.bf16.msra.mxu3 %v2542_v11 }
 0x9bf   : > { %v2398_v20 = vpop.permute.xlu1 %2397  ;;  %v5442_v31 = vpop.permute.xlu0 %2295 }
 0x9c0   : > { %v2309_v58 = vsel %vm1606_vm13, %v2294_v54, %v5442_v31  ;;  %v5447_v30 = vpop.permute.xlu2 %2263  ;;  %3300 = vmatmul.msk.bf16.vlgmr.msra.gmra.mxu0 %vm1995_vm14, %v5363_v12  ;;  %v2579_v54 = vsel %vm1999_vm6, %v2552_v34, 0 }
 0x9c1   : > { %2662 = vmatpush.bf16.msrb.mxu0 %v2576_v14  ;;  %v2316_v6 = vmul.f32 %v2309_v58, %v1621_v10  ;;  %v2277_v17 = vsel %vm1555_vm12, %v2262_v8, %v5447_v30  ;;  %v5682_v14 = vperm.slane %v4578_v51, 6 }
 0x9c2   : > { %v2284_v22 = vmul.f32 %v2277_v17, %v5679_v2 }
 0x9c4   : > { %v2516_v26 = vpack.c.bf16 %v2316_v6, %v2284_v22 }
 0x9c6   : > { %2627 = vmatpush.bf16.msra.mxu1 %v2516_v26  ;;  %v5684_v26 = vperm.slane %v4635_v35, 7 }
 0x9c7   : > { %v2330_v28 = vpop.permute.xlu1 %2329  ;;  %v2432_v49 = vpop.permute.xlu0 %2431 }
 0x9c8   : > { %v2396_v19 = vpop.permute.xlu2 %2395  ;;  %v2433_v56 = vsel %vm1814_vm7, %v5386_v36, %v2432_v49  ;;  %v2440_v39 = vsel %vm1814_vm7, %v2432_v49, %v5192_v1  ;;  %v5681_v36 = vperm.slane %v4573_v50, 7 }
 0x9c9   : > { %v2402_v32 = vsel %vm1762_vm9, %v2396_v19, %v2398_v20  ;;  %3301 = vmatmul.msk.bf16.vlgmr.msra.gmra.mxu1 %vm1995_vm14, %v5363_v12  ;;  %v2403_v10 = vsel %vm1762_vm9, %v5316_v9, %v2396_v19  ;;  %v5686_v19 = vperm.slane %v4701_v48, 5 }
 0x9ca   : > { %2675 = vmatpush.bf16.msrb.mxu1 %v2579_v54  ;;  %v2414_v8 = vmul.f32 %v2402_v32, %v1779_v45  ;;  %v2413_v21 = vmul.f32 %v2403_v10, %v1778_v44  ;;  %v2448_v11 = vmul.f32 %v2440_v39, %v5681_v36  ;;  %v5687_v32 = vperm.slane %v4706_v0, 4 }
 0x9cc   : > { %v2534_v38 = vpack.c.bf16 %v2414_v8, %v5153_v60  ;;  %v2533_v18 = vpack.c.bf16 %v2413_v21, %v5088_v5  ;;  %v5680_v60 = vperm.slane %v4573_v50, 6 }
 0x9ce   : > { %2651 = vmatpush.bf16.msra.mxu3 %v2534_v38  ;;  %2638 = vmatpush.bf16.msra.mxu2 %v2533_v18  ;;  %v2447_v24 = vmul.f32 %v2433_v56, %v5680_v60 }
 0x9cf   : > { %v2364_v9 = vpop.permute.xlu1 %2363  ;;  %v2332_v13 = vpop.permute.xlu0 %2331 }
 0x9d0   : > { %v2464_v45 = vpop.permute.xlu2 %2463 }
 0x9d1   : > { %v2465_v44 = vsel %vm1866_vm8, %v2462_v29, %v2464_v45  ;;  %v2472_v5 = vsel %vm1866_vm8, %v2464_v45, %v5205_v23  ;;  %v2340_v23 = vsel %vm1658_vm10, %v5393_v61, %v2330_v28  ;;  %v2339_v29 = vsel %vm1658_vm10, %v2330_v28, %v2332_v13 }
 0x9d2   : > { %v2479_v1 = vmul.f32 %v2465_v44, %v5682_v14  ;;  %v2480_v40 = vmul.f32 %v2472_v5, %v5683_v25  ;;  %v5689_v45 = vperm.slane %v4781_v62, 4 }
 0x9d4   : > { %v2543_v58 = vpack.c.bf16 %v2479_v1, %v2447_v24  ;;  %v2544_v6 = vpack.c.bf16 %v2480_v40, %v2448_v11  ;;  %v5691_v40 = vperm.slane %v4701_v48, 6 }
 0x9d6   : > { %2663 = vmatpush.bf16.msrb.mxu0 %v2543_v58  ;;  %2676 = vmatpush.bf16.msrb.mxu1 %v2544_v6 }
 0x9d7   : > { %v2400_v17 = vpop.permute.xlu0 %2399  ;;  %v2268_v50 = vpop.permute.xlu1 %2267 }
 0x9d8   : > { %v2401_v34 = vsel %vm1762_vm9, %v2398_v20, %v2400_v17  ;;  %v2408_v51 = vsel %vm1762_vm9, %v2400_v17, %v5249_v59  ;;  %v2362_v2 = vpop.permute.xlu2 %2361  ;;  %v5685_v20 = vperm.slane %v4701_v48, 4  ;;  %v2350_v59 = vmul.f32 %v2339_v29, %v5686_v19 }
 0x9d9   : > { %v2415_v22 = vmul.f32 %v2401_v34, %v1780_v63  ;;  %v2416_v54 = vmul.f32 %v2408_v51, %v5684_v26  ;;  %v2371_v61 = vsel %vm1710_vm11, %v2362_v2, %v2364_v9  ;;  %v2372_v28 = vsel %vm1710_vm11, %v5388_v4, %v2362_v2 }
 0x9da   : > { %v2349_v49 = vmul.f32 %v2340_v23, %v5685_v20  ;;  %v2381_v10 = vmul.f32 %v2372_v28, %v5687_v32  ;;  %v5688_v63 = vperm.slane %v4706_v0, 5  ;;  %v5694_v29 = vperm.slane %v4706_v0, 7 }
 0x9db   : > { %v2535_v8 = vpack.c.bf16 %v2415_v22, %v5124_v33  ;;  %v2536_v21 = vpack.c.bf16 %v2416_v54, %v5132_v7  ;;  %v5690_v7 = vperm.slane %v4775_v3, 4  ;;  %v5696_v51 = vperm.slane %v4781_v62, 5 }
 0x9dc   : > { %v2382_v35 = vmul.f32 %v2371_v61, %v5688_v63  ;;  %v2525_v38 = vpack.c.bf16 %v2381_v10, %v2349_v49  ;;  %v5697_v19 = vperm.slane %v4781_v62, 7  ;;  %v5698_v32 = vperm.slane %v4781_v62, 6 }
 0x9dd   : > { %2664 = vmatpush.bf16.msrb.mxu0 %v2535_v8  ;;  %2677 = vmatpush.bf16.msrb.mxu1 %v2536_v21 }
 0x9de   : > { %v2526_v18 = vpack.c.bf16 %v2382_v35, %v2350_v59  ;;  %2639 = vmatpush.bf16.msra.mxu2 %v2525_v38  ;;  %v5700_v35 = vperm.slane %v4775_v3, 7 }
 0x9df   : > { %v2298_v4 = vpop.permute.xlu0 %2297  ;;  %v2334_v5 = vpop.permute.xlu1 %2333 }
 0x9e0   : > { %2652 = vmatpush.bf16.msra.mxu3 %v2526_v18  ;;  %v2308_v56 = vsel %vm1606_vm13, %v5442_v31, %v2298_v4  ;;  %v2266_v39 = vpop.permute.xlu2 %2265  ;;  %v2337_v36 = vsel %vm1658_vm10, %v2334_v5, %v5300_v37  ;;  %v2338_v31 = vsel %vm1658_vm10, %v2332_v13, %v2334_v5  ;;  %v5692_v37 = vperm.slane %v4701_v48, 7 }
 0x9e1   : > { %v2317_v44 = vmul.f32 %v2308_v56, %v5689_v45  ;;  %v2276_v33 = vsel %vm1555_vm12, %v5447_v30, %v2266_v39  ;;  %v2275_v14 = vsel %vm1555_vm12, %v2266_v39, %v2268_v50  ;;  %v2351_v58 = vmul.f32 %v2338_v31, %v5691_v40 }
 0x9e2   : > { %v2285_v60 = vmul.f32 %v2276_v33, %v5690_v7  ;;  %v2352_v6 = vmul.f32 %v2337_v36, %v5692_v37  ;;  %v5693_v13 = vperm.slane %v4706_v0, 6 }
 0x9e4   : > { %v2517_v24 = vpack.c.bf16 %v2317_v44, %v2285_v60 }
 0x9e6   : > { %2640 = vmatpush.bf16.msra.mxu2 %v2517_v24 }
 0x9e7   : > { %v2366_v11 = vpop.permute.xlu0 %2365  ;;  %v2302_v26 = vpop.permute.xlu1 %2301 }
 0x9e8   : > { %v2369_v30 = vsel %vm1710_vm11, %v2366_v11, %v5321_v53  ;;  %v2370_v1 = vsel %vm1710_vm11, %v2364_v9, %v2366_v11  ;;  %v2300_v25 = vpop.permute.xlu2 %2299  ;;  %v5695_v53 = vperm.slane %v4775_v3, 5  ;;  %v2305_v0 = vsel %vm1606_vm13, %v2302_v26, %v5347_v27 }
 0x9e9   : > { %v2383_v23 = vmul.f32 %v2370_v1, %v5693_v13  ;;  %v2384_v17 = vmul.f32 %v2369_v30, %v5694_v29  ;;  %v2307_v34 = vsel %vm1606_vm13, %v2298_v4, %v2300_v25  ;;  %3302 = vmatmul.msk.bf16.vlgmr.msra.gmra.mxu2 %vm1995_vm14, %v5363_v12  ;;  %v2306_v61 = vsel %vm1606_vm13, %v2300_v25, %v2302_v26 }
 0x9ea   : > { %v2286_v9 = vmul.f32 %v2275_v14, %v5695_v53  ;;  %v2318_v2 = vmul.f32 %v2307_v34, %v5696_v51  ;;  %v2320_v59 = vmul.f32 %v2305_v0, %v5697_v19  ;;  %v2319_v10 = vmul.f32 %v2306_v61, %v5698_v32 }
 0x9eb   : > { %v2527_v48 = vpack.c.bf16 %v2383_v23, %v2351_v58  ;;  %v2528_v22 = vpack.c.bf16 %v2384_v17, %v2352_v6  ;;  %v5699_v27 = vperm.slane %v4775_v3, 6 }
 0x9ec   : > { %v2518_v54 = vpack.c.bf16 %v2318_v2, %v2286_v9 }
 0x9ed   : > { %2665 = vmatpush.bf16.msrb.mxu0 %v2527_v48  ;;  %2678 = vmatpush.bf16.msrb.mxu1 %v2528_v22 }
 0x9ee   : > { %2653 = vmatpush.bf16.msra.mxu3 %v2518_v54 }
 0x9f0   : > { %v2270_v28 = vpop.permute.xlu2 %2269 }
 0x9f1   : > { %v2273_v20 = vsel %vm1555_vm12, %v2270_v28, %v5335_v16  ;;  %v2274_v49 = vsel %vm1555_vm12, %v2268_v50, %v2270_v28  ;;  %3303 = vmatmul.msk.bf16.vlgmr.msra.gmra.mxu3 %vm1995_vm14, %v5363_v12 }
 0x9f2   : > { %v2287_v63 = vmul.f32 %v2274_v49, %v5699_v27  ;;  %v2288_v8 = vmul.f32 %v2273_v20, %v5700_v35 }
 0x9f4   : > { %v2519_v21 = vpack.c.bf16 %v2319_v10, %v2287_v63  ;;  %v2520_v16 = vpack.c.bf16 %v2320_v59, %v2288_v8 }
 0x9f6   : > { %2666 = vmatpush.bf16.msrb.mxu0 %v2519_v21  ;;  %2679 = vmatpush.bf16.msrb.mxu1 %v2520_v16 }
 0x9f9   : > { %3304 = vmatmul.msk.bf16.vlgmr.msrb.gmra.mxu0 %vm1995_vm14, %v5363_v12  ;;  %3305 = vmatmul.msk.bf16.vlgmr.msrb.gmra.mxu1 %vm1995_vm14, %v5363_v12 }
 0xa23   : > { %v2590_v15 = vpop.f32.mrf.mxu2 }
 0xa24   : > { %v2685_v3 = vadd.f32 %v2590_v15, %v4347_v41 }
 0xa26   : > { %2693 = vst [vmem:[%s386_s21] sm:$0xff] %v2685_v3 }
 0xa2b   : > { %v2592_v62 = vpop.f32.mrf.mxu2 }
 0xa2c   : > { %v2603_v50 = vpop.f32.mrf.mxu3 }
 0xa2d   : > { %v2686_v38 = vadd.f32 %v2603_v50, %v4349_v42 }
 0xa2f   : > { %2694 = vst [vmem:[%s386_s21 + $0x8] sm:$0xff] %v2686_v38 }
 0xa34   : > { %v2605_v18 = vpop.f32.mrf.mxu3 }
 0xa3d   : > { %v2616_v4 = vpop.f32.mrf.mxu0 }
 0xa3e   : > { %v2687_v56 = vadd.f32 %v2616_v4, %v4351_v43 }
 0xa40   : > { %2695 = vst [vmem:[%s386_s21 + $0x10] sm:$0xff] %v2687_v56 }
 0xa45   : > { %v2618_v12 = vpop.f32.mrf.mxu0 }
 0xa46   : > { %v2629_v39 = vpop.f32.mrf.mxu1 }
 0xa47   : > { %v2688_v45 = vadd.f32 %v2629_v39, %v4356_v46 }
 0xa49   : > { %2696 = vst [vmem:[%s386_s21 + $0x18] sm:$0xff] %v2688_v45 }
 0xa4e   : > { %v2631_v44 = vpop.f32.mrf.mxu1 }
 0xa6c   : > { %v2642_v5 = vpop.f32.mrf.mxu2 }
 0xa6d   : > { %v2689_v41 = vadd.f32 %v2642_v5, %v4358_v47 }
 0xa6f   : > { %2697 = vst [vmem:[%s386_s21 + $0x20] sm:$0xff] %v2689_v41 }
 0xa74   : > { %v2655_v33 = vpop.f32.mrf.mxu3  ;;  %v2644_v7 = vpop.f32.mrf.mxu2 }
 0xa75   : > { %v2690_v42 = vadd.f32 %v2655_v33, %v4362_v52 }
 0xa76   : > { %v2668_v60 = vpop.f32.mrf.mxu0  ;;  %v2681_v24 = vpop.f32.mrf.mxu1 }
 0xa77   : > { %v2691_v36 = vadd.f32 %v2668_v60, %v4364_v55  ;;  %v2692_v43 = vadd.f32 %v2681_v24, %v4367_v57  ;;  %2698 = vst [vmem:[%s386_s21 + $0x28] sm:$0xff] %v2690_v42 }
 0xa79   : > { %2699 = vst [vmem:[%s386_s21 + $0x30] sm:$0xff] %v2691_v36 }
 0xa7a   : > { %2700 = vst [vmem:[%s386_s21 + $0x38] sm:$0xff] %v2692_v43 }
 0xa7c   : > { %v2657_v46 = vpop.f32.mrf.mxu3 }
 0xa7e   : > { %v2670_v31 = vpop.f32.mrf.mxu0  ;;  %v2683_v11 = vpop.f32.mrf.mxu1 }
 0xa7f PF: > { %s21_s17 = sadd.s32 1, %s3469_s17  }
 0xa80   : > { %p18_p4 = scmp.ge.s32.totalorder %s21_s17, 4  }
 0xa82   :  { %20 = sbr.rel (!%p18_p4) target bundleno = 1 (0x1), region = 101 }

</bundles_post_ra>
